<compile_context>
chip_gen: v7x
topology: tpu7x:2x2x1
jax: 0.10.0
libtpu: 0.0.40
codegen_flags: <defaults>
</compile_context>

<pallas_src>
import functools
import math

import jax
import jax.numpy as jnp
from jax import lax
from jax.experimental import pallas as pl
from jax.experimental.pallas import tpu as pltpu

CP = 128                      # padded channel width (lane-dense everywhere)
NUM_CLASSES = 21
CMID = 32                     # logical ASPP mid channels (padded to CP)
RATES = (2, 4, 6)             # atrous rates, scaled for the small feature map
PAD_ASPP = max(RATES)         # pad once with max(rate); extra border is zeros
BN_EPS = 1e-5
_BN_SCALE = 1.0 / math.sqrt(1.0 + BN_EPS)   # eval BN: gamma=1, beta=0, mean=0, var=1


# ----------------------------------------------------------------------------
# Kernel 1: backbone (stem + 2 sections) -> feats (3, B, h, w, CP), grid=(B,)
# ----------------------------------------------------------------------------
def _backbone_kernel(p_ref, ws_ref, w1_ref, w2_ref, feats_ref, xpad_ref, col_ref):
    """Per batch element: stem matmul -> 3x3 conv -> 3x3 conv, VMEM resident.

    p_ref    : (1, h*w, 27)   stride-2 stem im2col patches (bf16)
    ws_ref   : (27, CP)       stem weight, BN scale folded (bf16)
    w1_ref   : (9*CP, CP)     section-1 3x3 weight, deep-K layout (bf16)
    w2_ref   : (9*CP, CP)     section-2 3x3 weight (bf16)
    feats_ref: (3, 1, h, w, CP) all three backbone taps for this batch element
    xpad_ref : (h+2, w+2, CP) f32 VMEM pad buffer (f32: odd sublane offsets)
    col_ref  : (h*w, 9*CP)    bf16 VMEM im2col buffer
    """
    h, w, C = feats_ref.shape[2], feats_ref.shape[3], feats_ref.shape[4]

    x0 = jnp.maximum(jnp.dot(p_ref[0], ws_ref[...],
                             preferred_element_type=jnp.float32), 0.0)
    feats_ref[0, 0] = x0.reshape(h, w, C).astype(feats_ref.dtype)

    def conv3(prev, w_ref):
        xpad_ref[...] = jnp.zeros_like(xpad_ref)
        xpad_ref[1:1 + h, 1:1 + w, :] = prev.reshape(h, w, C)
        for t in range(9):
            di, dj = t // 3, t % 3
            col_ref[:, t * C:(t + 1) * C] = (
                xpad_ref[di:di + h, dj:dj + w, :]
                .reshape(h * w, C).astype(col_ref.dtype))
        return jnp.maximum(jnp.dot(col_ref[...], w_ref[...],
                                   preferred_element_type=jnp.float32), 0.0)

    x1 = conv3(x0, w1_ref)
    feats_ref[1, 0] = x1.reshape(h, w, C).astype(feats_ref.dtype)
    x2 = conv3(x1, w2_ref)
    feats_ref[2, 0] = x2.reshape(h, w, C).astype(feats_ref.dtype)


def backbone(params, patches, h, w):
    B, _, Ks = patches.shape
    return pl.pallas_call(
        _backbone_kernel,
        grid=(B,),
        in_specs=[
            pl.BlockSpec((1, h * w, Ks), lambda b: (b, 0, 0)),
            pl.BlockSpec((Ks, CP), lambda b: (0, 0)),
            pl.BlockSpec((9 * CP, CP), lambda b: (0, 0)),
            pl.BlockSpec((9 * CP, CP), lambda b: (0, 0)),
        ],
        out_specs=pl.BlockSpec((3, 1, h, w, CP), lambda b: (0, b, 0, 0, 0)),
        out_shape=jax.ShapeDtypeStruct((3, B, h, w, CP), jnp.bfloat16),
        scratch_shapes=[
            pltpu.VMEM((h + 2, w + 2, CP), jnp.float32),
            pltpu.VMEM((h * w, 9 * CP), jnp.bfloat16),
        ],
        compiler_params=pltpu.CompilerParams(
            dimension_semantics=("parallel",)),
    )(patches, params["stem_w"], params["sec1_w"], params["sec2_w"])


# ----------------------------------------------------------------------------
# Kernel 2: fully fused DeepLab head (ASPP -> project -> 3x3 -> 1x1 -> resize)
# ----------------------------------------------------------------------------
def _head_kernel(x_ref, w1_ref, w3_ref, wpool_ref, wproj_ref, wprojp_ref,
                 wc3_ref, wfin_ref, fb_ref, mt_ref, o_ref,
                 xpad_ref, ypad_ref, col_ref, feat_ref, *, rates, pad):
    """One grid step = one head (branch / classifier); batch folded into block.

    x_ref   : (1, B, h, w, CP) bf16 backbone features
    w1/wpool/wprojp/wfin : (1, CP, CP) bf16
    w3      : (1, n_rates, 9*CP, CP) bf16  (deep-K dilated weights)
    wproj   : (1, 4*CP, CP) bf16,  wc3: (1, 9*CP, CP) bf16
    fb_ref  : (1, 1, CP) f32 final-conv bias
    mt_ref  : (h*w, H*W) bf16 bilinear resize matrix (align_corners=False)
    o_ref   : (1, B, CP, H*W) f32 channel-major upsampled logits
    """
    B, h, w, C = x_ref.shape[1], x_ref.shape[2], x_ref.shape[3], x_ref.shape[4]
    hw = h * w
    M = B * hw

    # Padded input (pad = max(rate)); all read/write sublane offsets are even,
    # so bf16 sublane packing stays aligned.
    xpad_ref[...] = jnp.zeros_like(xpad_ref)
    xpad_ref[:, pad:pad + h, pad:pad + w, :] = x_ref[0]

    xc = x_ref[0].reshape(M, C)                                       # bf16

    # ASPP branch 0: 1x1 conv + BN(folded) + ReLU -> slot 0 of concat buffer.
    y0 = jnp.maximum(jnp.dot(xc, w1_ref[0],
                             preferred_element_type=jnp.float32), 0.0)
    feat_ref[:, 0:C] = y0.astype(feat_ref.dtype)

    # ASPP dilated branches: VMEM im2col -> one deep-K (K = 9*C) dot each.
    for ridx, r in enumerate(rates):
        for t in range(9):
            di, dj = t // 3, t % 3
            h0 = pad + (di - 1) * r
            w0 = pad + (dj - 1) * r
            col_ref[:, t * C:(t + 1) * C] = (
                xpad_ref[:, h0:h0 + h, w0:w0 + w, :].reshape(M, C))
        yb = jnp.maximum(jnp.dot(col_ref[...], w3_ref[0, ridx],
                                 preferred_element_type=jnp.float32), 0.0)
        feat_ref[:, (1 + ridx) * C:(2 + ridx) * C] = yb.astype(feat_ref.dtype)

    # ASPP projection over the 4 spatial branches: single K = 4*C dot.
    proj = jnp.dot(feat_ref[...], wproj_ref[0],
                   preferred_element_type=jnp.float32)                # (M, C)

    # ASPPPooling branch (GAP -> 1x1 -> BN -> ReLU -> broadcast) enters as a
    # per-batch bias through its slice of the projection weight; then the
    # projection BN(folded) + ReLU.  Dropout(0.5) is identity in eval mode.
    ypad_ref[...] = jnp.zeros_like(ypad_ref)
    for b in range(B):
        xm = jnp.mean(x_ref[0, b].astype(jnp.float32).reshape(hw, C),
                      axis=0, keepdims=True)                          # (1, C)
        pooled = jnp.maximum(
            jnp.dot(xm.astype(jnp.bfloat16), wpool_ref[0],
                    preferred_element_type=jnp.float32), 0.0)
        pbias = jnp.dot(pooled.astype(jnp.bfloat16), wprojp_ref[0],
                        preferred_element_type=jnp.float32)           # (1, C)
        yb = jnp.maximum(proj[b * hw:(b + 1) * hw] + pbias, 0.0)
        ypad_ref[b, 1:1 + h, 1:1 + w, :] = yb.reshape(h, w, C)

    # 3x3 conv (pad=1) + BN(folded) + ReLU: im2col -> one K = 9*C dot.
    for t in range(9):
        di, dj = t // 3, t % 3
        col_ref[:, t * C:(t + 1) * C] = (
            ypad_ref[:, di:di + h, dj:dj + w, :]
            .reshape(M, C).astype(col_ref.dtype))
    z = jnp.maximum(jnp.dot(col_ref[...], wc3_ref[0],
                            preferred_element_type=jnp.float32), 0.0)

    # Final 1x1 conv (+bias).
    logits = jnp.dot(z.astype(jnp.bfloat16), wfin_ref[0],
                     preferred_element_type=jnp.float32) + fb_ref[0]

    # Bilinear upsample (align_corners=False), channel-major so no XLA
    # transpose is needed afterwards: out[c, (Ho,Wo)] = sum_hw logits[hw, c] * mt.
    mt = mt_ref[...]
    for b in range(B):
        lb = logits[b * hw:(b + 1) * hw].astype(jnp.bfloat16)         # (hw, C)
        o_ref[0, b] = lax.dot_general(
            lb, mt, (((0,), (0,)), ((), ())),
            preferred_element_type=jnp.float32)                       # (C, H*W)


def run_heads(hp, feats, H, W):
    NH, B, h, w, C = feats.shape
    mt = _resize_matrix_t(h, w, H, W).astype(jnp.bfloat16)            # (h*w, H*W)
    nr = len(RATES)
    return pl.pallas_call(
        functools.partial(_head_kernel, rates=RATES, pad=PAD_ASPP),
        grid=(NH,),
        in_specs=[
            pl.BlockSpec((1, B, h, w, C), lambda i: (i, 0, 0, 0, 0)),
            pl.BlockSpec((1, C, C), lambda i: (i, 0, 0)),
            pl.BlockSpec((1, nr, 9 * C, C), lambda i: (i, 0, 0, 0)),
            pl.BlockSpec((1, C, C), lambda i: (i, 0, 0)),
            pl.BlockSpec((1, 4 * C, C), lambda i: (i, 0, 0)),
            pl.BlockSpec((1, C, C), lambda i: (i, 0, 0)),
            pl.BlockSpec((1, 9 * C, C), lambda i: (i, 0, 0)),
            pl.BlockSpec((1, C, C), lambda i: (i, 0, 0)),
            pl.BlockSpec((1, 1, C), lambda i: (i, 0, 0)),
            pl.BlockSpec((h * w, H * W), lambda i: (0, 0)),
        ],
        out_specs=pl.BlockSpec((1, B, C, H * W), lambda i: (i, 0, 0, 0)),
        out_shape=jax.ShapeDtypeStruct((NH, B, C, H * W), jnp.float32),
        scratch_shapes=[
            pltpu.VMEM((B, h + 2 * PAD_ASPP, w + 2 * PAD_ASPP, C), jnp.bfloat16),
            pltpu.VMEM((B, h + 2, w + 2, C), jnp.float32),
            pltpu.VMEM((B * h * w, 9 * C), jnp.bfloat16),
            pltpu.VMEM((B * h * w, 4 * C), jnp.bfloat16),
        ],
        compiler_params=pltpu.CompilerParams(
            dimension_semantics=("parallel",)),
    )(feats, hp["w1"], hp["w3"], hp["w_pool"], hp["w_proj"], hp["w_proj_pool"],
      hp["w_conv3"], hp["w_final"], hp["final_b"], mt)


# ----------------------------------------------------------------------------
# Forward
# ----------------------------------------------------------------------------
def _interp_matrix(out_size, in_size):
    """Row-stochastic 1-D bilinear resize matrix, align_corners=False."""
    o = jnp.arange(out_size, dtype=jnp.float32)
    src = (o + 0.5) * (in_size / out_size) - 0.5
    src = jnp.clip(src, 0.0, float(in_size - 1))
    i0 = jnp.floor(src).astype(jnp.int32)
    i1 = jnp.minimum(i0 + 1, in_size - 1)
    w1 = src - i0.astype(jnp.float32)
    w0 = 1.0 - w1
    A = jnp.zeros((out_size, in_size), jnp.float32)
    A = A.at[jnp.arange(out_size), i0].add(w0)
    A = A.at[jnp.arange(out_size), i1].add(w1)
    return A


def _resize_matrix_t(h, w, H, W):
    ah = _interp_matrix(H, h)
    aw = _interp_matrix(W, w)
    m = jnp.einsum("ai,bj->abij", ah, aw).reshape(H * W, h * w)
    return m.T                                                        # (h*w, H*W)


def branchy_forward(params, x_nchw):
    """base[0] -> head0, base[1] -> head1, base[2] -> classifier head, each
    bilinearly upsampled to the input size and stacked on a new leading axis."""
    B, _, H, W = x_nchw.shape
    h, w = H // 2, W // 2
    x = jnp.transpose(x_nchw, (0, 2, 3, 1))                 # NCHW -> NHWC (tiny)
    # Stem im2col (3x3, stride 2, pad 1): tiny 3-channel input, built in XLA.
    xp = jnp.pad(x, ((0, 0), (1, 1), (1, 1), (0, 0)))
    cols = [xp[:, i:i + 2 * h:2, j:j + 2 * w:2, :]
            for i in range(3) for j in range(3)]
    patches = jnp.concatenate(cols, axis=-1).reshape(B, h * w, 27)
    patches = patches.astype(jnp.bfloat16)

    feats = backbone(params, patches, h, w)                 # (3, B, h, w, CP)
    out_cm = run_heads(params["heads"], feats, H, W)        # (3, B, CP, H*W)
    # Single slice to the logical classes + free reshape; no transpose needed.
    return out_cm[:, :, :NUM_CLASSES, :].reshape(3, B, NUM_CLASSES, H, W)


# ----------------------------------------------------------------------------
# Parameter construction (synthetic, eval-mode BN folded into the weights)
# ----------------------------------------------------------------------------
def kaiming(key, cout, cin, kh, kw):
    fan_out = cout * kh * kw
    return math.sqrt(2.0 / fan_out) * jax.random.normal(
        key, (cout, cin, kh, kw), jnp.float32)


def fold_tapped(w, scale):
    """(Cout, Cin, kh, kw) torch layout -> (kh*kw*CP, CP) deep-K, BN folded."""
    cout, cin, kh, kw = w.shape
    wt = jnp.transpose(w, (2, 3, 1, 0)).reshape(kh * kw, cin, cout) * scale
    wt = jnp.pad(wt, ((0, 0), (0, CP - cin), (0, CP - cout)))
    return wt.reshape(kh * kw * CP, CP)


def fold_mat(w, scale):
    """1x1 conv (Cout, Cin, 1, 1) -> (CP, CP) matmul weight, scale folded."""
    cout, cin = w.shape[:2]
    wm = w[:, :, 0, 0].T * scale
    return jnp.pad(wm, ((0, CP - cin), (0, CP - cout)))


def make_head_raw(key, cin, cmid, ncls):
    ks = jax.random.split(key, 8)
    p = {"aspp_1x1": kaiming(ks[0], cmid, cin, 1, 1),
         "aspp_d": [kaiming(ks[1 + i], cmid, cin, 3, 3) for i in range(3)],
         "aspp_pool": kaiming(ks[4], cmid, cin, 1, 1),
         "aspp_proj": kaiming(ks[5], cmid, 5 * cmid, 1, 1),
         "conv3": kaiming(ks[6], cmid, cmid, 3, 3)}
    kf, kb = jax.random.split(ks[7])
    p["final_w"] = kaiming(kf, ncls, cmid, 1, 1)
    p["final_b"] = 0.01 * jax.random.normal(kb, (ncls,), jnp.float32)
    return p


def stack_heads(raws):
    w1, w3, wpool, wprojp, wproj, wconv3, wfinal, fb = ([] for _ in range(8))
    for p in raws:
        cmid = p["conv3"].shape[0]
        w1.append(fold_mat(p["aspp_1x1"], _BN_SCALE))
        w3.append(jnp.stack([fold_tapped(wd, _BN_SCALE) for wd in p["aspp_d"]],
                            axis=0))                                 # (3, 9*CP, CP)
        wpool.append(fold_mat(p["aspp_pool"], _BN_SCALE))
        proj = p["aspp_proj"][:, :, 0, 0]                            # (cmid, 5*cmid)
        main = jnp.transpose(proj[:, :4 * cmid].reshape(cmid, 4, cmid),
                             (1, 2, 0)) * _BN_SCALE                  # (4, cin, cout)
        main = jnp.pad(main, ((0, 0), (0, CP - cmid), (0, CP - cmid)))
        wproj.append(main.reshape(4 * CP, CP))
        pool_slice = proj[:, 4 * cmid:].T * _BN_SCALE                # (cin, cout)
        wprojp.append(jnp.pad(pool_slice, ((0, CP - cmid), (0, CP - cmid))))
        wconv3.append(fold_tapped(p["conv3"], _BN_SCALE))
        wfinal.append(fold_mat(p["final_w"], 1.0))
        fb.append(jnp.pad(p["final_b"], (0, CP - p["final_b"].shape[0]))[None])
    bf = jnp.bfloat16
    return {"w1": jnp.stack(w1).astype(bf),
            "w3": jnp.stack(w3).astype(bf),
            "w_pool": jnp.stack(wpool).astype(bf),
            "w_proj": jnp.stack(wproj).astype(bf),
            "w_proj_pool": jnp.stack(wprojp).astype(bf),
            "w_conv3": jnp.stack(wconv3).astype(bf),
            "w_final": jnp.stack(wfinal).astype(bf),
            "final_b": jnp.stack(fb).astype(jnp.float32)}            # (NH, 1, CP)


def build_params(key):
    keys = jax.random.split(key, 6)
    # Synthetic backbone sections (see TODO at top of file).
    stem_w = kaiming(keys[0], 8, 3, 3, 3)
    sec1_w = kaiming(keys[1], 16, 8, 3, 3)
    sec2_w = kaiming(keys[2], 32, 16, 3, 3)
    params = {
        "stem_w": jnp.pad(
            jnp.transpose(stem_w, (2, 3, 1, 0)).reshape(27, 8) * _BN_SCALE,
            ((0, 0), (0, CP - 8))).astype(jnp.bfloat16),
        "sec1_w": fold_tapped(sec1_w, _BN_SCALE).astype(jnp.bfloat16),
        "sec2_w": fold_tapped(sec2_w, _BN_SCALE).astype(jnp.bfloat16),
    }
    head_cin = (8, 16, 32)   # branch0, branch1, classifier (logical channels)
    params["heads"] = stack_heads(
        [make_head_raw(k, cin, CMID, NUM_CLASSES)
         for k, cin in zip(keys[3:], head_cin)])
    return params


if __name__ == "__main__":
    key = jax.random.PRNGKey(0)
    kp, kx = jax.random.split(key)
    params = build_params(kp)
    x = jax.random.normal(kx, (2, 3, 16, 16), jnp.float32)

    fwd = jax.jit(lambda inp: branchy_forward(params, inp))
    out = jax.block_until_ready(fwd(x))

    assert out.shape == (3, 2, NUM_CLASSES, 16, 16), out.shape
    assert bool(jnp.all(jnp.isfinite(out)))
    print("KERNEL_OK")
</pallas_src>

<mosaic_0001>
module attributes {stable_mosaic.version = 11 : i64} {
  func.func private @main(%arg0: i32) attributes {dimension_semantics = [#tpu.dimension_semantics<core_parallel>], iteration_bounds = array<i64: 2>, tpu.core_type = #tpu.core_type<sc_scalar_subcore>, window_params = []} {
    return
  }
}

module attributes {stable_mosaic.version = 11 : i64} {
  func.func private @main(%arg0: i32) attributes {dimension_semantics = [#tpu.dimension_semantics<core_parallel>], iteration_bounds = array<i64: 2>, tpu.core_type = #tpu.core_type<sc_scalar_subcore>, window_params = []} {
    return
  }
}

module attributes {stable_mosaic.version = 11 : i64} {
  func.func @_backbone_kernel(%arg0: i32, %arg1: memref<1x64x27xbf16, #tpu.memory_space<vmem>>, %arg2: memref<27x128xbf16, #tpu.memory_space<vmem>>, %arg3: memref<1152x128xbf16, #tpu.memory_space<vmem>>, %arg4: memref<1152x128xbf16, #tpu.memory_space<vmem>>, %arg5: memref<3x1x8x8x128xbf16, #tpu.memory_space<vmem>>, %arg6: memref<10x10x128xf32, #tpu.memory_space<vmem>>, %arg7: memref<64x1152xbf16, #tpu.memory_space<vmem>>) attributes {dimension_semantics = [#tpu.dimension_semantics<parallel>], iteration_bounds = array<i64: 2>, scalar_prefetch = 0 : i64, scratch_operands = 2 : i64, tpu.core_type = #tpu.core_type<tc>, window_params = [{transform_indices = @transform_0, window_bounds = array<i64: 1, 64, 27>}, {pipeline_mode = #tpu.pipeline_mode<synchronous>, transform_indices = @transform_1, window_bounds = array<i64: 27, 128>}, {pipeline_mode = #tpu.pipeline_mode<synchronous>, transform_indices = @transform_2, window_bounds = array<i64: 1152, 128>}, {pipeline_mode = #tpu.pipeline_mode<synchronous>, transform_indices = @transform_3, window_bounds = array<i64: 1152, 128>}, {transform_indices = @transform_4, window_bounds = array<i64: 3, 1, 8, 8, 128>}]} {
    %c0 = arith.constant 0 : index
    %c0_0 = arith.constant 0 : index
    %c0_1 = arith.constant 0 : index
    %0 = vector.load %arg1[%c0, %c0_0, %c0_1] : memref<1x64x27xbf16, #tpu.memory_space<vmem>>, vector<1x64x27xbf16>
    %1 = vector.shape_cast %0 : vector<1x64x27xbf16> to vector<64x27xbf16>
    %c0_2 = arith.constant 0 : index
    %c0_3 = arith.constant 0 : index
    %2 = vector.load %arg2[%c0_2, %c0_3] : memref<27x128xbf16, #tpu.memory_space<vmem>>, vector<27x128xbf16>
    %cst = arith.constant dense<0.000000e+00> : vector<64x128xf32>
    %3 = tpu.matmul %1, %2, %cst {dimension_numbers = #tpu.dot_dimension_numbers<[1], [0], [0], [1], [0, 0, 1, 1], [], []>} : vector<64x27xbf16>, vector<27x128xbf16>, vector<64x128xf32> -> vector<64x128xf32>
    %cst_4 = arith.constant 0.000000e+00 : f32
    %4 = vector.broadcast %cst_4 : f32 to vector<64x128xf32>
    %5 = arith.maximumf %3, %4 : vector<64x128xf32>
    %6 = vector.shape_cast %5 : vector<64x128xf32> to vector<8x8x128xf32>
    %7 = arith.truncf %6 : vector<8x8x128xf32> to vector<8x8x128xbf16>
    %c0_5 = arith.constant 0 : index
    %c0_6 = arith.constant 0 : index
    %c0_7 = arith.constant 0 : index
    %c0_8 = arith.constant 0 : index
    %c0_9 = arith.constant 0 : index
    %8 = vector.load %arg5[%c0_5, %c0_6, %c0_7, %c0_8, %c0_9] : memref<3x1x8x8x128xbf16, #tpu.memory_space<vmem>>, vector<1x1x8x8x128xbf16>
    %9 = vector.shape_cast %8 : vector<1x1x8x8x128xbf16> to vector<8x8x128xbf16>
    %10 = vector.shape_cast %7 : vector<8x8x128xbf16> to vector<1x1x8x8x128xbf16>
    tpu.vector_store %arg5[%c0_5, %c0_6, %c0_7, %c0_8, %c0_9], %10 {strides = array<i32>} : memref<3x1x8x8x128xbf16, #tpu.memory_space<vmem>>, vector<1x1x8x8x128xbf16>,
    %cst_10 = arith.constant 0.000000e+00 : f32
    %11 = vector.broadcast %cst_10 : f32 to vector<10x10x128xf32>
    %c0_11 = arith.constant 0 : index
    %c0_12 = arith.constant 0 : index
    %c0_13 = arith.constant 0 : index
    %12 = vector.load %arg6[%c0_11, %c0_12, %c0_13] : memref<10x10x128xf32, #tpu.memory_space<vmem>>, vector<10x10x128xf32>
    tpu.vector_store %arg6[%c0_11, %c0_12, %c0_13], %11 {strides = array<i32>} : memref<10x10x128xf32, #tpu.memory_space<vmem>>, vector<10x10x128xf32>,
    %13 = vector.shape_cast %5 : vector<64x128xf32> to vector<8x8x128xf32>
    %c1 = arith.constant 1 : index
    %c1_14 = arith.constant 1 : index
    %c0_15 = arith.constant 0 : index
    %14 = vector.load %arg6[%c1, %c1_14, %c0_15] : memref<10x10x128xf32, #tpu.memory_space<vmem>>, vector<8x8x128xf32>
    tpu.vector_store %arg6[%c1, %c1_14, %c0_15], %13 {strides = array<i32>} : memref<10x10x128xf32, #tpu.memory_space<vmem>>, vector<8x8x128xf32>,
    %c0_16 = arith.constant 0 : index
    %c0_17 = arith.constant 0 : index
    %c0_18 = arith.constant 0 : index
    %15 = vector.load %arg6[%c0_16, %c0_17, %c0_18] : memref<10x10x128xf32, #tpu.memory_space<vmem>>, vector<8x8x128xf32>
    %16 = vector.shape_cast %15 : vector<8x8x128xf32> to vector<64x128xf32>
    %17 = arith.truncf %16 : vector<64x128xf32> to vector<64x128xbf16>
    %c0_19 = arith.constant 0 : index
    %c0_20 = arith.constant 0 : index
    %18 = vector.load %arg7[%c0_19, %c0_20] : memref<64x1152xbf16, #tpu.memory_space<vmem>>, vector<64x128xbf16>
    tpu.vector_store %arg7[%c0_19, %c0_20], %17 {strides = array<i32>} : memref<64x1152xbf16, #tpu.memory_space<vmem>>, vector<64x128xbf16>,
    %c0_21 = arith.constant 0 : index
    %c1_22 = arith.constant 1 : index
    %c0_23 = arith.constant 0 : index
    %19 = vector.load %arg6[%c0_21, %c1_22, %c0_23] : memref<10x10x128xf32, #tpu.memory_space<vmem>>, vector<8x8x128xf32>
    %20 = vector.shape_cast %19 : vector<8x8x128xf32> to vector<64x128xf32>
    %21 = arith.truncf %20 : vector<64x128xf32> to vector<64x128xbf16>
    %c0_24 = arith.constant 0 : index
    %c128 = arith.constant 128 : index
    %22 = vector.load %arg7[%c0_24, %c128] : memref<64x1152xbf16, #tpu.memory_space<vmem>>, vector<64x128xbf16>
    tpu.vector_store %arg7[%c0_24, %c128], %21 {strides = array<i32>} : memref<64x1152xbf16, #tpu.memory_space<vmem>>, vector<64x128xbf16>,
    %c0_25 = arith.constant 0 : index
    %c2 = arith.constant 2 : index
    %c0_26 = arith.constant 0 : index
    %23 = vector.load %arg6[%c0_25, %c2, %c0_26] : memref<10x10x128xf32, #tpu.memory_space<vmem>>, vector<8x8x128xf32>
    %24 = vector.shape_cast %23 : vector<8x8x128xf32> to vector<64x128xf32>
    %25 = arith.truncf %24 : vector<64x128xf32> to vector<64x128xbf16>
    %c0_27 = arith.constant 0 : index
    %c256 = arith.constant 256 : index
    %26 = vector.load %arg7[%c0_27, %c256] : memref<64x1152xbf16, #tpu.memory_space<vmem>>, vector<64x128xbf16>
    tpu.vector_store %arg7[%c0_27, %c256], %25 {strides = array<i32>} : memref<64x1152xbf16, #tpu.memory_space<vmem>>, vector<64x128xbf16>,
    %c1_28 = arith.constant 1 : index
    %c0_29 = arith.constant 0 : index
    %c0_30 = arith.constant 0 : index
    %27 = vector.load %arg6[%c1_28, %c0_29, %c0_30] : memref<10x10x128xf32, #tpu.memory_space<vmem>>, vector<8x8x128xf32>
    %28 = vector.shape_cast %27 : vector<8x8x128xf32> to vector<64x128xf32>
    %29 = arith.truncf %28 : vector<64x128xf32> to vector<64x128xbf16>
    %c0_31 = arith.constant 0 : index
    %c384 = arith.constant 384 : index
    %30 = vector.load %arg7[%c0_31, %c384] : memref<64x1152xbf16, #tpu.memory_space<vmem>>, vector<64x128xbf16>
    tpu.vector_store %arg7[%c0_31, %c384], %29 {strides = array<i32>} : memref<64x1152xbf16, #tpu.memory_space<vmem>>, vector<64x128xbf16>,
    %c1_32 = arith.constant 1 : index
    %c1_33 = arith.constant 1 : index
    %c0_34 = arith.constant 0 : index
    %31 = vector.load %arg6[%c1_32, %c1_33, %c0_34] : memref<10x10x128xf32, #tpu.memory_space<vmem>>, vector<8x8x128xf32>
    %32 = vector.shape_cast %31 : vector<8x8x128xf32> to vector<64x128xf32>
    %33 = arith.truncf %32 : vector<64x128xf32> to vector<64x128xbf16>
    %c0_35 = arith.constant 0 : index
    %c512 = arith.constant 512 : index
    %34 = vector.load %arg7[%c0_35, %c512] : memref<64x1152xbf16, #tpu.memory_space<vmem>>, vector<64x128xbf16>
    tpu.vector_store %arg7[%c0_35, %c512], %33 {strides = array<i32>} : memref<64x1152xbf16, #tpu.memory_space<vmem>>, vector<64x128xbf16>,
    %c1_36 = arith.constant 1 : index
    %c2_37 = arith.constant 2 : index
    %c0_38 = arith.constant 0 : index
    %35 = vector.load %arg6[%c1_36, %c2_37, %c0_38] : memref<10x10x128xf32, #tpu.memory_space<vmem>>, vector<8x8x128xf32>
    %36 = vector.shape_cast %35 : vector<8x8x128xf32> to vector<64x128xf32>
    %37 = arith.truncf %36 : vector<64x128xf32> to vector<64x128xbf16>
    %c0_39 = arith.constant 0 : index
    %c640 = arith.constant 640 : index
    %38 = vector.load %arg7[%c0_39, %c640] : memref<64x1152xbf16, #tpu.memory_space<vmem>>, vector<64x128xbf16>
    tpu.vector_store %arg7[%c0_39, %c640], %37 {strides = array<i32>} : memref<64x1152xbf16, #tpu.memory_space<vmem>>, vector<64x128xbf16>,
    %c2_40 = arith.constant 2 : index
    %c0_41 = arith.constant 0 : index
    %c0_42 = arith.constant 0 : index
    %39 = vector.load %arg6[%c2_40, %c0_41, %c0_42] : memref<10x10x128xf32, #tpu.memory_space<vmem>>, vector<8x8x128xf32>
    %40 = vector.shape_cast %39 : vector<8x8x128xf32> to vector<64x128xf32>
    %41 = arith.truncf %40 : vector<64x128xf32> to vector<64x128xbf16>
    %c0_43 = arith.constant 0 : index
    %c768 = arith.constant 768 : index
    %42 = vector.load %arg7[%c0_43, %c768] : memref<64x1152xbf16, #tpu.memory_space<vmem>>, vector<64x128xbf16>
    tpu.vector_store %arg7[%c0_43, %c768], %41 {strides = array<i32>} : memref<64x1152xbf16, #tpu.memory_space<vmem>>, vector<64x128xbf16>,
    %c2_44 = arith.constant 2 : index
    %c1_45 = arith.constant 1 : index
    %c0_46 = arith.constant 0 : index
    %43 = vector.load %arg6[%c2_44, %c1_45, %c0_46] : memref<10x10x128xf32, #tpu.memory_space<vmem>>, vector<8x8x128xf32>
    %44 = vector.shape_cast %43 : vector<8x8x128xf32> to vector<64x128xf32>
    %45 = arith.truncf %44 : vector<64x128xf32> to vector<64x128xbf16>
    %c0_47 = arith.constant 0 : index
    %c896 = arith.constant 896 : index
    %46 = vector.load %arg7[%c0_47, %c896] : memref<64x1152xbf16, #tpu.memory_space<vmem>>, vector<64x128xbf16>
    tpu.vector_store %arg7[%c0_47, %c896], %45 {strides = array<i32>} : memref<64x1152xbf16, #tpu.memory_space<vmem>>, vector<64x128xbf16>,
    %c2_48 = arith.constant 2 : index
    %c2_49 = arith.constant 2 : index
    %c0_50 = arith.constant 0 : index
    %47 = vector.load %arg6[%c2_48, %c2_49, %c0_50] : memref<10x10x128xf32, #tpu.memory_space<vmem>>, vector<8x8x128xf32>
    %48 = vector.shape_cast %47 : vector<8x8x128xf32> to vector<64x128xf32>
    %49 = arith.truncf %48 : vector<64x128xf32> to vector<64x128xbf16>
    %c0_51 = arith.constant 0 : index
    %c1024 = arith.constant 1024 : index
    %50 = vector.load %arg7[%c0_51, %c1024] : memref<64x1152xbf16, #tpu.memory_space<vmem>>, vector<64x128xbf16>
    tpu.vector_store %arg7[%c0_51, %c1024], %49 {strides = array<i32>} : memref<64x1152xbf16, #tpu.memory_space<vmem>>, vector<64x128xbf16>,
    %c0_52 = arith.constant 0 : index
    %c0_53 = arith.constant 0 : index
    %51 = vector.load %arg7[%c0_52, %c0_53] : memref<64x1152xbf16, #tpu.memory_space<vmem>>, vector<64x1152xbf16>
    %c0_54 = arith.constant 0 : index
    %c0_55 = arith.constant 0 : index
    %52 = vector.load %arg3[%c0_54, %c0_55] : memref<1152x128xbf16, #tpu.memory_space<vmem>>, vector<1152x128xbf16>
    %cst_56 = arith.constant dense<0.000000e+00> : vector<64x128xf32>
    %53 = tpu.matmul %51, %52, %cst_56 {dimension_numbers = #tpu.dot_dimension_numbers<[1], [0], [0], [1], [0, 0, 1, 1], [], []>} : vector<64x1152xbf16>, vector<1152x128xbf16>, vector<64x128xf32> -> vector<64x128xf32>
    %cst_57 = arith.constant 0.000000e+00 : f32
    %54 = vector.broadcast %cst_57 : f32 to vector<64x128xf32>
    %55 = arith.maximumf %53, %54 : vector<64x128xf32>
    %56 = vector.shape_cast %55 : vector<64x128xf32> to vector<8x8x128xf32>
    %57 = arith.truncf %56 : vector<8x8x128xf32> to vector<8x8x128xbf16>
    %c1_58 = arith.constant 1 : index
    %c0_59 = arith.constant 0 : index
    %c0_60 = arith.constant 0 : index
    %c0_61 = arith.constant 0 : index
    %c0_62 = arith.constant 0 : index
    %58 = vector.load %arg5[%c1_58, %c0_59, %c0_60, %c0_61, %c0_62] : memref<3x1x8x8x128xbf16, #tpu.memory_space<vmem>>, vector<1x1x8x8x128xbf16>
    %59 = vector.shape_cast %58 : vector<1x1x8x8x128xbf16> to vector<8x8x128xbf16>
    %60 = vector.shape_cast %57 : vector<8x8x128xbf16> to vector<1x1x8x8x128xbf16>
    tpu.vector_store %arg5[%c1_58, %c0_59, %c0_60, %c0_61, %c0_62], %60 {strides = array<i32>} : memref<3x1x8x8x128xbf16, #tpu.memory_space<vmem>>, vector<1x1x8x8x128xbf16>,
    %cst_63 = arith.constant 0.000000e+00 : f32
    %61 = vector.broadcast %cst_63 : f32 to vector<10x10x128xf32>
    %c0_64 = arith.constant 0 : index
    %c0_65 = arith.constant 0 : index
    %c0_66 = arith.constant 0 : index
    %62 = vector.load %arg6[%c0_64, %c0_65, %c0_66] : memref<10x10x128xf32, #tpu.memory_space<vmem>>, vector<10x10x128xf32>
    tpu.vector_store %arg6[%c0_64, %c0_65, %c0_66], %61 {strides = array<i32>} : memref<10x10x128xf32, #tpu.memory_space<vmem>>, vector<10x10x128xf32>,
    %63 = vector.shape_cast %55 : vector<64x128xf32> to vector<8x8x128xf32>
    %c1_67 = arith.constant 1 : index
    %c1_68 = arith.constant 1 : index
    %c0_69 = arith.constant 0 : index
    %64 = vector.load %arg6[%c1_67, %c1_68, %c0_69] : memref<10x10x128xf32, #tpu.memory_space<vmem>>, vector<8x8x128xf32>
    tpu.vector_store %arg6[%c1_67, %c1_68, %c0_69], %63 {strides = array<i32>} : memref<10x10x128xf32, #tpu.memory_space<vmem>>, vector<8x8x128xf32>,
    %c0_70 = arith.constant 0 : index
    %c0_71 = arith.constant 0 : index
    %c0_72 = arith.constant 0 : index
    %65 = vector.load %arg6[%c0_70, %c0_71, %c0_72] : memref<10x10x128xf32, #tpu.memory_space<vmem>>, vector<8x8x128xf32>
    %66 = vector.shape_cast %65 : vector<8x8x128xf32> to vector<64x128xf32>
    %67 = arith.truncf %66 : vector<64x128xf32> to vector<64x128xbf16>
    %c0_73 = arith.constant 0 : index
    %c0_74 = arith.constant 0 : index
    %68 = vector.load %arg7[%c0_73, %c0_74] : memref<64x1152xbf16, #tpu.memory_space<vmem>>, vector<64x128xbf16>
    tpu.vector_store %arg7[%c0_73, %c0_74], %67 {strides = array<i32>} : memref<64x1152xbf16, #tpu.memory_space<vmem>>, vector<64x128xbf16>,
    %c0_75 = arith.constant 0 : index
    %c1_76 = arith.constant 1 : index
    %c0_77 = arith.constant 0 : index
    %69 = vector.load %arg6[%c0_75, %c1_76, %c0_77] : memref<10x10x128xf32, #tpu.memory_space<vmem>>, vector<8x8x128xf32>
    %70 = vector.shape_cast %69 : vector<8x8x128xf32> to vector<64x128xf32>
    %71 = arith.truncf %70 : vector<64x128xf32> to vector<64x128xbf16>
    %c0_78 = arith.constant 0 : index
    %c128_79 = arith.constant 128 : index
    %72 = vector.load %arg7[%c0_78, %c128_79] : memref<64x1152xbf16, #tpu.memory_space<vmem>>, vector<64x128xbf16>
    tpu.vector_store %arg7[%c0_78, %c128_79], %71 {strides = array<i32>} : memref<64x1152xbf16, #tpu.memory_space<vmem>>, vector<64x128xbf16>,
    %c0_80 = arith.constant 0 : index
    %c2_81 = arith.constant 2 : index
    %c0_82 = arith.constant 0 : index
    %73 = vector.load %arg6[%c0_80, %c2_81, %c0_82] : memref<10x10x128xf32, #tpu.memory_space<vmem>>, vector<8x8x128xf32>
    %74 = vector.shape_cast %73 : vector<8x8x128xf32> to vector<64x128xf32>
    %75 = arith.truncf %74 : vector<64x128xf32> to vector<64x128xbf16>
    %c0_83 = arith.constant 0 : index
    %c256_84 = arith.constant 256 : index
    %76 = vector.load %arg7[%c0_83, %c256_84] : memref<64x1152xbf16, #tpu.memory_space<vmem>>, vector<64x128xbf16>
    tpu.vector_store %arg7[%c0_83, %c256_84], %75 {strides = array<i32>} : memref<64x1152xbf16, #tpu.memory_space<vmem>>, vector<64x128xbf16>,
    %c1_85 = arith.constant 1 : index
    %c0_86 = arith.constant 0 : index
    %c0_87 = arith.constant 0 : index
    %77 = vector.load %arg6[%c1_85, %c0_86, %c0_87] : memref<10x10x128xf32, #tpu.memory_space<vmem>>, vector<8x8x128xf32>
    %78 = vector.shape_cast %77 : vector<8x8x128xf32> to vector<64x128xf32>
    %79 = arith.truncf %78 : vector<64x128xf32> to vector<64x128xbf16>
    %c0_88 = arith.constant 0 : index
    %c384_89 = arith.constant 384 : index
    %80 = vector.load %arg7[%c0_88, %c384_89] : memref<64x1152xbf16, #tpu.memory_space<vmem>>, vector<64x128xbf16>
    tpu.vector_store %arg7[%c0_88, %c384_89], %79 {strides = array<i32>} : memref<64x1152xbf16, #tpu.memory_space<vmem>>, vector<64x128xbf16>,
    %c1_90 = arith.constant 1 : index
    %c1_91 = arith.constant 1 : index
    %c0_92 = arith.constant 0 : index
    %81 = vector.load %arg6[%c1_90, %c1_91, %c0_92] : memref<10x10x128xf32, #tpu.memory_space<vmem>>, vector<8x8x128xf32>
    %82 = vector.shape_cast %81 : vector<8x8x128xf32> to vector<64x128xf32>
    %83 = arith.truncf %82 : vector<64x128xf32> to vector<64x128xbf16>
    %c0_93 = arith.constant 0 : index
    %c512_94 = arith.constant 512 : index
    %84 = vector.load %arg7[%c0_93, %c512_94] : memref<64x1152xbf16, #tpu.memory_space<vmem>>, vector<64x128xbf16>
    tpu.vector_store %arg7[%c0_93, %c512_94], %83 {strides = array<i32>} : memref<64x1152xbf16, #tpu.memory_space<vmem>>, vector<64x128xbf16>,
    %c1_95 = arith.constant 1 : index
    %c2_96 = arith.constant 2 : index
    %c0_97 = arith.constant 0 : index
    %85 = vector.load %arg6[%c1_95, %c2_96, %c0_97] : memref<10x10x128xf32, #tpu.memory_space<vmem>>, vector<8x8x128xf32>
    %86 = vector.shape_cast %85 : vector<8x8x128xf32> to vector<64x128xf32>
    %87 = arith.truncf %86 : vector<64x128xf32> to vector<64x128xbf16>
    %c0_98 = arith.constant 0 : index
    %c640_99 = arith.constant 640 : index
    %88 = vector.load %arg7[%c0_98, %c640_99] : memref<64x1152xbf16, #tpu.memory_space<vmem>>, vector<64x128xbf16>
    tpu.vector_store %arg7[%c0_98, %c640_99], %87 {strides = array<i32>} : memref<64x1152xbf16, #tpu.memory_space<vmem>>, vector<64x128xbf16>,
    %c2_100 = arith.constant 2 : index
    %c0_101 = arith.constant 0 : index
    %c0_102 = arith.constant 0 : index
    %89 = vector.load %arg6[%c2_100, %c0_101, %c0_102] : memref<10x10x128xf32, #tpu.memory_space<vmem>>, vector<8x8x128xf32>
    %90 = vector.shape_cast %89 : vector<8x8x128xf32> to vector<64x128xf32>
    %91 = arith.truncf %90 : vector<64x128xf32> to vector<64x128xbf16>
    %c0_103 = arith.constant 0 : index
    %c768_104 = arith.constant 768 : index
    %92 = vector.load %arg7[%c0_103, %c768_104] : memref<64x1152xbf16, #tpu.memory_space<vmem>>, vector<64x128xbf16>
    tpu.vector_store %arg7[%c0_103, %c768_104], %91 {strides = array<i32>} : memref<64x1152xbf16, #tpu.memory_space<vmem>>, vector<64x128xbf16>,
    %c2_105 = arith.constant 2 : index
    %c1_106 = arith.constant 1 : index
    %c0_107 = arith.constant 0 : index
    %93 = vector.load %arg6[%c2_105, %c1_106, %c0_107] : memref<10x10x128xf32, #tpu.memory_space<vmem>>, vector<8x8x128xf32>
    %94 = vector.shape_cast %93 : vector<8x8x128xf32> to vector<64x128xf32>
    %95 = arith.truncf %94 : vector<64x128xf32> to vector<64x128xbf16>
    %c0_108 = arith.constant 0 : index
    %c896_109 = arith.constant 896 : index
    %96 = vector.load %arg7[%c0_108, %c896_109] : memref<64x1152xbf16, #tpu.memory_space<vmem>>, vector<64x128xbf16>
    tpu.vector_store %arg7[%c0_108, %c896_109], %95 {strides = array<i32>} : memref<64x1152xbf16, #tpu.memory_space<vmem>>, vector<64x128xbf16>,
    %c2_110 = arith.constant 2 : index
    %c2_111 = arith.constant 2 : index
    %c0_112 = arith.constant 0 : index
    %97 = vector.load %arg6[%c2_110, %c2_111, %c0_112] : memref<10x10x128xf32, #tpu.memory_space<vmem>>, vector<8x8x128xf32>
    %98 = vector.shape_cast %97 : vector<8x8x128xf32> to vector<64x128xf32>
    %99 = arith.truncf %98 : vector<64x128xf32> to vector<64x128xbf16>
    %c0_113 = arith.constant 0 : index
    %c1024_114 = arith.constant 1024 : index
    %100 = vector.load %arg7[%c0_113, %c1024_114] : memref<64x1152xbf16, #tpu.memory_space<vmem>>, vector<64x128xbf16>
    tpu.vector_store %arg7[%c0_113, %c1024_114], %99 {strides = array<i32>} : memref<64x1152xbf16, #tpu.memory_space<vmem>>, vector<64x128xbf16>,
    %c0_115 = arith.constant 0 : index
    %c0_116 = arith.constant 0 : index
    %101 = vector.load %arg7[%c0_115, %c0_116] : memref<64x1152xbf16, #tpu.memory_space<vmem>>, vector<64x1152xbf16>
    %c0_117 = arith.constant 0 : index
    %c0_118 = arith.constant 0 : index
    %102 = vector.load %arg4[%c0_117, %c0_118] : memref<1152x128xbf16, #tpu.memory_space<vmem>>, vector<1152x128xbf16>
    %cst_119 = arith.constant dense<0.000000e+00> : vector<64x128xf32>
    %103 = tpu.matmul %101, %102, %cst_119 {dimension_numbers = #tpu.dot_dimension_numbers<[1], [0], [0], [1], [0, 0, 1, 1], [], []>} : vector<64x1152xbf16>, vector<1152x128xbf16>, vector<64x128xf32> -> vector<64x128xf32>
    %cst_120 = arith.constant 0.000000e+00 : f32
    %104 = vector.broadcast %cst_120 : f32 to vector<64x128xf32>
    %105 = arith.maximumf %103, %104 : vector<64x128xf32>
    %106 = vector.shape_cast %105 : vector<64x128xf32> to vector<8x8x128xf32>
    %107 = arith.truncf %106 : vector<8x8x128xf32> to vector<8x8x128xbf16>
    %c2_121 = arith.constant 2 : index
    %c0_122 = arith.constant 0 : index
    %c0_123 = arith.constant 0 : index
    %c0_124 = arith.constant 0 : index
    %c0_125 = arith.constant 0 : index
    %108 = vector.load %arg5[%c2_121, %c0_122, %c0_123, %c0_124, %c0_125] : memref<3x1x8x8x128xbf16, #tpu.memory_space<vmem>>, vector<1x1x8x8x128xbf16>
    %109 = vector.shape_cast %108 : vector<1x1x8x8x128xbf16> to vector<8x8x128xbf16>
    %110 = vector.shape_cast %107 : vector<8x8x128xbf16> to vector<1x1x8x8x128xbf16>
    tpu.vector_store %arg5[%c2_121, %c0_122, %c0_123, %c0_124, %c0_125], %110 {strides = array<i32>} : memref<3x1x8x8x128xbf16, #tpu.memory_space<vmem>>, vector<1x1x8x8x128xbf16>,
    return
  }
  func.func @transform_0(%arg0: i32) -> (i32, i32, i32) {
    %c0_i32 = arith.constant 0 : i32
    %c0_i32_0 = arith.constant 0 : i32
    %c0_i32_1 = arith.constant 0 : i32
    return %arg0, %c0_i32, %c0_i32_0 : i32, i32, i32
  }
  func.func @transform_1(%arg0: i32) -> (i32, i32) {
    %c0_i32 = arith.constant 0 : i32
    %c0_i32_0 = arith.constant 0 : i32
    %c0_i32_1 = arith.constant 0 : i32
    return %c0_i32, %c0_i32_0 : i32, i32
  }
  func.func @transform_2(%arg0: i32) -> (i32, i32) {
    %c0_i32 = arith.constant 0 : i32
    %c0_i32_0 = arith.constant 0 : i32
    %c0_i32_1 = arith.constant 0 : i32
    return %c0_i32, %c0_i32_0 : i32, i32
  }
  func.func @transform_3(%arg0: i32) -> (i32, i32) {
    %c0_i32 = arith.constant 0 : i32
    %c0_i32_0 = arith.constant 0 : i32
    %c0_i32_1 = arith.constant 0 : i32
    return %c0_i32, %c0_i32_0 : i32, i32
  }
  func.func @transform_4(%arg0: i32) -> (i32, i32, i32, i32, i32) {
    %c0_i32 = arith.constant 0 : i32
    %c0_i32_0 = arith.constant 0 : i32
    %c0_i32_1 = arith.constant 0 : i32
    %c0_i32_2 = arith.constant 0 : i32
    %c0_i32_3 = arith.constant 0 : i32
    return %c0_i32, %arg0, %c0_i32_0, %c0_i32_1, %c0_i32_2 : i32, i32, i32, i32, i32
  }
}

module attributes {stable_mosaic.version = 11 : i64} {
  func.func @_head_kernel(%arg0: i32, %arg1: memref<1x2x8x8x128xbf16, #tpu.memory_space<vmem>>, %arg2: memref<1x128x128xbf16, #tpu.memory_space<vmem>>, %arg3: memref<1x3x1152x128xbf16, #tpu.memory_space<vmem>>, %arg4: memref<1x128x128xbf16, #tpu.memory_space<vmem>>, %arg5: memref<1x512x128xbf16, #tpu.memory_space<vmem>>, %arg6: memref<1x128x128xbf16, #tpu.memory_space<vmem>>, %arg7: memref<1x1152x128xbf16, #tpu.memory_space<vmem>>, %arg8: memref<1x128x128xbf16, #tpu.memory_space<vmem>>, %arg9: memref<1x1x128xf32, #tpu.memory_space<vmem>>, %arg10: memref<64x256xbf16, #tpu.memory_space<vmem>>, %arg11: memref<1x2x128x256xf32, #tpu.memory_space<vmem>>, %arg12: memref<2x20x20x128xbf16, #tpu.memory_space<vmem>>, %arg13: memref<2x10x10x128xf32, #tpu.memory_space<vmem>>, %arg14: memref<128x1152xbf16, #tpu.memory_space<vmem>>, %arg15: memref<128x512xbf16, #tpu.memory_space<vmem>>) attributes {dimension_semantics = [#tpu.dimension_semantics<parallel>], iteration_bounds = array<i64: 3>, scalar_prefetch = 0 : i64, scratch_operands = 4 : i64, tpu.core_type = #tpu.core_type<tc>, window_params = [{transform_indices = @transform_0, window_bounds = array<i64: 1, 2, 8, 8, 128>}, {transform_indices = @transform_1, window_bounds = array<i64: 1, 128, 128>}, {transform_indices = @transform_2, window_bounds = array<i64: 1, 3, 1152, 128>}, {transform_indices = @transform_3, window_bounds = array<i64: 1, 128, 128>}, {transform_indices = @transform_4, window_bounds = array<i64: 1, 512, 128>}, {transform_indices = @transform_5, window_bounds = array<i64: 1, 128, 128>}, {transform_indices = @transform_6, window_bounds = array<i64: 1, 1152, 128>}, {transform_indices = @transform_7, window_bounds = array<i64: 1, 128, 128>}, {transform_indices = @transform_8, window_bounds = array<i64: 1, 1, 128>}, {pipeline_mode = #tpu.pipeline_mode<synchronous>, transform_indices = @transform_9, window_bounds = array<i64: 64, 256>}, {transform_indices = @transform_10, window_bounds = array<i64: 1, 2, 128, 256>}]} {
    %cst = arith.constant 0.000000e+00 : bf16
    %0 = vector.broadcast %cst : bf16 to vector<2x20x20x128xbf16>
    %c0 = arith.constant 0 : index
    %c0_0 = arith.constant 0 : index
    %c0_1 = arith.constant 0 : index
    %c0_2 = arith.constant 0 : index
    %1 = vector.load %arg12[%c0, %c0_0, %c0_1, %c0_2] : memref<2x20x20x128xbf16, #tpu.memory_space<vmem>>, vector<2x20x20x128xbf16>
    tpu.vector_store %arg12[%c0, %c0_0, %c0_1, %c0_2], %0 {strides = array<i32>} : memref<2x20x20x128xbf16, #tpu.memory_space<vmem>>, vector<2x20x20x128xbf16>,
    %c0_3 = arith.constant 0 : index
    %c0_4 = arith.constant 0 : index
    %c0_5 = arith.constant 0 : index
    %c0_6 = arith.constant 0 : index
    %c0_7 = arith.constant 0 : index
    %2 = vector.load %arg1[%c0_3, %c0_4, %c0_5, %c0_6, %c0_7] : memref<1x2x8x8x128xbf16, #tpu.memory_space<vmem>>, vector<1x2x8x8x128xbf16>
    %3 = vector.shape_cast %2 : vector<1x2x8x8x128xbf16> to vector<2x8x8x128xbf16>
    %c0_8 = arith.constant 0 : index
    %c6 = arith.constant 6 : index
    %c6_9 = arith.constant 6 : index
    %c0_10 = arith.constant 0 : index
    %4 = vector.load %arg12[%c0_8, %c6, %c6_9, %c0_10] : memref<2x20x20x128xbf16, #tpu.memory_space<vmem>>, vector<2x8x8x128xbf16>
    tpu.vector_store %arg12[%c0_8, %c6, %c6_9, %c0_10], %3 {strides = array<i32>} : memref<2x20x20x128xbf16, #tpu.memory_space<vmem>>, vector<2x8x8x128xbf16>,
    %c0_11 = arith.constant 0 : index
    %c0_12 = arith.constant 0 : index
    %c0_13 = arith.constant 0 : index
    %c0_14 = arith.constant 0 : index
    %c0_15 = arith.constant 0 : index
    %5 = vector.load %arg1[%c0_11, %c0_12, %c0_13, %c0_14, %c0_15] : memref<1x2x8x8x128xbf16, #tpu.memory_space<vmem>>, vector<1x2x8x8x128xbf16>
    %6 = vector.shape_cast %5 : vector<1x2x8x8x128xbf16> to vector<2x8x8x128xbf16>
    %7 = vector.shape_cast %6 : vector<2x8x8x128xbf16> to vector<128x128xbf16>
    %c0_16 = arith.constant 0 : index
    %c0_17 = arith.constant 0 : index
    %c0_18 = arith.constant 0 : index
    %8 = vector.load %arg2[%c0_16, %c0_17, %c0_18] : memref<1x128x128xbf16, #tpu.memory_space<vmem>>, vector<1x128x128xbf16>
    %9 = vector.shape_cast %8 : vector<1x128x128xbf16> to vector<128x128xbf16>
    %cst_19 = arith.constant dense<0.000000e+00> : vector<128x128xf32>
    %10 = tpu.matmul %7, %9, %cst_19 {dimension_numbers = #tpu.dot_dimension_numbers<[1], [0], [0], [1], [0, 0, 1, 1], [], []>} : vector<128x128xbf16>, vector<128x128xbf16>, vector<128x128xf32> -> vector<128x128xf32>
    %cst_20 = arith.constant 0.000000e+00 : f32
    %11 = vector.broadcast %cst_20 : f32 to vector<128x128xf32>
    %12 = arith.maximumf %10, %11 : vector<128x128xf32>
    %13 = arith.truncf %12 : vector<128x128xf32> to vector<128x128xbf16>
    %c0_21 = arith.constant 0 : index
    %c0_22 = arith.constant 0 : index
    %14 = vector.load %arg15[%c0_21, %c0_22] : memref<128x512xbf16, #tpu.memory_space<vmem>>, vector<128x128xbf16>
    tpu.vector_store %arg15[%c0_21, %c0_22], %13 {strides = array<i32>} : memref<128x512xbf16, #tpu.memory_space<vmem>>, vector<128x128xbf16>,
    %c0_23 = arith.constant 0 : index
    %c4 = arith.constant 4 : index
    %c4_24 = arith.constant 4 : index
    %c0_25 = arith.constant 0 : index
    %15 = vector.load %arg12[%c0_23, %c4, %c4_24, %c0_25] : memref<2x20x20x128xbf16, #tpu.memory_space<vmem>>, vector<2x8x8x128xbf16>
    %16 = vector.shape_cast %15 : vector<2x8x8x128xbf16> to vector<128x128xbf16>
    %c0_26 = arith.constant 0 : index
    %c0_27 = arith.constant 0 : index
    %17 = vector.load %arg14[%c0_26, %c0_27] : memref<128x1152xbf16, #tpu.memory_space<vmem>>, vector<128x128xbf16>
    tpu.vector_store %arg14[%c0_26, %c0_27], %16 {strides = array<i32>} : memref<128x1152xbf16, #tpu.memory_space<vmem>>, vector<128x128xbf16>,
    %c0_28 = arith.constant 0 : index
    %c4_29 = arith.constant 4 : index
    %c6_30 = arith.constant 6 : index
    %c0_31 = arith.constant 0 : index
    %18 = vector.load %arg12[%c0_28, %c4_29, %c6_30, %c0_31] : memref<2x20x20x128xbf16, #tpu.memory_space<vmem>>, vector<2x8x8x128xbf16>
    %19 = vector.shape_cast %18 : vector<2x8x8x128xbf16> to vector<128x128xbf16>
    %c0_32 = arith.constant 0 : index
    %c128 = arith.constant 128 : index
    %20 = vector.load %arg14[%c0_32, %c128] : memref<128x1152xbf16, #tpu.memory_space<vmem>>, vector<128x128xbf16>
    tpu.vector_store %arg14[%c0_32, %c128], %19 {strides = array<i32>} : memref<128x1152xbf16, #tpu.memory_space<vmem>>, vector<128x128xbf16>,
    %c0_33 = arith.constant 0 : index
    %c4_34 = arith.constant 4 : index
    %c8 = arith.constant 8 : index
    %c0_35 = arith.constant 0 : index
    %21 = vector.load %arg12[%c0_33, %c4_34, %c8, %c0_35] : memref<2x20x20x128xbf16, #tpu.memory_space<vmem>>, vector<2x8x8x128xbf16>
    %22 = vector.shape_cast %21 : vector<2x8x8x128xbf16> to vector<128x128xbf16>
    %c0_36 = arith.constant 0 : index
    %c256 = arith.constant 256 : index
    %23 = vector.load %arg14[%c0_36, %c256] : memref<128x1152xbf16, #tpu.memory_space<vmem>>, vector<128x128xbf16>
    tpu.vector_store %arg14[%c0_36, %c256], %22 {strides = array<i32>} : memref<128x1152xbf16, #tpu.memory_space<vmem>>, vector<128x128xbf16>,
    %c0_37 = arith.constant 0 : index
    %c6_38 = arith.constant 6 : index
    %c4_39 = arith.constant 4 : index
    %c0_40 = arith.constant 0 : index
    %24 = vector.load %arg12[%c0_37, %c6_38, %c4_39, %c0_40] : memref<2x20x20x128xbf16, #tpu.memory_space<vmem>>, vector<2x8x8x128xbf16>
    %25 = vector.shape_cast %24 : vector<2x8x8x128xbf16> to vector<128x128xbf16>
    %c0_41 = arith.constant 0 : index
    %c384 = arith.constant 384 : index
    %26 = vector.load %arg14[%c0_41, %c384] : memref<128x1152xbf16, #tpu.memory_space<vmem>>, vector<128x128xbf16>
    tpu.vector_store %arg14[%c0_41, %c384], %25 {strides = array<i32>} : memref<128x1152xbf16, #tpu.memory_space<vmem>>, vector<128x128xbf16>,
    %c0_42 = arith.constant 0 : index
    %c6_43 = arith.constant 6 : index
    %c6_44 = arith.constant 6 : index
    %c0_45 = arith.constant 0 : index
    %27 = vector.load %arg12[%c0_42, %c6_43, %c6_44, %c0_45] : memref<2x20x20x128xbf16, #tpu.memory_space<vmem>>, vector<2x8x8x128xbf16>
    %28 = vector.shape_cast %27 : vector<2x8x8x128xbf16> to vector<128x128xbf16>
    %c0_46 = arith.constant 0 : index
    %c512 = arith.constant 512 : index
    %29 = vector.load %arg14[%c0_46, %c512] : memref<128x1152xbf16, #tpu.memory_space<vmem>>, vector<128x128xbf16>
    tpu.vector_store %arg14[%c0_46, %c512], %28 {strides = array<i32>} : memref<128x1152xbf16, #tpu.memory_space<vmem>>, vector<128x128xbf16>,
    %c0_47 = arith.constant 0 : index
    %c6_48 = arith.constant 6 : index
    %c8_49 = arith.constant 8 : index
    %c0_50 = arith.constant 0 : index
    %30 = vector.load %arg12[%c0_47, %c6_48, %c8_49, %c0_50] : memref<2x20x20x128xbf16, #tpu.memory_space<vmem>>, vector<2x8x8x128xbf16>
    %31 = vector.shape_cast %30 : vector<2x8x8x128xbf16> to vector<128x128xbf16>
    %c0_51 = arith.constant 0 : index
    %c640 = arith.constant 640 : index
    %32 = vector.load %arg14[%c0_51, %c640] : memref<128x1152xbf16, #tpu.memory_space<vmem>>, vector<128x128xbf16>
    tpu.vector_store %arg14[%c0_51, %c640], %31 {strides = array<i32>} : memref<128x1152xbf16, #tpu.memory_space<vmem>>, vector<128x128xbf16>,
    %c0_52 = arith.constant 0 : index
    %c8_53 = arith.constant 8 : index
    %c4_54 = arith.constant 4 : index
    %c0_55 = arith.constant 0 : index
    %33 = vector.load %arg12[%c0_52, %c8_53, %c4_54, %c0_55] : memref<2x20x20x128xbf16, #tpu.memory_space<vmem>>, vector<2x8x8x128xbf16>
    %34 = vector.shape_cast %33 : vector<2x8x8x128xbf16> to vector<128x128xbf16>
    %c0_56 = arith.constant 0 : index
    %c768 = arith.constant 768 : index
    %35 = vector.load %arg14[%c0_56, %c768] : memref<128x1152xbf16, #tpu.memory_space<vmem>>, vector<128x128xbf16>
    tpu.vector_store %arg14[%c0_56, %c768], %34 {strides = array<i32>} : memref<128x1152xbf16, #tpu.memory_space<vmem>>, vector<128x128xbf16>,
    %c0_57 = arith.constant 0 : index
    %c8_58 = arith.constant 8 : index
    %c6_59 = arith.constant 6 : index
    %c0_60 = arith.constant 0 : index
    %36 = vector.load %arg12[%c0_57, %c8_58, %c6_59, %c0_60] : memref<2x20x20x128xbf16, #tpu.memory_space<vmem>>, vector<2x8x8x128xbf16>
    %37 = vector.shape_cast %36 : vector<2x8x8x128xbf16> to vector<128x128xbf16>
    %c0_61 = arith.constant 0 : index
    %c896 = arith.constant 896 : index
    %38 = vector.load %arg14[%c0_61, %c896] : memref<128x1152xbf16, #tpu.memory_space<vmem>>, vector<128x128xbf16>
    tpu.vector_store %arg14[%c0_61, %c896], %37 {strides = array<i32>} : memref<128x1152xbf16, #tpu.memory_space<vmem>>, vector<128x128xbf16>,
    %c0_62 = arith.constant 0 : index
    %c8_63 = arith.constant 8 : index
    %c8_64 = arith.constant 8 : index
    %c0_65 = arith.constant 0 : index
    %39 = vector.load %arg12[%c0_62, %c8_63, %c8_64, %c0_65] : memref<2x20x20x128xbf16, #tpu.memory_space<vmem>>, vector<2x8x8x128xbf16>
    %40 = vector.shape_cast %39 : vector<2x8x8x128xbf16> to vector<128x128xbf16>
    %c0_66 = arith.constant 0 : index
    %c1024 = arith.constant 1024 : index
    %41 = vector.load %arg14[%c0_66, %c1024] : memref<128x1152xbf16, #tpu.memory_space<vmem>>, vector<128x128xbf16>
    tpu.vector_store %arg14[%c0_66, %c1024], %40 {strides = array<i32>} : memref<128x1152xbf16, #tpu.memory_space<vmem>>, vector<128x128xbf16>,
    %c0_67 = arith.constant 0 : index
    %c0_68 = arith.constant 0 : index
    %42 = vector.load %arg14[%c0_67, %c0_68] : memref<128x1152xbf16, #tpu.memory_space<vmem>>, vector<128x1152xbf16>
    %c0_69 = arith.constant 0 : index
    %c0_70 = arith.constant 0 : index
    %c0_71 = arith.constant 0 : index
    %c0_72 = arith.constant 0 : index
    %43 = vector.load %arg3[%c0_69, %c0_70, %c0_71, %c0_72] : memref<1x3x1152x128xbf16, #tpu.memory_space<vmem>>, vector<1x1x1152x128xbf16>
    %44 = vector.shape_cast %43 : vector<1x1x1152x128xbf16> to vector<1152x128xbf16>
    %cst_73 = arith.constant dense<0.000000e+00> : vector<128x128xf32>
    %45 = tpu.matmul %42, %44, %cst_73 {dimension_numbers = #tpu.dot_dimension_numbers<[1], [0], [0], [1], [0, 0, 1, 1], [], []>} : vector<128x1152xbf16>, vector<1152x128xbf16>, vector<128x128xf32> -> vector<128x128xf32>
    %cst_74 = arith.constant 0.000000e+00 : f32
    %46 = vector.broadcast %cst_74 : f32 to vector<128x128xf32>
    %47 = arith.maximumf %45, %46 : vector<128x128xf32>
    %48 = arith.truncf %47 : vector<128x128xf32> to vector<128x128xbf16>
    %c0_75 = arith.constant 0 : index
    %c128_76 = arith.constant 128 : index
    %49 = vector.load %arg15[%c0_75, %c128_76] : memref<128x512xbf16, #tpu.memory_space<vmem>>, vector<128x128xbf16>
    tpu.vector_store %arg15[%c0_75, %c128_76], %48 {strides = array<i32>} : memref<128x512xbf16, #tpu.memory_space<vmem>>, vector<128x128xbf16>,
    %c0_77 = arith.constant 0 : index
    %c2 = arith.constant 2 : index
    %c2_78 = arith.constant 2 : index
    %c0_79 = arith.constant 0 : index
    %50 = vector.load %arg12[%c0_77, %c2, %c2_78, %c0_79] : memref<2x20x20x128xbf16, #tpu.memory_space<vmem>>, vector<2x8x8x128xbf16>
    %51 = vector.shape_cast %50 : vector<2x8x8x128xbf16> to vector<128x128xbf16>
    %c0_80 = arith.constant 0 : index
    %c0_81 = arith.constant 0 : index
    %52 = vector.load %arg14[%c0_80, %c0_81] : memref<128x1152xbf16, #tpu.memory_space<vmem>>, vector<128x128xbf16>
    tpu.vector_store %arg14[%c0_80, %c0_81], %51 {strides = array<i32>} : memref<128x1152xbf16, #tpu.memory_space<vmem>>, vector<128x128xbf16>,
    %c0_82 = arith.constant 0 : index
    %c2_83 = arith.constant 2 : index
    %c6_84 = arith.constant 6 : index
    %c0_85 = arith.constant 0 : index
    %53 = vector.load %arg12[%c0_82, %c2_83, %c6_84, %c0_85] : memref<2x20x20x128xbf16, #tpu.memory_space<vmem>>, vector<2x8x8x128xbf16>
    %54 = vector.shape_cast %53 : vector<2x8x8x128xbf16> to vector<128x128xbf16>
    %c0_86 = arith.constant 0 : index
    %c128_87 = arith.constant 128 : index
    %55 = vector.load %arg14[%c0_86, %c128_87] : memref<128x1152xbf16, #tpu.memory_space<vmem>>, vector<128x128xbf16>
    tpu.vector_store %arg14[%c0_86, %c128_87], %54 {strides = array<i32>} : memref<128x1152xbf16, #tpu.memory_space<vmem>>, vector<128x128xbf16>,
    %c0_88 = arith.constant 0 : index
    %c2_89 = arith.constant 2 : index
    %c10 = arith.constant 10 : index
    %c0_90 = arith.constant 0 : index
    %56 = vector.load %arg12[%c0_88, %c2_89, %c10, %c0_90] : memref<2x20x20x128xbf16, #tpu.memory_space<vmem>>, vector<2x8x8x128xbf16>
    %57 = vector.shape_cast %56 : vector<2x8x8x128xbf16> to vector<128x128xbf16>
    %c0_91 = arith.constant 0 : index
    %c256_92 = arith.constant 256 : index
    %58 = vector.load %arg14[%c0_91, %c256_92] : memref<128x1152xbf16, #tpu.memory_space<vmem>>, vector<128x128xbf16>
    tpu.vector_store %arg14[%c0_91, %c256_92], %57 {strides = array<i32>} : memref<128x1152xbf16, #tpu.memory_space<vmem>>, vector<128x128xbf16>,
    %c0_93 = arith.constant 0 : index
    %c6_94 = arith.constant 6 : index
    %c2_95 = arith.constant 2 : index
    %c0_96 = arith.constant 0 : index
    %59 = vector.load %arg12[%c0_93, %c6_94, %c2_95, %c0_96] : memref<2x20x20x128xbf16, #tpu.memory_space<vmem>>, vector<2x8x8x128xbf16>
    %60 = vector.shape_cast %59 : vector<2x8x8x128xbf16> to vector<128x128xbf16>
    %c0_97 = arith.constant 0 : index
    %c384_98 = arith.constant 384 : index
    %61 = vector.load %arg14[%c0_97, %c384_98] : memref<128x1152xbf16, #tpu.memory_space<vmem>>, vector<128x128xbf16>
    tpu.vector_store %arg14[%c0_97, %c384_98], %60 {strides = array<i32>} : memref<128x1152xbf16, #tpu.memory_space<vmem>>, vector<128x128xbf16>,
    %c0_99 = arith.constant 0 : index
    %c6_100 = arith.constant 6 : index
    %c6_101 = arith.constant 6 : index
    %c0_102 = arith.constant 0 : index
    %62 = vector.load %arg12[%c0_99, %c6_100, %c6_101, %c0_102] : memref<2x20x20x128xbf16, #tpu.memory_space<vmem>>, vector<2x8x8x128xbf16>
    %63 = vector.shape_cast %62 : vector<2x8x8x128xbf16> to vector<128x128xbf16>
    %c0_103 = arith.constant 0 : index
    %c512_104 = arith.constant 512 : index
    %64 = vector.load %arg14[%c0_103, %c512_104] : memref<128x1152xbf16, #tpu.memory_space<vmem>>, vector<128x128xbf16>
    tpu.vector_store %arg14[%c0_103, %c512_104], %63 {strides = array<i32>} : memref<128x1152xbf16, #tpu.memory_space<vmem>>, vector<128x128xbf16>,
    %c0_105 = arith.constant 0 : index
    %c6_106 = arith.constant 6 : index
    %c10_107 = arith.constant 10 : index
    %c0_108 = arith.constant 0 : index
    %65 = vector.load %arg12[%c0_105, %c6_106, %c10_107, %c0_108] : memref<2x20x20x128xbf16, #tpu.memory_space<vmem>>, vector<2x8x8x128xbf16>
    %66 = vector.shape_cast %65 : vector<2x8x8x128xbf16> to vector<128x128xbf16>
    %c0_109 = arith.constant 0 : index
    %c640_110 = arith.constant 640 : index
    %67 = vector.load %arg14[%c0_109, %c640_110] : memref<128x1152xbf16, #tpu.memory_space<vmem>>, vector<128x128xbf16>
    tpu.vector_store %arg14[%c0_109, %c640_110], %66 {strides = array<i32>} : memref<128x1152xbf16, #tpu.memory_space<vmem>>, vector<128x128xbf16>,
    %c0_111 = arith.constant 0 : index
    %c10_112 = arith.constant 10 : index
    %c2_113 = arith.constant 2 : index
    %c0_114 = arith.constant 0 : index
    %68 = vector.load %arg12[%c0_111, %c10_112, %c2_113, %c0_114] : memref<2x20x20x128xbf16, #tpu.memory_space<vmem>>, vector<2x8x8x128xbf16>
    %69 = vector.shape_cast %68 : vector<2x8x8x128xbf16> to vector<128x128xbf16>
    %c0_115 = arith.constant 0 : index
    %c768_116 = arith.constant 768 : index
    %70 = vector.load %arg14[%c0_115, %c768_116] : memref<128x1152xbf16, #tpu.memory_space<vmem>>, vector<128x128xbf16>
    tpu.vector_store %arg14[%c0_115, %c768_116], %69 {strides = array<i32>} : memref<128x1152xbf16, #tpu.memory_space<vmem>>, vector<128x128xbf16>,
    %c0_117 = arith.constant 0 : index
    %c10_118 = arith.constant 10 : index
    %c6_119 = arith.constant 6 : index
    %c0_120 = arith.constant 0 : index
    %71 = vector.load %arg12[%c0_117, %c10_118, %c6_119, %c0_120] : memref<2x20x20x128xbf16, #tpu.memory_space<vmem>>, vector<2x8x8x128xbf16>
    %72 = vector.shape_cast %71 : vector<2x8x8x128xbf16> to vector<128x128xbf16>
    %c0_121 = arith.constant 0 : index
    %c896_122 = arith.constant 896 : index
    %73 = vector.load %arg14[%c0_121, %c896_122] : memref<128x1152xbf16, #tpu.memory_space<vmem>>, vector<128x128xbf16>
    tpu.vector_store %arg14[%c0_121, %c896_122], %72 {strides = array<i32>} : memref<128x1152xbf16, #tpu.memory_space<vmem>>, vector<128x128xbf16>,
    %c0_123 = arith.constant 0 : index
    %c10_124 = arith.constant 10 : index
    %c10_125 = arith.constant 10 : index
    %c0_126 = arith.constant 0 : index
    %74 = vector.load %arg12[%c0_123, %c10_124, %c10_125, %c0_126] : memref<2x20x20x128xbf16, #tpu.memory_space<vmem>>, vector<2x8x8x128xbf16>
    %75 = vector.shape_cast %74 : vector<2x8x8x128xbf16> to vector<128x128xbf16>
    %c0_127 = arith.constant 0 : index
    %c1024_128 = arith.constant 1024 : index
    %76 = vector.load %arg14[%c0_127, %c1024_128] : memref<128x1152xbf16, #tpu.memory_space<vmem>>, vector<128x128xbf16>
    tpu.vector_store %arg14[%c0_127, %c1024_128], %75 {strides = array<i32>} : memref<128x1152xbf16, #tpu.memory_space<vmem>>, vector<128x128xbf16>,
    %c0_129 = arith.constant 0 : index
    %c0_130 = arith.constant 0 : index
    %77 = vector.load %arg14[%c0_129, %c0_130] : memref<128x1152xbf16, #tpu.memory_space<vmem>>, vector<128x1152xbf16>
    %c0_131 = arith.constant 0 : index
    %c1 = arith.constant 1 : index
    %c0_132 = arith.constant 0 : index
    %c0_133 = arith.constant 0 : index
    %78 = vector.load %arg3[%c0_131, %c1, %c0_132, %c0_133] : memref<1x3x1152x128xbf16, #tpu.memory_space<vmem>>, vector<1x1x1152x128xbf16>
    %79 = vector.shape_cast %78 : vector<1x1x1152x128xbf16> to vector<1152x128xbf16>
    %cst_134 = arith.constant dense<0.000000e+00> : vector<128x128xf32>
    %80 = tpu.matmul %77, %79, %cst_134 {dimension_numbers = #tpu.dot_dimension_numbers<[1], [0], [0], [1], [0, 0, 1, 1], [], []>} : vector<128x1152xbf16>, vector<1152x128xbf16>, vector<128x128xf32> -> vector<128x128xf32>
    %cst_135 = arith.constant 0.000000e+00 : f32
    %81 = vector.broadcast %cst_135 : f32 to vector<128x128xf32>
    %82 = arith.maximumf %80, %81 : vector<128x128xf32>
    %83 = arith.truncf %82 : vector<128x128xf32> to vector<128x128xbf16>
    %c0_136 = arith.constant 0 : index
    %c256_137 = arith.constant 256 : index
    %84 = vector.load %arg15[%c0_136, %c256_137] : memref<128x512xbf16, #tpu.memory_space<vmem>>, vector<128x128xbf16>
    tpu.vector_store %arg15[%c0_136, %c256_137], %83 {strides = array<i32>} : memref<128x512xbf16, #tpu.memory_space<vmem>>, vector<128x128xbf16>,
    %c0_138 = arith.constant 0 : index
    %c0_139 = arith.constant 0 : index
    %c0_140 = arith.constant 0 : index
    %c0_141 = arith.constant 0 : index
    %85 = vector.load %arg12[%c0_138, %c0_139, %c0_140, %c0_141] : memref<2x20x20x128xbf16, #tpu.memory_space<vmem>>, vector<2x8x8x128xbf16>
    %86 = vector.shape_cast %85 : vector<2x8x8x128xbf16> to vector<128x128xbf16>
    %c0_142 = arith.constant 0 : index
    %c0_143 = arith.constant 0 : index
    %87 = vector.load %arg14[%c0_142, %c0_143] : memref<128x1152xbf16, #tpu.memory_space<vmem>>, vector<128x128xbf16>
    tpu.vector_store %arg14[%c0_142, %c0_143], %86 {strides = array<i32>} : memref<128x1152xbf16, #tpu.memory_space<vmem>>, vector<128x128xbf16>,
    %c0_144 = arith.constant 0 : index
    %c0_145 = arith.constant 0 : index
    %c6_146 = arith.constant 6 : index
    %c0_147 = arith.constant 0 : index
    %88 = vector.load %arg12[%c0_144, %c0_145, %c6_146, %c0_147] : memref<2x20x20x128xbf16, #tpu.memory_space<vmem>>, vector<2x8x8x128xbf16>
    %89 = vector.shape_cast %88 : vector<2x8x8x128xbf16> to vector<128x128xbf16>
    %c0_148 = arith.constant 0 : index
    %c128_149 = arith.constant 128 : index
    %90 = vector.load %arg14[%c0_148, %c128_149] : memref<128x1152xbf16, #tpu.memory_space<vmem>>, vector<128x128xbf16>
    tpu.vector_store %arg14[%c0_148, %c128_149], %89 {strides = array<i32>} : memref<128x1152xbf16, #tpu.memory_space<vmem>>, vector<128x128xbf16>,
    %c0_150 = arith.constant 0 : index
    %c0_151 = arith.constant 0 : index
    %c12 = arith.constant 12 : index
    %c0_152 = arith.constant 0 : index
    %91 = vector.load %arg12[%c0_150, %c0_151, %c12, %c0_152] : memref<2x20x20x128xbf16, #tpu.memory_space<vmem>>, vector<2x8x8x128xbf16>
    %92 = vector.shape_cast %91 : vector<2x8x8x128xbf16> to vector<128x128xbf16>
    %c0_153 = arith.constant 0 : index
    %c256_154 = arith.constant 256 : index
    %93 = vector.load %arg14[%c0_153, %c256_154] : memref<128x1152xbf16, #tpu.memory_space<vmem>>, vector<128x128xbf16>
    tpu.vector_store %arg14[%c0_153, %c256_154], %92 {strides = array<i32>} : memref<128x1152xbf16, #tpu.memory_space<vmem>>, vector<128x128xbf16>,
    %c0_155 = arith.constant 0 : index
    %c6_156 = arith.constant 6 : index
    %c0_157 = arith.constant 0 : index
    %c0_158 = arith.constant 0 : index
    %94 = vector.load %arg12[%c0_155, %c6_156, %c0_157, %c0_158] : memref<2x20x20x128xbf16, #tpu.memory_space<vmem>>, vector<2x8x8x128xbf16>
    %95 = vector.shape_cast %94 : vector<2x8x8x128xbf16> to vector<128x128xbf16>
    %c0_159 = arith.constant 0 : index
    %c384_160 = arith.constant 384 : index
    %96 = vector.load %arg14[%c0_159, %c384_160] : memref<128x1152xbf16, #tpu.memory_space<vmem>>, vector<128x128xbf16>
    tpu.vector_store %arg14[%c0_159, %c384_160], %95 {strides = array<i32>} : memref<128x1152xbf16, #tpu.memory_space<vmem>>, vector<128x128xbf16>,
    %c0_161 = arith.constant 0 : index
    %c6_162 = arith.constant 6 : index
    %c6_163 = arith.constant 6 : index
    %c0_164 = arith.constant 0 : index
    %97 = vector.load %arg12[%c0_161, %c6_162, %c6_163, %c0_164] : memref<2x20x20x128xbf16, #tpu.memory_space<vmem>>, vector<2x8x8x128xbf16>
    %98 = vector.shape_cast %97 : vector<2x8x8x128xbf16> to vector<128x128xbf16>
    %c0_165 = arith.constant 0 : index
    %c512_166 = arith.constant 512 : index
    %99 = vector.load %arg14[%c0_165, %c512_166] : memref<128x1152xbf16, #tpu.memory_space<vmem>>, vector<128x128xbf16>
    tpu.vector_store %arg14[%c0_165, %c512_166], %98 {strides = array<i32>} : memref<128x1152xbf16, #tpu.memory_space<vmem>>, vector<128x128xbf16>,
    %c0_167 = arith.constant 0 : index
    %c6_168 = arith.constant 6 : index
    %c12_169 = arith.constant 12 : index
    %c0_170 = arith.constant 0 : index
    %100 = vector.load %arg12[%c0_167, %c6_168, %c12_169, %c0_170] : memref<2x20x20x128xbf16, #tpu.memory_space<vmem>>, vector<2x8x8x128xbf16>
    %101 = vector.shape_cast %100 : vector<2x8x8x128xbf16> to vector<128x128xbf16>
    %c0_171 = arith.constant 0 : index
    %c640_172 = arith.constant 640 : index
    %102 = vector.load %arg14[%c0_171, %c640_172] : memref<128x1152xbf16, #tpu.memory_space<vmem>>, vector<128x128xbf16>
    tpu.vector_store %arg14[%c0_171, %c640_172], %101 {strides = array<i32>} : memref<128x1152xbf16, #tpu.memory_space<vmem>>, vector<128x128xbf16>,
    %c0_173 = arith.constant 0 : index
    %c12_174 = arith.constant 12 : index
    %c0_175 = arith.constant 0 : index
    %c0_176 = arith.constant 0 : index
    %103 = vector.load %arg12[%c0_173, %c12_174, %c0_175, %c0_176] : memref<2x20x20x128xbf16, #tpu.memory_space<vmem>>, vector<2x8x8x128xbf16>
    %104 = vector.shape_cast %103 : vector<2x8x8x128xbf16> to vector<128x128xbf16>
    %c0_177 = arith.constant 0 : index
    %c768_178 = arith.constant 768 : index
    %105 = vector.load %arg14[%c0_177, %c768_178] : memref<128x1152xbf16, #tpu.memory_space<vmem>>, vector<128x128xbf16>
    tpu.vector_store %arg14[%c0_177, %c768_178], %104 {strides = array<i32>} : memref<128x1152xbf16, #tpu.memory_space<vmem>>, vector<128x128xbf16>,
    %c0_179 = arith.constant 0 : index
    %c12_180 = arith.constant 12 : index
    %c6_181 = arith.constant 6 : index
    %c0_182 = arith.constant 0 : index
    %106 = vector.load %arg12[%c0_179, %c12_180, %c6_181, %c0_182] : memref<2x20x20x128xbf16, #tpu.memory_space<vmem>>, vector<2x8x8x128xbf16>
    %107 = vector.shape_cast %106 : vector<2x8x8x128xbf16> to vector<128x128xbf16>
    %c0_183 = arith.constant 0 : index
    %c896_184 = arith.constant 896 : index
    %108 = vector.load %arg14[%c0_183, %c896_184] : memref<128x1152xbf16, #tpu.memory_space<vmem>>, vector<128x128xbf16>
    tpu.vector_store %arg14[%c0_183, %c896_184], %107 {strides = array<i32>} : memref<128x1152xbf16, #tpu.memory_space<vmem>>, vector<128x128xbf16>,
    %c0_185 = arith.constant 0 : index
    %c12_186 = arith.constant 12 : index
    %c12_187 = arith.constant 12 : index
    %c0_188 = arith.constant 0 : index
    %109 = vector.load %arg12[%c0_185, %c12_186, %c12_187, %c0_188] : memref<2x20x20x128xbf16, #tpu.memory_space<vmem>>, vector<2x8x8x128xbf16>
    %110 = vector.shape_cast %109 : vector<2x8x8x128xbf16> to vector<128x128xbf16>
    %c0_189 = arith.constant 0 : index
    %c1024_190 = arith.constant 1024 : index
    %111 = vector.load %arg14[%c0_189, %c1024_190] : memref<128x1152xbf16, #tpu.memory_space<vmem>>, vector<128x128xbf16>
    tpu.vector_store %arg14[%c0_189, %c1024_190], %110 {strides = array<i32>} : memref<128x1152xbf16, #tpu.memory_space<vmem>>, vector<128x128xbf16>,
    %c0_191 = arith.constant 0 : index
    %c0_192 = arith.constant 0 : index
    %112 = vector.load %arg14[%c0_191, %c0_192] : memref<128x1152xbf16, #tpu.memory_space<vmem>>, vector<128x1152xbf16>
    %c0_193 = arith.constant 0 : index
    %c2_194 = arith.constant 2 : index
    %c0_195 = arith.constant 0 : index
    %c0_196 = arith.constant 0 : index
    %113 = vector.load %arg3[%c0_193, %c2_194, %c0_195, %c0_196] : memref<1x3x1152x128xbf16, #tpu.memory_space<vmem>>, vector<1x1x1152x128xbf16>
    %114 = vector.shape_cast %113 : vector<1x1x1152x128xbf16> to vector<1152x128xbf16>
    %cst_197 = arith.constant dense<0.000000e+00> : vector<128x128xf32>
    %115 = tpu.matmul %112, %114, %cst_197 {dimension_numbers = #tpu.dot_dimension_numbers<[1], [0], [0], [1], [0, 0, 1, 1], [], []>} : vector<128x1152xbf16>, vector<1152x128xbf16>, vector<128x128xf32> -> vector<128x128xf32>
    %cst_198 = arith.constant 0.000000e+00 : f32
    %116 = vector.broadcast %cst_198 : f32 to vector<128x128xf32>
    %117 = arith.maximumf %115, %116 : vector<128x128xf32>
    %118 = arith.truncf %117 : vector<128x128xf32> to vector<128x128xbf16>
    %c0_199 = arith.constant 0 : index
    %c384_200 = arith.constant 384 : index
    %119 = vector.load %arg15[%c0_199, %c384_200] : memref<128x512xbf16, #tpu.memory_space<vmem>>, vector<128x128xbf16>
    tpu.vector_store %arg15[%c0_199, %c384_200], %118 {strides = array<i32>} : memref<128x512xbf16, #tpu.memory_space<vmem>>, vector<128x128xbf16>,
    %c0_201 = arith.constant 0 : index
    %c0_202 = arith.constant 0 : index
    %120 = vector.load %arg15[%c0_201, %c0_202] : memref<128x512xbf16, #tpu.memory_space<vmem>>, vector<128x512xbf16>
    %c0_203 = arith.constant 0 : index
    %c0_204 = arith.constant 0 : index
    %c0_205 = arith.constant 0 : index
    %121 = vector.load %arg5[%c0_203, %c0_204, %c0_205] : memref<1x512x128xbf16, #tpu.memory_space<vmem>>, vector<1x512x128xbf16>
    %122 = vector.shape_cast %121 : vector<1x512x128xbf16> to vector<512x128xbf16>
    %cst_206 = arith.constant dense<0.000000e+00> : vector<128x128xf32>
    %123 = tpu.matmul %120, %122, %cst_206 {dimension_numbers = #tpu.dot_dimension_numbers<[1], [0], [0], [1], [0, 0, 1, 1], [], []>} : vector<128x512xbf16>, vector<512x128xbf16>, vector<128x128xf32> -> vector<128x128xf32>
    %cst_207 = arith.constant 0.000000e+00 : f32
    %124 = vector.broadcast %cst_207 : f32 to vector<2x10x10x128xf32>
    %c0_208 = arith.constant 0 : index
    %c0_209 = arith.constant 0 : index
    %c0_210 = arith.constant 0 : index
    %c0_211 = arith.constant 0 : index
    %125 = vector.load %arg13[%c0_208, %c0_209, %c0_210, %c0_211] : memref<2x10x10x128xf32, #tpu.memory_space<vmem>>, vector<2x10x10x128xf32>
    tpu.vector_store %arg13[%c0_208, %c0_209, %c0_210, %c0_211], %124 {strides = array<i32>} : memref<2x10x10x128xf32, #tpu.memory_space<vmem>>, vector<2x10x10x128xf32>,
    %c0_212 = arith.constant 0 : index
    %c0_213 = arith.constant 0 : index
    %c0_214 = arith.constant 0 : index
    %c0_215 = arith.constant 0 : index
    %c0_216 = arith.constant 0 : index
    %126 = vector.load %arg1[%c0_212, %c0_213, %c0_214, %c0_215, %c0_216] : memref<1x2x8x8x128xbf16, #tpu.memory_space<vmem>>, vector<1x1x8x8x128xbf16>
    %127 = vector.shape_cast %126 : vector<1x1x8x8x128xbf16> to vector<8x8x128xbf16>
    %128 = arith.extf %127 : vector<8x8x128xbf16> to vector<8x8x128xf32>
    %129 = vector.shape_cast %128 : vector<8x8x128xf32> to vector<64x128xf32>
    %cst_217 = arith.constant dense<0.000000e+00> : vector<128xf32>
    %130 = vector.multi_reduction <add>, %129, %cst_217 [0] : vector<64x128xf32> to vector<128xf32>
    %131 = vector.shape_cast %130 : vector<128xf32> to vector<1x128xf32>
    %cst_218 = arith.constant 6.400000e+01 : f32
    %132 = vector.broadcast %cst_218 : f32 to vector<1x128xf32>
    %133 = arith.divf %131, %132 : vector<1x128xf32>
    %134 = arith.truncf %133 : vector<1x128xf32> to vector<1x128xbf16>
    %c0_219 = arith.constant 0 : index
    %c0_220 = arith.constant 0 : index
    %c0_221 = arith.constant 0 : index
    %135 = vector.load %arg4[%c0_219, %c0_220, %c0_221] : memref<1x128x128xbf16, #tpu.memory_space<vmem>>, vector<1x128x128xbf16>
    %136 = vector.shape_cast %135 : vector<1x128x128xbf16> to vector<128x128xbf16>
    %cst_222 = arith.constant dense<0.000000e+00> : vector<1x128xf32>
    %137 = tpu.matmul %134, %136, %cst_222 {dimension_numbers = #tpu.dot_dimension_numbers<[1], [0], [0], [1], [0, 0, 1, 1], [], []>} : vector<1x128xbf16>, vector<128x128xbf16>, vector<1x128xf32> -> vector<1x128xf32>
    %cst_223 = arith.constant 0.000000e+00 : f32
    %138 = vector.broadcast %cst_223 : f32 to vector<1x128xf32>
    %139 = arith.maximumf %137, %138 : vector<1x128xf32>
    %140 = arith.truncf %139 : vector<1x128xf32> to vector<1x128xbf16>
    %c0_224 = arith.constant 0 : index
    %c0_225 = arith.constant 0 : index
    %c0_226 = arith.constant 0 : index
    %141 = vector.load %arg6[%c0_224, %c0_225, %c0_226] : memref<1x128x128xbf16, #tpu.memory_space<vmem>>, vector<1x128x128xbf16>
    %142 = vector.shape_cast %141 : vector<1x128x128xbf16> to vector<128x128xbf16>
    %cst_227 = arith.constant dense<0.000000e+00> : vector<1x128xf32>
    %143 = tpu.matmul %140, %142, %cst_227 {dimension_numbers = #tpu.dot_dimension_numbers<[1], [0], [0], [1], [0, 0, 1, 1], [], []>} : vector<1x128xbf16>, vector<128x128xbf16>, vector<1x128xf32> -> vector<1x128xf32>
    %144 = vector.extract_strided_slice %123 {offsets = [0, 0], sizes = [64, 128], strides = [1, 1]} : vector<128x128xf32> to vector<64x128xf32>
    %145 = vector.broadcast %143 : vector<1x128xf32> to vector<64x128xf32>
    %146 = arith.addf %144, %145 : vector<64x128xf32>
    %cst_228 = arith.constant 0.000000e+00 : f32
    %147 = vector.broadcast %cst_228 : f32 to vector<64x128xf32>
    %148 = arith.maximumf %146, %147 : vector<64x128xf32>
    %149 = vector.shape_cast %148 : vector<64x128xf32> to vector<8x8x128xf32>
    %c0_229 = arith.constant 0 : index
    %c1_230 = arith.constant 1 : index
    %c1_231 = arith.constant 1 : index
    %c0_232 = arith.constant 0 : index
    %150 = vector.load %arg13[%c0_229, %c1_230, %c1_231, %c0_232] : memref<2x10x10x128xf32, #tpu.memory_space<vmem>>, vector<1x8x8x128xf32>
    %151 = vector.shape_cast %150 : vector<1x8x8x128xf32> to vector<8x8x128xf32>
    %152 = vector.shape_cast %149 : vector<8x8x128xf32> to vector<1x8x8x128xf32>
    tpu.vector_store %arg13[%c0_229, %c1_230, %c1_231, %c0_232], %152 {strides = array<i32>} : memref<2x10x10x128xf32, #tpu.memory_space<vmem>>, vector<1x8x8x128xf32>,
    %c0_233 = arith.constant 0 : index
    %c1_234 = arith.constant 1 : index
    %c0_235 = arith.constant 0 : index
    %c0_236 = arith.constant 0 : index
    %c0_237 = arith.constant 0 : index
    %153 = vector.load %arg1[%c0_233, %c1_234, %c0_235, %c0_236, %c0_237] : memref<1x2x8x8x128xbf16, #tpu.memory_space<vmem>>, vector<1x1x8x8x128xbf16>
    %154 = vector.shape_cast %153 : vector<1x1x8x8x128xbf16> to vector<8x8x128xbf16>
    %155 = arith.extf %154 : vector<8x8x128xbf16> to vector<8x8x128xf32>
    %156 = vector.shape_cast %155 : vector<8x8x128xf32> to vector<64x128xf32>
    %cst_238 = arith.constant dense<0.000000e+00> : vector<128xf32>
    %157 = vector.multi_reduction <add>, %156, %cst_238 [0] : vector<64x128xf32> to vector<128xf32>
    %158 = vector.shape_cast %157 : vector<128xf32> to vector<1x128xf32>
    %cst_239 = arith.constant 6.400000e+01 : f32
    %159 = vector.broadcast %cst_239 : f32 to vector<1x128xf32>
    %160 = arith.divf %158, %159 : vector<1x128xf32>
    %161 = arith.truncf %160 : vector<1x128xf32> to vector<1x128xbf16>
    %c0_240 = arith.constant 0 : index
    %c0_241 = arith.constant 0 : index
    %c0_242 = arith.constant 0 : index
    %162 = vector.load %arg4[%c0_240, %c0_241, %c0_242] : memref<1x128x128xbf16, #tpu.memory_space<vmem>>, vector<1x128x128xbf16>
    %163 = vector.shape_cast %162 : vector<1x128x128xbf16> to vector<128x128xbf16>
    %cst_243 = arith.constant dense<0.000000e+00> : vector<1x128xf32>
    %164 = tpu.matmul %161, %163, %cst_243 {dimension_numbers = #tpu.dot_dimension_numbers<[1], [0], [0], [1], [0, 0, 1, 1], [], []>} : vector<1x128xbf16>, vector<128x128xbf16>, vector<1x128xf32> -> vector<1x128xf32>
    %cst_244 = arith.constant 0.000000e+00 : f32
    %165 = vector.broadcast %cst_244 : f32 to vector<1x128xf32>
    %166 = arith.maximumf %164, %165 : vector<1x128xf32>
    %167 = arith.truncf %166 : vector<1x128xf32> to vector<1x128xbf16>
    %c0_245 = arith.constant 0 : index
    %c0_246 = arith.constant 0 : index
    %c0_247 = arith.constant 0 : index
    %168 = vector.load %arg6[%c0_245, %c0_246, %c0_247] : memref<1x128x128xbf16, #tpu.memory_space<vmem>>, vector<1x128x128xbf16>
    %169 = vector.shape_cast %168 : vector<1x128x128xbf16> to vector<128x128xbf16>
    %cst_248 = arith.constant dense<0.000000e+00> : vector<1x128xf32>
    %170 = tpu.matmul %167, %169, %cst_248 {dimension_numbers = #tpu.dot_dimension_numbers<[1], [0], [0], [1], [0, 0, 1, 1], [], []>} : vector<1x128xbf16>, vector<128x128xbf16>, vector<1x128xf32> -> vector<1x128xf32>
    %171 = vector.extract_strided_slice %123 {offsets = [64, 0], sizes = [64, 128], strides = [1, 1]} : vector<128x128xf32> to vector<64x128xf32>
    %172 = vector.broadcast %170 : vector<1x128xf32> to vector<64x128xf32>
    %173 = arith.addf %171, %172 : vector<64x128xf32>
    %cst_249 = arith.constant 0.000000e+00 : f32
    %174 = vector.broadcast %cst_249 : f32 to vector<64x128xf32>
    %175 = arith.maximumf %173, %174 : vector<64x128xf32>
    %176 = vector.shape_cast %175 : vector<64x128xf32> to vector<8x8x128xf32>
    %c1_250 = arith.constant 1 : index
    %c1_251 = arith.constant 1 : index
    %c1_252 = arith.constant 1 : index
    %c0_253 = arith.constant 0 : index
    %177 = vector.load %arg13[%c1_250, %c1_251, %c1_252, %c0_253] : memref<2x10x10x128xf32, #tpu.memory_space<vmem>>, vector<1x8x8x128xf32>
    %178 = vector.shape_cast %177 : vector<1x8x8x128xf32> to vector<8x8x128xf32>
    %179 = vector.shape_cast %176 : vector<8x8x128xf32> to vector<1x8x8x128xf32>
    tpu.vector_store %arg13[%c1_250, %c1_251, %c1_252, %c0_253], %179 {strides = array<i32>} : memref<2x10x10x128xf32, #tpu.memory_space<vmem>>, vector<1x8x8x128xf32>,
    %c0_254 = arith.constant 0 : index
    %c0_255 = arith.constant 0 : index
    %c0_256 = arith.constant 0 : index
    %c0_257 = arith.constant 0 : index
    %180 = vector.load %arg13[%c0_254, %c0_255, %c0_256, %c0_257] : memref<2x10x10x128xf32, #tpu.memory_space<vmem>>, vector<2x8x8x128xf32>
    %181 = vector.shape_cast %180 : vector<2x8x8x128xf32> to vector<128x128xf32>
    %182 = arith.truncf %181 : vector<128x128xf32> to vector<128x128xbf16>
    %c0_258 = arith.constant 0 : index
    %c0_259 = arith.constant 0 : index
    %183 = vector.load %arg14[%c0_258, %c0_259] : memref<128x1152xbf16, #tpu.memory_space<vmem>>, vector<128x128xbf16>
    tpu.vector_store %arg14[%c0_258, %c0_259], %182 {strides = array<i32>} : memref<128x1152xbf16, #tpu.memory_space<vmem>>, vector<128x128xbf16>,
    %c0_260 = arith.constant 0 : index
    %c0_261 = arith.constant 0 : index
    %c1_262 = arith.constant 1 : index
    %c0_263 = arith.constant 0 : index
    %184 = vector.load %arg13[%c0_260, %c0_261, %c1_262, %c0_263] : memref<2x10x10x128xf32, #tpu.memory_space<vmem>>, vector<2x8x8x128xf32>
    %185 = vector.shape_cast %184 : vector<2x8x8x128xf32> to vector<128x128xf32>
    %186 = arith.truncf %185 : vector<128x128xf32> to vector<128x128xbf16>
    %c0_264 = arith.constant 0 : index
    %c128_265 = arith.constant 128 : index
    %187 = vector.load %arg14[%c0_264, %c128_265] : memref<128x1152xbf16, #tpu.memory_space<vmem>>, vector<128x128xbf16>
    tpu.vector_store %arg14[%c0_264, %c128_265], %186 {strides = array<i32>} : memref<128x1152xbf16, #tpu.memory_space<vmem>>, vector<128x128xbf16>,
    %c0_266 = arith.constant 0 : index
    %c0_267 = arith.constant 0 : index
    %c2_268 = arith.constant 2 : index
    %c0_269 = arith.constant 0 : index
    %188 = vector.load %arg13[%c0_266, %c0_267, %c2_268, %c0_269] : memref<2x10x10x128xf32, #tpu.memory_space<vmem>>, vector<2x8x8x128xf32>
    %189 = vector.shape_cast %188 : vector<2x8x8x128xf32> to vector<128x128xf32>
    %190 = arith.truncf %189 : vector<128x128xf32> to vector<128x128xbf16>
    %c0_270 = arith.constant 0 : index
    %c256_271 = arith.constant 256 : index
    %191 = vector.load %arg14[%c0_270, %c256_271] : memref<128x1152xbf16, #tpu.memory_space<vmem>>, vector<128x128xbf16>
    tpu.vector_store %arg14[%c0_270, %c256_271], %190 {strides = array<i32>} : memref<128x1152xbf16, #tpu.memory_space<vmem>>, vector<128x128xbf16>,
    %c0_272 = arith.constant 0 : index
    %c1_273 = arith.constant 1 : index
    %c0_274 = arith.constant 0 : index
    %c0_275 = arith.constant 0 : index
    %192 = vector.load %arg13[%c0_272, %c1_273, %c0_274, %c0_275] : memref<2x10x10x128xf32, #tpu.memory_space<vmem>>, vector<2x8x8x128xf32>
    %193 = vector.shape_cast %192 : vector<2x8x8x128xf32> to vector<128x128xf32>
    %194 = arith.truncf %193 : vector<128x128xf32> to vector<128x128xbf16>
    %c0_276 = arith.constant 0 : index
    %c384_277 = arith.constant 384 : index
    %195 = vector.load %arg14[%c0_276, %c384_277] : memref<128x1152xbf16, #tpu.memory_space<vmem>>, vector<128x128xbf16>
    tpu.vector_store %arg14[%c0_276, %c384_277], %194 {strides = array<i32>} : memref<128x1152xbf16, #tpu.memory_space<vmem>>, vector<128x128xbf16>,
    %c0_278 = arith.constant 0 : index
    %c1_279 = arith.constant 1 : index
    %c1_280 = arith.constant 1 : index
    %c0_281 = arith.constant 0 : index
    %196 = vector.load %arg13[%c0_278, %c1_279, %c1_280, %c0_281] : memref<2x10x10x128xf32, #tpu.memory_space<vmem>>, vector<2x8x8x128xf32>
    %197 = vector.shape_cast %196 : vector<2x8x8x128xf32> to vector<128x128xf32>
    %198 = arith.truncf %197 : vector<128x128xf32> to vector<128x128xbf16>
    %c0_282 = arith.constant 0 : index
    %c512_283 = arith.constant 512 : index
    %199 = vector.load %arg14[%c0_282, %c512_283] : memref<128x1152xbf16, #tpu.memory_space<vmem>>, vector<128x128xbf16>
    tpu.vector_store %arg14[%c0_282, %c512_283], %198 {strides = array<i32>} : memref<128x1152xbf16, #tpu.memory_space<vmem>>, vector<128x128xbf16>,
    %c0_284 = arith.constant 0 : index
    %c1_285 = arith.constant 1 : index
    %c2_286 = arith.constant 2 : index
    %c0_287 = arith.constant 0 : index
    %200 = vector.load %arg13[%c0_284, %c1_285, %c2_286, %c0_287] : memref<2x10x10x128xf32, #tpu.memory_space<vmem>>, vector<2x8x8x128xf32>
    %201 = vector.shape_cast %200 : vector<2x8x8x128xf32> to vector<128x128xf32>
    %202 = arith.truncf %201 : vector<128x128xf32> to vector<128x128xbf16>
    %c0_288 = arith.constant 0 : index
    %c640_289 = arith.constant 640 : index
    %203 = vector.load %arg14[%c0_288, %c640_289] : memref<128x1152xbf16, #tpu.memory_space<vmem>>, vector<128x128xbf16>
    tpu.vector_store %arg14[%c0_288, %c640_289], %202 {strides = array<i32>} : memref<128x1152xbf16, #tpu.memory_space<vmem>>, vector<128x128xbf16>,
    %c0_290 = arith.constant 0 : index
    %c2_291 = arith.constant 2 : index
    %c0_292 = arith.constant 0 : index
    %c0_293 = arith.constant 0 : index
    %204 = vector.load %arg13[%c0_290, %c2_291, %c0_292, %c0_293] : memref<2x10x10x128xf32, #tpu.memory_space<vmem>>, vector<2x8x8x128xf32>
    %205 = vector.shape_cast %204 : vector<2x8x8x128xf32> to vector<128x128xf32>
    %206 = arith.truncf %205 : vector<128x128xf32> to vector<128x128xbf16>
    %c0_294 = arith.constant 0 : index
    %c768_295 = arith.constant 768 : index
    %207 = vector.load %arg14[%c0_294, %c768_295] : memref<128x1152xbf16, #tpu.memory_space<vmem>>, vector<128x128xbf16>
    tpu.vector_store %arg14[%c0_294, %c768_295], %206 {strides = array<i32>} : memref<128x1152xbf16, #tpu.memory_space<vmem>>, vector<128x128xbf16>,
    %c0_296 = arith.constant 0 : index
    %c2_297 = arith.constant 2 : index
    %c1_298 = arith.constant 1 : index
    %c0_299 = arith.constant 0 : index
    %208 = vector.load %arg13[%c0_296, %c2_297, %c1_298, %c0_299] : memref<2x10x10x128xf32, #tpu.memory_space<vmem>>, vector<2x8x8x128xf32>
    %209 = vector.shape_cast %208 : vector<2x8x8x128xf32> to vector<128x128xf32>
    %210 = arith.truncf %209 : vector<128x128xf32> to vector<128x128xbf16>
    %c0_300 = arith.constant 0 : index
    %c896_301 = arith.constant 896 : index
    %211 = vector.load %arg14[%c0_300, %c896_301] : memref<128x1152xbf16, #tpu.memory_space<vmem>>, vector<128x128xbf16>
    tpu.vector_store %arg14[%c0_300, %c896_301], %210 {strides = array<i32>} : memref<128x1152xbf16, #tpu.memory_space<vmem>>, vector<128x128xbf16>,
    %c0_302 = arith.constant 0 : index
    %c2_303 = arith.constant 2 : index
    %c2_304 = arith.constant 2 : index
    %c0_305 = arith.constant 0 : index
    %212 = vector.load %arg13[%c0_302, %c2_303, %c2_304, %c0_305] : memref<2x10x10x128xf32, #tpu.memory_space<vmem>>, vector<2x8x8x128xf32>
    %213 = vector.shape_cast %212 : vector<2x8x8x128xf32> to vector<128x128xf32>
    %214 = arith.truncf %213 : vector<128x128xf32> to vector<128x128xbf16>
    %c0_306 = arith.constant 0 : index
    %c1024_307 = arith.constant 1024 : index
    %215 = vector.load %arg14[%c0_306, %c1024_307] : memref<128x1152xbf16, #tpu.memory_space<vmem>>, vector<128x128xbf16>
    tpu.vector_store %arg14[%c0_306, %c1024_307], %214 {strides = array<i32>} : memref<128x1152xbf16, #tpu.memory_space<vmem>>, vector<128x128xbf16>,
    %c0_308 = arith.constant 0 : index
    %c0_309 = arith.constant 0 : index
    %216 = vector.load %arg14[%c0_308, %c0_309] : memref<128x1152xbf16, #tpu.memory_space<vmem>>, vector<128x1152xbf16>
    %c0_310 = arith.constant 0 : index
    %c0_311 = arith.constant 0 : index
    %c0_312 = arith.constant 0 : index
    %217 = vector.load %arg7[%c0_310, %c0_311, %c0_312] : memref<1x1152x128xbf16, #tpu.memory_space<vmem>>, vector<1x1152x128xbf16>
    %218 = vector.shape_cast %217 : vector<1x1152x128xbf16> to vector<1152x128xbf16>
    %cst_313 = arith.constant dense<0.000000e+00> : vector<128x128xf32>
    %219 = tpu.matmul %216, %218, %cst_313 {dimension_numbers = #tpu.dot_dimension_numbers<[1], [0], [0], [1], [0, 0, 1, 1], [], []>} : vector<128x1152xbf16>, vector<1152x128xbf16>, vector<128x128xf32> -> vector<128x128xf32>
    %cst_314 = arith.constant 0.000000e+00 : f32
    %220 = vector.broadcast %cst_314 : f32 to vector<128x128xf32>
    %221 = arith.maximumf %219, %220 : vector<128x128xf32>
    %222 = arith.truncf %221 : vector<128x128xf32> to vector<128x128xbf16>
    %c0_315 = arith.constant 0 : index
    %c0_316 = arith.constant 0 : index
    %c0_317 = arith.constant 0 : index
    %223 = vector.load %arg8[%c0_315, %c0_316, %c0_317] : memref<1x128x128xbf16, #tpu.memory_space<vmem>>, vector<1x128x128xbf16>
    %224 = vector.shape_cast %223 : vector<1x128x128xbf16> to vector<128x128xbf16>
    %cst_318 = arith.constant dense<0.000000e+00> : vector<128x128xf32>
    %225 = tpu.matmul %222, %224, %cst_318 {dimension_numbers = #tpu.dot_dimension_numbers<[1], [0], [0], [1], [0, 0, 1, 1], [], []>} : vector<128x128xbf16>, vector<128x128xbf16>, vector<128x128xf32> -> vector<128x128xf32>
    %c0_319 = arith.constant 0 : index
    %c0_320 = arith.constant 0 : index
    %c0_321 = arith.constant 0 : index
    %226 = vector.load %arg9[%c0_319, %c0_320, %c0_321] : memref<1x1x128xf32, #tpu.memory_space<vmem>>, vector<1x1x128xf32>
    %227 = vector.shape_cast %226 : vector<1x1x128xf32> to vector<1x128xf32>
    %228 = vector.broadcast %227 : vector<1x128xf32> to vector<128x128xf32>
    %229 = arith.addf %225, %228 : vector<128x128xf32>
    %c0_322 = arith.constant 0 : index
    %c0_323 = arith.constant 0 : index
    %230 = vector.load %arg10[%c0_322, %c0_323] : memref<64x256xbf16, #tpu.memory_space<vmem>>, vector<64x256xbf16>
    %231 = vector.extract_strided_slice %229 {offsets = [0, 0], sizes = [64, 128], strides = [1, 1]} : vector<128x128xf32> to vector<64x128xf32>
    %232 = arith.truncf %231 : vector<64x128xf32> to vector<64x128xbf16>
    %cst_324 = arith.constant dense<0.000000e+00> : vector<128x256xf32>
    %233 = tpu.matmul %232, %230, %cst_324 {dimension_numbers = #tpu.dot_dimension_numbers<[0], [0], [1], [1], [0, 1, 1, 1], [], []>} : vector<64x128xbf16>, vector<64x256xbf16>, vector<128x256xf32> -> vector<128x256xf32>
    %c0_325 = arith.constant 0 : index
    %c0_326 = arith.constant 0 : index
    %c0_327 = arith.constant 0 : index
    %c0_328 = arith.constant 0 : index
    %234 = vector.load %arg11[%c0_325, %c0_326, %c0_327, %c0_328] : memref<1x2x128x256xf32, #tpu.memory_space<vmem>>, vector<1x1x128x256xf32>
    %235 = vector.shape_cast %234 : vector<1x1x128x256xf32> to vector<128x256xf32>
    %236 = vector.shape_cast %233 : vector<128x256xf32> to vector<1x1x128x256xf32>
    tpu.vector_store %arg11[%c0_325, %c0_326, %c0_327, %c0_328], %236 {strides = array<i32>} : memref<1x2x128x256xf32, #tpu.memory_space<vmem>>, vector<1x1x128x256xf32>,
    %237 = vector.extract_strided_slice %229 {offsets = [64, 0], sizes = [64, 128], strides = [1, 1]} : vector<128x128xf32> to vector<64x128xf32>
    %238 = arith.truncf %237 : vector<64x128xf32> to vector<64x128xbf16>
    %cst_329 = arith.constant dense<0.000000e+00> : vector<128x256xf32>
    %239 = tpu.matmul %238, %230, %cst_329 {dimension_numbers = #tpu.dot_dimension_numbers<[0], [0], [1], [1], [0, 1, 1, 1], [], []>} : vector<64x128xbf16>, vector<64x256xbf16>, vector<128x256xf32> -> vector<128x256xf32>
    %c0_330 = arith.constant 0 : index
    %c1_331 = arith.constant 1 : index
    %c0_332 = arith.constant 0 : index
    %c0_333 = arith.constant 0 : index
    %240 = vector.load %arg11[%c0_330, %c1_331, %c0_332, %c0_333] : memref<1x2x128x256xf32, #tpu.memory_space<vmem>>, vector<1x1x128x256xf32>
    %241 = vector.shape_cast %240 : vector<1x1x128x256xf32> to vector<128x256xf32>
    %242 = vector.shape_cast %239 : vector<128x256xf32> to vector<1x1x128x256xf32>
    tpu.vector_store %arg11[%c0_330, %c1_331, %c0_332, %c0_333], %242 {strides = array<i32>} : memref<1x2x128x256xf32, #tpu.memory_space<vmem>>, vector<1x1x128x256xf32>,
    return
  }
  func.func @transform_0(%arg0: i32) -> (i32, i32, i32, i32, i32) {
    %c0_i32 = arith.constant 0 : i32
    %c0_i32_0 = arith.constant 0 : i32
    %c0_i32_1 = arith.constant 0 : i32
    %c0_i32_2 = arith.constant 0 : i32
    %c0_i32_3 = arith.constant 0 : i32
    return %arg0, %c0_i32, %c0_i32_0, %c0_i32_1, %c0_i32_2 : i32, i32, i32, i32, i32
  }
  func.func @transform_1(%arg0: i32) -> (i32, i32, i32) {
    %c0_i32 = arith.constant 0 : i32
    %c0_i32_0 = arith.constant 0 : i32
    %c0_i32_1 = arith.constant 0 : i32
    return %arg0, %c0_i32, %c0_i32_0 : i32, i32, i32
  }
  func.func @transform_2(%arg0: i32) -> (i32, i32, i32, i32) {
    %c0_i32 = arith.constant 0 : i32
    %c0_i32_0 = arith.constant 0 : i32
    %c0_i32_1 = arith.constant 0 : i32
    %c0_i32_2 = arith.constant 0 : i32
    return %arg0, %c0_i32, %c0_i32_0, %c0_i32_1 : i32, i32, i32, i32
  }
  func.func @transform_3(%arg0: i32) -> (i32, i32, i32) {
    %c0_i32 = arith.constant 0 : i32
    %c0_i32_0 = arith.constant 0 : i32
    %c0_i32_1 = arith.constant 0 : i32
    return %arg0, %c0_i32, %c0_i32_0 : i32, i32, i32
  }
  func.func @transform_4(%arg0: i32) -> (i32, i32, i32) {
    %c0_i32 = arith.constant 0 : i32
    %c0_i32_0 = arith.constant 0 : i32
    %c0_i32_1 = arith.constant 0 : i32
    return %arg0, %c0_i32, %c0_i32_0 : i32, i32, i32
  }
  func.func @transform_5(%arg0: i32) -> (i32, i32, i32) {
    %c0_i32 = arith.constant 0 : i32
    %c0_i32_0 = arith.constant 0 : i32
    %c0_i32_1 = arith.constant 0 : i32
    return %arg0, %c0_i32, %c0_i32_0 : i32, i32, i32
  }
  func.func @transform_6(%arg0: i32) -> (i32, i32, i32) {
    %c0_i32 = arith.constant 0 : i32
    %c0_i32_0 = arith.constant 0 : i32
    %c0_i32_1 = arith.constant 0 : i32
    return %arg0, %c0_i32, %c0_i32_0 : i32, i32, i32
  }
  func.func @transform_7(%arg0: i32) -> (i32, i32, i32) {
    %c0_i32 = arith.constant 0 : i32
    %c0_i32_0 = arith.constant 0 : i32
    %c0_i32_1 = arith.constant 0 : i32
    return %arg0, %c0_i32, %c0_i32_0 : i32, i32, i32
  }
  func.func @transform_8(%arg0: i32) -> (i32, i32, i32) {
    %c0_i32 = arith.constant 0 : i32
    %c0_i32_0 = arith.constant 0 : i32
    %c0_i32_1 = arith.constant 0 : i32
    return %arg0, %c0_i32, %c0_i32_0 : i32, i32, i32
  }
  func.func @transform_9(%arg0: i32) -> (i32, i32) {
    %c0_i32 = arith.constant 0 : i32
    %c0_i32_0 = arith.constant 0 : i32
    %c0_i32_1 = arith.constant 0 : i32
    return %c0_i32, %c0_i32_0 : i32, i32
  }
  func.func @transform_10(%arg0: i32) -> (i32, i32, i32, i32) {
    %c0_i32 = arith.constant 0 : i32
    %c0_i32_0 = arith.constant 0 : i32
    %c0_i32_1 = arith.constant 0 : i32
    %c0_i32_2 = arith.constant 0 : i32
    return %arg0, %c0_i32, %c0_i32_0, %c0_i32_1 : i32, i32, i32, i32
  }
}

</mosaic_0001>

<bundles_post_ra>
// kernel: _lambda_.2
= control target key start
LH: loop header
LB: loop body
LE: loop exit
PB: predicated region body
PF: predicated region fallthrough
CT: control target
= control target key end

     0   :  { %s3699_s15 = smov 0   ;;  %s3701_s16 = smov 0   ;;  %s4432_s0 = inlined_call_operand.vmem [shape: bf16[2,64,27], index: 0, kind: input, shape index: {}]   ;;  %s4433_s1 = inlined_call_operand.vmem [shape: bf16[27,128], index: 1, kind: input, shape index: {}]   ;;  %s4434_s2 = inlined_call_operand.vmem [shape: bf16[1152,128], index: 2, kind: input, shape index: {}]   ;;  %s4435_s3 = inlined_call_operand.vmem [shape: bf16[1152,128], index: 3, kind: input, shape index: {}]   ;;  %s4436_s4 = inlined_call_operand.vmem [shape: bf16[3,2,8,8,128], index: 4, kind: output, shape index: {}]  }
   0x1   :  { %s3703_s17 = smov 0  }
   0x2 LB: > { %s3712_s18 = sadd.s32 4294967295, %s3670_s17   ;;  %s3714_s19 = sadd.s32 1, %s3670_s17   ;;  %s3670_s17 = sphi %s3703_s17, %s4440_s17   ;;  %s3666_s16 = sphi %s3701_s16, %s4439_s16   ;;  %s3662_s15 = sphi %s3699_s15, %s4438_s15  }
   0x3   : > { %s107_s20 = ssub.s32 %s3670_s17, %s3714_s19  ;;  %s110_s21 = sadd.s32 1, %s3666_s16 }
   0x4   : > { %p108_p0 = scmp.eq.s32.totalorder %s107_s20, 0  ;;  %p120_p1 = scmp.ne.s32.totalorder %s3666_s16, %s3662_s15 }
   0x5   : > { %p121_p2 = scmp.eq.s32.totalorder %s3712_s18, 1  ;;  %p2810_p3 = scmp.ge.s32.totalorder %s3670_s17, 1 }
   0x6   : > { %s3722_s22 = scalar_select %p108_p0, %s3666_s16, %s110_s21  }
   0x7   : > { %p3724_p4 = por %p121_p2, %p120_p1  ;;  %p162_p5 = scmp.lt.s32.totalorder %s3670_s17, 3 }
   0x9   : > { %p163_p6 = pnand %p2810_p3, %p162_p5 }
   0xa   : > { %v3497_v0 = vld [vmem:[%s4433_s1] sm:$0xff] (!%p163_p6)   ;;  %vm249_vm0 = vcmask (!%p163_p6), 1044480   ;;  %v3498_v1 = vld [vmem:[%s4433_s1 + $0x8] sm:$0x3f] (!%p163_p6)   ;;  %vm250_vm1 = vcmask (!%p163_p6), 1045504   ;;  %p187_p7 = scmp.lt.s32.totalorder (!%p163_p6), %s3712_s18, 1 }
   0xb   : > { %166 = sbr.rel (%p163_p6) target bundleno = 843 (0x34b), region = 36  ;;  %3410 = vmatprep.subr.bf16.mxu0 (!%p163_p6), %v3497_v0  ;;  %v3672_v2 = vmov (!%p163_p6), 65535   ;;  %v3503_v4 = vld [vmem:[%s4434_s2 + $0x40] sm:$0xff] (!%p163_p6)   ;;  %v3506_v9 = vld [vmem:[%s4434_s2 + $0x48] sm:$0xff] (!%p163_p6)   ;;  %vm236_vm2 = vcmask (!%p163_p6), 220160   ;;  %v3510_v17 = vld [vmem:[%s4434_s2 + $0x50] sm:$0xff] (!%p163_p6)  }
   0xc   : > { %3411 = vmatpush3.bf16.msra.mxu0 (!%p163_p6), %v3497_v0  ;;  %v251_v3 = vsel (!%p163_p6), %vm249_vm0, 4294967295, %v3672_v2  ;;  %v3504_v6 = vld [vmem:[%s4434_s2] sm:$0xff] (!%p163_p6)   ;;  %3066 = vmatprep.subr.bf16.mxu1 (!%p163_p6), %v3503_v4  ;;  %v3508_v14 = vld [vmem:[%s4434_s2 + $0x8] sm:$0xff] (!%p163_p6)   ;;  %v3512_v19 = vld [vmem:[%s4434_s2 + $0x10] sm:$0xff] (!%p163_p6)   ;;  %v3673_v28 = vmov (!%p163_p6), 0.0   ;;  %s184_s17 = sand.u32 (!%p163_p6), 1, %s3662_s15  }
   0xd   : > { %v252_v5 = vsel (!%p163_p6), %vm250_vm1, %v251_v3, 0  ;;  %v3505_v7 = vld [vmem:[%s4434_s2 + $0xc0] sm:$0xff] (!%p163_p6)   ;;  %3067 = vmatpush3.bf16.msra.mxu1 (!%p163_p6), %v3504_v6  ;;  %v3509_v16 = vld [vmem:[%s4434_s2 + $0xc8] sm:$0xff] (!%p163_p6)   ;;  %v3513_v20 = vld [vmem:[%s4434_s2 + $0xd0] sm:$0xff] (!%p163_p6)   ;;  %351 = vst [vmem:[#allocation2 + $0x30] sm:$0xff] (!%p163_p6), %v3673_v28  ;;  %s3470_s20 = smul.u32 (!%p163_p6), 96, %s184_s17 }
   0xe   : > { %v254_v8 = vand.u32 (!%p163_p6), %v3498_v1, %v252_v5  ;;  %v3507_v10 = vld [vmem:[%s4434_s2 + $0x80] sm:$0xff] (!%p163_p6)   ;;  %3068 = vmatprep.subr.bf16.mxu1 (!%p163_p6), %v3506_v9  ;;  %v3511_v18 = vld [vmem:[%s4434_s2 + $0x88] sm:$0xff] (!%p163_p6)   ;;  %v3514_v21 = vld [vmem:[%s4434_s2 + $0x58] sm:$0xff] (!%p163_p6)   ;;  %352 = vst [vmem:[#allocation2 + $0x38] sm:$0x3] (!%p163_p6), %v3673_v28 }
   0xf   : > { %v3515_v22 = vld [vmem:[%s4434_s2 + $0x90] sm:$0xff] (!%p163_p6)   ;;  %v3516_v23 = vld [vmem:[%s4434_s2 + $0x18] sm:$0xff] (!%p163_p6)   ;;  %v3518_v25 = vld [vmem:[%s4434_s2 + $0x60] sm:$0xff] (!%p163_p6)   ;;  %345 = vst [vmem:[#allocation2] sm:$0xff] (!%p163_p6), %v3673_v28  ;;  %s3882_s15 = scalar_lea.vmem (!%p163_p6), [#allocation4], %s3470_s20 }
  0x10   : > { %3412 = vmatprep.subr.bf16.mxu0 (!%p163_p6), %v254_v8  ;;  %v3517_v24 = vld [vmem:[%s4434_s2 + $0xd8] sm:$0xff] (!%p163_p6)   ;;  %v3520_v27 = vld [vmem:[%s4434_s2 + $0x20] sm:$0xff] (!%p163_p6)   ;;  %346 = vst [vmem:[#allocation2 + $0x8] sm:$0x3] (!%p163_p6), %v3673_v28  ;;  %347 = vst [vmem:[#allocation2 + $0x10] sm:$0xff] (!%p163_p6), %v3673_v28 }
  0x11   : > { %3413 = vmatpush3.bf16.msra.mxu0 (!%p163_p6), %v254_v8  ;;  %3069 = vmatpush3.bf16.msra.mxu1 (!%p163_p6), %v3508_v14  ;;  %v3519_v26 = vld [vmem:[%s4434_s2 + $0x98] sm:$0xff] (!%p163_p6)   ;;  %348 = vst [vmem:[#allocation2 + $0x18] sm:$0x3] (!%p163_p6), %v3673_v28  ;;  %349 = vst [vmem:[#allocation2 + $0x20] sm:$0xff] (!%p163_p6), %v3673_v28  ;;  %v3521_v29 = vld [vmem:[%s4434_s2 + $0xe0] sm:$0xff] (!%p163_p6)  }
  0x12   : > { %s188_s30 = scalar_select %p187_p7, %s3712_s18, 1  ;;  %3106 = vmatprep.subr.bf16.mxu0 %v3505_v7  ;;  %3070 = vmatprep.subr.bf16.mxu1 %v3510_v17  ;;  %350 = vst [vmem:[#allocation2 + $0x28] sm:$0x3] %v3673_v28  ;;  %353 = vst [vmem:[#allocation2 + $0x40] sm:$0xff] %v3673_v28  ;;  %v3522_v30 = vld [vmem:[%s4434_s2 + $0x68] sm:$0xff]   ;;  %v3523_v31 = vld [vmem:[%s4434_s2 + $0xa0] sm:$0xff]  }
  0x13   : > { %354 = vst [vmem:[#allocation2 + $0x48] sm:$0x3] %v3673_v28  ;;  %355 = vst [vmem:[#allocation2 + $0x50] sm:$0xff] %v3673_v28  ;;  %v3524_v32 = vld [vmem:[%s4434_s2 + $0x28] sm:$0xff]   ;;  %v3526_v34 = vld [vmem:[%s4434_s2 + $0x70] sm:$0xff]   ;;  %s2988_s21 = sshll.u32 (%p3724_p4), %s3712_s18, 5 }
  0x14   : > { %s2987_s9 = sshll.u32 %s188_s30, 5  ;;  %356 = vst [vmem:[#allocation2 + $0x58] sm:$0x3] %v3673_v28  ;;  %357 = vst [vmem:[#allocation2 + $0x60] sm:$0xff] %v3673_v28  ;;  %v3525_v33 = vld [vmem:[%s4434_s2 + $0xe8] sm:$0xff]   ;;  %v3528_v36 = vld [vmem:[%s4434_s2 + $0x30] sm:$0xff]   ;;  %s2624_s26 = scalar_lea.vmem (%p3724_p4), %s4436_s4, %s2988_s21 }
  0x15   : > { %s191_s14 = scalar_lea.vmem %s4432_s0, %s2987_s9  ;;  %3071 = vmatpush3.bf16.msra.mxu1 %v3512_v19  ;;  %358 = vst [vmem:[#allocation2 + $0x68] sm:$0x3] %v3673_v28  ;;  %359 = vst [vmem:[#allocation2 + $0x70] sm:$0xff] %v3673_v28  ;;  %v3527_v35 = vld [vmem:[%s4434_s2 + $0xa8] sm:$0xff]   ;;  %v3529_v37 = vld [vmem:[%s4434_s2 + $0xf0] sm:$0xff]  }
  0x16   : > { %v3499_v11 = vld [vmem:[%s191_s14] sm:$0xff]   ;;  %v3500_v12 = vld [vmem:[%s191_s14 + $0x8] sm:$0xff]   ;;  %v3501_v13 = vld [vmem:[%s191_s14 + $0x10] sm:$0xff]   ;;  %3072 = vmatprep.subr.bf16.mxu1 %v3514_v21  ;;  %360 = vst [vmem:[#allocation2 + $0x78] sm:$0x3] %v3673_v28 }
  0x17   : > { %3414 = vmatprep.mubr.msk.bf16.mxu0 %vm236_vm2, %v3499_v11  ;;  %v3502_v15 = vld [vmem:[%s191_s14 + $0x18] sm:$0xff]   ;;  %361 = vst [vmem:[#allocation2 + $0x80] sm:$0xff] %v3673_v28  ;;  %362 = vst [vmem:[#allocation2 + $0x88] sm:$0x3] %v3673_v28  ;;  %v3531_v39 = vld [vmem:[%s4434_s2 + $0xb0] sm:$0xff]  }
  0x18   : > { %3415 = vmatmul.mubr.msk.bf16.vlgmr.msra.gmra.mrb[0].mxu0 %vm236_vm2, %v3500_v12  ;;  %363 = vst [vmem:[#allocation2 + $0x90] sm:$0xff] %v3673_v28  ;;  %364 = vst [vmem:[#allocation2 + $0x98] sm:$0x3] %v3673_v28  ;;  %v3530_v38 = vld [vmem:[%s4434_s2 + $0x78] sm:$0xff]   ;;  %v390_v41 = vld [vmem:[#allocation2 + $0x1] sm:$0xff] }
  0x19   : > { %3418 = vmatprep.mubr.msk.bf16.mxu0 %vm236_vm2, %v3501_v13  ;;  %3107 = vmatpush3.bf16.msra.mxu0 %v3507_v10  ;;  %v3532_v40 = vld [vmem:[%s4434_s2 + $0x38] sm:$0xff]   ;;  %v3856_v43 = vld [vmem:[#allocation2 + $0x2] sm:$0xff] }
  0x1a   : > { %3108 = vmatprep.subr.bf16.mxu0 %v3509_v16  ;;  %3073 = vmatpush3.bf16.msra.mxu1 %v3516_v23  ;;  %v3533_v42 = vld [vmem:[%s4434_s2 + $0xf8] sm:$0xff]   ;;  %1482 = vst [vmem:[#allocation2 + $0x8] sm:$0x3] %v3673_v28  ;;  %v3535_v45 = vld [vmem:[%s4434_s2 + $0x140] sm:$0xff]   ;;  %1481 = vst [vmem:[#allocation2] sm:$0xff] %v3673_v28 }
  0x1b   : > { %3074 = vmatprep.subr.bf16.mxu1 %v3518_v25  ;;  %v3534_v44 = vld [vmem:[%s4434_s2 + $0xb8] sm:$0xff]   ;;  %v3537_v46 = vld [vmem:[%s4434_s2 + $0x1c0] sm:$0xff]   ;;  %v3538_v12 = vld [vmem:[%s4434_s2 + $0x148] sm:$0xff]  }
  0x1c   : > { %v3536_v6 = vld [vmem:[%s4434_s2 + $0x100] sm:$0xff]   ;;  %v3541_v23 = vld [vmem:[%s4434_s2 + $0x1c8] sm:$0xff]  }
  0x1d   : > { %3109 = vmatpush3.bf16.msra.mxu0 %v3511_v18 }
  0x1e   : > { %3110 = vmatprep.subr.bf16.mxu0 %v3513_v20  ;;  %3075 = vmatpush3.bf16.msra.mxu1 %v3520_v27  ;;  %v3539_v20 = vld [vmem:[%s4434_s2 + $0x180] sm:$0xff]   ;;  %v3543_v27 = vld [vmem:[%s4434_s2 + $0x188] sm:$0xff]  }
  0x1f   : > { %3076 = vmatprep.subr.bf16.mxu1 %v3522_v30  ;;  %v3869_v47 = vld [vmem:[#allocation2 + $0x91] sm:$0xff] }
  0x20   : > { %3419 = vmatmul.mubr.msk.bf16.gmra.mrb[4].mxu0 %vm236_vm2, %v3502_v15  ;;  %v3871_v48 = vld [vmem:[#allocation2 + $0x92] sm:$0xff] }
  0x21   : > { %3111 = vmatpush3.bf16.msra.mxu0 %v3515_v22  ;;  %1499 = vst [vmem:[#allocation2 + $0x90] sm:$0xff] %v3673_v28  ;;  %1500 = vst [vmem:[#allocation2 + $0x98] sm:$0x3] %v3673_v28  ;;  %v3540_v22 = vld [vmem:[%s4434_s2 + $0x108] sm:$0xff]  }
  0x22   : > { %3112 = vmatprep.subr.bf16.mxu0 %v3517_v24  ;;  %3077 = vmatpush3.bf16.msra.mxu1 %v3524_v32  ;;  %v3545_v32 = vld [vmem:[%s4434_s2 + $0x1d0] sm:$0xff]  }
  0x23   : > { %3078 = vmatprep.subr.bf16.mxu1 %v3526_v34 }
  0x25   : > { %3113 = vmatpush3.bf16.msra.mxu0 %v3519_v26  ;;  %v3542_v26 = vld [vmem:[%s4434_s2 + $0x150] sm:$0xff]  }
  0x26   : > { %3114 = vmatprep.subr.bf16.mxu0 %v3521_v29  ;;  %3079 = vmatpush3.bf16.msra.mxu1 %v3528_v36  ;;  %v3544_v29 = vld [vmem:[%s4434_s2 + $0x110] sm:$0xff]   ;;  %v3546_v36 = vld [vmem:[%s4434_s2 + $0x158] sm:$0xff]  }
  0x27   : > { %3080 = vmatprep.subr.bf16.mxu1 %v3530_v38 }
  0x29   : > { %3115 = vmatpush3.bf16.msra.mxu0 %v3523_v31 }
  0x2a   : > { %3116 = vmatprep.subr.bf16.mxu0 %v3525_v33  ;;  %3081 = vmatpush3.bf16.msra.mxu1 %v3532_v40 }
  0x2b   : > { %3146 = vmatprep.subr.bf16.mxu1 %v3535_v45  ;;  %v3549_v45 = vld [vmem:[%s4434_s2 + $0x1d8] sm:$0xff]  }
  0x2d   : > { %3117 = vmatpush3.bf16.msra.mxu0 %v3527_v35 }
  0x2e   : > { %3118 = vmatprep.subr.bf16.mxu0 %v3529_v37 }
  0x31   : > { %3119 = vmatpush3.bf16.msra.mxu0 %v3531_v39 }
  0x32   : > { %3120 = vmatprep.subr.bf16.mxu0 %v3533_v42 }
  0x35   : > { %3121 = vmatpush3.bf16.msra.mxu0 %v3534_v44  ;;  %v3548_v44 = vld [vmem:[%s4434_s2 + $0x118] sm:$0xff]  }
  0x36   : > { %3186 = vmatprep.subr.bf16.mxu0 %v3537_v46  ;;  %v3550_v46 = vld [vmem:[%s4434_s2 + $0x160] sm:$0xff]  }
  0xeb   : > { %v3416_v49 = vpop.f32.mrb[0].mxu0 }
  0xec   : > { %v323_v50 = vmax.f32 %v3416_v49, 0.0  ;;  %v290_v51 = vpop.f32.mrb[1].mxu0  ;;  %v3551_v49 = vld [vmem:[%s4434_s2 + $0x198] sm:$0xff]  }
  0xed   : > { %v321_v52 = vmax.f32 %v290_v51, 0.0  ;;  %v3417_v53 = vpop.f32.mrb[2].mxu0 }
  0xee   : > { %368 = vst [vmem:[#allocation2 + $0x31] sm:$0xff] %v323_v50  ;;  %v324_v54 = vmax.f32 %v3417_v53, 0.0  ;;  %v293_v55 = vpop.f32.mrb[3].mxu0  ;;  %v3554_v53 = vld [vmem:[%s4434_s2 + $0x168] sm:$0xff]  }
  0xef   : > { %366 = vst [vmem:[#allocation2 + $0x11] sm:$0xff] %v321_v52  ;;  %v322_v56 = vmax.f32 %v293_v55, 0.0  ;;  %v398_v57 = vpack.c.bf16 %v321_v52, %v390_v41  ;;  %v3547_v41 = vld [vmem:[%s4434_s2 + $0x190] sm:$0xff]  }
  0xf0   : > { %v3876_v58 = vpack.c.bf16 %v324_v54, %v323_v50  ;;  %369 = vst [vmem:[#allocation2 + $0x41] sm:$0xff] %v324_v54 }
  0xf1   : > { %v3878_v59 = vpack.c.bf16 %v322_v56, %v321_v52  ;;  %367 = vst [vmem:[#allocation2 + $0x21] sm:$0xff] %v322_v56  ;;  %1163 = vmatprep.mubr.bf16.mxu1 %v398_v57  ;;  %v3880_v60 = vpack.c.bf16 %v323_v50, %v322_v56  ;;  %v3552_v50 = vld [vmem:[%s4434_s2 + $0x120] sm:$0xff]   ;;  %v3556_v56 = vld [vmem:[%s4434_s2 + $0x128] sm:$0xff]  }
  0xf2   : > { %3049 = vst [vmem:[%s3882_s15 + $0x8] sm:$0xff] %v3876_v58   ;;  %v3553_v52 = vld [vmem:[%s4434_s2 + $0x1e0] sm:$0xff]   ;;  %v3557_v57 = vld [vmem:[%s4434_s2 + $0x1e8] sm:$0xff]  }
  0xf3   : > { %2993 = vst [vmem:[%s3882_s15] sm:$0xff] %v3878_v59   ;;  %v3420_v61 = vpop.f32.mrb[4].mxu0 }
  0xf4   : > { %v327_v62 = vmax.f32 %v3420_v61, 0.0  ;;  %v306_v63 = vpop.f32.mrb[5].mxu0 }
  0xf5   : > { %v325_v0 = vmax.f32 %v306_v63, 0.0  ;;  %v3421_v1 = vpop.f32.mrb[6].mxu0  ;;  %v424_v2 = vld [vmem:[#allocation2 + $0x30] sm:$0xff]  ;;  %v3559_v63 = vld [vmem:[%s4434_s2 + $0x1a8] sm:$0xff]  }
  0xf6   : > { %v3888_v3 = vld [vmem:[#allocation2 + $0x32] sm:$0xff]  ;;  %372 = vst [vmem:[#allocation2 + $0x71] sm:$0xff] %v327_v62  ;;  %v3890_v4 = vmax.f32 %v3421_v1, 0.0  ;;  %v309_v7 = vpop.f32.mrb[7].mxu0 }
  0xf7   : > { %v375_v5 = vld [vmem:[#allocation2 + $0x10] sm:$0xff]  ;;  %1487 = vst [vmem:[#allocation2 + $0x30] sm:$0xff] %v3673_v28  ;;  %1488 = vst [vmem:[#allocation2 + $0x38] sm:$0x3] %v3673_v28  ;;  %v326_v10 = vmax.f32 %v309_v7, 0.0  ;;  %v3900_v11 = vld [vmem:[#allocation2 + $0x40] sm:$0xff]  ;;  %v3905_v13 = vpack.c.bf16 %v325_v0, %v324_v54 }
  0xf8   : > { %v3895_v8 = vld [vmem:[#allocation2 + $0x12] sm:$0xff]  ;;  %370 = vst [vmem:[#allocation2 + $0x51] sm:$0xff] %v325_v0  ;;  %v382_v9 = vpack.c.bf16 %v375_v5, %v3673_v28  ;;  %v3907_v14 = vld [vmem:[#allocation2 + $0x42] sm:$0xff]  ;;  %v3912_v15 = vpack.c.bf16 %v3890_v4, %v327_v62  ;;  %373 = vst [vmem:[#allocation2 + $0x81] sm:$0xff] %v3890_v4  ;;  %v431_v25 = vpack.c.bf16 %v3900_v11, %v424_v2 }
  0xf9   : > { %1483 = vst [vmem:[#allocation2 + $0x10] sm:$0xff] %v3673_v28  ;;  %1484 = vst [vmem:[#allocation2 + $0x18] sm:$0x3] %v3673_v28  ;;  %v423_v16 = vld [vmem:[#allocation2 + $0x20] sm:$0xff]  ;;  %v3919_v18 = vpack.c.bf16 %v326_v10, %v325_v0  ;;  %v414_v21 = vpack.c.bf16 %v3895_v8, %v3856_v43  ;;  %v3937_v24 = vpack.c.bf16 %v327_v62, %v326_v10  ;;  %v3558_v62 = vld [vmem:[%s4434_s2 + $0x170] sm:$0xff]  }
  0xfa   : > { %v3915_v17 = vld [vmem:[#allocation2 + $0x22] sm:$0xff]  ;;  %1490 = vst [vmem:[#allocation2 + $0x48] sm:$0x3] %v3673_v28  ;;  %1489 = vst [vmem:[#allocation2 + $0x40] sm:$0xff] %v3673_v28  ;;  %1164 = vmatmul.mubr.bf16.vlgmr.msra.gmra.mrb[0].mxu1 %v382_v9  ;;  %v430_v19 = vpack.c.bf16 %v423_v16, %v375_v5  ;;  %v3962_v35 = vpack.c.bf16 %v424_v2, %v423_v16  ;;  %v3560_v0 = vld [vmem:[%s4434_s2 + $0x130] sm:$0xff]  }
  0xfb   : > { %371 = vst [vmem:[#allocation2 + $0x61] sm:$0xff] %v326_v10  ;;  %1485 = vst [vmem:[#allocation2 + $0x20] sm:$0xff] %v3673_v28  ;;  %3147 = vmatpush3.bf16.msra.mxu1 %v3536_v6  ;;  %1171 = vmatprep.mubr.bf16.mxu1 %v3880_v60  ;;  %v3986_v43 = vpack.c.bf16 %v3888_v3, %v3915_v17  ;;  %v3555_v54 = vld [vmem:[%s4434_s2 + $0x1a0] sm:$0xff]   ;;  %v3561_v2 = vld [vmem:[%s4434_s2 + $0x1f0] sm:$0xff]   ;;  %v462_v6 = vpack.c.bf16 %v3915_v17, %v3895_v8 }
  0xfc   : > { %1486 = vst [vmem:[#allocation2 + $0x28] sm:$0x3] %v3673_v28  ;;  %3051 = vst [vmem:[%s3882_s15 + $0x18] sm:$0xff] %v3912_v15   ;;  %1228 = vmatprep.mubr.bf16.mxu0 %v430_v19  ;;  %3148 = vmatprep.subr.bf16.mxu1 %v3538_v12  ;;  %v3562_v5 = vld [vmem:[%s4434_s2 + $0x178] sm:$0xff]   ;;  %v3563_v7 = vld [vmem:[%s4434_s2 + $0x1b0] sm:$0xff]   ;;  %v463_v17 = vpack.c.bf16 %v3907_v14, %v3888_v3  ;;  %v498_v19 = vpack.c.bf16 %v3869_v47, %v3890_v4 }
  0xfd   : > { %3050 = vst [vmem:[%s3882_s15 + $0x10] sm:$0xff] %v3919_v18   ;;  %1229 = vmatmul.mubr.bf16.vlgmr.msra.gmra.mrb[8].mxu0 %v414_v21  ;;  %v3951_v30 = vld [vmem:[#allocation2 + $0x70] sm:$0xff]  ;;  %v3564_v10 = vld [vmem:[%s4434_s2 + $0x138] sm:$0xff]   ;;  %v3567_v8 = vld [vmem:[%s4434_s2 + $0x200] sm:$0xff]  }
  0xfe   : > { %1236 = vmatprep.mubr.bf16.mxu0 %v431_v25  ;;  %3187 = vmatpush3.bf16.msra.mxu0 %v3539_v20  ;;  %v3953_v31 = vld [vmem:[#allocation2 + $0x72] sm:$0xff]  ;;  %v3568_v16 = vld [vmem:[%s4434_s2 + $0x208] sm:$0xff]  }
  0xff   : > { %3149 = vmatpush3.bf16.msra.mxu1 %v3540_v22  ;;  %3188 = vmatprep.subr.bf16.mxu0 %v3541_v23  ;;  %v426_v33 = vld [vmem:[#allocation2 + $0x50] sm:$0xff]  ;;  %1495 = vst [vmem:[#allocation2 + $0x70] sm:$0xff] %v3673_v28  ;;  %1496 = vst [vmem:[#allocation2 + $0x78] sm:$0x3] %v3673_v28  ;;  %v3967_v37 = vld [vmem:[#allocation2 + $0x80] sm:$0xff] }
 0x100   : > { %v3958_v34 = vld [vmem:[#allocation2 + $0x52] sm:$0xff]  ;;  %3150 = vmatprep.subr.bf16.mxu1 %v3542_v26  ;;  %v3969_v38 = vld [vmem:[#allocation2 + $0x82] sm:$0xff]  ;;  %v4005_v51 = vpack.c.bf16 %v426_v33, %v3900_v11  ;;  %v433_v61 = vpack.c.bf16 %v3967_v37, %v3951_v30  ;;  %v482_v47 = vpack.c.bf16 %v3673_v28, %v3967_v37 }
 0x101   : > { %1491 = vst [vmem:[#allocation2 + $0x50] sm:$0xff] %v3673_v28  ;;  %1492 = vst [vmem:[#allocation2 + $0x58] sm:$0x3] %v3673_v28  ;;  %v4020_v55 = vpack.c.bf16 %v3958_v34, %v3907_v14  ;;  %v3565_v11 = vld [vmem:[%s4434_s2 + $0x1f8] sm:$0xff]   ;;  %v3571_v14 = vld [vmem:[%s4434_s2 + $0x220] sm:$0xff]   ;;  %v514_v4 = vpack.c.bf16 %v3871_v48, %v3969_v38 }
 0x102   : > { %v427_v39 = vld [vmem:[#allocation2 + $0x60] sm:$0xff]  ;;  %1497 = vst [vmem:[#allocation2 + $0x80] sm:$0xff] %v3673_v28  ;;  %1498 = vst [vmem:[#allocation2 + $0x88] sm:$0x3] %v3673_v28  ;;  %3189 = vmatpush3.bf16.msra.mxu0 %v3543_v27  ;;  %1172 = vmatmul.mubr.bf16.gmra.mrb[4].mxu1 %v3962_v35  ;;  %v3566_v12 = vld [vmem:[%s4434_s2 + $0x1b8] sm:$0xff]  }
 0x103   : > { %v3973_v40 = vld [vmem:[#allocation2 + $0x62] sm:$0xff]  ;;  %v432_v42 = vpack.c.bf16 %v427_v39, %v426_v33  ;;  %3151 = vmatpush3.bf16.msra.mxu1 %v3544_v29  ;;  %1179 = vmatprep.mubr.bf16.mxu1 %v3905_v13  ;;  %v385_v1 = vpack.c.bf16 %v3951_v30, %v427_v39  ;;  %v3570_v3 = vld [vmem:[%s4434_s2 + $0x218] sm:$0xff]   ;;  %v3573_v20 = vld [vmem:[%s4434_s2 + $0x230] sm:$0xff]  }
 0x104   : > { %1494 = vst [vmem:[#allocation2 + $0x68] sm:$0x3] %v3673_v28  ;;  %1493 = vst [vmem:[#allocation2 + $0x60] sm:$0xff] %v3673_v28  ;;  %3190 = vmatprep.subr.bf16.mxu0 %v3545_v32  ;;  %3152 = vmatprep.subr.bf16.mxu1 %v3546_v36  ;;  %v417_v9 = vpack.c.bf16 %v3953_v31, %v3973_v40  ;;  %v3574_v21 = vld [vmem:[%s4434_s2 + $0x238] sm:$0xff]   ;;  %v3577_v22 = vld [vmem:[%s4435_s3 + $0xc0] sm:$0xff]  }
 0x105   : > { %1237 = vmatmul.mubr.bf16.gmra.mrb[12].mxu0 %v3986_v43  ;;  %v3578_v23 = vld [vmem:[%s4435_s3 + $0x48] sm:$0xff]   ;;  %v3579_v48 = vld [vmem:[%s4435_s3 + $0x80] sm:$0xff]   ;;  %v3582_v26 = vld [vmem:[%s4435_s3 + $0x50] sm:$0xff]  }
 0x106   : > { %3191 = vmatpush3.bf16.msra.mxu0 %v3547_v41  ;;  %1244 = vmatprep.mubr.bf16.mxu0 %v432_v42  ;;  %v3581_v25 = vld [vmem:[%s4435_s3 + $0xc8] sm:$0xff]   ;;  %v3584_v29 = vld [vmem:[%s4435_s3 + $0x10] sm:$0xff]   ;;  %v3588_v33 = vld [vmem:[%s4435_s3 + $0x18] sm:$0xff]  }
 0x107   : > { %3153 = vmatpush3.bf16.msra.mxu1 %v3548_v44  ;;  %3192 = vmatprep.subr.bf16.mxu0 %v3549_v45  ;;  %v3583_v27 = vld [vmem:[%s4435_s3 + $0x88] sm:$0xff]   ;;  %v3585_v30 = vld [vmem:[%s4435_s3 + $0xd0] sm:$0xff]   ;;  %v3591_v36 = vld [vmem:[%s4435_s3 + $0x98] sm:$0xff]  }
 0x108   : > { %3154 = vmatprep.subr.bf16.mxu1 %v3550_v46  ;;  %v3587_v32 = vld [vmem:[%s4435_s3 + $0x90] sm:$0xff]   ;;  %v3592_v37 = vld [vmem:[%s4435_s3 + $0x20] sm:$0xff]   ;;  %v3594_v39 = vld [vmem:[%s4435_s3 + $0x68] sm:$0xff]  }
 0x109   : > { %v3596_v41 = vld [vmem:[%s4435_s3 + $0x28] sm:$0xff]   ;;  %v3600_v45 = vld [vmem:[%s4435_s3 + $0x30] sm:$0xff]  }
 0x10a   : > { %3193 = vmatpush3.bf16.msra.mxu0 %v3551_v49  ;;  %1180 = vmatmul.mubr.bf16.gmra.mrb[8].mxu1 %v4005_v51  ;;  %v3597_v42 = vld [vmem:[%s4435_s3 + $0xe8] sm:$0xff]   ;;  %v3601_v46 = vld [vmem:[%s4435_s3 + $0xf0] sm:$0xff]   ;;  %v3602_v49 = vld [vmem:[%s4435_s3 + $0x78] sm:$0xff]  }
 0x10b   : > { %3155 = vmatpush3.bf16.msra.mxu1 %v3552_v50  ;;  %1187 = vmatprep.mubr.bf16.mxu1 %v3937_v24  ;;  %v3599_v44 = vld [vmem:[%s4435_s3 + $0xa8] sm:$0xff]   ;;  %v3603_v50 = vld [vmem:[%s4435_s3 + $0xb0] sm:$0xff]  }
 0x10c   : > { %3194 = vmatprep.subr.bf16.mxu0 %v3553_v52  ;;  %3156 = vmatprep.subr.bf16.mxu1 %v3554_v53  ;;  %v3605_v52 = vld [vmem:[%s4435_s3 + $0xf8] sm:$0xff]  }
 0x10d   : > { %1245 = vmatmul.mubr.bf16.gmra.mrb[16].mxu0 %v4020_v55  ;;  %v3606_v53 = vld [vmem:[%s4435_s3 + $0xb8] sm:$0xff]  }
 0x10e   : > { %1252 = vmatprep.mubr.bf16.mxu0 %v433_v61  ;;  %3195 = vmatpush3.bf16.msra.mxu0 %v3555_v54  ;;  %v3607_v54 = vld [vmem:[%s4435_s3 + $0x140] sm:$0xff]  }
 0x10f   : > { %3157 = vmatpush3.bf16.msra.mxu1 %v3556_v56  ;;  %3196 = vmatprep.subr.bf16.mxu0 %v3557_v57 }
 0x110   : > { %3158 = vmatprep.subr.bf16.mxu1 %v3558_v62 }
 0x112   : > { %3197 = vmatpush3.bf16.msra.mxu0 %v3559_v63  ;;  %1188 = vmatmul.mubr.bf16.gmra.mrb[12].mxu1 %v385_v1 }
 0x113   : > { %3159 = vmatpush3.bf16.msra.mxu1 %v3560_v0  ;;  %1293 = vmatprep.mubr.bf16.mxu1 %v462_v6 }
 0x114   : > { %3198 = vmatprep.subr.bf16.mxu0 %v3561_v2  ;;  %3160 = vmatprep.subr.bf16.mxu1 %v3562_v5 }
 0x115   : > { %1253 = vmatmul.mubr.bf16.gmra.mrb[20].mxu0 %v417_v9 }
 0x116   : > { %3199 = vmatpush3.bf16.msra.mxu0 %v3563_v7  ;;  %1358 = vmatprep.mubr.bf16.mxu0 %v3880_v60  ;;  %v3569_v60 = vld [vmem:[%s4434_s2 + $0x210] sm:$0xff]  }
 0x117   : > { %3161 = vmatpush3.bf16.msra.mxu1 %v3564_v10  ;;  %3200 = vmatprep.subr.bf16.mxu0 %v3565_v11 }
 0x118   : > { %3422 = vmatprep.subr.bf16.mxu1 %v3567_v8 }
 0x11a   : > { %3201 = vmatpush3.bf16.msra.mxu0 %v3566_v12  ;;  %1294 = vmatmul.mubr.bf16.vlgmr.msra.gmra.mrb[16].mxu1 %v3878_v59  ;;  %v464_v59 = vpack.c.bf16 %v3973_v40, %v3958_v34  ;;  %v3589_v34 = vld [vmem:[%s4435_s3 + $0xd8] sm:$0xff]   ;;  %v3595_v40 = vld [vmem:[%s4435_s3 + $0xa0] sm:$0xff]  }
 0x11b   : > { %3423 = vmatpush3.bf16.msra.mxu1 %v3567_v8  ;;  %1301 = vmatprep.mubr.bf16.mxu1 %v463_v17 }
 0x11c   : > { %3424 = vmatprep.subr.bf16.mxu1 %v3568_v16 }
 0x11d   : > { %1359 = vmatmul.mubr.bf16.vlgmr.msra.gmra.mrb[24].mxu0 %v3962_v35  ;;  %v3590_v35 = vld [vmem:[%s4435_s3 + $0x60] sm:$0xff]  }
 0x11e   : > { %1366 = vmatprep.mubr.bf16.mxu0 %v3905_v13  ;;  %v3572_v13 = vld [vmem:[%s4434_s2 + $0x228] sm:$0xff]  }
 0x11f   : > { %3425 = vmatpush3.bf16.msra.mxu1 %v3568_v16 }
 0x120   : > { %3426 = vmatprep.subr.bf16.mxu1 %v3569_v60 }
 0x122   : > { %1302 = vmatmul.mubr.bf16.gmra.mrb[20].mxu1 %v3876_v58  ;;  %v465_v58 = vpack.c.bf16 %v3969_v38, %v3953_v31  ;;  %v3586_v31 = vld [vmem:[%s4435_s3 + $0x58] sm:$0xff]   ;;  %v3593_v38 = vld [vmem:[%s4435_s3 + $0xe0] sm:$0xff]  }
 0x123   : > { %3427 = vmatpush3.bf16.msra.mxu1 %v3569_v60  ;;  %1309 = vmatprep.mubr.bf16.mxu1 %v464_v59 }
 0x124   : > { %3428 = vmatprep.subr.bf16.mxu1 %v3570_v3 }
 0x125   : > { %1367 = vmatmul.mubr.bf16.gmra.mrb[28].mxu0 %v4005_v51  ;;  %v3604_v51 = vld [vmem:[%s4435_s3 + $0x38] sm:$0xff]  }
 0x126   : > { %1374 = vmatprep.mubr.bf16.mxu0 %v3937_v24  ;;  %v3580_v24 = vld [vmem:[%s4435_s3 + $0x8] sm:$0xff]  }
 0x127   : > { %3429 = vmatpush3.bf16.msra.mxu1 %v3570_v3 }
 0x128   : > { %3430 = vmatprep.subr.bf16.mxu1 %v3571_v14 }
 0x12a   : > { %1310 = vmatmul.mubr.bf16.gmra.mrb[24].mxu1 %v3919_v18  ;;  %v3576_v18 = vld [vmem:[%s4435_s3] sm:$0xff]  }
 0x12b   : > { %3431 = vmatpush3.bf16.msra.mxu1 %v3571_v14  ;;  %1317 = vmatprep.mubr.bf16.mxu1 %v465_v58 }
 0x12c   : > { %3432 = vmatprep.subr.bf16.mxu1 %v3572_v13 }
 0x12d   : > { %1375 = vmatmul.mubr.bf16.gmra.mrb[32].mxu0 %v385_v1 }
 0x12e   : > { %1382 = vmatprep.mubr.bf16.mxu0 %v498_v19 }
 0x12f   : > { %3433 = vmatpush3.bf16.msra.mxu1 %v3572_v13 }
 0x130   : > { %3434 = vmatprep.subr.bf16.mxu1 %v3573_v20 }
 0x132   : > { %1318 = vmatmul.mubr.bf16.gmra.mrb[28].mxu1 %v3912_v15  ;;  %v3575_v15 = vld [vmem:[%s4435_s3 + $0x40] sm:$0xff]  }
 0x133   : > { %3435 = vmatpush3.bf16.msra.mxu1 %v3573_v20  ;;  %3438 = vmatprep.mubr.bf16.mxu1 %v3986_v43  ;;  %v3598_v43 = vld [vmem:[%s4435_s3 + $0x70] sm:$0xff]  }
 0x134   : > { %3436 = vmatprep.subr.bf16.mxu1 %v3574_v21  ;;  %3238 = vmatprep.subr.bf16.mxu0 %v3575_v15 }
 0x135   : > { %1383 = vmatmul.mubr.bf16.gmra.mrb[36].mxu0 %v482_v47 }
 0x136   : > { %3239 = vmatpush3.bf16.msra.mxu0 %v3576_v18 }
 0x137   : > { %3437 = vmatpush3.bf16.msra.mxu1 %v3574_v21  ;;  %3240 = vmatprep.subr.bf16.mxu0 %v3578_v23 }
 0x138   : > { %3278 = vmatprep.subr.bf16.mxu1 %v3577_v22 }
 0x13a   : > { %3439 = vmatmul.mubr.bf16.vlgmr.msra.gmra.mrb[32].mxu1 %v4020_v55  ;;  %3241 = vmatpush3.bf16.msra.mxu0 %v3580_v24  ;;  %v3609_v55 = vld [vmem:[%s4435_s3 + $0x1c0] sm:$0xff]  }
 0x13b   : > { %3442 = vmatprep.mubr.bf16.mxu1 %v417_v9  ;;  %3279 = vmatpush3.bf16.msra.mxu1 %v3579_v48 }
 0x13c   : > { %3280 = vmatprep.subr.bf16.mxu1 %v3581_v25  ;;  %3242 = vmatprep.subr.bf16.mxu0 %v3582_v26 }
 0x13e   : > { %3243 = vmatpush3.bf16.msra.mxu0 %v3584_v29 }
 0x13f   : > { %3281 = vmatpush3.bf16.msra.mxu1 %v3583_v27  ;;  %3244 = vmatprep.subr.bf16.mxu0 %v3586_v31 }
 0x140   : > { %3282 = vmatprep.subr.bf16.mxu1 %v3585_v30 }
 0x142   : > { %3443 = vmatmul.mubr.bf16.gmra.mrb[36].mxu1 %v514_v4  ;;  %3245 = vmatpush3.bf16.msra.mxu0 %v3588_v33 }
 0x143   : > { %3283 = vmatpush3.bf16.msra.mxu1 %v3587_v32  ;;  %3246 = vmatprep.subr.bf16.mxu0 %v3590_v35 }
 0x144   : > { %3284 = vmatprep.subr.bf16.mxu1 %v3589_v34 }
 0x146   : > { %3247 = vmatpush3.bf16.msra.mxu0 %v3592_v37 }
 0x147   : > { %3285 = vmatpush3.bf16.msra.mxu1 %v3591_v36  ;;  %3248 = vmatprep.subr.bf16.mxu0 %v3594_v39 }
 0x148   : > { %3286 = vmatprep.subr.bf16.mxu1 %v3593_v38 }
 0x14a   : > { %3249 = vmatpush3.bf16.msra.mxu0 %v3596_v41 }
 0x14b   : > { %3287 = vmatpush3.bf16.msra.mxu1 %v3595_v40  ;;  %3250 = vmatprep.subr.bf16.mxu0 %v3598_v43 }
 0x14c   : > { %3288 = vmatprep.subr.bf16.mxu1 %v3597_v42 }
 0x14e   : > { %3251 = vmatpush3.bf16.msra.mxu0 %v3600_v45 }
 0x14f   : > { %3289 = vmatpush3.bf16.msra.mxu1 %v3599_v44  ;;  %3252 = vmatprep.subr.bf16.mxu0 %v3602_v49 }
 0x150   : > { %3290 = vmatprep.subr.bf16.mxu1 %v3601_v46 }
 0x152   : > { %3253 = vmatpush3.bf16.msra.mxu0 %v3604_v51 }
 0x153   : > { %3291 = vmatpush3.bf16.msra.mxu1 %v3603_v50  ;;  %3318 = vmatprep.subr.bf16.mxu0 %v3607_v54 }
 0x154   : > { %3292 = vmatprep.subr.bf16.mxu1 %v3605_v52 }
 0x157   : > { %3293 = vmatpush3.bf16.msra.mxu1 %v3606_v53 }
 0x158   : > { %3358 = vmatprep.subr.bf16.mxu1 %v3609_v55 }
 0x1cd   : > { %v3082_v56 = vpop.f32.mrb[0].mxu1 }
 0x1ce   : > { %v3083_v57 = vpop.f32.mrb[1].mxu1 }
 0x1cf   : > { %v3084_v61 = vadd.f32 %v3083_v57, %v3082_v56  ;;  %v3085_v62 = vpop.f32.mrb[2].mxu1 }
 0x1d0   : > { %v3122_v63 = vpop.f32.mrb[8].mxu0  ;;  %v3086_v0 = vpop.f32.mrb[3].mxu1 }
 0x1d1   : > { %v3087_v1 = vadd.f32 %v3086_v0, %v3085_v62  ;;  %v3123_v2 = vpop.f32.mrb[9].mxu0 }
 0x1d2   : > { %v3124_v5 = vadd.f32 %v3123_v2, %v3122_v63  ;;  %v3125_v6 = vpop.f32.mrb[10].mxu0 }
 0x1d3   : > { %v3126_v7 = vpop.f32.mrb[11].mxu0 }
 0x1d4   : > { %v1231_v9 = vadd.f32 %v3124_v5, %v3084_v61  ;;  %v3127_v10 = vadd.f32 %v3126_v7, %v3125_v6 }
 0x1d5   : > { %v3088_v11 = vpop.f32.mrb[4].mxu1 }
 0x1d6   : > { %v1234_v8 = vadd.f32 %v3127_v10, %v3087_v1  ;;  %v3089_v12 = vpop.f32.mrb[5].mxu1 }
 0x1d7   : > { %v3090_v16 = vadd.f32 %v3089_v12, %v3088_v11  ;;  %v3091_v17 = vpop.f32.mrb[6].mxu1 }
 0x1d8   : > { %v3128_v60 = vpop.f32.mrb[12].mxu0  ;;  %v3092_v3 = vpop.f32.mrb[7].mxu1 }
 0x1d9   : > { %v3093_v59 = vadd.f32 %v3092_v3, %v3091_v17  ;;  %v3129_v14 = vpop.f32.mrb[13].mxu0 }
 0x1da   : > { %v3130_v13 = vadd.f32 %v3129_v14, %v3128_v60  ;;  %v3131_v58 = vpop.f32.mrb[14].mxu0 }
 0x1db   : > { %v3132_v19 = vpop.f32.mrb[15].mxu0 }
 0x1dc   : > { %v1239_v20 = vadd.f32 %v3130_v13, %v3090_v16  ;;  %v3133_v21 = vadd.f32 %v3132_v19, %v3131_v58 }
 0x1dd   : > { %v3094_v47 = vpop.f32.mrb[8].mxu1 }
 0x1de   : > { %v1242_v4 = vadd.f32 %v3133_v21, %v3093_v59  ;;  %v3095_v15 = vpop.f32.mrb[9].mxu1 }
 0x1df   : > { %v3096_v18 = vadd.f32 %v3095_v15, %v3094_v47  ;;  %v3097_v22 = vpop.f32.mrb[10].mxu1 }
 0x1e0   : > { %v3134_v23 = vpop.f32.mrb[16].mxu0  ;;  %v3098_v48 = vpop.f32.mrb[11].mxu1 }
 0x1e1   : > { %v3099_v24 = vadd.f32 %v3098_v48, %v3097_v22  ;;  %v3135_v25 = vpop.f32.mrb[17].mxu0 }
 0x1e2   : > { %v3136_v26 = vadd.f32 %v3135_v25, %v3134_v23  ;;  %v3137_v27 = vpop.f32.mrb[18].mxu0 }
 0x1e3   : > { %v3138_v29 = vpop.f32.mrb[19].mxu0 }
 0x1e4   : > { %v1247_v30 = vadd.f32 %v3136_v26, %v3096_v18  ;;  %v3139_v31 = vadd.f32 %v3138_v29, %v3137_v27 }
 0x1e5   : > { %v3100_v32 = vpop.f32.mrb[12].mxu1 }
 0x1e6   : > { %v1250_v33 = vadd.f32 %v3139_v31, %v3099_v24  ;;  %v3101_v34 = vpop.f32.mrb[13].mxu1 }
 0x1e7   : > { %v3102_v35 = vadd.f32 %v3101_v34, %v3100_v32  ;;  %v3103_v36 = vpop.f32.mrb[14].mxu1 }
 0x1e8   : > { %v3140_v37 = vpop.f32.mrb[20].mxu0  ;;  %v3104_v38 = vpop.f32.mrb[15].mxu1 }
 0x1e9   : > { %v3105_v39 = vadd.f32 %v3104_v38, %v3103_v36  ;;  %v3141_v40 = vpop.f32.mrb[21].mxu0 }
 0x1ea   : > { %v3142_v41 = vadd.f32 %v3141_v40, %v3140_v37  ;;  %v3143_v42 = vpop.f32.mrb[22].mxu0 }
 0x1eb   : > { %v3144_v43 = vpop.f32.mrb[23].mxu0 }
 0x1ec   : > { %v1255_v44 = vadd.f32 %v3142_v41, %v3102_v35  ;;  %v3145_v45 = vadd.f32 %v3144_v43, %v3143_v42 }
 0x1ed   : > { %v3162_v46 = vpop.f32.mrb[16].mxu1 }
 0x1ee   : > { %v1258_v49 = vadd.f32 %v3145_v45, %v3105_v39  ;;  %v3163_v50 = vpop.f32.mrb[17].mxu1 }
 0x1ef   : > { %v3164_v51 = vadd.f32 %v3163_v50, %v3162_v46  ;;  %v3165_v52 = vpop.f32.mrb[18].mxu1 }
 0x1f0   : > { %v3202_v53 = vpop.f32.mrb[24].mxu0  ;;  %v3166_v54 = vpop.f32.mrb[19].mxu1 }
 0x1f1   : > { %v1296_v55 = vadd.f32 %v3164_v51, %v1231_v9  ;;  %v3167_v56 = vadd.f32 %v3166_v54, %v3165_v52  ;;  %v3203_v57 = vpop.f32.mrb[25].mxu0 }
 0x1f2   : > { %v3204_v61 = vadd.f32 %v3203_v57, %v3202_v53  ;;  %v3205_v62 = vpop.f32.mrb[26].mxu0 }
 0x1f3   : > { %v1299_v63 = vadd.f32 %v3167_v56, %v1234_v8  ;;  %v3206_v0 = vpop.f32.mrb[27].mxu0 }
 0x1f4   : > { %v3207_v1 = vadd.f32 %v3206_v0, %v3205_v62  ;;  %v1361_v2 = vadd.f32 %v3204_v61, %v1296_v55 }
 0x1f5   : > { %v3168_v5 = vpop.f32.mrb[20].mxu1 }
 0x1f6   : > { %v3169_v6 = vpop.f32.mrb[21].mxu1  ;;  %v1364_v7 = vadd.f32 %v3207_v1, %v1299_v63  ;;  %v1525_v63 = vld [vmem:[#allocation2 + $0x1] sm:$0xff] }
 0x1f7   : > { %v3170_v10 = vadd.f32 %v3169_v6, %v3168_v5  ;;  %v3171_v11 = vpop.f32.mrb[22].mxu1 }
 0x1f8   : > { %v3208_v12 = vpop.f32.mrb[28].mxu0  ;;  %v3172_v16 = vpop.f32.mrb[23].mxu1 }
 0x1f9   : > { %v1304_v17 = vadd.f32 %v3170_v10, %v1239_v20  ;;  %v3173_v60 = vadd.f32 %v3172_v16, %v3171_v11  ;;  %v3209_v3 = vpop.f32.mrb[29].mxu0 }
 0x1fa   : > { %v3210_v59 = vadd.f32 %v3209_v3, %v3208_v12  ;;  %v3211_v9 = vpop.f32.mrb[30].mxu0 }
 0x1fb   : > { %v1307_v14 = vadd.f32 %v3173_v60, %v1242_v4  ;;  %v3212_v13 = vpop.f32.mrb[31].mxu0 }
 0x1fc   : > { %v3213_v58 = vadd.f32 %v3212_v13, %v3211_v9  ;;  %v1369_v19 = vadd.f32 %v3210_v59, %v1304_v17 }
 0x1fd   : > { %v3174_v8 = vpop.f32.mrb[24].mxu1 }
 0x1fe   : > { %v3175_v21 = vpop.f32.mrb[25].mxu1  ;;  %v1372_v47 = vadd.f32 %v3213_v58, %v1307_v14 }
 0x1ff   : > { %v3176_v15 = vadd.f32 %v3175_v21, %v3174_v8  ;;  %v3177_v18 = vpop.f32.mrb[26].mxu1 }
 0x200   : > { %v3214_v22 = vpop.f32.mrb[32].mxu0  ;;  %v3178_v23 = vpop.f32.mrb[27].mxu1 }
 0x201   : > { %v1312_v48 = vadd.f32 %v3176_v15, %v1247_v30  ;;  %v3179_v24 = vadd.f32 %v3178_v23, %v3177_v18  ;;  %v3215_v25 = vpop.f32.mrb[33].mxu0  ;;  %v3610_v18 = vld [vmem:[%s4435_s3 + $0x148] sm:$0xff]  }
 0x202   : > { %v3216_v26 = vadd.f32 %v3215_v25, %v3214_v22  ;;  %v3217_v20 = vpop.f32.mrb[34].mxu0 }
 0x203   : > { %v1315_v27 = vadd.f32 %v3179_v24, %v1250_v33  ;;  %v3218_v29 = vpop.f32.mrb[35].mxu0 }
 0x204   : > { %v3219_v31 = vadd.f32 %v3218_v29, %v3217_v20  ;;  %v1377_v32 = vadd.f32 %v3216_v26, %v1312_v48  ;;  %v3611_v26 = vld [vmem:[%s4435_s3 + $0x180] sm:$0xff]   ;;  %v3612_v29 = vld [vmem:[%s4435_s3 + $0x108] sm:$0xff]  }
 0x205   : > { %v3180_v4 = vpop.f32.mrb[28].mxu1 }
 0x206   : > { %v3181_v34 = vpop.f32.mrb[29].mxu1  ;;  %v1380_v35 = vadd.f32 %v3219_v31, %v1315_v27  ;;  %v3613_v31 = vld [vmem:[%s4435_s3 + $0x1c8] sm:$0xff]  }
 0x207   : > { %v3182_v36 = vadd.f32 %v3181_v34, %v3180_v4  ;;  %v3183_v37 = vpop.f32.mrb[30].mxu1  ;;  %v3614_v34 = vld [vmem:[%s4435_s3 + $0x150] sm:$0xff]  }
 0x208   : > { %v3220_v38 = vpop.f32.mrb[36].mxu0  ;;  %v3184_v39 = vpop.f32.mrb[31].mxu1 }
 0x209   : > { %v1320_v40 = vadd.f32 %v3182_v36, %v1255_v44  ;;  %v3185_v41 = vadd.f32 %v3184_v39, %v3183_v37  ;;  %v3221_v42 = vpop.f32.mrb[37].mxu0  ;;  %v3616_v36 = vld [vmem:[%s4435_s3 + $0x110] sm:$0xff]  }
 0x20a   : > { %v3222_v43 = vadd.f32 %v3221_v42, %v3220_v38  ;;  %v3223_v30 = vpop.f32.mrb[38].mxu0  ;;  %v3617_v39 = vld [vmem:[%s4435_s3 + $0x1d0] sm:$0xff]  }
 0x20b   : > { %v1323_v45 = vadd.f32 %v3185_v41, %v1258_v49  ;;  %v3224_v46 = vpop.f32.mrb[39].mxu0 }
 0x20c   : > { %v3225_v50 = vadd.f32 %v3224_v46, %v3223_v30  ;;  %v1385_v51 = vadd.f32 %v3222_v43, %v1320_v40  ;;  %v3618_v40 = vld [vmem:[%s4435_s3 + $0x158] sm:$0xff]   ;;  %v3619_v43 = vld [vmem:[%s4435_s3 + $0x190] sm:$0xff]  }
 0x20d   : > { %v3440_v33 = vpop.f32.mrb[32].mxu1  ;;  %v3620_v46 = vld [vmem:[%s4435_s3 + $0x118] sm:$0xff]  }
 0x20e   : > { %v1434_v52 = vadd.f32 %v3440_v33, %v1369_v19  ;;  %v1425_v53 = vpop.f32.mrb[33].mxu1  ;;  %v1388_v54 = vadd.f32 %v3225_v50, %v1323_v45  ;;  %v3608_v19 = vld [vmem:[%s4435_s3 + $0x100] sm:$0xff]   ;;  %v3621_v50 = vld [vmem:[%s4435_s3 + $0x1d8] sm:$0xff]  }
 0x20f   : > { %v1426_v55 = vadd.f32 %v1425_v53, %v1361_v2  ;;  %v3441_v56 = vpop.f32.mrb[34].mxu1  ;;  %v3622_v33 = vld [vmem:[%s4435_s3 + $0x160] sm:$0xff]  }
 0x210   : > { %v1458_v57 = vmax.f32 %v1434_v52, 0.0  ;;  %v1437_v61 = vadd.f32 %v3441_v56, %v1372_v47  ;;  %v1428_v62 = vpop.f32.mrb[35].mxu1  ;;  %v1541_v47 = vld [vmem:[#allocation2 + $0x2] sm:$0xff]  ;;  %v3623_v52 = vld [vmem:[%s4435_s3 + $0x198] sm:$0xff]  }
 0x211   : > { %v1456_v44 = vmax.f32 %v1426_v55, 0.0  ;;  %v1429_v0 = vadd.f32 %v1428_v62, %v1364_v7  ;;  %v3624_v53 = vld [vmem:[%s4435_s3 + $0x120] sm:$0xff]  }
 0x212   : > { %1503 = vst [vmem:[#allocation2 + $0x31] sm:$0xff] %v1458_v57  ;;  %v1459_v1 = vmax.f32 %v1437_v61, 0.0  ;;  %v3625_v56 = vld [vmem:[%s4435_s3 + $0x1e0] sm:$0xff]  }
 0x213   : > { %1501 = vst [vmem:[#allocation2 + $0x11] sm:$0xff] %v1456_v44  ;;  %v1457_v49 = vmax.f32 %v1429_v0, 0.0  ;;  %v1533_v5 = vpack.c.bf16 %v1456_v44, %v1525_v63  ;;  %v3627_v63 = vld [vmem:[%s4435_s3 + $0x1a0] sm:$0xff]  }
 0x214   : > { %v4212_v6 = vpack.c.bf16 %v1459_v1, %v1458_v57  ;;  %1504 = vst [vmem:[#allocation2 + $0x41] sm:$0xff] %v1459_v1 }
 0x215   : > { %v4214_v10 = vpack.c.bf16 %v1457_v49, %v1456_v44  ;;  %1502 = vst [vmem:[#allocation2 + $0x21] sm:$0xff] %v1457_v49  ;;  %v3444_v2 = vpop.f32.mrb[36].mxu1  ;;  %2297 = vmatprep.mubr.bf16.mxu0 %v1533_v5  ;;  %v4216_v11 = vpack.c.bf16 %v1458_v57, %v1457_v49  ;;  %v3626_v57 = vld [vmem:[%s4435_s3 + $0x168] sm:$0xff]  }
 0x216   : > { %3053 = vst [vmem:[%s3882_s15 + $0x28] sm:$0xff] %v4212_v6   ;;  %v1450_v12 = vadd.f32 %v3444_v2, %v1385_v51  ;;  %v1441_v7 = vpop.f32.mrb[37].mxu1  ;;  %v3629_v49 = vld [vmem:[%s4435_s3 + $0x1e8] sm:$0xff]   ;;  %v3630_v2 = vld [vmem:[%s4435_s3 + $0x170] sm:$0xff]  }
 0x217   : > { %3052 = vst [vmem:[%s3882_s15 + $0x20] sm:$0xff] %v4214_v10   ;;  %v1442_v16 = vadd.f32 %v1441_v7, %v1377_v32  ;;  %v3445_v17 = vpop.f32.mrb[38].mxu1  ;;  %v3632_v7 = vld [vmem:[%s4435_s3 + $0x130] sm:$0xff]  }
 0x218   : > { %v1462_v60 = vmax.f32 %v1450_v12, 0.0  ;;  %v1453_v3 = vadd.f32 %v3445_v17, %v1388_v54  ;;  %v1444_v59 = vpop.f32.mrb[39].mxu1  ;;  %v3631_v12 = vld [vmem:[%s4435_s3 + $0x1a8] sm:$0xff]  }
 0x219   : > { %v1460_v9 = vmax.f32 %v1442_v16, 0.0  ;;  %v1445_v14 = vadd.f32 %v1444_v59, %v1380_v35  ;;  %v1559_v27 = vld [vmem:[#allocation2 + $0x30] sm:$0xff]  ;;  %v3615_v35 = vld [vmem:[%s4435_s3 + $0x188] sm:$0xff]  }
 0x21a   : > { %1507 = vst [vmem:[#allocation2 + $0x71] sm:$0xff] %v1462_v60  ;;  %v4222_v13 = vmax.f32 %v1453_v3, 0.0  ;;  %v1510_v58 = vld [vmem:[#allocation2 + $0x10] sm:$0xff]  ;;  %v3634_v3 = vld [vmem:[%s4435_s3 + $0x178] sm:$0xff]  }
 0x21b   : > { %1505 = vst [vmem:[#allocation2 + $0x51] sm:$0xff] %v1460_v9  ;;  %v1461_v8 = vmax.f32 %v1445_v14, 0.0  ;;  %v1517_v21 = vpack.c.bf16 %v1510_v58, %v3673_v28  ;;  %v4228_v15 = vld [vmem:[#allocation2 + $0x12] sm:$0xff]  ;;  %v4233_v22 = vpack.c.bf16 %v1460_v9, %v1459_v1  ;;  %v1560_v24 = vld [vmem:[#allocation2 + $0x40] sm:$0xff]  ;;  %v3628_v1 = vld [vmem:[%s4435_s3 + $0x128] sm:$0xff]  }
 0x21c   : > { %v4236_v23 = vpack.c.bf16 %v4222_v13, %v1462_v60  ;;  %1508 = vst [vmem:[#allocation2 + $0x81] sm:$0xff] %v4222_v13  ;;  %v1558_v48 = vld [vmem:[#allocation2 + $0x20] sm:$0xff]  ;;  %v1549_v20 = vpack.c.bf16 %v4228_v15, %v1541_v47  ;;  %v1566_v4 = vpack.c.bf16 %v1560_v24, %v1559_v27  ;;  %v4278_v42 = vld [vmem:[#allocation2 + $0x32] sm:$0xff] }
 0x21d   : > { %v4239_v25 = vpack.c.bf16 %v1461_v8, %v1460_v9  ;;  %1506 = vst [vmem:[#allocation2 + $0x61] sm:$0xff] %v1461_v8  ;;  %2298 = vmatmul.mubr.bf16.vlgmr.msra.gmra.mrb[40].mxu0 %v1517_v21  ;;  %v1565_v28 = vpack.c.bf16 %v1558_v48, %v1510_v58  ;;  %v4254_v32 = vpack.c.bf16 %v1462_v60, %v1461_v8  ;;  %v4269_v38 = vld [vmem:[#allocation2 + $0x22] sm:$0xff]  ;;  %v3633_v60 = vld [vmem:[%s4435_s3 + $0x1f0] sm:$0xff]   ;;  %v3637_v8 = vld [vmem:[%s4435_s3 + $0x1f8] sm:$0xff]  }
 0x21e   : > { %3055 = vst [vmem:[%s3882_s15 + $0x38] sm:$0xff] %v4236_v23   ;;  %3319 = vmatpush3.bf16.msra.mxu0 %v3608_v19  ;;  %2305 = vmatprep.mubr.bf16.mxu0 %v4216_v11  ;;  %v4267_v37 = vpack.c.bf16 %v1559_v27, %v1558_v48  ;;  %v4286_v30 = vpack.c.bf16 %v4278_v42, %v4269_v38  ;;  %v1545_v62 = vld [vmem:[#allocation2 + $0x42] sm:$0xff]  ;;  %v3635_v14 = vld [vmem:[%s4435_s3 + $0x1b0] sm:$0xff]   ;;  %v3636_v19 = vld [vmem:[%s4435_s3 + $0x138] sm:$0xff]  }
 0x21f   : > { %3054 = vst [vmem:[%s3882_s15 + $0x30] sm:$0xff] %v4239_v25   ;;  %2362 = vmatprep.mubr.bf16.mxu1 %v1565_v28  ;;  %3320 = vmatprep.subr.bf16.mxu0 %v3610_v18  ;;  %v1597_v59 = vpack.c.bf16 %v4269_v38, %v4228_v15  ;;  %v3639_v21 = vld [vmem:[%s4435_s3 + $0x200] sm:$0xff]   ;;  %v3638_v47 = vld [vmem:[%s4435_s3 + $0x1b8] sm:$0xff]   ;;  %v3640_v15 = vld [vmem:[%s4435_s3 + $0x208] sm:$0xff]   ;;  %v1598_v18 = vpack.c.bf16 %v1545_v62, %v4278_v42 }
 0x220   : > { %2363 = vmatmul.mubr.bf16.vlgmr.msra.gmra.mrb[40].mxu1 %v1549_v20  ;;  %v3642_v48 = vld [vmem:[%s4435_s3 + $0x218] sm:$0xff]   ;;  %v3644_v28 = vld [vmem:[%s4435_s3 + $0x228] sm:$0xff]   ;;  %v3645_v27 = vld [vmem:[%s4435_s3 + $0x230] sm:$0xff]  }
 0x221   : > { %2370 = vmatprep.mubr.bf16.mxu1 %v1566_v4  ;;  %3359 = vmatpush3.bf16.msra.mxu1 %v3611_v26  ;;  %v1563_v0 = vld [vmem:[#allocation2 + $0x70] sm:$0xff] }
 0x222   : > { %3321 = vmatpush3.bf16.msra.mxu0 %v3612_v29  ;;  %3360 = vmatprep.subr.bf16.mxu1 %v3613_v31  ;;  %v1561_v45 = vld [vmem:[#allocation2 + $0x50] sm:$0xff]  ;;  %v3646_v29 = vld [vmem:[%s4435_s3 + $0x238] sm:$0xff]  }
 0x223   : > { %3322 = vmatprep.subr.bf16.mxu0 %v3614_v34  ;;  %v4304_v54 = vpack.c.bf16 %v1561_v45, %v1560_v24  ;;  %v4306_v55 = vld [vmem:[#allocation2 + $0x52] sm:$0xff]  ;;  %v4314_v61 = vld [vmem:[#allocation2 + $0x80] sm:$0xff] }
 0x224   : > { %v1562_v41 = vld [vmem:[#allocation2 + $0x60] sm:$0xff]  ;;  %v4322_v44 = vpack.c.bf16 %v4306_v55, %v1545_v62  ;;  %v1568_v5 = vpack.c.bf16 %v4314_v61, %v1563_v0  ;;  %v1548_v9 = vld [vmem:[#allocation2 + $0x72] sm:$0xff] }
 0x225   : > { %3361 = vmatpush3.bf16.msra.mxu1 %v3615_v35  ;;  %2306 = vmatmul.mubr.bf16.gmra.mrb[44].mxu0 %v4267_v37  ;;  %v1567_v51 = vpack.c.bf16 %v1562_v41, %v1561_v45  ;;  %v1520_v16 = vpack.c.bf16 %v1563_v0, %v1562_v41  ;;  %v1547_v17 = vld [vmem:[#allocation2 + $0x62] sm:$0xff]  ;;  %v1644_v31 = vld [vmem:[#allocation2 + $0x92] sm:$0xff] }
 0x226   : > { %3323 = vmatpush3.bf16.msra.mxu0 %v3616_v36  ;;  %2313 = vmatprep.mubr.bf16.mxu0 %v4233_v22  ;;  %v1552_v58 = vpack.c.bf16 %v1548_v9, %v1547_v17  ;;  %v1599_v24 = vpack.c.bf16 %v1547_v17, %v4306_v55 }
 0x227   : > { %3362 = vmatprep.subr.bf16.mxu1 %v3617_v39  ;;  %3324 = vmatprep.subr.bf16.mxu0 %v3618_v40 }
 0x228   : > { %2371 = vmatmul.mubr.bf16.gmra.mrb[44].mxu1 %v4286_v30 }
 0x229   : > { %2378 = vmatprep.mubr.bf16.mxu1 %v1567_v51  ;;  %3363 = vmatpush3.bf16.msra.mxu1 %v3619_v43 }
 0x22a   : > { %3325 = vmatpush3.bf16.msra.mxu0 %v3620_v46  ;;  %3364 = vmatprep.subr.bf16.mxu1 %v3621_v50 }
 0x22b   : > { %3326 = vmatprep.subr.bf16.mxu0 %v3622_v33 }
 0x22d   : > { %3365 = vmatpush3.bf16.msra.mxu1 %v3623_v52  ;;  %2314 = vmatmul.mubr.bf16.gmra.mrb[48].mxu0 %v4304_v54 }
 0x22e   : > { %3327 = vmatpush3.bf16.msra.mxu0 %v3624_v53  ;;  %2321 = vmatprep.mubr.bf16.mxu0 %v4254_v32 }
 0x22f   : > { %3366 = vmatprep.subr.bf16.mxu1 %v3625_v56  ;;  %3328 = vmatprep.subr.bf16.mxu0 %v3626_v57 }
 0x230   : > { %2379 = vmatmul.mubr.bf16.gmra.mrb[48].mxu1 %v4322_v44 }
 0x231   : > { %2386 = vmatprep.mubr.bf16.mxu1 %v1568_v5  ;;  %3367 = vmatpush3.bf16.msra.mxu1 %v3627_v63 }
 0x232   : > { %3329 = vmatpush3.bf16.msra.mxu0 %v3628_v1  ;;  %3368 = vmatprep.subr.bf16.mxu1 %v3629_v49 }
 0x233   : > { %3330 = vmatprep.subr.bf16.mxu0 %v3630_v2 }
 0x235   : > { %3369 = vmatpush3.bf16.msra.mxu1 %v3631_v12  ;;  %2322 = vmatmul.mubr.bf16.gmra.mrb[52].mxu0 %v1520_v16 }
 0x236   : > { %3331 = vmatpush3.bf16.msra.mxu0 %v3632_v7  ;;  %2427 = vmatprep.mubr.bf16.mxu0 %v1597_v59 }
 0x237   : > { %3370 = vmatprep.subr.bf16.mxu1 %v3633_v60  ;;  %3332 = vmatprep.subr.bf16.mxu0 %v3634_v3 }
 0x238   : > { %2387 = vmatmul.mubr.bf16.gmra.mrb[52].mxu1 %v1552_v58 }
 0x239   : > { %3371 = vmatpush3.bf16.msra.mxu1 %v3635_v14  ;;  %2492 = vmatprep.mubr.bf16.mxu1 %v4216_v11  ;;  %v3641_v11 = vld [vmem:[%s4435_s3 + $0x210] sm:$0xff]  }
 0x23a   : > { %3333 = vmatpush3.bf16.msra.mxu0 %v3636_v19  ;;  %3372 = vmatprep.subr.bf16.mxu1 %v3637_v8 }
 0x23b   : > { %3446 = vmatprep.subr.bf16.mxu0 %v3639_v21 }
 0x23d   : > { %3373 = vmatpush3.bf16.msra.mxu1 %v3638_v47  ;;  %2428 = vmatmul.mubr.bf16.vlgmr.msra.gmra.mrb[56].mxu0 %v4214_v10  ;;  %v3643_v10 = vld [vmem:[%s4435_s3 + $0x220] sm:$0xff]  }
 0x23e   : > { %3447 = vmatpush3.bf16.msra.mxu0 %v3639_v21  ;;  %2435 = vmatprep.mubr.bf16.mxu0 %v1598_v18 }
 0x23f   : > { %3448 = vmatprep.subr.bf16.mxu0 %v3640_v15 }
 0x240   : > { %2493 = vmatmul.mubr.bf16.vlgmr.msra.gmra.mrb[56].mxu1 %v4267_v37 }
 0x241   : > { %2500 = vmatprep.mubr.bf16.mxu1 %v4233_v22  ;;  %v1596_v22 = vld [vmem:[#allocation2 + $0x82] sm:$0xff] }
 0x242   : > { %3449 = vmatpush3.bf16.msra.mxu0 %v3640_v15  ;;  %v1600_v26 = vpack.c.bf16 %v1596_v22, %v1548_v9 }
 0x243   : > { %3450 = vmatprep.subr.bf16.mxu0 %v3641_v11 }
 0x245   : > { %2436 = vmatmul.mubr.bf16.gmra.mrb[60].mxu0 %v4212_v6  ;;  %v1628_v6 = vld [vmem:[#allocation2 + $0x91] sm:$0xff] }
 0x246   : > { %3451 = vmatpush3.bf16.msra.mxu0 %v3641_v11  ;;  %2443 = vmatprep.mubr.bf16.mxu0 %v1599_v24  ;;  %v1632_v20 = vpack.c.bf16 %v1628_v6, %v4222_v13 }
 0x247   : > { %3452 = vmatprep.subr.bf16.mxu0 %v3642_v48 }
 0x248   : > { %2501 = vmatmul.mubr.bf16.gmra.mrb[60].mxu1 %v4304_v54 }
 0x249   : > { %2508 = vmatprep.mubr.bf16.mxu1 %v4254_v32  ;;  %v1648_v32 = vpack.c.bf16 %v1644_v31, %v1596_v22 }
 0x24a   : > { %3453 = vmatpush3.bf16.msra.mxu0 %v3642_v48 }
 0x24b   : > { %3454 = vmatprep.subr.bf16.mxu0 %v3643_v10 }
 0x24d   : > { %2444 = vmatmul.mubr.bf16.gmra.mrb[64].mxu0 %v4239_v25  ;;  %v3647_v25 = vld [vmem:[#allocation2] sm:$0xff] }
 0x24e   : > { %3455 = vmatpush3.bf16.msra.mxu0 %v3643_v10  ;;  %2451 = vmatprep.mubr.bf16.mxu0 %v1600_v26  ;;  %v1616_v13 = vpack.c.bf16 %v3647_v25, %v4314_v61 }
 0x24f   : > { %3456 = vmatprep.subr.bf16.mxu0 %v3644_v28 }
 0x250   : > { %2509 = vmatmul.mubr.bf16.gmra.mrb[64].mxu1 %v1520_v16 }
 0x251   : > { %2516 = vmatprep.mubr.bf16.mxu1 %v1632_v20 }
 0x252   : > { %3457 = vmatpush3.bf16.msra.mxu0 %v3644_v28 }
 0x253   : > { %3458 = vmatprep.subr.bf16.mxu0 %v3645_v27 }
 0x255   : > { %2452 = vmatmul.mubr.bf16.gmra.mrb[68].mxu0 %v4236_v23 }
 0x256   : > { %3459 = vmatpush3.bf16.msra.mxu0 %v3645_v27  ;;  %3462 = vmatprep.mubr.bf16.mxu0 %v4286_v30 }
 0x257   : > { %3460 = vmatprep.subr.bf16.mxu0 %v3646_v29 }
 0x258   : > { %2517 = vmatmul.mubr.bf16.gmra.mrb[68].mxu1 %v1616_v13 }
 0x25a   : > { %3461 = vmatpush3.bf16.msra.mxu0 %v3646_v29 }
 0x25d   : > { %3463 = vmatmul.mubr.bf16.vlgmr.msra.gmra.mrb[72].mxu0 %v4322_v44 }
 0x25e   : > { %3466 = vmatprep.mubr.bf16.mxu0 %v1552_v58 }
 0x265   : > { %3467 = vmatmul.mubr.bf16.gmra.mrb[76].mxu0 %v1648_v32 }
 0x2f0   : > { %v3254_v4 = vpop.f32.mrb[40].mxu0 }
 0x2f1   : > { %v3255_v34 = vpop.f32.mrb[41].mxu0 }
 0x2f2   : > { %v3256_v35 = vadd.f32 %v3255_v34, %v3254_v4  ;;  %v3257_v36 = vpop.f32.mrb[42].mxu0 }
 0x2f3   : > { %v3294_v23 = vpop.f32.mrb[40].mxu1  ;;  %v3258_v37 = vpop.f32.mrb[43].mxu0 }
 0x2f4   : > { %v3259_v38 = vadd.f32 %v3258_v37, %v3257_v36  ;;  %v3295_v39 = vpop.f32.mrb[41].mxu1 }
 0x2f5   : > { %v3296_v40 = vadd.f32 %v3295_v39, %v3294_v23  ;;  %v3297_v41 = vpop.f32.mrb[42].mxu1 }
 0x2f6   : > { %v3298_v42 = vpop.f32.mrb[43].mxu1 }
 0x2f7   : > { %v2365_v43 = vadd.f32 %v3296_v40, %v3256_v35  ;;  %v3299_v30 = vadd.f32 %v3298_v42, %v3297_v41 }
 0x2f8   : > { %v3260_v45 = vpop.f32.mrb[44].mxu0 }
 0x2f9   : > { %v2368_v46 = vadd.f32 %v3299_v30, %v3259_v38  ;;  %v3261_v50 = vpop.f32.mrb[45].mxu0 }
 0x2fa   : > { %v3262_v51 = vadd.f32 %v3261_v50, %v3260_v45  ;;  %v3263_v33 = vpop.f32.mrb[46].mxu0 }
 0x2fb   : > { %v3300_v52 = vpop.f32.mrb[44].mxu1  ;;  %v3264_v53 = vpop.f32.mrb[47].mxu0 }
 0x2fc   : > { %v3265_v54 = vadd.f32 %v3264_v53, %v3263_v33  ;;  %v3301_v55 = vpop.f32.mrb[45].mxu1 }
 0x2fd   : > { %v3302_v56 = vadd.f32 %v3301_v55, %v3300_v52  ;;  %v3303_v57 = vpop.f32.mrb[46].mxu1 }
 0x2fe   : > { %v3304_v61 = vpop.f32.mrb[47].mxu1 }
 0x2ff   : > { %v2373_v62 = vadd.f32 %v3302_v56, %v3262_v51  ;;  %v3305_v63 = vadd.f32 %v3304_v61, %v3303_v57 }
 0x300   : > { %v3266_v44 = vpop.f32.mrb[48].mxu0 }
 0x301   : > { %v2376_v0 = vadd.f32 %v3305_v63, %v3265_v54  ;;  %v3267_v1 = vpop.f32.mrb[49].mxu0 }
 0x302   : > { %v3268_v49 = vadd.f32 %v3267_v1, %v3266_v44  ;;  %v3269_v5 = vpop.f32.mrb[50].mxu0 }
 0x303   : > { %v3306_v2 = vpop.f32.mrb[48].mxu1  ;;  %v3270_v12 = vpop.f32.mrb[51].mxu0 }
 0x304   : > { %v3271_v7 = vadd.f32 %v3270_v12, %v3269_v5  ;;  %v3307_v16 = vpop.f32.mrb[49].mxu1 }
 0x305   : > { %v3308_v17 = vadd.f32 %v3307_v16, %v3306_v2  ;;  %v3309_v60 = vpop.f32.mrb[50].mxu1 }
 0x306   : > { %v3310_v3 = vpop.f32.mrb[51].mxu1 }
 0x307   : > { %v2381_v59 = vadd.f32 %v3308_v17, %v3268_v49  ;;  %v3311_v9 = vadd.f32 %v3310_v3, %v3309_v60 }
 0x308   : > { %v3272_v14 = vpop.f32.mrb[52].mxu0 }
 0x309   : > { %v2384_v58 = vadd.f32 %v3311_v9, %v3271_v7  ;;  %v3273_v19 = vpop.f32.mrb[53].mxu0 }
 0x30a   : > { %v3274_v8 = vadd.f32 %v3273_v19, %v3272_v14  ;;  %v3275_v21 = vpop.f32.mrb[54].mxu0 }
 0x30b   : > { %v3312_v47 = vpop.f32.mrb[52].mxu1  ;;  %v3276_v15 = vpop.f32.mrb[55].mxu0 }
 0x30c   : > { %v3277_v18 = vadd.f32 %v3276_v15, %v3275_v21  ;;  %v3313_v11 = vpop.f32.mrb[53].mxu1 }
 0x30d   : > { %v3314_v48 = vadd.f32 %v3313_v11, %v3312_v47  ;;  %v3315_v24 = vpop.f32.mrb[54].mxu1 }
 0x30e   : > { %v3316_v10 = vpop.f32.mrb[55].mxu1 }
 0x30f   : > { %v2389_v22 = vadd.f32 %v3314_v48, %v3274_v8  ;;  %v3317_v28 = vadd.f32 %v3316_v10, %v3315_v24 }
 0x310   : > { %v3334_v26 = vpop.f32.mrb[56].mxu0 }
 0x311   : > { %v2392_v6 = vadd.f32 %v3317_v28, %v3277_v18  ;;  %v3335_v20 = vpop.f32.mrb[57].mxu0 }
 0x312   : > { %v3336_v27 = vadd.f32 %v3335_v20, %v3334_v26  ;;  %v3337_v29 = vpop.f32.mrb[58].mxu0 }
 0x313   : > { %v3374_v25 = vpop.f32.mrb[56].mxu1  ;;  %v3338_v13 = vpop.f32.mrb[59].mxu0 }
 0x314   : > { %v2430_v31 = vadd.f32 %v3336_v27, %v2365_v43  ;;  %v3339_v32 = vadd.f32 %v3338_v13, %v3337_v29  ;;  %v3375_v4 = vpop.f32.mrb[57].mxu1 }
 0x315   : > { %v3376_v34 = vadd.f32 %v3375_v4, %v3374_v25  ;;  %v3377_v35 = vpop.f32.mrb[58].mxu1 }
 0x316   : > { %v2433_v36 = vadd.f32 %v3339_v32, %v2368_v46  ;;  %v3378_v23 = vpop.f32.mrb[59].mxu1 }
 0x317   : > { %v3379_v37 = vadd.f32 %v3378_v23, %v3377_v35  ;;  %v2495_v38 = vadd.f32 %v3376_v34, %v2430_v31 }
 0x318   : > { %v3340_v39 = vpop.f32.mrb[60].mxu0 }
 0x319   : > { %v3341_v40 = vpop.f32.mrb[61].mxu0  ;;  %v2498_v41 = vadd.f32 %v3379_v37, %v2433_v36 }
 0x31a   : > { %v3342_v42 = vadd.f32 %v3341_v40, %v3340_v39  ;;  %v3343_v30 = vpop.f32.mrb[62].mxu0 }
 0x31b   : > { %v3380_v45 = vpop.f32.mrb[60].mxu1  ;;  %v3344_v50 = vpop.f32.mrb[63].mxu0 }
 0x31c   : > { %v2438_v51 = vadd.f32 %v3342_v42, %v2373_v62  ;;  %v3345_v33 = vadd.f32 %v3344_v50, %v3343_v30  ;;  %v3381_v52 = vpop.f32.mrb[61].mxu1 }
 0x31d   : > { %v3382_v53 = vadd.f32 %v3381_v52, %v3380_v45  ;;  %v3383_v43 = vpop.f32.mrb[62].mxu1 }
 0x31e   : > { %v2441_v54 = vadd.f32 %v3345_v33, %v2376_v0  ;;  %v3384_v55 = vpop.f32.mrb[63].mxu1 }
 0x31f   : > { %v3385_v56 = vadd.f32 %v3384_v55, %v3383_v43  ;;  %v2503_v57 = vadd.f32 %v3382_v53, %v2438_v51  ;;  %v2640_v55 = vld [vmem:[%s3882_s15] sm:$0xff] (%p3724_p4)  }
 0x320   : > { %v3346_v46 = vpop.f32.mrb[64].mxu0  ;;  %2641 = vst [vmem:[%s2624_s26] sm:$0xff] (%p3724_p4), %v2640_v55  }
 0x321   : > { %v3347_v61 = vpop.f32.mrb[65].mxu0  ;;  %v2506_v63 = vadd.f32 %v3385_v56, %v2441_v54  ;;  %v2644_v56 = vld [vmem:[%s3882_s15 + $0x8] sm:$0xff] (%p3724_p4)  }
 0x322   : > { %v3348_v44 = vadd.f32 %v3347_v61, %v3346_v46  ;;  %v3349_v1 = vpop.f32.mrb[66].mxu0  ;;  %v2652_v46 = vld [vmem:[%s3882_s15 + $0x18] sm:$0xff] (%p3724_p4)   ;;  %v2656_v61 = vld [vmem:[%s3882_s15 + $0x20] sm:$0xff] (%p3724_p4)   ;;  %2645 = vst [vmem:[%s2624_s26 + $0x8] sm:$0xff] (%p3724_p4), %v2644_v56  }
 0x323   : > { %v3386_v49 = vpop.f32.mrb[64].mxu1  ;;  %v3350_v5 = vpop.f32.mrb[67].mxu0  ;;  %2653 = vst [vmem:[%s2624_s26 + $0x18] sm:$0xff] (%p3724_p4), %v2652_v46   ;;  %2657 = vst [vmem:[%s2624_s26 + $0x40] sm:$0xff] (%p3724_p4), %v2656_v61  }
 0x324   : > { %v2446_v2 = vadd.f32 %v3348_v44, %v2381_v59  ;;  %v3351_v12 = vadd.f32 %v3350_v5, %v3349_v1  ;;  %v3387_v7 = vpop.f32.mrb[65].mxu1  ;;  %v2664_v44 = vld [vmem:[%s3882_s15 + $0x30] sm:$0xff] (%p3724_p4)   ;;  %v2668_v1 = vld [vmem:[%s3882_s15 + $0x38] sm:$0xff] (%p3724_p4)  }
 0x325   : > { %v3388_v16 = vadd.f32 %v3387_v7, %v3386_v49  ;;  %v3389_v62 = vpop.f32.mrb[66].mxu1  ;;  %2665 = vst [vmem:[%s2624_s26 + $0x50] sm:$0xff] (%p3724_p4), %v2664_v44   ;;  %2669 = vst [vmem:[%s2624_s26 + $0x58] sm:$0xff] (%p3724_p4), %v2668_v1  }
 0x326   : > { %v2449_v17 = vadd.f32 %v3351_v12, %v2384_v58  ;;  %v3390_v60 = vpop.f32.mrb[67].mxu1 }
 0x327   : > { %v3391_v3 = vadd.f32 %v3390_v60, %v3389_v62  ;;  %v2511_v9 = vadd.f32 %v3388_v16, %v2446_v2 }
 0x328   : > { %v3352_v0 = vpop.f32.mrb[68].mxu0 }
 0x329   : > { %v3353_v14 = vpop.f32.mrb[69].mxu0  ;;  %v2514_v19 = vadd.f32 %v3391_v3, %v2449_v17 }
 0x32a   : > { %v3354_v8 = vadd.f32 %v3353_v14, %v3352_v0  ;;  %v3355_v21 = vpop.f32.mrb[70].mxu0 }
 0x32b   : > { %v3392_v47 = vpop.f32.mrb[68].mxu1  ;;  %v3356_v15 = vpop.f32.mrb[71].mxu0 }
 0x32c   : > { %v2454_v18 = vadd.f32 %v3354_v8, %v2389_v22  ;;  %v3357_v11 = vadd.f32 %v3356_v15, %v3355_v21  ;;  %v3393_v48 = vpop.f32.mrb[69].mxu1 }
 0x32d   : > { %v3394_v24 = vadd.f32 %v3393_v48, %v3392_v47  ;;  %v3395_v59 = vpop.f32.mrb[70].mxu1 }
 0x32e   : > { %v2457_v10 = vadd.f32 %v3357_v11, %v2392_v6  ;;  %v3396_v28 = vpop.f32.mrb[71].mxu1 }
 0x32f   : > { %v3397_v26 = vadd.f32 %v3396_v28, %v3395_v59  ;;  %v2519_v20 = vadd.f32 %v3394_v24, %v2454_v18 }
 0x330   : > { %v3464_v58 = vpop.f32.mrb[72].mxu0 }
 0x331   : > { %v2568_v27 = vadd.f32 %v3464_v58, %v2503_v57  ;;  %v2559_v29 = vpop.f32.mrb[73].mxu0  ;;  %v2522_v25 = vadd.f32 %v3397_v26, %v2457_v10  ;;  %v2648_v57 = vld [vmem:[%s3882_s15 + $0x10] sm:$0xff] (%p3724_p4)  }
 0x332   : > { %v2560_v13 = vadd.f32 %v2559_v29, %v2495_v38  ;;  %v3465_v31 = vpop.f32.mrb[74].mxu0  ;;  %2649 = vst [vmem:[%s2624_s26 + $0x10] sm:$0xff] (%p3724_p4), %v2648_v57  }
 0x333   : > { %v2571_v32 = vadd.f32 %v3465_v31, %v2506_v63  ;;  %v2562_v4 = vpop.f32.mrb[75].mxu0  ;;  %v2592_v22 = vmax.f32 %v2568_v27, 0.0  ;;  %v2660_v63 = vld [vmem:[%s3882_s15 + $0x28] sm:$0xff] (%p3724_p4)  }
 0x334   : > { %v2563_v34 = vadd.f32 %v2562_v4, %v2498_v41  ;;  %v2590_v36 = vmax.f32 %v2560_v13, 0.0  ;;  %2661 = vst [vmem:[%s2624_s26 + $0x48] sm:$0xff] (%p3724_p4), %v2660_v63  }
 0x335   : > { %v2593_v35 = vmax.f32 %v2571_v32, 0.0 }
 0x336   : > { %v2591_v23 = vmax.f32 %v2563_v34, 0.0 }
 0x337   : > { %v3037_v37 = vpack.c.bf16 %v2593_v35, %v2592_v22 }
 0x338   : > { %v3032_v6 = vpack.c.bf16 %v2591_v23, %v2590_v36  ;;  %v3468_v39 = vpop.f32.mrb[76].mxu0 }
 0x339   : > { %3057 = vst [vmem:[%s3882_s15 + $0x48] sm:$0xff] %v3037_v37   ;;  %v2584_v40 = vadd.f32 %v3468_v39, %v2519_v20  ;;  %v2575_v42 = vpop.f32.mrb[77].mxu0 }
 0x33a   : > { %3056 = vst [vmem:[%s3882_s15 + $0x40] sm:$0xff] %v3032_v6   ;;  %v2576_v30 = vadd.f32 %v2575_v42, %v2511_v9  ;;  %v3469_v45 = vpop.f32.mrb[78].mxu0 }
 0x33b   : > { %v2587_v38 = vadd.f32 %v3469_v45, %v2522_v25  ;;  %v2578_v50 = vpop.f32.mrb[79].mxu0  ;;  %v2596_v33 = vmax.f32 %v2584_v40, 0.0 }
 0x33c   : > { %v2579_v51 = vadd.f32 %v2578_v50, %v2514_v19  ;;  %v2594_v52 = vmax.f32 %v2576_v30, 0.0  ;;  %2621 = sbr.rel (!%p3724_p4) target bundleno = 843 (0x34b), region = 40 }
 0x33d   : > { %v2597_v41 = vmax.f32 %v2587_v38, 0.0 }
 0x33e   : > { %v2595_v53 = vmax.f32 %v2579_v51, 0.0 }
 0x33f   : > { %v3047_v43 = vpack.c.bf16 %v2597_v41, %v2596_v33 }
 0x340   : > { %v3042_v54 = vpack.c.bf16 %v2595_v53, %v2594_v52  ;;  %v2676_v5 = vld [vmem:[%s3882_s15 + $0x48] sm:$0xff] (%p3724_p4)  }
 0x341   : > { %3059 = vst [vmem:[%s3882_s15 + $0x58] sm:$0xff] %v3047_v43   ;;  %v2672_v49 = vld [vmem:[%s3882_s15 + $0x40] sm:$0xff] (%p3724_p4)   ;;  %2677 = vst [vmem:[%s2624_s26 + $0x88] sm:$0xff] (%p3724_p4), %v2676_v5  }
 0x342   : > { %3058 = vst [vmem:[%s3882_s15 + $0x50] sm:$0xff] %v3042_v54   ;;  %2673 = vst [vmem:[%s2624_s26 + $0x80] sm:$0xff] (%p3724_p4), %v2672_v49  }
 0x348   : > { %v2684_v12 = vld [vmem:[%s3882_s15 + $0x58] sm:$0xff]  }
 0x349   : > { %v2680_v2 = vld [vmem:[%s3882_s15 + $0x50] sm:$0xff]   ;;  %2685 = vst [vmem:[%s2624_s26 + $0x98] sm:$0xff] %v2684_v12  }
 0x34a   : > { %2681 = vst [vmem:[%s2624_s26 + $0x90] sm:$0xff] %v2680_v2  }
 0x34b PF: > { %p11_p8 = scmp.ge.s32.totalorder %s3714_s19, 4   ;;  %s4438_s15 = smov %s3666_s16 }
 0x34c   : > { %s4439_s16 = smov %s3722_s22  ;;  %s4440_s17 = smov %s3714_s19 }
 0x34d   :  { %13 = sbr.rel (!%p11_p8) target bundleno = 2 (0x2), region = 111 }

// kernel: _lambda_.3
= control target key start
LH: loop header
LB: loop body
LE: loop exit
PB: predicated region body
PF: predicated region fallthrough
CT: control target
= control target key end

     0   :  { %s15169_s13 = smov 0   ;;  %s17633_s0 = inlined_call_operand.vmem [shape: bf16[3,2,8,8,128], index: 0, kind: input, shape index: {}]   ;;  %s17634_s1 = inlined_call_operand.vmem [shape: bf16[3,128,128], index: 1, kind: input, shape index: {}]   ;;  %s17635_s2 = inlined_call_operand.vmem [shape: bf16[3,3,1152,128], index: 2, kind: input, shape index: {}]   ;;  %s17636_s3 = inlined_call_operand.vmem [shape: bf16[3,128,128], index: 3, kind: input, shape index: {}]   ;;  %s17637_s4 = inlined_call_operand.vmem [shape: bf16[3,512,128], index: 4, kind: input, shape index: {}]   ;;  %s17638_s5 = inlined_call_operand.vmem [shape: bf16[3,128,128], index: 5, kind: input, shape index: {}]   ;;  %s17639_s6 = inlined_call_operand.vmem [shape: bf16[3,1152,128], index: 6, kind: input, shape index: {}]   ;;  %s17640_s7 = inlined_call_operand.vmem [shape: bf16[3,128,128], index: 7, kind: input, shape index: {}]   ;;  %s17641_s8 = inlined_call_operand.vmem [shape: f32[3,1,128], index: 8, kind: input, shape index: {}]   ;;  %s17642_s9 = inlined_call_operand.vmem [shape: bf16[64,256], index: 9, kind: input, shape index: {}]   ;;  %s17643_s10 = inlined_call_operand.vmem [shape: f32[3,2,128,256], index: 10, kind: output, shape index: {}]  }
   0x1 LB: > { %s11746_s14 = sadd.s32 4294967295, %s15109_s13   ;;  %p11750_p0 = scmp.ge.s32.totalorder %s15109_s13, 1  ;;  %s15109_s13 = sphi %s15169_s13, %s20_s13  }
   0x2   : > { %p390_p1 = scmp.lt.s32.totalorder %s15109_s13, 4 }
   0x4   : > { %p391_p2 = pnand %p11750_p0, %p390_p1 }
   0x5   : > { %p15179_p3 = scmp.lt.s32.totalorder (!%p391_p2), %s11746_s14, 2  ;;  %v17644_v0 = vmov (!%p391_p2), 0   ;;  %vm1257_vm0 = vcmask (!%p391_p2), 1040384   ;;  %vm1258_vm1 = vcmask (!%p391_p2), 1044484   ;;  %vm1086_vm3 = vcmask (!%p391_p2), 1041408  }
   0x6   : > { %394 = sbr.rel (%p391_p2) target bundleno = 2041 (0x7f9), region = 60  ;;  %527 = vst [vmem:[#allocation2 + $0x30] sm:$0xf] (!%p391_p2), %v17644_v0  ;;  %528 = vst [vmem:[#allocation2 + $0x34] sm:$0xf] (!%p391_p2), %v17644_v0  ;;  %vm1087_vm4 = vcmask (!%p391_p2), 1045508  }
   0x7   : > { %530 = vst [vmem:[#allocation2 + $0x3c] sm:$0xf] (!%p391_p2), %v17644_v0  ;;  %531 = vst [vmem:[#allocation2 + $0x40] sm:$0xf] (!%p391_p2), %v17644_v0  ;;  %vm3483_vm6 = vcmask (!%p391_p2), 1042432   ;;  %vm3484_vm7 = vcmask (!%p391_p2), 1046532  }
   0x8   : > { %515 = vst [vmem:[#allocation2] sm:$0xf] (!%p391_p2), %v17644_v0  ;;  %516 = vst [vmem:[#allocation2 + $0x4] sm:$0xf] (!%p391_p2), %v17644_v0  ;;  %vm15113_vm9 = vmmov (!%p391_p2), 0   ;;  %vm11238_vm10 = vcmask (!%p391_p2), 523264  }
   0x9   : > { %517 = vst [vmem:[#allocation2 + $0x8] sm:$0x3] (!%p391_p2), %v17644_v0  ;;  %518 = vst [vmem:[#allocation2 + $0xc] sm:$0xf] (!%p391_p2), %v17644_v0 }
   0xa   : > { %519 = vst [vmem:[#allocation2 + $0x10] sm:$0xf] (!%p391_p2), %v17644_v0  ;;  %520 = vst [vmem:[#allocation2 + $0x14] sm:$0x3] (!%p391_p2), %v17644_v0 }
   0xb   : > { %521 = vst [vmem:[#allocation2 + $0x18] sm:$0xf] (!%p391_p2), %v17644_v0  ;;  %522 = vst [vmem:[#allocation2 + $0x1c] sm:$0xf] (!%p391_p2), %v17644_v0 }
   0xc   : > { %523 = vst [vmem:[#allocation2 + $0x20] sm:$0x3] (!%p391_p2), %v17644_v0  ;;  %524 = vst [vmem:[#allocation2 + $0x24] sm:$0xf] (!%p391_p2), %v17644_v0 }
   0xd   : > { %525 = vst [vmem:[#allocation2 + $0x28] sm:$0xf] %v17644_v0  ;;  %526 = vst [vmem:[#allocation2 + $0x2c] sm:$0x3] %v17644_v0  ;;  %s17655_s14 = smov (!%p15179_p3, %s11746_s14), 2 }
   0xe   : > { %529 = vst [vmem:[#allocation2 + $0x38] sm:$0x3] %v17644_v0  ;;  %532 = vst [vmem:[#allocation2 + $0x44] sm:$0x3] %v17644_v0  ;;  %s15310_s16 = sshll.u32 %s17655_s14, 6  ;;  %s14652_s17 = smul.u32 1728, %s17655_s14 }
   0xf   : > { %533 = vst [vmem:[#allocation2 + $0x48] sm:$0xf] %v17644_v0  ;;  %534 = vst [vmem:[#allocation2 + $0x4c] sm:$0xf] %v17644_v0  ;;  %s15317_s20 = scalar_lea.vmem %s17634_s1, %s15310_s16  ;;  %s15352_s26 = scalar_lea.vmem %s17633_s0, %s15310_s16  ;;  %v1193_v26 = vld [vmem:[#allocation2 + $0x30] sm:$0x8] }
  0x10   : > { %535 = vst [vmem:[#allocation2 + $0x50] sm:$0x3] %v17644_v0  ;;  %536 = vst [vmem:[#allocation2 + $0x54] sm:$0xf] %v17644_v0  ;;  %v14665_v1 = vld [vmem:[%s15317_s20] sm:$0xff]   ;;  %s15323_s23 = scalar_lea.vmem %s17635_s2, %s14652_s17  ;;  %v14668_v2 = vld [vmem:[%s15317_s20 + $0x8] sm:$0xff]   ;;  %s16596_s15 = scalar_lea.vmem %s17636_s3, %s15310_s16 }
  0x11   : > { %537 = vst [vmem:[#allocation2 + $0x58] sm:$0xf] %v17644_v0  ;;  %538 = vst [vmem:[#allocation2 + $0x5c] sm:$0x3] %v17644_v0  ;;  %14380 = vmatprep.subr.bf16.mxu0 %v14665_v1  ;;  %v14666_v3 = vld [vmem:[%s15323_s23 + $0x40] sm:$0xff]   ;;  %v14669_v5 = vld [vmem:[%s15323_s23 + $0x48] sm:$0xff]   ;;  %s16793_s19 = scalar_lea.vmem %s17638_s5, %s15310_s16 }
  0x12   : > { %539 = vst [vmem:[#allocation2 + $0x60] sm:$0xf] %v17644_v0  ;;  %540 = vst [vmem:[#allocation2 + $0x64] sm:$0xf] %v17644_v0  ;;  %14381 = vmatpush3.bf16.msra.mxu0 %v14665_v1  ;;  %v14667_v4 = vld [vmem:[%s15323_s23] sm:$0xff]   ;;  %13112 = vmatprep.subr.bf16.mxu1 %v14666_v3  ;;  %v14670_v6 = vld [vmem:[%s15323_s23 + $0x8] sm:$0xff]  }
  0x13   : > { %541 = vst [vmem:[#allocation2 + $0x68] sm:$0x3] %v17644_v0  ;;  %542 = vst [vmem:[#allocation2 + $0x6c] sm:$0xf] %v17644_v0  ;;  %14382 = vmatprep.subr.bf16.mxu0 %v14668_v2  ;;  %13113 = vmatpush3.bf16.msra.mxu1 %v14667_v4  ;;  %v14671_v7 = vld [vmem:[%s15317_s20 + $0x10] sm:$0xff]   ;;  %v14674_v10 = vld [vmem:[%s15317_s20 + $0x18] sm:$0xff]  }
  0x14   : > { %543 = vst [vmem:[#allocation2 + $0x70] sm:$0xf] %v17644_v0  ;;  %544 = vst [vmem:[#allocation2 + $0x74] sm:$0x3] %v17644_v0  ;;  %13114 = vmatprep.subr.bf16.mxu1 %v14669_v5  ;;  %v14672_v8 = vld [vmem:[%s15323_s23 + $0x50] sm:$0xff]   ;;  %v14675_v11 = vld [vmem:[%s15323_s23 + $0x58] sm:$0xff]  }
  0x15   : > { %545 = vst [vmem:[#allocation2 + $0x78] sm:$0xf] %v17644_v0  ;;  %546 = vst [vmem:[#allocation2 + $0x7c] sm:$0xf] %v17644_v0  ;;  %v14673_v9 = vld [vmem:[%s15323_s23 + $0x10] sm:$0xff]   ;;  %v14677_v12 = vld [vmem:[%s15317_s20 + $0x20] sm:$0xff]  }
  0x16   : > { %547 = vst [vmem:[#allocation2 + $0x80] sm:$0x3] %v17644_v0  ;;  %548 = vst [vmem:[#allocation2 + $0x84] sm:$0xf] %v17644_v0  ;;  %14383 = vmatpush3.bf16.msra.mxu0 %v14668_v2  ;;  %v14676_v13 = vld [vmem:[%s15323_s23 + $0x18] sm:$0xff]   ;;  %v14678_v14 = vld [vmem:[%s15323_s23 + $0x60] sm:$0xff]  }
  0x17   : > { %549 = vst [vmem:[#allocation2 + $0x88] sm:$0xf] %v17644_v0  ;;  %550 = vst [vmem:[#allocation2 + $0x8c] sm:$0x3] %v17644_v0  ;;  %14384 = vmatprep.subr.bf16.mxu0 %v14671_v7  ;;  %13115 = vmatpush3.bf16.msra.mxu1 %v14670_v6  ;;  %v14680_v15 = vld [vmem:[%s15317_s20 + $0x28] sm:$0xff]   ;;  %v14679_v16 = vld [vmem:[%s15323_s23 + $0x20] sm:$0xff]  }
  0x18   : > { %551 = vst [vmem:[#allocation2 + $0x90] sm:$0xf] %v17644_v0  ;;  %552 = vst [vmem:[#allocation2 + $0x94] sm:$0xf] %v17644_v0  ;;  %13116 = vmatprep.subr.bf16.mxu1 %v14672_v8  ;;  %v14681_v17 = vld [vmem:[%s15323_s23 + $0x68] sm:$0xff]   ;;  %v14683_v19 = vld [vmem:[%s15317_s20 + $0x30] sm:$0xff]  }
  0x19   : > { %553 = vst [vmem:[#allocation2 + $0x98] sm:$0x3] %v17644_v0  ;;  %554 = vst [vmem:[#allocation2 + $0x9c] sm:$0xf] %v17644_v0  ;;  %v14682_v20 = vld [vmem:[%s15323_s23 + $0x28] sm:$0xff]   ;;  %v14684_v21 = vld [vmem:[%s15323_s23 + $0x70] sm:$0xff]  }
  0x1a   : > { %555 = vst [vmem:[#allocation2 + $0xa0] sm:$0xf] %v17644_v0  ;;  %556 = vst [vmem:[#allocation2 + $0xa4] sm:$0x3] %v17644_v0  ;;  %14385 = vmatpush3.bf16.msra.mxu0 %v14671_v7  ;;  %v14685_v22 = vld [vmem:[%s15323_s23 + $0x30] sm:$0xff]   ;;  %v14686_v23 = vld [vmem:[%s15317_s20 + $0x38] sm:$0xff]  }
  0x1b   : > { %557 = vst [vmem:[#allocation2 + $0xa8] sm:$0xf] %v17644_v0  ;;  %558 = vst [vmem:[#allocation2 + $0xac] sm:$0xf] %v17644_v0  ;;  %14386 = vmatprep.subr.bf16.mxu0 %v14674_v10  ;;  %13117 = vmatpush3.bf16.msra.mxu1 %v14673_v9  ;;  %v14689_v24 = vld [vmem:[%s15352_s26] sm:$0xff]   ;;  %v14687_v25 = vld [vmem:[%s15323_s23 + $0x78] sm:$0xff]  }
  0x1c   : > { %559 = vst [vmem:[#allocation2 + $0xb0] sm:$0x3] %v17644_v0  ;;  %560 = vst [vmem:[#allocation2 + $0xb4] sm:$0xf] %v17644_v0  ;;  %13118 = vmatprep.subr.bf16.mxu1 %v14675_v11  ;;  %14396 = vmatprep.mubr.bf16.mxu0 %v14689_v24  ;;  %v1194_v27 = vld [vmem:[#allocation2 + $0x34] sm:$0x7] }
  0x1d   : > { %561 = vst [vmem:[#allocation2 + $0xb8] sm:$0xf] %v17644_v0  ;;  %562 = vst [vmem:[#allocation2 + $0xbc] sm:$0x3] %v17644_v0  ;;  %v1195_v28 = vld [vmem:[#allocation2 + $0x3c] sm:$0x8] }
  0x1e   : > { %563 = vst [vmem:[#allocation2 + $0xc0] sm:$0xf] %v17644_v0  ;;  %564 = vst [vmem:[#allocation2 + $0xc4] sm:$0xf] %v17644_v0  ;;  %14387 = vmatpush3.bf16.msra.mxu0 %v14674_v10  ;;  %v14688_v29 = vld [vmem:[%s15323_s23 + $0x38] sm:$0xff]   ;;  %v11807_v31 = vrot.slane %v1193_v26, 11 }
  0x1f   : > { %565 = vst [vmem:[#allocation2 + $0xc8] sm:$0x3] %v17644_v0  ;;  %566 = vst [vmem:[#allocation2 + $0xcc] sm:$0xf] %v17644_v0  ;;  %14388 = vmatprep.subr.bf16.mxu0 %v14677_v12  ;;  %13119 = vmatpush3.bf16.msra.mxu1 %v14676_v13  ;;  %v1196_v30 = vld [vmem:[#allocation2 + $0x40] sm:$0x7] }
  0x20   : > { %567 = vst [vmem:[#allocation2 + $0xd0] sm:$0xf] %v17644_v0  ;;  %568 = vst [vmem:[#allocation2 + $0xd4] sm:$0x3] %v17644_v0  ;;  %13120 = vmatprep.subr.bf16.mxu1 %v14678_v14  ;;  %v1262_v32 = vrot.slane %v1194_v27, 7  ;;  %v11808_v33 = vrot.slane %v1195_v28, 11 }
  0x21   : > { %569 = vst [vmem:[#allocation2 + $0xd8] sm:$0xf] %v17644_v0  ;;  %570 = vst [vmem:[#allocation2 + $0xdc] sm:$0xf] %v17644_v0  ;;  %v14690_v35 = vld [vmem:[%s15352_s26 + $0x8] sm:$0xff]   ;;  %v1266_v36 = vrot.slane %v1196_v30, 7 }
  0x22   : > { %571 = vst [vmem:[#allocation2 + $0xe0] sm:$0x3] %v17644_v0  ;;  %572 = vst [vmem:[#allocation2 + $0xe4] sm:$0xf] %v17644_v0  ;;  %14389 = vmatpush3.bf16.msra.mxu0 %v14677_v12  ;;  %v14691_v37 = vld [vmem:[%s15323_s23 + $0xc0] sm:$0xff]   ;;  %v14693_v50 = vld [vmem:[%s15323_s23 + $0xc8] sm:$0xff]  }
  0x23   : > { %573 = vst [vmem:[#allocation2 + $0xe8] sm:$0xf] %v17644_v0  ;;  %574 = vst [vmem:[#allocation2 + $0xec] sm:$0x3] %v17644_v0  ;;  %14390 = vmatprep.subr.bf16.mxu0 %v14680_v15  ;;  %13121 = vmatpush3.bf16.msra.mxu1 %v14679_v16  ;;  %v1022_v39 = vld [vmem:[#allocation2 + $0x30] sm:$0xc] }
  0x24   : > { %575 = vst [vmem:[#allocation2 + $0xf0] sm:$0xf] %v17644_v0  ;;  %576 = vst [vmem:[#allocation2 + $0xf4] sm:$0xf] %v17644_v0  ;;  %13122 = vmatprep.subr.bf16.mxu1 %v14681_v17  ;;  %v1023_v40 = vld [vmem:[#allocation2 + $0x34] sm:$0x3] }
  0x25   : > { %577 = vst [vmem:[#allocation2 + $0xf8] sm:$0x3] %v17644_v0  ;;  %578 = vst [vmem:[#allocation2 + $0xfc] sm:$0xf] %v17644_v0  ;;  %v1024_v41 = vld [vmem:[#allocation2 + $0x3c] sm:$0xc] }
  0x26   : > { %579 = vst [vmem:[#allocation2 + $0x100] sm:$0xf] %v17644_v0  ;;  %580 = vst [vmem:[#allocation2 + $0x104] sm:$0x3] %v17644_v0  ;;  %14391 = vmatpush3.bf16.msra.mxu0 %v14680_v15  ;;  %v1025_v43 = vld [vmem:[#allocation2 + $0x40] sm:$0x3] }
  0x27   : > { %581 = vst [vmem:[#allocation2 + $0x108] sm:$0xf] %v17644_v0  ;;  %582 = vst [vmem:[#allocation2 + $0x10c] sm:$0xf] %v17644_v0  ;;  %14392 = vmatprep.subr.bf16.mxu0 %v14683_v19  ;;  %13123 = vmatpush3.bf16.msra.mxu1 %v14682_v20  ;;  %v11783_v44 = vrot.slane %v1022_v39, 10  ;;  %v1091_v45 = vrot.slane %v1023_v40, 6 }
  0x28   : > { %583 = vst [vmem:[#allocation2 + $0x110] sm:$0x3] %v17644_v0  ;;  %584 = vst [vmem:[#allocation2 + $0x114] sm:$0xf] %v17644_v0  ;;  %13124 = vmatprep.subr.bf16.mxu1 %v14684_v21  ;;  %v11784_v46 = vrot.slane %v1024_v41, 10  ;;  %v14692_v47 = vld [vmem:[%s15323_s23 + $0x80] sm:$0xff]  }
  0x29   : > { %585 = vst [vmem:[#allocation2 + $0x118] sm:$0xf] %v17644_v0  ;;  %586 = vst [vmem:[#allocation2 + $0x11c] sm:$0x3] %v17644_v0  ;;  %v1095_v49 = vrot.slane %v1025_v43, 6  ;;  %v14695_v54 = vld [vmem:[%s15352_s26 + $0x10] sm:$0xff]  }
  0x2a   : > { %587 = vst [vmem:[#allocation2 + $0x120] sm:$0xf] %v17644_v0  ;;  %588 = vst [vmem:[#allocation2 + $0x124] sm:$0xf] %v17644_v0  ;;  %14393 = vmatpush3.bf16.msra.mxu0 %v14683_v19  ;;  %v14694_v55 = vld [vmem:[%s15323_s23 + $0x88] sm:$0xff]   ;;  %v14697_v60 = vld [vmem:[%s15323_s23 + $0xd0] sm:$0xff]  }
  0x2b   : > { %589 = vst [vmem:[#allocation2 + $0x128] sm:$0x3] %v17644_v0  ;;  %590 = vst [vmem:[#allocation2 + $0x12c] sm:$0xf] %v17644_v0  ;;  %14394 = vmatprep.subr.bf16.mxu0 %v14686_v23  ;;  %13125 = vmatpush3.bf16.msra.mxu1 %v14685_v22  ;;  %v635_v56 = vld [vmem:[%s15352_s26] sm:$0xf] }
  0x2c   : > { %591 = vst [vmem:[#allocation2 + $0x130] sm:$0xf] %v17644_v0  ;;  %592 = vst [vmem:[#allocation2 + $0x134] sm:$0x3] %v17644_v0  ;;  %13126 = vmatprep.subr.bf16.mxu1 %v14687_v25  ;;  %v636_v57 = vld [vmem:[%s15352_s26 + $0x4] sm:$0xf] }
  0x2d   : > { %593 = vst [vmem:[#allocation2 + $0x138] sm:$0xf] %v17644_v0  ;;  %594 = vst [vmem:[#allocation2 + $0x13c] sm:$0xf] %v17644_v0  ;;  %v667_v58 = vrot.slane %v635_v56, 5  ;;  %v669_v59 = vrot.slane %v636_v57, 5 }
  0x2e   : > { %595 = vst [vmem:[#allocation2 + $0x140] sm:$0x3] %v17644_v0  ;;  %596 = vst [vmem:[#allocation2 + $0x144] sm:$0xf] %v17644_v0  ;;  %14395 = vmatpush3.bf16.msra.mxu0 %v14686_v23  ;;  %v14696_v61 = vld [vmem:[%s15352_s26 + $0x18] sm:$0xff]   ;;  %v14698_v1 = vld [vmem:[%s15323_s23 + $0x90] sm:$0xff]  }
  0x2f   : > { %597 = vst [vmem:[#allocation2 + $0x148] sm:$0xf] %v17644_v0  ;;  %598 = vst [vmem:[#allocation2 + $0x14c] sm:$0x3] %v17644_v0  ;;  %13176 = vmatprep.subr.bf16.mxu0 %v14691_v37  ;;  %13127 = vmatpush3.bf16.msra.mxu1 %v14688_v29  ;;  %v668_v62 = vrot.slane %v667_v58, 4  ;;  %v670_v63 = vrot.slane %v669_v59, 4 }
  0x30   : > { %599 = vst [vmem:[#allocation2 + $0x150] sm:$0xf] %v17644_v0  ;;  %600 = vst [vmem:[#allocation2 + $0x154] sm:$0xf] %v17644_v0  ;;  %v14699_v2 = vld [vmem:[%s15323_s23 + $0xd8] sm:$0xff]   ;;  %v14701_v3 = vld [vmem:[%s15352_s26 + $0x20] sm:$0xff]  }
  0x31   : > { %601 = vst [vmem:[#allocation2 + $0x158] sm:$0x3] %v17644_v0  ;;  %602 = vst [vmem:[#allocation2 + $0x15c] sm:$0xf] %v17644_v0  ;;  %14397 = vmatmul.mubr.bf16.vlgmr.msra.gmra.mrb[0].mxu0 %v14690_v35  ;;  %v14700_v4 = vld [vmem:[%s15323_s23 + $0x98] sm:$0xff]   ;;  %v14702_v9 = vld [vmem:[%s15352_s26 + $0x28] sm:$0xff]  }
  0x32   : > { %603 = vst [vmem:[#allocation2 + $0x160] sm:$0xf] %v17644_v0  ;;  %604 = vst [vmem:[#allocation2 + $0x164] sm:$0x3] %v17644_v0  ;;  %13177 = vmatpush3.bf16.msra.mxu0 %v14692_v47  ;;  %14400 = vmatprep.mubr.bf16.mxu0 %v14695_v54  ;;  %v637_v5 = vld [vmem:[%s15352_s26 + $0x8] sm:$0xf] }
  0x33   : > { %605 = vst [vmem:[#allocation2 + $0x168] sm:$0xf] %v17644_v0  ;;  %606 = vst [vmem:[#allocation2 + $0x16c] sm:$0xf] %v17644_v0  ;;  %13178 = vmatprep.subr.bf16.mxu0 %v14693_v50  ;;  %v638_v6 = vld [vmem:[%s15352_s26 + $0xc] sm:$0xf] }
  0x34   : > { %607 = vst [vmem:[#allocation2 + $0x170] sm:$0x3] %v17644_v0  ;;  %608 = vst [vmem:[#allocation2 + $0x174] sm:$0xf] %v17644_v0  ;;  %v671_v7 = vrot.slane %v637_v5, 5  ;;  %v673_v8 = vrot.slane %v638_v6, 5 }
  0x35   : > { %609 = vst [vmem:[#allocation2 + $0x178] sm:$0xf] %v17644_v0  ;;  %610 = vst [vmem:[#allocation2 + $0x17c] sm:$0x3] %v17644_v0  ;;  %v14703_v10 = vld [vmem:[%s15323_s23 + $0xe0] sm:$0xff]   ;;  %v14707_v47 = vld [vmem:[%s15352_s26 + $0x30] sm:$0xff]  }
  0x36   : > { %611 = vst [vmem:[#allocation2 + $0x180] sm:$0xf] %v17644_v0  ;;  %612 = vst [vmem:[#allocation2 + $0x184] sm:$0xf] %v17644_v0  ;;  %13179 = vmatpush3.bf16.msra.mxu0 %v14694_v55  ;;  %v672_v19 = vrot.slane %v671_v7, 4  ;;  %v674_v29 = vrot.slane %v673_v8, 4 }
  0x37   : > { %613 = vst [vmem:[#allocation2 + $0x188] sm:$0x3] %v17644_v0  ;;  %614 = vst [vmem:[#allocation2 + $0x18c] sm:$0xf] %v17644_v0  ;;  %13180 = vmatprep.subr.bf16.mxu0 %v14697_v60  ;;  %v14704_v30 = vld [vmem:[%s15323_s23 + $0xa0] sm:$0xff]   ;;  %v14709_v57 = vld [vmem:[%s15323_s23 + $0xf0] sm:$0xff]  }
  0x38   : > { %615 = vst [vmem:[#allocation2 + $0x190] sm:$0xf] %v17644_v0  ;;  %616 = vst [vmem:[#allocation2 + $0x194] sm:$0x3] %v17644_v0  ;;  %v640_v55 = vld [vmem:[%s15352_s26 + $0x14] sm:$0xf] }
  0x39   : > { %617 = vst [vmem:[#allocation2 + $0x198] sm:$0xf] %v17644_v0  ;;  %618 = vst [vmem:[#allocation2 + $0x19c] sm:$0xf] %v17644_v0  ;;  %14401 = vmatmul.mubr.bf16.gmra.mrb[4].mxu0 %v14696_v61  ;;  %v14712_v6 = vld [vmem:[%s15323_s23 + $0x100] sm:$0xff]   ;;  %s13053_s27 = sshll.u32 %s17655_s14, 8 }
  0x3a   : > { %619 = vst [vmem:[#allocation2 + $0x1a0] sm:$0x3] %v17644_v0  ;;  %620 = vst [vmem:[#allocation2 + $0x1a4] sm:$0xf] %v17644_v0  ;;  %13181 = vmatpush3.bf16.msra.mxu0 %v14698_v1  ;;  %14404 = vmatprep.mubr.bf16.mxu0 %v14701_v3  ;;  %v14711_v1 = vld [vmem:[%s15323_s23 + $0x140] sm:$0xff]   ;;  %s16438_s30 = scalar_lea.vmem %s17637_s4, %s13053_s27  ;;  %s14653_s20 = smul.u32 576, %s17655_s14 }
  0x3b   : > { %621 = vst [vmem:[#allocation2 + $0x1a8] sm:$0xf] %v17644_v0  ;;  %622 = vst [vmem:[#allocation2 + $0x1ac] sm:$0x3] %v17644_v0  ;;  %13182 = vmatprep.subr.bf16.mxu0 %v14699_v2  ;;  %13240 = vmatprep.subr.bf16.mxu1 %v14711_v1  ;;  %s13056_s27 = sshll.u32 %s17655_s14, 9 }
  0x3c   : > { %623 = vst [vmem:[#allocation2 + $0x1b0] sm:$0xf] %v17644_v0  ;;  %624 = vst [vmem:[#allocation2 + $0x1b4] sm:$0xf] %v17644_v0 }
  0x3d   : > { %625 = vst [vmem:[#allocation2 + $0x1b8] sm:$0x3] %v17644_v0  ;;  %626 = vst [vmem:[#allocation2 + $0x1bc] sm:$0xf] %v17644_v0 }
  0x3e   : > { %627 = vst [vmem:[#allocation2 + $0x1c0] sm:$0xf] %v17644_v0  ;;  %628 = vst [vmem:[#allocation2 + $0x1c4] sm:$0x3] %v17644_v0  ;;  %13183 = vmatpush3.bf16.msra.mxu0 %v14700_v4 }
  0x3f   : > { %629 = vst [vmem:[#allocation2 + $0x1c8] sm:$0xf] %v17644_v0  ;;  %630 = vst [vmem:[#allocation2 + $0x1cc] sm:$0xf] %v17644_v0  ;;  %13184 = vmatprep.subr.bf16.mxu0 %v14703_v10 }
  0x40   : > { %631 = vst [vmem:[#allocation2 + $0x1d0] sm:$0x3] %v17644_v0  ;;  %632 = vst [vmem:[#allocation2 + $0x1d4] sm:$0xf] %v17644_v0 }
  0x41   : > { %633 = vst [vmem:[#allocation2 + $0x1d8] sm:$0xf] %v17644_v0  ;;  %634 = vst [vmem:[#allocation2 + $0x1dc] sm:$0x3] %v17644_v0  ;;  %14405 = vmatmul.mubr.bf16.gmra.mrb[8].mxu0 %v14702_v9 }
  0x42   : > { %vm15341_vm2 = vmor %vm1257_vm0, %vm1258_vm1  ;;  %732 = vst [vmem:[#allocation2 + $0x48] sm:$0x8] %v667_v58  ;;  %13185 = vmatpush3.bf16.msra.mxu0 %v14704_v30  ;;  %14408 = vmatprep.mubr.bf16.mxu0 %v14707_v47  ;;  %v677_v58 = vrot.slane %v640_v55, 5  ;;  %v14715_v55 = vld [vmem:[#allocation2 + $0x34] ss:$12 sps:$4 sm:$0xff]  }
  0x43   : > { %vm15360_vm5 = vmor %vm1086_vm3, %vm1087_vm4  ;;  %v1263_v38 = vsel %vm15341_vm2, %v11807_v31, %v1262_v32  ;;  %v1267_v42 = vsel %vm15341_vm2, %v11808_v33, %v1266_v36  ;;  %734 = vst [vmem:[#allocation2 + $0x54] sm:$0x8] %v669_v59  ;;  %v14705_v31 = vld [vmem:[%s15323_s23 + $0xe8] sm:$0xff]   ;;  %v14710_v59 = vld [vmem:[%s15323_s23 + $0xb0] sm:$0xff]  }
  0x44   : > { %v11823_v48 = vcombine.low %v1263_v38, %v1267_v42  ;;  %v1092_v51 = vsel %vm15360_vm5, %v11783_v44, %v1091_v45  ;;  %v1096_v52 = vsel %vm15360_vm5, %v11784_v46, %v1095_v49  ;;  %733 = vst [vmem:[#allocation2 + $0x4c] sm:$0x7] %v668_v62  ;;  %735 = vst [vmem:[#allocation2 + $0x58] sm:$0x7] %v670_v63  ;;  %v14706_v38 = vld [vmem:[%s15323_s23 + $0xa8] sm:$0xff]   ;;  %13186 = vmatprep.subr.bf16.mxu0 %v14705_v31  ;;  %v14708_v49 = vld [vmem:[%s15352_s26 + $0x38] sm:$0xff]  }
  0x45   : > { %v11799_v53 = vcombine.low %v1092_v51, %v1096_v52  ;;  %736 = vst [vmem:[#allocation2 + $0x60] sm:$0x8] %v671_v7  ;;  %738 = vst [vmem:[#allocation2 + $0x6c] sm:$0x8] %v673_v8  ;;  %v639_v52 = vld [vmem:[%s15352_s26 + $0x10] sm:$0xf] }
  0x46   : > { %2933 = vmatprep.mubr.bf16.mxu1 %v11823_v48  ;;  %737 = vst [vmem:[#allocation2 + $0x64] sm:$0x7] %v672_v19  ;;  %739 = vst [vmem:[#allocation2 + $0x70] sm:$0x7] %v674_v29  ;;  %13187 = vmatpush3.bf16.msra.mxu0 %v14706_v38  ;;  %v675_v56 = vrot.slane %v639_v52, 5  ;;  %v678_v5 = vrot.slane %v677_v58, 4 }
  0x47   : > { %2934 = vmatmul.mubr.bf16.vlgmr.msra.gmra.mrb[0].mxu1 %v11799_v53  ;;  %13188 = vmatprep.subr.bf16.mxu0 %v14709_v57  ;;  %742 = vst [vmem:[#allocation2 + $0x84] sm:$0x8] %v677_v58  ;;  %vm15668_vm8 = vmor %vm3483_vm6, %vm3484_vm7 }
  0x48   : > { %v676_v63 = vrot.slane %v675_v56, 4  ;;  %740 = vst [vmem:[#allocation2 + $0x78] sm:$0x8] %v675_v56  ;;  %743 = vst [vmem:[#allocation2 + $0x88] sm:$0x7] %v678_v5  ;;  %13241 = vmatpush3.bf16.msra.mxu1 %v14712_v6  ;;  %v14717_v56 = vld [vmem:[%s15323_s23 + $0x180] sm:$0xff]  }
  0x49   : > { %v1197_v11 = vld [vmem:[#allocation2 + $0x48] sm:$0x8]  ;;  %14409 = vmatmul.mubr.bf16.gmra.mrb[12].mxu0 %v14708_v49 }
  0x4a   : > { %v1199_v12 = vld [vmem:[#allocation2 + $0x54] sm:$0x8]  ;;  %v1026_v13 = vld [vmem:[#allocation2 + $0x48] sm:$0xc]  ;;  %v11809_v14 = vrot.slane %v1197_v11, 11  ;;  %13189 = vmatpush3.bf16.msra.mxu0 %v14710_v59  ;;  %v14713_v11 = vld [vmem:[%s15323_s23 + $0xf8] sm:$0xff]  }
  0x4b   : > { %v11810_v15 = vrot.slane %v1199_v12, 11  ;;  %v1028_v16 = vld [vmem:[#allocation2 + $0x54] sm:$0xc]  ;;  %v11785_v17 = vrot.slane %v1026_v13, 10  ;;  %v1198_v20 = vld [vmem:[#allocation2 + $0x4c] sm:$0x7]  ;;  %13190 = vmatprep.subr.bf16.mxu0 %v14713_v11 }
  0x4c   : > { %v1200_v21 = vld [vmem:[#allocation2 + $0x58] sm:$0x7]  ;;  %v1027_v22 = vld [vmem:[#allocation2 + $0x4c] sm:$0x3]  ;;  %v1270_v23 = vrot.slane %v1198_v20, 7  ;;  %v11786_v27 = vrot.slane %v1028_v16, 10 }
  0x4d   : > { %v1274_v24 = vrot.slane %v1200_v21, 7  ;;  %v1029_v25 = vld [vmem:[#allocation2 + $0x58] sm:$0x3]  ;;  %v1099_v26 = vrot.slane %v1027_v22, 6  ;;  %v1201_v40 = vld [vmem:[#allocation2 + $0x60] sm:$0x8] }
  0x4e   : > { %v1103_v28 = vrot.slane %v1029_v25, 6  ;;  %v1271_v32 = vsel %vm15341_vm2, %v11809_v14, %v1270_v23  ;;  %v1203_v41 = vld [vmem:[#allocation2 + $0x6c] sm:$0x8]  ;;  %v1030_v42 = vld [vmem:[#allocation2 + $0x60] sm:$0xc]  ;;  %v11811_v43 = vrot.slane %v1201_v40, 11 }
  0x4f   : > { %v1275_v33 = vsel %vm15341_vm2, %v11810_v15, %v1274_v24  ;;  %v1100_v35 = vsel %vm15360_vm5, %v11785_v17, %v1099_v26  ;;  %v11812_v44 = vrot.slane %v1203_v41, 11  ;;  %v1032_v45 = vld [vmem:[#allocation2 + $0x6c] sm:$0xc]  ;;  %v11787_v46 = vrot.slane %v1030_v42, 10  ;;  %v1202_v50 = vld [vmem:[#allocation2 + $0x64] sm:$0x7] }
  0x50   : > { %v11824_v36 = vcombine.low %v1271_v32, %v1275_v33  ;;  %v1104_v37 = vsel %vm15360_vm5, %v11786_v27, %v1103_v28  ;;  %v11788_v48 = vrot.slane %v1032_v45, 10  ;;  %v1031_v51 = vld [vmem:[#allocation2 + $0x64] sm:$0x3]  ;;  %v1278_v53 = vrot.slane %v1202_v50, 7  ;;  %v1204_v60 = vld [vmem:[#allocation2 + $0x70] sm:$0x7] }
  0x51   : > { %v11800_v39 = vcombine.low %v1100_v35, %v1104_v37  ;;  %v1107_v54 = vrot.slane %v1031_v51, 6  ;;  %v1033_v62 = vld [vmem:[#allocation2 + $0x70] sm:$0x3]  ;;  %v1282_v2 = vrot.slane %v1204_v60, 7  ;;  %741 = vst [vmem:[#allocation2 + $0x7c] sm:$0x7] %v676_v63 }
  0x52   : > { %2941 = vmatprep.mubr.bf16.mxu1 %v11824_v36  ;;  %v1279_v61 = vsel %vm15341_vm2, %v11811_v43, %v1278_v53  ;;  %v1111_v4 = vrot.slane %v1033_v62, 6  ;;  %v14714_v12 = vld [vmem:[%s15323_s23 + $0xb8] sm:$0xff]   ;;  %v1436_v13 = vld [vmem:[#allocation2 + $0x48] sm:$0xc]  ;;  %v1437_v14 = vld [vmem:[#allocation2 + $0x4c] sm:$0x3] }
  0x53   : > { %2942 = vmatmul.mubr.bf16.gmra.mrb[4].mxu1 %v11800_v39  ;;  %v1108_v3 = vsel %vm15360_vm5, %v11787_v46, %v1107_v54  ;;  %v1283_v7 = vsel %vm15341_vm2, %v11812_v44, %v1282_v2  ;;  %v1438_v15 = vld [vmem:[#allocation2 + $0x54] sm:$0xc]  ;;  %v1439_v16 = vld [vmem:[#allocation2 + $0x58] sm:$0x3]  ;;  %v1205_v17 = vld [vmem:[#allocation2 + $0x78] sm:$0x8]  ;;  %13191 = vmatpush3.bf16.msra.mxu0 %v14714_v12 }
  0x54   : > { %v1112_v8 = vsel %vm15360_vm5, %v11788_v48, %v1111_v4  ;;  %v11825_v9 = vcombine.low %v1279_v61, %v1283_v7  ;;  %v1034_v19 = vld [vmem:[#allocation2 + $0x78] sm:$0xc]  ;;  %v11839_v20 = vrot.slane %v1436_v13, 10  ;;  %v1502_v21 = vrot.slane %v1437_v14, 6  ;;  %v1207_v22 = vld [vmem:[#allocation2 + $0x84] sm:$0x8] }
  0x55   : > { %v11801_v10 = vcombine.low %v1108_v3, %v1112_v8  ;;  %v11813_v23 = vrot.slane %v1205_v17, 11  ;;  %v1036_v24 = vld [vmem:[#allocation2 + $0x84] sm:$0xc]  ;;  %v11789_v25 = vrot.slane %v1034_v19, 10  ;;  %v11814_v27 = vrot.slane %v1207_v22, 11  ;;  %v14718_v5 = vld [vmem:[%s15323_s23 + $0x148] sm:$0xff]  }
  0x56   : > { %2949 = vmatprep.mubr.bf16.mxu1 %v11825_v9  ;;  %v11790_v29 = vrot.slane %v1036_v24, 10  ;;  %v1208_v30 = vld [vmem:[#allocation2 + $0x88] sm:$0x7]  ;;  %v1503_v35 = vsel %vm15360_vm5, %v11839_v20, %v1502_v21  ;;  %v11840_v38 = vrot.slane %v1438_v15, 10  ;;  %v1506_v39 = vrot.slane %v1439_v16, 6  ;;  %v14716_v50 = vld [vmem:[%s15323_s23 + $0x1c0] sm:$0xff]   ;;  %13242 = vmatprep.subr.bf16.mxu1 %v14718_v5 }
  0x57   : > { %v1037_v32 = vld [vmem:[#allocation2 + $0x88] sm:$0x3]  ;;  %v1290_v36 = vrot.slane %v1208_v30, 7  ;;  %v1209_v40 = vld [vmem:[#allocation2 + $0x120] sm:$0x8]  ;;  %13304 = vmatprep.subr.bf16.mxu0 %v14716_v50  ;;  %v14722_v24 = vld [vmem:[%s15323_s23 + $0x150] sm:$0xff]  }
  0x58   : > { %v1206_v26 = vld [vmem:[#allocation2 + $0x7c] sm:$0x7]  ;;  %v1119_v37 = vrot.slane %v1037_v32, 6  ;;  %v1210_v43 = vld [vmem:[#allocation2 + $0x124] sm:$0x7]  ;;  %v1507_v48 = vsel %vm15360_vm5, %v11840_v38, %v1506_v39  ;;  %v11815_v49 = vrot.slane %v1209_v40, 11 }
  0x59   : > { %v1035_v28 = vld [vmem:[#allocation2 + $0x7c] sm:$0x3]  ;;  %v1286_v31 = vrot.slane %v1206_v26, 7  ;;  %v1211_v44 = vld [vmem:[#allocation2 + $0x12c] sm:$0x8]  ;;  %v1291_v46 = vsel %vm15341_vm2, %v11814_v27, %v1290_v36  ;;  %v11855_v53 = vcombine.low %v1503_v35, %v1507_v48  ;;  %v1294_v54 = vrot.slane %v1210_v43, 7 }
  0x5a   : > { %v1115_v33 = vrot.slane %v1035_v28, 6  ;;  %v1212_v45 = vld [vmem:[#allocation2 + $0x130] sm:$0x7]  ;;  %v1120_v47 = vsel %vm15360_vm5, %v11790_v29, %v1119_v37  ;;  %v11816_v57 = vrot.slane %v1211_v44, 11  ;;  %v1038_v59 = vld [vmem:[#allocation2 + $0x120] sm:$0xc] }
  0x5b   : > { %2950 = vmatmul.mubr.bf16.gmra.mrb[8].mxu1 %v11801_v10  ;;  %v1287_v41 = vsel %vm15341_vm2, %v11813_v23, %v1286_v31  ;;  %v1298_v58 = vrot.slane %v1212_v45, 7  ;;  %3030 = vmatprep.mubr.bf16.mxu0 %v11855_v53  ;;  %v1295_v60 = vsel %vm15341_vm2, %v11815_v49, %v1294_v54  ;;  %v1039_v61 = vld [vmem:[#allocation2 + $0x124] sm:$0x3]  ;;  %v1040_v62 = vld [vmem:[#allocation2 + $0x12c] sm:$0xc]  ;;  %v11791_v2 = vrot.slane %v1038_v59, 10 }
  0x5c   : > { %v1116_v42 = vsel %vm15360_vm5, %v11789_v25, %v1115_v33  ;;  %v11826_v51 = vcombine.low %v1287_v41, %v1291_v46  ;;  %v1041_v63 = vld [vmem:[#allocation2 + $0x130] sm:$0x3]  ;;  %3031 = vmatmul.mubr.bf16.vlgmr.msra.gmra.mrb[16].mxu0 %v14715_v55  ;;  %v1123_v3 = vrot.slane %v1039_v61, 6  ;;  %v11792_v4 = vrot.slane %v1040_v62, 10  ;;  %v14719_v8 = vld [vmem:[%s15323_s23 + $0x108] sm:$0xff]   ;;  %v14725_v36 = vld [vmem:[%s15323_s23 + $0x158] sm:$0xff]  }
  0x5d   : > { %v11802_v52 = vcombine.low %v1116_v42, %v1120_v47  ;;  %v1299_v1 = vsel %vm15341_vm2, %v11816_v57, %v1298_v58  ;;  %v1127_v7 = vrot.slane %v1041_v63, 6  ;;  %13305 = vmatpush3.bf16.msra.mxu0 %v14717_v56  ;;  %13243 = vmatpush3.bf16.msra.mxu1 %v14719_v8  ;;  %v1440_v11 = vld [vmem:[#allocation2 + $0x60] sm:$0xc]  ;;  %v1441_v12 = vld [vmem:[#allocation2 + $0x64] sm:$0x3]  ;;  %v14721_v20 = vld [vmem:[%s15323_s23 + $0x1c8] sm:$0xff]  }
  0x5e   : > { %2957 = vmatprep.mubr.bf16.mxu1 %v11826_v51  ;;  %v11827_v6 = vcombine.low %v1295_v60, %v1299_v1  ;;  %v1124_v9 = vsel %vm15360_vm5, %v11791_v2, %v1123_v3  ;;  %v1442_v13 = vld [vmem:[#allocation2 + $0x6c] sm:$0xc]  ;;  %v1443_v15 = vld [vmem:[#allocation2 + $0x70] sm:$0x3]  ;;  %v11841_v16 = vrot.slane %v1440_v11, 10  ;;  %v1510_v17 = vrot.slane %v1441_v12, 6  ;;  %13306 = vmatprep.subr.bf16.mxu0 %v14721_v20 }
  0x5f   : > { %v1128_v10 = vsel %vm15360_vm5, %v11792_v4, %v1127_v7  ;;  %v11842_v19 = vrot.slane %v1442_v13, 10  ;;  %v1514_v21 = vrot.slane %v1443_v15, 6  ;;  %v643_v22 = vld [vmem:[%s15352_s26 + $0x20] sm:$0xf]  ;;  %v644_v23 = vld [vmem:[%s15352_s26 + $0x24] sm:$0xf]  ;;  %13244 = vmatprep.subr.bf16.mxu1 %v14722_v24 }
  0x60   : > { %v11803_v14 = vcombine.low %v1124_v9, %v1128_v10  ;;  %v1511_v25 = vsel %vm15360_vm5, %v11841_v16, %v1510_v17  ;;  %v683_v26 = vrot.slane %v643_v22, 5  ;;  %v685_v27 = vrot.slane %v644_v23, 5  ;;  %v14720_v29 = vld [vmem:[#allocation2 + $0x4c] ss:$12 sps:$4 sm:$0xff]   ;;  %v14724_v35 = vld [vmem:[%s15323_s23 + $0x110] sm:$0xff]   ;;  %v14729_v53 = vld [vmem:[%s15323_s23 + $0x160] sm:$0xff]  }
  0x61   : > { %v1515_v28 = vsel %vm15360_vm5, %v11842_v19, %v1514_v21  ;;  %v14723_v33 = vld [vmem:[%s15323_s23 + $0x188] sm:$0xff]   ;;  %13245 = vmatpush3.bf16.msra.mxu1 %v14724_v35  ;;  %v14726_v37 = vld [vmem:[%s15323_s23 + $0x118] sm:$0xff]   ;;  %v1446_v40 = vld [vmem:[#allocation2 + $0x84] sm:$0xc] }
  0x62   : > { %v11856_v30 = vcombine.low %v1511_v25, %v1515_v28  ;;  %v684_v31 = vrot.slane %v683_v26, 4  ;;  %v686_v32 = vrot.slane %v685_v27, 4  ;;  %748 = vst [vmem:[#allocation2 + $0x138] sm:$0x8] %v683_v26  ;;  %750 = vst [vmem:[#allocation2 + $0x144] sm:$0x8] %v685_v27  ;;  %13307 = vmatpush3.bf16.msra.mxu0 %v14723_v33  ;;  %13246 = vmatprep.subr.bf16.mxu1 %v14725_v36 }
  0x63   : > { %2958 = vmatmul.mubr.bf16.gmra.mrb[12].mxu1 %v11802_v52  ;;  %v1444_v38 = vld [vmem:[#allocation2 + $0x78] sm:$0xc]  ;;  %v1445_v39 = vld [vmem:[#allocation2 + $0x7c] sm:$0x3]  ;;  %v1447_v41 = vld [vmem:[#allocation2 + $0x88] sm:$0x3] }
  0x64   : > { %2965 = vmatprep.mubr.bf16.mxu1 %v11827_v6  ;;  %3038 = vmatprep.mubr.bf16.mxu0 %v11856_v30  ;;  %749 = vst [vmem:[#allocation2 + $0x13c] sm:$0x7] %v684_v31  ;;  %751 = vst [vmem:[#allocation2 + $0x148] sm:$0x7] %v686_v32  ;;  %v11843_v42 = vrot.slane %v1444_v38, 10  ;;  %v1518_v43 = vrot.slane %v1445_v39, 6 }
  0x65   : > { %3039 = vmatmul.mubr.bf16.gmra.mrb[20].mxu0 %v14720_v29  ;;  %v11844_v44 = vrot.slane %v1446_v40, 10  ;;  %v14728_v45 = vld [vmem:[%s15323_s23 + $0x1d0] sm:$0xff]   ;;  %13247 = vmatpush3.bf16.msra.mxu1 %v14726_v37  ;;  %v1522_v1 = vrot.slane %v1447_v41, 6  ;;  %v645_v2 = vld [vmem:[%s15352_s26 + $0x28] sm:$0xf] }
  0x66   : > { %13308 = vmatprep.subr.bf16.mxu0 %v14728_v45  ;;  %13248 = vmatprep.subr.bf16.mxu1 %v14729_v53  ;;  %v1519_v63 = vsel %vm15360_vm5, %v11843_v42, %v1518_v43  ;;  %v646_v3 = vld [vmem:[%s15352_s26 + $0x2c] sm:$0xf]  ;;  %v687_v7 = vrot.slane %v645_v2, 5  ;;  %v14730_v8 = vld [vmem:[%s15323_s23 + $0x190] sm:$0xff]   ;;  %v641_v22 = vld [vmem:[%s15352_s26 + $0x18] sm:$0xf] }
  0x67   : > { %v1523_v11 = vsel %vm15360_vm5, %v11844_v44, %v1522_v1  ;;  %v689_v12 = vrot.slane %v646_v3, 5  ;;  %v14727_v13 = vld [vmem:[#allocation2 + $0x64] ss:$12 sps:$4 sm:$0xff]   ;;  %13309 = vmatpush3.bf16.msra.mxu0 %v14730_v8  ;;  %v14732_v19 = vld [vmem:[%s15323_s23 + $0x168] sm:$0xff]   ;;  %v642_v23 = vld [vmem:[%s15352_s26 + $0x1c] sm:$0xf] }
  0x68   : > { %v11857_v16 = vcombine.low %v1519_v63, %v1523_v11  ;;  %v688_v17 = vrot.slane %v687_v7, 4  ;;  %752 = vst [vmem:[#allocation2 + $0x150] sm:$0x8] %v687_v7  ;;  %v14733_v21 = vld [vmem:[%s15323_s23 + $0x128] sm:$0xff]   ;;  %v679_v24 = vrot.slane %v641_v22, 5  ;;  %v681_v25 = vrot.slane %v642_v23, 5 }
  0x69   : > { %v1213_v46 = vld [vmem:[#allocation2 + $0x138] sm:$0x8]  ;;  %v1215_v47 = vld [vmem:[#allocation2 + $0x144] sm:$0x8]  ;;  %v690_v20 = vrot.slane %v689_v12, 4 }
  0x6a   : > { %v1042_v48 = vld [vmem:[#allocation2 + $0x138] sm:$0xc]  ;;  %v11817_v49 = vrot.slane %v1213_v46, 11  ;;  %v11818_v50 = vrot.slane %v1215_v47, 11  ;;  %v1044_v51 = vld [vmem:[#allocation2 + $0x144] sm:$0xc]  ;;  %3046 = vmatprep.mubr.bf16.mxu0 %v11857_v16 }
  0x6b   : > { %2966 = vmatmul.mubr.bf16.gmra.mrb[16].mxu1 %v11803_v14  ;;  %v11793_v52 = vrot.slane %v1042_v48, 10  ;;  %v1214_v54 = vld [vmem:[#allocation2 + $0x13c] sm:$0x7]  ;;  %v1216_v55 = vld [vmem:[#allocation2 + $0x148] sm:$0x7]  ;;  %v11794_v61 = vrot.slane %v1044_v51, 10 }
  0x6c   : > { %v1043_v56 = vld [vmem:[#allocation2 + $0x13c] sm:$0x3]  ;;  %v1302_v57 = vrot.slane %v1214_v54, 7  ;;  %v1306_v58 = vrot.slane %v1216_v55, 7  ;;  %v1045_v59 = vld [vmem:[#allocation2 + $0x148] sm:$0x3] }
  0x6d   : > { %v1131_v60 = vrot.slane %v1043_v56, 6  ;;  %v1135_v62 = vrot.slane %v1045_v59, 6  ;;  %v14731_v14 = vld [vmem:[%s15323_s23 + $0x120] sm:$0xff]   ;;  %754 = vst [vmem:[#allocation2 + $0x15c] sm:$0x8] %v689_v12  ;;  %3047 = vmatmul.mubr.bf16.gmra.mrb[24].mxu0 %v14727_v13  ;;  %v680_v32 = vrot.slane %v679_v24, 4 }
  0x6e   : > { %v1303_v4 = vsel %vm15341_vm2, %v11817_v49, %v1302_v57  ;;  %v1307_v5 = vsel %vm15341_vm2, %v11818_v50, %v1306_v58  ;;  %13249 = vmatpush3.bf16.msra.mxu1 %v14731_v14  ;;  %753 = vst [vmem:[#allocation2 + $0x154] sm:$0x7] %v688_v17  ;;  %755 = vst [vmem:[#allocation2 + $0x160] sm:$0x7] %v690_v20  ;;  %v647_v26 = vld [vmem:[%s15352_s26 + $0x30] sm:$0xf] }
  0x6f   : > { %v1132_v6 = vsel %vm15360_vm5, %v11793_v52, %v1131_v60  ;;  %v11828_v9 = vcombine.low %v1303_v4, %v1307_v5  ;;  %v1136_v10 = vsel %vm15360_vm5, %v11794_v61, %v1135_v62  ;;  %13250 = vmatprep.subr.bf16.mxu1 %v14732_v19  ;;  %v648_v27 = vld [vmem:[%s15352_s26 + $0x34] sm:$0xf]  ;;  %v691_v28 = vrot.slane %v647_v26, 5  ;;  %v1217_v30 = vld [vmem:[#allocation2 + $0x150] sm:$0x8]  ;;  %v14735_v53 = vld [vmem:[%s15323_s23 + $0x1d8] sm:$0xff]  }
  0x70   : > { %v11804_v15 = vcombine.low %v1132_v6, %v1136_v10  ;;  %v693_v29 = vrot.slane %v648_v27, 5  ;;  %v1046_v31 = vld [vmem:[#allocation2 + $0x150] sm:$0xc]  ;;  %v682_v33 = vrot.slane %v681_v25, 4  ;;  %744 = vst [vmem:[#allocation2 + $0x90] sm:$0x8] %v679_v24  ;;  %13310 = vmatprep.subr.bf16.mxu0 %v14735_v53 }
  0x71   : > { %2973 = vmatprep.mubr.bf16.mxu1 %v11828_v9  ;;  %746 = vst [vmem:[#allocation2 + $0x9c] sm:$0x8] %v681_v25  ;;  %v11819_v36 = vrot.slane %v1217_v30, 11  ;;  %v11795_v38 = vrot.slane %v1046_v31, 10  ;;  %756 = vst [vmem:[#allocation2 + $0x168] sm:$0x8] %v691_v28 }
  0x72   : > { %13251 = vmatpush3.bf16.msra.mxu1 %v14733_v21  ;;  %758 = vst [vmem:[#allocation2 + $0x174] sm:$0x8] %v693_v29  ;;  %745 = vst [vmem:[#allocation2 + $0x94] sm:$0x7] %v680_v32  ;;  %v692_v49 = vrot.slane %v691_v28, 4  ;;  %v694_v50 = vrot.slane %v693_v29, 4 }
  0x73   : > { %2974 = vmatmul.mubr.bf16.gmra.mrb[20].mxu1 %v11804_v15  ;;  %747 = vst [vmem:[#allocation2 + $0xa0] sm:$0x7] %v682_v33  ;;  %v14736_v56 = vld [vmem:[%s15323_s23 + $0x170] sm:$0xff]   ;;  %v14734_v8 = vld [vmem:[#allocation2 + $0x7c] ss:$12 sps:$4 sm:$0xff]  }
  0x74   : > { %v1219_v35 = vld [vmem:[#allocation2 + $0x15c] sm:$0x8]  ;;  %757 = vst [vmem:[#allocation2 + $0x16c] sm:$0x7] %v692_v49  ;;  %759 = vst [vmem:[#allocation2 + $0x178] sm:$0x7] %v694_v50  ;;  %13252 = vmatprep.subr.bf16.mxu1 %v14736_v56 }
  0x75   : > { %v1048_v37 = vld [vmem:[#allocation2 + $0x15c] sm:$0xc]  ;;  %v1218_v39 = vld [vmem:[#allocation2 + $0x154] sm:$0x7]  ;;  %v11820_v40 = vrot.slane %v1219_v35, 11  ;;  %v14743_v49 = vld [vmem:[%s15323_s23 + $0x1e0] sm:$0xff]  }
  0x76   : > { %v1047_v41 = vld [vmem:[#allocation2 + $0x154] sm:$0x3]  ;;  %v11796_v42 = vrot.slane %v1048_v37, 10  ;;  %v1220_v43 = vld [vmem:[#allocation2 + $0x160] sm:$0x7]  ;;  %v1310_v44 = vrot.slane %v1218_v39, 7 }
  0x77   : > { %v1049_v45 = vld [vmem:[#allocation2 + $0x160] sm:$0x3]  ;;  %v1139_v46 = vrot.slane %v1047_v41, 6  ;;  %v1314_v47 = vrot.slane %v1220_v43, 7  ;;  %v1448_v59 = vld [vmem:[#allocation2 + $0x90] sm:$0xc] }
  0x78   : > { %v1143_v48 = vrot.slane %v1049_v45, 6  ;;  %v1311_v51 = vsel %vm15341_vm2, %v11819_v36, %v1310_v44  ;;  %v1450_v60 = vld [vmem:[#allocation2 + $0x9c] sm:$0xc]  ;;  %v11845_v61 = vrot.slane %v1448_v59, 10  ;;  %v1221_v63 = vld [vmem:[#allocation2 + $0x168] sm:$0x8] }
  0x79   : > { %v1140_v52 = vsel %vm15360_vm5, %v11795_v38, %v1139_v46  ;;  %v1315_v54 = vsel %vm15341_vm2, %v11820_v40, %v1314_v47  ;;  %v11846_v62 = vrot.slane %v1450_v60, 10  ;;  %v1223_v1 = vld [vmem:[#allocation2 + $0x174] sm:$0x8]  ;;  %v1449_v2 = vld [vmem:[#allocation2 + $0x94] sm:$0x3]  ;;  %v11821_v4 = vrot.slane %v1221_v63, 11 }
  0x7a   : > { %v1144_v55 = vsel %vm15360_vm5, %v11796_v42, %v1143_v48  ;;  %v11829_v57 = vcombine.low %v1311_v51, %v1315_v54  ;;  %v1451_v3 = vld [vmem:[#allocation2 + $0xa0] sm:$0x3]  ;;  %v11822_v5 = vrot.slane %v1223_v1, 11  ;;  %v1526_v6 = vrot.slane %v1449_v2, 6  ;;  %v1050_v9 = vld [vmem:[#allocation2 + $0x168] sm:$0xc] }
  0x7b   : > { %v11805_v58 = vcombine.low %v1140_v52, %v1144_v55  ;;  %v1530_v7 = vrot.slane %v1451_v3, 6  ;;  %v1052_v10 = vld [vmem:[#allocation2 + $0x174] sm:$0xc]  ;;  %v11797_v11 = vrot.slane %v1050_v9, 10  ;;  %v14737_v13 = vld [vmem:[%s15323_s23 + $0x198] sm:$0xff]   ;;  %v14744_v59 = vld [vmem:[%s15323_s23 + $0x1a0] sm:$0xff]  }
  0x7c   : > { %2981 = vmatprep.mubr.bf16.mxu1 %v11829_v57  ;;  %v11798_v12 = vrot.slane %v1052_v10, 10  ;;  %v14738_v14 = vld [vmem:[%s15323_s23 + $0x130] sm:$0xff]   ;;  %v1527_v15 = vsel %vm15360_vm5, %v11845_v61, %v1526_v6  ;;  %v1222_v19 = vld [vmem:[#allocation2 + $0x16c] sm:$0x7]  ;;  %v1224_v20 = vld [vmem:[#allocation2 + $0x178] sm:$0x7]  ;;  %13311 = vmatpush3.bf16.msra.mxu0 %v14737_v13 }
  0x7d   : > { %2982 = vmatmul.mubr.bf16.gmra.mrb[24].mxu1 %v11805_v58  ;;  %v1531_v16 = vsel %vm15360_vm5, %v11846_v62, %v1530_v7  ;;  %v1051_v21 = vld [vmem:[#allocation2 + $0x16c] sm:$0x3]  ;;  %v1318_v22 = vrot.slane %v1222_v19, 7  ;;  %v1322_v23 = vrot.slane %v1224_v20, 7  ;;  %v1053_v24 = vld [vmem:[#allocation2 + $0x178] sm:$0x3]  ;;  %13312 = vmatprep.subr.bf16.mxu0 %v14743_v49 }
  0x7e   : > { %v11858_v17 = vcombine.low %v1527_v15, %v1531_v16  ;;  %13253 = vmatpush3.bf16.msra.mxu1 %v14738_v14  ;;  %v1147_v25 = vrot.slane %v1051_v21, 6  ;;  %v14739_v26 = vld [vmem:[%s15323_s23 + $0x178] sm:$0xff]   ;;  %v1151_v27 = vrot.slane %v1053_v24, 6  ;;  %v1454_v37 = vld [vmem:[#allocation2 + $0x144] sm:$0xc] }
  0x7f   : > { %v14740_v28 = vld [vmem:[%s15323_s23 + $0x138] sm:$0xff]   ;;  %v1319_v29 = vsel %vm15341_vm2, %v11821_v4, %v1318_v22  ;;  %v1323_v30 = vsel %vm15341_vm2, %v11822_v5, %v1322_v23  ;;  %13254 = vmatprep.subr.bf16.mxu1 %v14739_v26  ;;  %v1455_v38 = vld [vmem:[#allocation2 + $0x148] sm:$0x3]  ;;  %v11848_v42 = vrot.slane %v1454_v37, 10  ;;  %v14741_v45 = vld [vmem:[#allocation2 + $0x124] ss:$12 sps:$4 sm:$0xff]  }
  0x80   : > { %3054 = vmatprep.mubr.bf16.mxu0 %v11858_v17  ;;  %v1148_v31 = vsel %vm15360_vm5, %v11797_v11, %v1147_v25  ;;  %v1452_v32 = vld [vmem:[#allocation2 + $0x138] sm:$0xc]  ;;  %v1453_v33 = vld [vmem:[#allocation2 + $0x13c] sm:$0x3]  ;;  %v11830_v35 = vcombine.low %v1319_v29, %v1323_v30  ;;  %v1152_v36 = vsel %vm15360_vm5, %v11798_v12, %v1151_v27  ;;  %v1538_v43 = vrot.slane %v1455_v38, 6  ;;  %13313 = vmatpush3.bf16.msra.mxu0 %v14744_v59  ;;  %v14747_v12 = vld [vmem:[%s15323_s23 + $0x1e8] sm:$0xff]  }
  0x81   : > { %3055 = vmatmul.mubr.bf16.gmra.mrb[28].mxu0 %v14734_v8  ;;  %v11847_v39 = vrot.slane %v1452_v32, 10  ;;  %v1534_v40 = vrot.slane %v1453_v33, 6  ;;  %v11806_v41 = vcombine.low %v1148_v31, %v1152_v36  ;;  %v14742_v47 = vld [vmem:[#allocation2 + $0x4c] ss:$12 sps:$4 sm:$0xff]   ;;  %v1604_v50 = vld [vmem:[#allocation2 + $0x48] sm:$0x8]  ;;  %13314 = vmatprep.subr.bf16.mxu0 %v14747_v12 }
  0x82   : > { %13255 = vmatpush3.bf16.msra.mxu1 %v14740_v28  ;;  %2989 = vmatprep.mubr.bf16.mxu1 %v11830_v35  ;;  %v1539_v46 = vsel %vm15360_vm5, %v11848_v42, %v1538_v43  ;;  %v1605_v51 = vld [vmem:[#allocation2 + $0x4c] sm:$0x7]  ;;  %v1606_v52 = vld [vmem:[#allocation2 + $0x54] sm:$0x8]  ;;  %v1607_v53 = vld [vmem:[#allocation2 + $0x58] sm:$0x7] }
  0x83   : > { %v1535_v44 = vsel %vm15360_vm5, %v11847_v39, %v1534_v40  ;;  %v11863_v54 = vrot.slane %v1604_v50, 11  ;;  %v1670_v55 = vrot.slane %v1605_v51, 7  ;;  %v11864_v56 = vrot.slane %v1606_v52, 11  ;;  %v1456_v60 = vld [vmem:[#allocation2 + $0x150] sm:$0xc]  ;;  %v14748_v23 = vld [vmem:[%s15323_s23 + $0x1a8] sm:$0xff]  }
  0x84   : > { %v11859_v48 = vcombine.low %v1535_v44, %v1539_v46  ;;  %v1674_v57 = vrot.slane %v1607_v53, 7  ;;  %v1457_v61 = vld [vmem:[#allocation2 + $0x154] sm:$0x3]  ;;  %v1458_v63 = vld [vmem:[#allocation2 + $0x15c] sm:$0xc]  ;;  %v11849_v2 = vrot.slane %v1456_v60, 10  ;;  %13315 = vmatpush3.bf16.msra.mxu0 %v14748_v23 }
  0x85   : > { %2990 = vmatmul.mubr.bf16.gmra.mrb[28].mxu1 %v11806_v41  ;;  %v1671_v58 = vsel %vm15341_vm2, %v11863_v54, %v1670_v55  ;;  %v1459_v1 = vld [vmem:[#allocation2 + $0x160] sm:$0x3]  ;;  %v1542_v3 = vrot.slane %v1457_v61, 6  ;;  %v11850_v5 = vrot.slane %v1458_v63, 10  ;;  %v14745_v8 = vld [vmem:[#allocation2 + $0x13c] ss:$12 sps:$4 sm:$0xff]  }
  0x86   : > { %3127 = vmatprep.mubr.bf16.mxu1 %v14742_v47  ;;  %3062 = vmatprep.mubr.bf16.mxu0 %v11859_v48  ;;  %v1675_v62 = vsel %vm15341_vm2, %v11864_v56, %v1674_v57  ;;  %v1546_v6 = vrot.slane %v1459_v1, 6  ;;  %v14746_v10 = vld [vmem:[#allocation2 + $0x64] ss:$12 sps:$4 sm:$0xff]   ;;  %v1608_v13 = vld [vmem:[#allocation2 + $0x60] sm:$0x8]  ;;  %v14755_v60 = vld [vmem:[%s15323_s23 + $0x1f8] sm:$0xff]  }
  0x87   : > { %v11879_v4 = vcombine.low %v1671_v58, %v1675_v62  ;;  %v1543_v7 = vsel %vm15360_vm5, %v11849_v2, %v1542_v3  ;;  %v1609_v14 = vld [vmem:[#allocation2 + $0x64] sm:$0x7]  ;;  %v1610_v15 = vld [vmem:[#allocation2 + $0x6c] sm:$0x8]  ;;  %v1611_v16 = vld [vmem:[#allocation2 + $0x70] sm:$0x7] }
  0x88   : > { %v1547_v9 = vsel %vm15360_vm5, %v11850_v5, %v1546_v6  ;;  %v11865_v17 = vrot.slane %v1608_v13, 11  ;;  %v1678_v19 = vrot.slane %v1609_v14, 7  ;;  %v11866_v20 = vrot.slane %v1610_v15, 11  ;;  %v1460_v24 = vld [vmem:[#allocation2 + $0x168] sm:$0xc]  ;;  %v14751_v40 = vld [vmem:[%s15323_s23 + $0x1f0] sm:$0xff]  }
  0x89   : > { %3063 = vmatmul.mubr.bf16.gmra.mrb[32].mxu0 %v14741_v45  ;;  %v11860_v11 = vcombine.low %v1543_v7, %v1547_v9  ;;  %v1682_v21 = vrot.slane %v1611_v16, 7  ;;  %v1461_v25 = vld [vmem:[#allocation2 + $0x16c] sm:$0x3]  ;;  %v1462_v27 = vld [vmem:[#allocation2 + $0x174] sm:$0xc]  ;;  %v11851_v29 = vrot.slane %v1460_v24, 10  ;;  %13316 = vmatprep.subr.bf16.mxu0 %v14751_v40 }
  0x8a   : > { %v1679_v22 = vsel %vm15341_vm2, %v11865_v17, %v1678_v19  ;;  %v1463_v28 = vld [vmem:[#allocation2 + $0x178] sm:$0x3]  ;;  %v1550_v30 = vrot.slane %v1461_v25, 6  ;;  %v11852_v32 = vrot.slane %v1462_v27, 10  ;;  %v14749_v36 = vld [vmem:[#allocation2 + $0x154] ss:$12 sps:$4 sm:$0xff]  }
  0x8b   : > { %3070 = vmatprep.mubr.bf16.mxu0 %v11860_v11  ;;  %v1683_v26 = vsel %vm15341_vm2, %v11866_v20, %v1682_v21  ;;  %v1554_v33 = vrot.slane %v1463_v28, 6  ;;  %v14750_v38 = vld [vmem:[#allocation2 + $0x7c] ss:$12 sps:$4 sm:$0xff]   ;;  %v1612_v41 = vld [vmem:[#allocation2 + $0x78] sm:$0x8]  ;;  %v14752_v50 = vld [vmem:[%s15323_s23 + $0x1b0] sm:$0xff]  }
  0x8c   : > { %v11880_v31 = vcombine.low %v1679_v22, %v1683_v26  ;;  %v1551_v35 = vsel %vm15360_vm5, %v11851_v29, %v1550_v30  ;;  %v1613_v42 = vld [vmem:[#allocation2 + $0x7c] sm:$0x7]  ;;  %v1614_v43 = vld [vmem:[#allocation2 + $0x84] sm:$0x8]  ;;  %v1615_v44 = vld [vmem:[#allocation2 + $0x88] sm:$0x7]  ;;  %13317 = vmatpush3.bf16.msra.mxu0 %v14752_v50 }
  0x8d   : > { %3128 = vmatmul.mubr.bf16.vlgmr.msra.gmra.mrb[32].mxu1 %v11879_v4  ;;  %v1555_v37 = vsel %vm15360_vm5, %v11852_v32, %v1554_v33  ;;  %v11867_v45 = vrot.slane %v1612_v41, 11  ;;  %v1686_v46 = vrot.slane %v1613_v42, 7  ;;  %v11868_v47 = vrot.slane %v1614_v43, 11  ;;  %v649_v51 = vld [vmem:[%s15352_s26 + $0x38] sm:$0xf]  ;;  %13318 = vmatprep.subr.bf16.mxu0 %v14755_v60  ;;  %v14757_v9 = vld [vmem:[%s15323_s23 + $0x200] sm:$0xff]  }
  0x8e   : > { %3135 = vmatprep.mubr.bf16.mxu1 %v14746_v10  ;;  %v11861_v39 = vcombine.low %v1551_v35, %v1555_v37  ;;  %v1690_v48 = vrot.slane %v1615_v44, 7  ;;  %v650_v52 = vld [vmem:[%s15352_s26 + $0x3c] sm:$0xf]  ;;  %v695_v54 = vrot.slane %v649_v51, 5  ;;  %v14754_v59 = vld [vmem:[#allocation2 + $0x94] ss:$12 sps:$4 sm:$0xff]   ;;  %14412 = vmatprep.subr.bf16.mxu1 %v14757_v9 }
  0x8f   : > { %v1687_v49 = vsel %vm15341_vm2, %v11867_v45, %v1686_v46  ;;  %v697_v55 = vrot.slane %v650_v52, 5  ;;  %v1616_v61 = vld [vmem:[#allocation2 + $0x90] sm:$0x8]  ;;  %v1617_v62 = vld [vmem:[#allocation2 + $0x94] sm:$0x7]  ;;  %v14756_v6 = vld [vmem:[%s15323_s23 + $0x1b8] sm:$0xff]   ;;  %14413 = vmatpush3.bf16.msra.mxu1 %v14757_v9 }
  0x90   : > { %v1691_v53 = vsel %vm15341_vm2, %v11868_v47, %v1690_v48  ;;  %v696_v57 = vrot.slane %v695_v54, 4  ;;  %760 = vst [vmem:[#allocation2 + $0x180] sm:$0x8] %v695_v54  ;;  %v1618_v63 = vld [vmem:[#allocation2 + $0x9c] sm:$0x8]  ;;  %v11869_v2 = vrot.slane %v1616_v61, 11  ;;  %13319 = vmatpush3.bf16.msra.mxu0 %v14756_v6 }
  0x91   : > { %3071 = vmatmul.mubr.bf16.gmra.mrb[36].mxu0 %v14745_v8  ;;  %v11881_v56 = vcombine.low %v1687_v49, %v1691_v53  ;;  %v698_v58 = vrot.slane %v697_v55, 4  ;;  %762 = vst [vmem:[#allocation2 + $0x18c] sm:$0x8] %v697_v55  ;;  %v1619_v1 = vld [vmem:[#allocation2 + $0xa0] sm:$0x7]  ;;  %v1694_v3 = vrot.slane %v1617_v62, 7 }
  0x92   : > { %3078 = vmatprep.mubr.bf16.mxu0 %v11861_v39  ;;  %761 = vst [vmem:[#allocation2 + $0x184] sm:$0x7] %v696_v57  ;;  %v11870_v4 = vrot.slane %v1618_v63, 11  ;;  %v1698_v5 = vrot.slane %v1619_v1, 7  ;;  %v2013_v10 = vld [vmem:[#allocation2 + $0x60] sm:$0x8] }
  0x93   : > { %763 = vst [vmem:[#allocation2 + $0x190] sm:$0x7] %v698_v58  ;;  %v1695_v7 = vsel %vm15341_vm2, %v11869_v2, %v1694_v3  ;;  %v2014_v12 = vld [vmem:[#allocation2 + $0x64] sm:$0x7]  ;;  %v2015_v13 = vld [vmem:[#allocation2 + $0x6c] sm:$0x8] }
  0x94   : > { %v1699_v8 = vsel %vm15341_vm2, %v11870_v4, %v1698_v5  ;;  %v2016_v14 = vld [vmem:[#allocation2 + $0x70] sm:$0x7]  ;;  %v11919_v17 = vrot.slane %v2013_v10, 11  ;;  %v2079_v19 = vrot.slane %v2014_v12, 7  ;;  %v11920_v22 = vrot.slane %v2015_v13, 11  ;;  %v14759_v45 = vld [vmem:[%s15323_s23 + $0x280] sm:$0xff]  }
  0x95   : > { %3136 = vmatmul.mubr.bf16.gmra.mrb[36].mxu1 %v11880_v31  ;;  %v11882_v11 = vcombine.low %v1695_v7, %v1699_v8  ;;  %v2083_v23 = vrot.slane %v2016_v14, 7  ;;  %v14753_v29 = vld [vmem:[#allocation2 + $0x16c] ss:$12 sps:$4 sm:$0xff]   ;;  %v14758_v31 = vld [vmem:[#allocation2 + $0x13c] ss:$12 sps:$4 sm:$0xff]   ;;  %13384 = vmatprep.subr.bf16.mxu0 %v14759_v45  ;;  %v14760_v3 = vld [vmem:[%s15323_s23 + $0x240] sm:$0xff]  }
  0x96   : > { %3143 = vmatprep.mubr.bf16.mxu1 %v14750_v38  ;;  %v2080_v26 = vsel %vm15341_vm2, %v11919_v17, %v2079_v19  ;;  %v1845_v32 = vld [vmem:[#allocation2 + $0x60] sm:$0xc]  ;;  %v1846_v33 = vld [vmem:[#allocation2 + $0x64] sm:$0x3]  ;;  %v1847_v35 = vld [vmem:[#allocation2 + $0x6c] sm:$0xc] }
  0x97   : > { %v1464_v15 = vld [vmem:[#allocation2 + $0x180] sm:$0xc]  ;;  %v2084_v30 = vsel %vm15341_vm2, %v11920_v22, %v2083_v23  ;;  %v11895_v40 = vrot.slane %v1845_v32, 10  ;;  %v1911_v42 = vrot.slane %v1846_v33, 6  ;;  %v11896_v43 = vrot.slane %v1847_v35, 10  ;;  %v14761_v53 = vld [vmem:[%s15323_s23 + $0x208] sm:$0xff]  }
  0x98   : > { %v1466_v16 = vld [vmem:[#allocation2 + $0x18c] sm:$0xc]  ;;  %v11853_v20 = vrot.slane %v1464_v15, 10  ;;  %v11935_v39 = vcombine.low %v2080_v26, %v2084_v30  ;;  %v1620_v46 = vld [vmem:[#allocation2 + $0x138] sm:$0x8]  ;;  %14414 = vmatprep.subr.bf16.mxu1 %v14761_v53 }
  0x99   : > { %3079 = vmatmul.mubr.bf16.gmra.mrb[40].mxu0 %v14749_v36  ;;  %v11854_v21 = vrot.slane %v1466_v16, 10  ;;  %v1465_v24 = vld [vmem:[#allocation2 + $0x184] sm:$0x3]  ;;  %v1848_v36 = vld [vmem:[#allocation2 + $0x70] sm:$0x3]  ;;  %v11871_v50 = vrot.slane %v1620_v46, 11  ;;  %v1912_v55 = vsel %vm15360_vm5, %v11895_v40, %v1911_v42  ;;  %14415 = vmatpush3.bf16.msra.mxu1 %v14761_v53 }
  0x9a   : > { %v1467_v25 = vld [vmem:[#allocation2 + $0x190] sm:$0x3]  ;;  %v1558_v27 = vrot.slane %v1465_v24, 6  ;;  %v1915_v44 = vrot.slane %v1848_v36, 6  ;;  %v1621_v47 = vld [vmem:[#allocation2 + $0x13c] sm:$0x7] }
  0x9b   : > { %v1562_v28 = vrot.slane %v1467_v25, 6  ;;  %v1622_v48 = vld [vmem:[#allocation2 + $0x144] sm:$0x8]  ;;  %v1623_v49 = vld [vmem:[#allocation2 + $0x148] sm:$0x7]  ;;  %v1702_v51 = vrot.slane %v1621_v47, 7 }
  0x9c   : > { %v1559_v37 = vsel %vm15360_vm5, %v11853_v20, %v1558_v27  ;;  %v11872_v52 = vrot.slane %v1622_v48, 11  ;;  %v1706_v54 = vrot.slane %v1623_v49, 7  ;;  %v2017_v58 = vld [vmem:[#allocation2 + $0x78] sm:$0x8]  ;;  %v2019_v61 = vld [vmem:[#allocation2 + $0x84] sm:$0x8] }
  0x9d   : > { %3144 = vmatmul.mubr.bf16.gmra.mrb[40].mxu1 %v11881_v56  ;;  %v1563_v38 = vsel %vm15360_vm5, %v11854_v21, %v1562_v28  ;;  %v1916_v56 = vsel %vm15360_vm5, %v11896_v43, %v1915_v44  ;;  %v1703_v57 = vsel %vm15341_vm2, %v11871_v50, %v1702_v51  ;;  %v2020_v62 = vld [vmem:[#allocation2 + $0x88] sm:$0x7]  ;;  %v11921_v63 = vrot.slane %v2017_v58, 11  ;;  %v14762_v8 = vld [vmem:[#allocation2 + $0x154] ss:$12 sps:$4 sm:$0xff]   ;;  %v14766_v36 = vld [vmem:[%s15323_s23 + $0x218] sm:$0xff]  }
  0x9e   : > { %3151 = vmatprep.mubr.bf16.mxu1 %v14754_v59  ;;  %v11862_v41 = vcombine.low %v1559_v37, %v1563_v38  ;;  %v2018_v59 = vld [vmem:[#allocation2 + $0x7c] sm:$0x7]  ;;  %v1707_v60 = vsel %vm15341_vm2, %v11872_v52, %v1706_v54  ;;  %v11922_v4 = vrot.slane %v2019_v61, 11  ;;  %v2091_v5 = vrot.slane %v2020_v62, 7  ;;  %v1849_v9 = vld [vmem:[#allocation2 + $0x78] sm:$0xc] }
  0x9f   : > { %v2087_v1 = vrot.slane %v2018_v59, 7  ;;  %v11883_v2 = vcombine.low %v1703_v57, %v1707_v60  ;;  %v11911_v6 = vcombine.low %v1912_v55, %v1916_v56  ;;  %v1850_v10 = vld [vmem:[#allocation2 + $0x7c] sm:$0x3]  ;;  %v1851_v13 = vld [vmem:[#allocation2 + $0x84] sm:$0xc]  ;;  %v11897_v15 = vrot.slane %v1849_v9, 10 }
  0xa0   : > { %3086 = vmatprep.mubr.bf16.mxu0 %v11862_v41  ;;  %v2092_v12 = vsel %vm15341_vm2, %v11922_v4, %v2091_v5  ;;  %v1852_v14 = vld [vmem:[#allocation2 + $0x88] sm:$0x3]  ;;  %v1919_v16 = vrot.slane %v1850_v10, 6  ;;  %v11898_v19 = vrot.slane %v1851_v13, 10  ;;  %v1624_v21 = vld [vmem:[#allocation2 + $0x150] sm:$0x8] }
  0xa1   : > { %3087 = vmatmul.mubr.bf16.gmra.mrb[44].mxu0 %v14753_v29  ;;  %v2088_v7 = vsel %vm15341_vm2, %v11921_v63, %v2087_v1  ;;  %v1923_v20 = vrot.slane %v1852_v14, 6  ;;  %v1625_v22 = vld [vmem:[#allocation2 + $0x154] sm:$0x7]  ;;  %v1626_v23 = vld [vmem:[#allocation2 + $0x15c] sm:$0x8]  ;;  %v11873_v25 = vrot.slane %v1624_v21, 11 }
  0xa2   : > { %3224 = vmatprep.mubr.bf16.mxu0 %v11935_v39  ;;  %v11936_v17 = vcombine.low %v2088_v7, %v2092_v12  ;;  %v1627_v24 = vld [vmem:[#allocation2 + $0x160] sm:$0x7]  ;;  %v1710_v26 = vrot.slane %v1625_v22, 7  ;;  %v11874_v27 = vrot.slane %v1626_v23, 11  ;;  %v14764_v28 = vld [vmem:[%s15323_s23 + $0x210] sm:$0xff]   ;;  %v1920_v29 = vsel %vm15360_vm5, %v11897_v15, %v1919_v16  ;;  %v14765_v32 = vld [vmem:[%s15323_s23 + $0x248] sm:$0xff]  }
  0xa3   : > { %v1924_v30 = vsel %vm15360_vm5, %v11898_v19, %v1923_v20  ;;  %14416 = vmatprep.subr.bf16.mxu1 %v14764_v28  ;;  %v2021_v37 = vld [vmem:[#allocation2 + $0x90] sm:$0x8]  ;;  %v2022_v40 = vld [vmem:[#allocation2 + $0x94] sm:$0x7]  ;;  %v2023_v41 = vld [vmem:[#allocation2 + $0x9c] sm:$0x8] }
  0xa4   : > { %v1711_v33 = vsel %vm15341_vm2, %v11873_v25, %v1710_v26  ;;  %14417 = vmatpush3.bf16.msra.mxu1 %v14764_v28  ;;  %v11912_v38 = vcombine.low %v1920_v29, %v1924_v30  ;;  %v2024_v42 = vld [vmem:[#allocation2 + $0xa0] sm:$0x7]  ;;  %v11923_v43 = vrot.slane %v2021_v37, 11  ;;  %v2095_v44 = vrot.slane %v2022_v40, 7  ;;  %v14767_v47 = vld [vmem:[#allocation2 + $0x16c] ss:$12 sps:$4 sm:$0xff]  }
  0xa5   : > { %3152 = vmatmul.mubr.bf16.gmra.mrb[44].mxu1 %v11882_v11  ;;  %v14763_v11 = vld [vmem:[%s15323_s23 + $0x288] sm:$0xff]   ;;  %14418 = vmatprep.subr.bf16.mxu1 %v14766_v36  ;;  %v11924_v45 = vrot.slane %v2023_v41, 11  ;;  %v2099_v46 = vrot.slane %v2024_v42, 7  ;;  %v1853_v48 = vld [vmem:[#allocation2 + $0x90] sm:$0xc]  ;;  %v14769_v61 = vld [vmem:[%s15323_s23 + $0x220] sm:$0xff]  }
  0xa6   : > { %3159 = vmatprep.mubr.bf16.mxu1 %v14758_v31  ;;  %v1714_v31 = vrot.slane %v1627_v24, 7  ;;  %v2096_v49 = vsel %vm15341_vm2, %v11923_v43, %v2095_v44  ;;  %v1854_v51 = vld [vmem:[#allocation2 + $0x94] sm:$0x3]  ;;  %v1855_v52 = vld [vmem:[#allocation2 + $0x9c] sm:$0xc]  ;;  %v11899_v55 = vrot.slane %v1853_v48, 10 }
  0xa7   : > { %v2100_v50 = vsel %vm15341_vm2, %v11924_v45, %v2099_v46  ;;  %v1856_v53 = vld [vmem:[#allocation2 + $0xa0] sm:$0x3]  ;;  %v1927_v56 = vrot.slane %v1854_v51, 6  ;;  %v11900_v57 = vrot.slane %v1855_v52, 10  ;;  %v14768_v58 = vld [vmem:[%s15323_s23 + $0x290] sm:$0xff]   ;;  %v14771_v10 = vld [vmem:[%s15323_s23 + $0x228] sm:$0xff]  }
  0xa8   : > { %v1715_v35 = vsel %vm15341_vm2, %v11874_v27, %v1714_v31  ;;  %14419 = vmatpush3.bf16.msra.mxu1 %v14766_v36  ;;  %v11937_v54 = vcombine.low %v2096_v49, %v2100_v50  ;;  %v1931_v59 = vrot.slane %v1856_v53, 6  ;;  %v1628_v60 = vld [vmem:[#allocation2 + $0x168] sm:$0x8]  ;;  %v1629_v63 = vld [vmem:[#allocation2 + $0x16c] sm:$0x7]  ;;  %v14770_v7 = vld [vmem:[%s15323_s23 + $0x250] sm:$0xff]  }
  0xa9   : > { %3225 = vmatmul.mubr.bf16.vlgmr.msra.gmra.mrb[48].mxu0 %v11911_v6  ;;  %v11884_v39 = vcombine.low %v1711_v33, %v1715_v35  ;;  %v1928_v62 = vsel %vm15360_vm5, %v11899_v55, %v1927_v56  ;;  %v1630_v1 = vld [vmem:[#allocation2 + $0x174] sm:$0x8]  ;;  %v11875_v4 = vrot.slane %v1628_v60, 11  ;;  %v1718_v5 = vrot.slane %v1629_v63, 7  ;;  %14420 = vmatprep.subr.bf16.mxu1 %v14769_v61  ;;  %v2025_v13 = vld [vmem:[#allocation2 + $0xa8] sm:$0x8] }
  0xaa   : > { %13385 = vmatpush3.bf16.msra.mxu0 %v14760_v3  ;;  %3232 = vmatprep.mubr.bf16.mxu0 %v11936_v17  ;;  %v1932_v3 = vsel %vm15360_vm5, %v11900_v57, %v1931_v59  ;;  %v11876_v6 = vrot.slane %v1630_v1, 11  ;;  %v2026_v14 = vld [vmem:[#allocation2 + $0xac] sm:$0x7]  ;;  %v2027_v15 = vld [vmem:[#allocation2 + $0xb4] sm:$0x8]  ;;  %v11925_v19 = vrot.slane %v2025_v13, 11 }
  0xab   : > { %13386 = vmatprep.subr.bf16.mxu0 %v14763_v11  ;;  %v1719_v11 = vsel %vm15341_vm2, %v11875_v4, %v1718_v5  ;;  %v2028_v17 = vld [vmem:[#allocation2 + $0xb8] sm:$0x7]  ;;  %v2103_v20 = vrot.slane %v2026_v14, 7  ;;  %v11926_v21 = vrot.slane %v2027_v15, 11  ;;  %v14774_v24 = vld [vmem:[%s15323_s23 + $0x230] sm:$0xff]   ;;  %v14778_v13 = vld [vmem:[%s15323_s23 + $0x2a0] sm:$0xff]  }
  0xac   : > { %14421 = vmatpush3.bf16.msra.mxu1 %v14769_v61  ;;  %v14773_v22 = vld [vmem:[%s15323_s23 + $0x298] sm:$0xff]   ;;  %v2107_v23 = vrot.slane %v2028_v17, 7  ;;  %v14772_v26 = vld [vmem:[#allocation2 + $0x184] ss:$12 sps:$4 sm:$0xff]   ;;  %v1857_v27 = vld [vmem:[#allocation2 + $0xa8] sm:$0xc] }
  0xad   : > { %3160 = vmatmul.mubr.bf16.gmra.mrb[48].mxu1 %v11883_v2  ;;  %v1631_v2 = vld [vmem:[#allocation2 + $0x178] sm:$0x7]  ;;  %14422 = vmatprep.subr.bf16.mxu1 %v14771_v10  ;;  %v2104_v25 = vsel %vm15341_vm2, %v11925_v19, %v2103_v20  ;;  %v1858_v28 = vld [vmem:[#allocation2 + $0xac] sm:$0x3]  ;;  %v1859_v30 = vld [vmem:[#allocation2 + $0xb4] sm:$0xc] }
  0xae   : > { %3167 = vmatprep.mubr.bf16.mxu1 %v14762_v8  ;;  %13387 = vmatpush3.bf16.msra.mxu0 %v14765_v32  ;;  %v11913_v8 = vcombine.low %v1928_v62, %v1932_v3  ;;  %v1722_v9 = vrot.slane %v1631_v2, 7  ;;  %v2108_v29 = vsel %vm15341_vm2, %v11926_v21, %v2107_v23  ;;  %v1860_v31 = vld [vmem:[#allocation2 + $0xb8] sm:$0x3]  ;;  %v11901_v32 = vrot.slane %v1857_v27, 10  ;;  %v1633_v40 = vld [vmem:[#allocation2 + $0x184] sm:$0x7] }
  0xaf   : > { %13388 = vmatprep.subr.bf16.mxu0 %v14768_v58  ;;  %v1935_v33 = vrot.slane %v1858_v28, 6  ;;  %v11938_v35 = vcombine.low %v2104_v25, %v2108_v29  ;;  %v11902_v36 = vrot.slane %v1859_v30, 10  ;;  %v1939_v37 = vrot.slane %v1860_v31, 6  ;;  %v1634_v41 = vld [vmem:[#allocation2 + $0x18c] sm:$0x8]  ;;  %v14776_v50 = vld [vmem:[%s15323_s23 + $0x238] sm:$0xff]  }
  0xb0   : > { %v1723_v12 = vsel %vm15341_vm2, %v11876_v6, %v1722_v9  ;;  %14423 = vmatpush3.bf16.msra.mxu1 %v14771_v10  ;;  %v1635_v43 = vld [vmem:[#allocation2 + $0x190] sm:$0x7]  ;;  %v1726_v45 = vrot.slane %v1633_v40, 7  ;;  %v11878_v46 = vrot.slane %v1634_v41, 11  ;;  %v2029_v53 = vld [vmem:[#allocation2 + $0x150] sm:$0x8] }
  0xb1   : > { %3233 = vmatmul.mubr.bf16.gmra.mrb[52].mxu0 %v11912_v38  ;;  %v11885_v16 = vcombine.low %v1719_v11, %v1723_v12  ;;  %14424 = vmatprep.subr.bf16.mxu1 %v14774_v24  ;;  %v1936_v38 = vsel %vm15360_vm5, %v11901_v32, %v1935_v33  ;;  %v1940_v42 = vsel %vm15360_vm5, %v11902_v36, %v1939_v37  ;;  %v1730_v49 = vrot.slane %v1635_v43, 7  ;;  %v2031_v56 = vld [vmem:[#allocation2 + $0x15c] sm:$0x8]  ;;  %v2032_v57 = vld [vmem:[#allocation2 + $0x160] sm:$0x7]  ;;  %v14783_v20 = vld [vmem:[%s15323_s23 + $0x308] sm:$0xff]  }
  0xb2   : > { %3240 = vmatprep.mubr.bf16.mxu0 %v11937_v54  ;;  %13389 = vmatpush3.bf16.msra.mxu0 %v14770_v7  ;;  %v11914_v48 = vcombine.low %v1936_v38, %v1940_v42  ;;  %v2030_v54 = vld [vmem:[#allocation2 + $0x154] sm:$0x7]  ;;  %v11927_v58 = vrot.slane %v2029_v53, 11  ;;  %v11928_v60 = vrot.slane %v2031_v56, 11  ;;  %v2115_v61 = vrot.slane %v2032_v57, 7  ;;  %v14781_v17 = vld [vmem:[%s15323_s23 + $0x300] sm:$0xff]  }
  0xb3   : > { %13390 = vmatprep.subr.bf16.mxu0 %v14773_v22  ;;  %v1731_v52 = vsel %vm15341_vm2, %v11878_v46, %v1730_v49  ;;  %v2111_v59 = vrot.slane %v2030_v54, 7  ;;  %v1861_v62 = vld [vmem:[#allocation2 + $0x150] sm:$0xc]  ;;  %v1862_v63 = vld [vmem:[#allocation2 + $0x154] sm:$0x3]  ;;  %v14782_v19 = vld [vmem:[%s15323_s23 + $0x2c0] sm:$0xff]  }
  0xb4   : > { %14425 = vmatpush3.bf16.msra.mxu1 %v14774_v24  ;;  %v1863_v2 = vld [vmem:[#allocation2 + $0x15c] sm:$0xc]  ;;  %v1864_v3 = vld [vmem:[#allocation2 + $0x160] sm:$0x3]  ;;  %v11903_v4 = vrot.slane %v1861_v62, 10  ;;  %v1943_v5 = vrot.slane %v1862_v63, 6  ;;  %v2116_v6 = vsel %vm15341_vm2, %v11928_v60, %v2115_v61 }
  0xb5   : > { %3168 = vmatmul.mubr.bf16.gmra.mrb[52].mxu1 %v11884_v39  ;;  %v1632_v39 = vld [vmem:[#allocation2 + $0x180] sm:$0x8]  ;;  %14426 = vmatprep.subr.bf16.mxu1 %v14776_v50  ;;  %v2112_v1 = vsel %vm15341_vm2, %v11927_v58, %v2111_v59  ;;  %v11904_v7 = vrot.slane %v1863_v2, 10  ;;  %v14777_v11 = vld [vmem:[#allocation2 + $0x64] ss:$12 sps:$4 sm:$0xff]   ;;  %v14784_v21 = vld [vmem:[%s15323_s23 + $0x2c8] sm:$0xff]  }
  0xb6   : > { %3175 = vmatprep.mubr.bf16.mxu1 %v14767_v47  ;;  %v11877_v44 = vrot.slane %v1632_v39, 11  ;;  %v14775_v47 = vld [vmem:[%s15323_s23 + $0x258] sm:$0xff]   ;;  %v11939_v9 = vcombine.low %v2112_v1, %v2116_v6  ;;  %v1944_v10 = vsel %vm15360_vm5, %v11903_v4, %v1943_v5  ;;  %v2033_v22 = vld [vmem:[#allocation2 + $0x168] sm:$0x8]  ;;  %v2034_v23 = vld [vmem:[#allocation2 + $0x16c] sm:$0x7] }
  0xb7   : > { %13391 = vmatpush3.bf16.msra.mxu0 %v14775_v47  ;;  %v14779_v15 = vld [vmem:[#allocation2 + $0x7c] ss:$12 sps:$4 sm:$0xff]   ;;  %v2035_v24 = vld [vmem:[#allocation2 + $0x174] sm:$0x8]  ;;  %v2036_v25 = vld [vmem:[#allocation2 + $0x178] sm:$0x7] }
  0xb8   : > { %v1727_v51 = vsel %vm15341_vm2, %v11877_v44, %v1726_v45  ;;  %14427 = vmatpush3.bf16.msra.mxu1 %v14776_v50  ;;  %13392 = vmatprep.subr.bf16.mxu0 %v14778_v13  ;;  %v2119_v27 = vrot.slane %v2034_v23, 7  ;;  %v11930_v28 = vrot.slane %v2035_v24, 11  ;;  %v2123_v29 = vrot.slane %v2036_v25, 7  ;;  %v1865_v30 = vld [vmem:[#allocation2 + $0x168] sm:$0xc]  ;;  %v14789_v49 = vld [vmem:[%s15323_s23 + $0x310] sm:$0xff]  }
  0xb9   : > { %3241 = vmatmul.mubr.bf16.gmra.mrb[56].mxu0 %v11913_v8  ;;  %v11886_v55 = vcombine.low %v1727_v51, %v1731_v52  ;;  %v1947_v8 = vrot.slane %v1864_v3, 6  ;;  %13448 = vmatprep.subr.bf16.mxu1 %v14781_v17  ;;  %v1866_v31 = vld [vmem:[#allocation2 + $0x16c] sm:$0x3]  ;;  %v1867_v33 = vld [vmem:[#allocation2 + $0x174] sm:$0xc]  ;;  %v11905_v36 = vrot.slane %v1865_v30, 10 }
  0xba   : > { %3248 = vmatprep.mubr.bf16.mxu0 %v11938_v35  ;;  %v1868_v35 = vld [vmem:[#allocation2 + $0x178] sm:$0x3]  ;;  %v1951_v37 = vrot.slane %v1866_v31, 6  ;;  %v2124_v38 = vsel %vm15341_vm2, %v11930_v28, %v2123_v29  ;;  %v11906_v39 = vrot.slane %v1867_v33, 10  ;;  %v14785_v43 = vld [vmem:[#allocation2 + $0x94] ss:$12 sps:$4 sm:$0xff]  }
  0xbb   : > { %v1948_v12 = vsel %vm15360_vm5, %v11904_v7, %v1947_v8  ;;  %v1955_v40 = vrot.slane %v1868_v35, 6  ;;  %v14786_v45 = vld [vmem:[%s15323_s23 + $0x2a8] sm:$0xff]   ;;  %v14790_v50 = vld [vmem:[%s15323_s23 + $0x2d0] sm:$0xff]   ;;  %v14791_v51 = vld [vmem:[%s15323_s23 + $0x318] sm:$0xff]  }
  0xbc   : > { %v11915_v14 = vcombine.low %v1944_v10, %v1948_v12  ;;  %v1952_v42 = vsel %vm15360_vm5, %v11905_v36, %v1951_v37  ;;  %v14787_v47 = vld [vmem:[#allocation2 + $0xac] ss:$12 sps:$4 sm:$0xff]   ;;  %v2037_v53 = vld [vmem:[#allocation2 + $0x180] sm:$0x8]  ;;  %v2038_v54 = vld [vmem:[#allocation2 + $0x184] sm:$0x7] }
  0xbd   : > { %3176 = vmatmul.mubr.bf16.gmra.mrb[56].mxu1 %v11885_v16  ;;  %v14780_v16 = vld [vmem:[%s15323_s23 + $0x260] sm:$0xff]   ;;  %v1956_v44 = vsel %vm15360_vm5, %v11906_v39, %v1955_v40  ;;  %v14792_v52 = vld [vmem:[%s15323_s23 + $0x2d8] sm:$0xff]   ;;  %v2040_v56 = vld [vmem:[#allocation2 + $0x190] sm:$0x7]  ;;  %v11931_v57 = vrot.slane %v2037_v53, 11  ;;  %v2127_v58 = vrot.slane %v2038_v54, 7 }
  0xbe   : > { %3183 = vmatprep.mubr.bf16.mxu1 %v14772_v26  ;;  %13393 = vmatpush3.bf16.msra.mxu0 %v14780_v16  ;;  %v11929_v26 = vrot.slane %v2033_v22, 11  ;;  %v11916_v46 = vcombine.low %v1952_v42, %v1956_v44  ;;  %v2131_v60 = vrot.slane %v2040_v56, 7  ;;  %v1869_v61 = vld [vmem:[#allocation2 + $0x180] sm:$0xc]  ;;  %v1870_v62 = vld [vmem:[#allocation2 + $0x184] sm:$0x3] }
  0xbf   : > { %13394 = vmatprep.subr.bf16.mxu0 %v14786_v45  ;;  %v2128_v63 = vsel %vm15341_vm2, %v11931_v57, %v2127_v58  ;;  %v1871_v1 = vld [vmem:[#allocation2 + $0x18c] sm:$0xc]  ;;  %v1872_v2 = vld [vmem:[#allocation2 + $0x190] sm:$0x3]  ;;  %v11907_v3 = vrot.slane %v1869_v61, 10  ;;  %v1959_v4 = vrot.slane %v1870_v62, 6 }
  0xc0   : > { %v2120_v32 = vsel %vm15341_vm2, %v11929_v26, %v2119_v27  ;;  %v11908_v6 = vrot.slane %v1871_v1, 10  ;;  %v1963_v7 = vrot.slane %v1872_v2, 6  ;;  %v14793_v10 = vld [vmem:[#allocation2 + $0x154] ss:$12 sps:$4 sm:$0xff]   ;;  %v2042_v22 = vld [vmem:[#allocation2 + $0x19c] sm:$0x7] }
  0xc1   : > { %3249 = vmatmul.mubr.bf16.gmra.mrb[60].mxu0 %v11914_v48  ;;  %v11940_v41 = vcombine.low %v2120_v32, %v2124_v38  ;;  %v14788_v48 = vld [vmem:[%s15323_s23 + $0x268] sm:$0xff]   ;;  %v14794_v12 = vld [vmem:[%s15323_s23 + $0x2b0] sm:$0xff]   ;;  %v14797_v16 = vld [vmem:[%s15323_s23 + $0x320] sm:$0xff]   ;;  %v2135_v26 = vrot.slane %v2042_v22, 7 }
  0xc2   : > { %3256 = vmatprep.mubr.bf16.mxu0 %v11939_v9  ;;  %13395 = vmatpush3.bf16.msra.mxu0 %v14788_v48  ;;  %v1960_v9 = vsel %vm15360_vm5, %v11907_v3, %v1959_v4  ;;  %v14798_v17 = vld [vmem:[%s15323_s23 + $0x2e0] sm:$0xff]   ;;  %v2044_v24 = vld [vmem:[#allocation2 + $0x1a8] sm:$0x7]  ;;  %v1873_v29 = vld [vmem:[#allocation2 + $0x198] sm:$0xc] }
  0xc3   : > { %13396 = vmatprep.subr.bf16.mxu0 %v14794_v12  ;;  %v2043_v23 = vld [vmem:[#allocation2 + $0x1a4] sm:$0x8]  ;;  %v2139_v28 = vrot.slane %v2044_v24, 7  ;;  %v1874_v30 = vld [vmem:[#allocation2 + $0x19c] sm:$0x3]  ;;  %v11909_v35 = vrot.slane %v1873_v29, 10 }
  0xc4   : > { %v11934_v27 = vrot.slane %v2043_v23, 11  ;;  %v1875_v32 = vld [vmem:[#allocation2 + $0x1a4] sm:$0xc]  ;;  %v1876_v33 = vld [vmem:[#allocation2 + $0x1a8] sm:$0x3]  ;;  %v1967_v36 = vrot.slane %v1874_v30, 6 }
  0xc5   : > { %3184 = vmatmul.mubr.bf16.gmra.mrb[60].mxu1 %v11886_v55  ;;  %v2039_v55 = vld [vmem:[#allocation2 + $0x18c] sm:$0x8]  ;;  %v11910_v38 = vrot.slane %v1875_v32, 10  ;;  %v1971_v39 = vrot.slane %v1876_v33, 6  ;;  %v14801_v42 = vld [vmem:[#allocation2 + $0x184] ss:$12 sps:$4 sm:$0xff]  }
  0xc6   : > { %14428 = vmatprep.mubr.bf16.mxu1 %v14777_v11  ;;  %v11932_v59 = vrot.slane %v2039_v55, 11  ;;  %v1964_v11 = vsel %vm15360_vm5, %v11908_v6, %v1963_v7  ;;  %v2140_v37 = vsel %vm15341_vm2, %v11934_v27, %v2139_v28  ;;  %v14802_v44 = vld [vmem:[%s15323_s23 + $0x2b8] sm:$0xff]   ;;  %v14805_v48 = vld [vmem:[%s15323_s23 + $0x330] sm:$0xff]   ;;  %v3592_v54 = vld [vmem:[#allocation2 + $0x24] sm:$0x8] }
  0xc7   : > { %v11917_v13 = vcombine.low %v1960_v9, %v1964_v11  ;;  %v3591_v53 = vld [vmem:[#allocation2 + $0x1c] sm:$0x7]  ;;  %v3593_v55 = vld [vmem:[#allocation2 + $0x28] sm:$0x7]  ;;  %v12048_v58 = vrot.slane %v3592_v54, 11  ;;  %v14809_v22 = vld [vmem:[%s15323_s23 + $0x380] sm:$0xff]  }
  0xc8   : > { %v2132_v5 = vsel %vm15341_vm2, %v11932_v59, %v2131_v60  ;;  %v3656_v57 = vrot.slane %v3591_v53, 7  ;;  %v3660_v59 = vrot.slane %v3593_v55, 7  ;;  %v3419_v60 = vld [vmem:[#allocation2 + $0x18] sm:$0xe]  ;;  %v3420_v61 = vld [vmem:[#allocation2 + $0x1c] sm:$0x1] }
  0xc9   : > { %3257 = vmatmul.mubr.bf16.gmra.mrb[64].mxu0 %v11915_v14  ;;  %v11941_v8 = vcombine.low %v2128_v63, %v2132_v5  ;;  %v14795_v14 = vld [vmem:[#allocation2 + $0x16c] ss:$12 sps:$4 sm:$0xff]   ;;  %v3421_v1 = vld [vmem:[#allocation2 + $0x24] sm:$0xe]  ;;  %v3422_v2 = vld [vmem:[#allocation2 + $0x28] sm:$0x1] }
  0xca   : > { %3264 = vmatprep.mubr.bf16.mxu0 %v11940_v41  ;;  %v1968_v41 = vsel %vm15360_vm5, %v11909_v35, %v1967_v36  ;;  %v12023_v3 = vrot.slane %v3419_v60, 9  ;;  %v3488_v4 = vrot.slane %v3420_v61, 5  ;;  %v3661_v5 = vsel %vm15341_vm2, %v12048_v58, %v3660_v59  ;;  %v3927_v9 = vld [vmem:[#allocation2 + $0x4c] sm:$0x1]  ;;  %v3928_v12 = vld [vmem:[#allocation2 + $0x54] sm:$0xe] }
  0xcb   : > { %v12024_v6 = vrot.slane %v3421_v1, 9  ;;  %v3492_v7 = vrot.slane %v3422_v2, 5  ;;  %v3758_v23 = vld [vmem:[#allocation2 + $0x1c] sm:$0xe]  ;;  %v3759_v24 = vld [vmem:[#allocation2 + $0x20] sm:$0x1] }
  0xcc   : > { %v3489_v11 = vsel %vm15668_vm8, %v12023_v3, %v3488_v4  ;;  %v3760_v27 = vld [vmem:[#allocation2 + $0x28] sm:$0xe]  ;;  %v3761_v28 = vld [vmem:[#allocation2 + $0x2c] sm:$0x1]  ;;  %v12071_v29 = vrot.slane %v3758_v23, 9  ;;  %v3824_v30 = vrot.slane %v3759_v24, 5 }
  0xcd   : > { %14429 = vmatmul.mubr.bf16.vlgmr.msra.gmra.mrb[64].mxu1 %v14779_v15  ;;  %v14796_v15 = vld [vmem:[%s15323_s23 + $0x270] sm:$0xff]   ;;  %v12072_v32 = vrot.slane %v3760_v27, 9  ;;  %v3828_v33 = vrot.slane %v3761_v28, 5  ;;  %v14810_v36 = vld [vmem:[%s15323_s23 + $0x340] sm:$0xff]   ;;  %v14812_v23 = vld [vmem:[%s15323_s23 + $0x348] sm:$0xff]  }
  0xce   : > { %13449 = vmatpush3.bf16.msra.mxu1 %v14782_v19  ;;  %14432 = vmatprep.mubr.bf16.mxu1 %v14785_v43  ;;  %v14799_v19 = vld [vmem:[%s15323_s23 + $0x328] sm:$0xff]   ;;  %v1972_v43 = vsel %vm15360_vm5, %v11910_v38, %v1971_v39  ;;  %v3825_v35 = vsel %vm15668_vm8, %v12071_v29, %v3824_v30  ;;  %v3595_v38 = vld [vmem:[#allocation2 + $0x34] sm:$0x7]  ;;  %v3930_v58 = vld [vmem:[#allocation2 + $0x60] sm:$0xe] }
  0xcf   : > { %13450 = vmatprep.subr.bf16.mxu1 %v14783_v20  ;;  %13397 = vmatpush3.bf16.msra.mxu0 %v14796_v15  ;;  %v14800_v20 = vld [vmem:[%s15323_s23 + $0x2e8] sm:$0xff]   ;;  %v11918_v45 = vcombine.low %v1968_v41, %v1972_v43  ;;  %v3992_v15 = vrot.slane %v3927_v9, 5  ;;  %v3596_v41 = vld [vmem:[#allocation2 + $0x3c] sm:$0x8]  ;;  %v3931_v59 = vld [vmem:[#allocation2 + $0x64] sm:$0x1] }
  0xd0   : > { %13398 = vmatprep.subr.bf16.mxu0 %v14802_v44  ;;  %v3664_v44 = vrot.slane %v3595_v38, 7  ;;  %v3933_v1 = vld [vmem:[#allocation2 + $0x70] sm:$0x1]  ;;  %v12097_v2 = vrot.slane %v3930_v58, 9  ;;  %v4000_v3 = vrot.slane %v3931_v59, 5  ;;  %v14811_v9 = vld [vmem:[%s15323_s23 + $0x388] sm:$0xff]  }
  0xd1   : > { %3265 = vmatmul.mubr.bf16.gmra.mrb[68].mxu0 %v11916_v46  ;;  %v14803_v46 = vld [vmem:[#allocation2 + $0x19c] ss:$12 sps:$4 sm:$0xff]   ;;  %v3600_v29 = vld [vmem:[#allocation2 + $0x54] sm:$0x8]  ;;  %v3601_v30 = vld [vmem:[#allocation2 + $0x58] sm:$0x7] }
  0xd2   : > { %13451 = vmatpush3.bf16.msra.mxu1 %v14784_v21  ;;  %3272 = vmatprep.mubr.bf16.mxu0 %v11941_v8  ;;  %v2041_v21 = vld [vmem:[#allocation2 + $0x198] sm:$0x8]  ;;  %v3926_v8 = vld [vmem:[#allocation2 + $0x48] sm:$0xe]  ;;  %v3428_v38 = vld [vmem:[#allocation2 + $0x4c] sm:$0x1] }
  0xd3   : > { %13452 = vmatprep.subr.bf16.mxu1 %v14789_v49  ;;  %v11933_v25 = vrot.slane %v2041_v21, 11  ;;  %v14806_v49 = vld [vmem:[%s15323_s23 + $0x2f0] sm:$0xff]   ;;  %v3598_v24 = vld [vmem:[#allocation2 + $0x48] sm:$0x8] }
  0xd5   : > { %14433 = vmatmul.mubr.bf16.gmra.mrb[68].mxu1 %v14787_v47  ;;  %v2136_v31 = vsel %vm15341_vm2, %v11933_v25, %v2135_v26  ;;  %v14804_v47 = vld [vmem:[%s15323_s23 + $0x278] sm:$0xff]  }
  0xd6   : > { %13453 = vmatpush3.bf16.msra.mxu1 %v14790_v50  ;;  %14436 = vmatprep.mubr.bf16.mxu1 %v14793_v10  ;;  %v11942_v40 = vcombine.low %v2136_v31, %v2140_v37  ;;  %v14807_v50 = vld [vmem:[%s15323_s23 + $0x338] sm:$0xff]   ;;  %v3594_v37 = vld [vmem:[#allocation2 + $0x30] sm:$0x8] }
  0xd7   : > { %13454 = vmatprep.subr.bf16.mxu1 %v14791_v51  ;;  %13399 = vmatpush3.bf16.msra.mxu0 %v14804_v47  ;;  %v14808_v51 = vld [vmem:[%s15323_s23 + $0x2f8] sm:$0xff]   ;;  %v12049_v43 = vrot.slane %v3594_v37, 11  ;;  %v3427_v37 = vld [vmem:[#allocation2 + $0x48] sm:$0xe] }
  0xd8   : > { %13512 = vmatprep.subr.bf16.mxu0 %v14809_v22 }
  0xd9   : > { %3273 = vmatmul.mubr.bf16.gmra.mrb[72].mxu0 %v11917_v13  ;;  %v3929_v13 = vld [vmem:[#allocation2 + $0x58] sm:$0x1] }
  0xda   : > { %13455 = vmatpush3.bf16.msra.mxu1 %v14792_v52  ;;  %3280 = vmatprep.mubr.bf16.mxu0 %v11942_v40  ;;  %v3590_v52 = vld [vmem:[#allocation2 + $0x18] sm:$0x8]  ;;  %v3829_v40 = vsel %vm15668_vm8, %v12072_v32, %v3828_v33 }
  0xdb   : > { %13456 = vmatprep.subr.bf16.mxu1 %v14797_v16  ;;  %v12047_v56 = vrot.slane %v3590_v52, 11  ;;  %v3493_v16 = vsel %vm15668_vm8, %v12024_v6, %v3492_v7  ;;  %v3426_v52 = vld [vmem:[#allocation2 + $0x40] sm:$0x1]  ;;  %v4004_v6 = vrot.slane %v3933_v1, 5  ;;  %v3767_v1 = vld [vmem:[#allocation2 + $0x50] sm:$0x1] }
  0xdd   : > { %14437 = vmatmul.mubr.bf16.gmra.mrb[72].mxu1 %v14795_v14  ;;  %v3657_v63 = vsel %vm15341_vm2, %v12047_v56, %v3656_v57  ;;  %v12095_v14 = vrot.slane %v3926_v8, 9  ;;  %v3500_v57 = vrot.slane %v3426_v52, 5  ;;  %v4001_v8 = vsel %vm15668_vm8, %v12097_v2, %v4000_v3  ;;  %v3936_v52 = vld [vmem:[#allocation2 + $0x84] sm:$0xe] }
  0xde   : > { %13457 = vmatpush3.bf16.msra.mxu1 %v14798_v17  ;;  %14440 = vmatprep.mubr.bf16.mxu1 %v14801_v42  ;;  %v12063_v10 = vcombine.low %v3657_v63, %v3661_v5  ;;  %v12096_v17 = vrot.slane %v3928_v12, 9  ;;  %v3597_v42 = vld [vmem:[#allocation2 + $0x40] sm:$0x7]  ;;  %v3932_v63 = vld [vmem:[#allocation2 + $0x6c] sm:$0xe] }
  0xdf   : > { %13458 = vmatprep.subr.bf16.mxu1 %v14799_v19  ;;  %v3996_v19 = vrot.slane %v3929_v13, 5  ;;  %v3993_v21 = vsel %vm15668_vm8, %v12095_v14, %v3992_v15  ;;  %v3668_v47 = vrot.slane %v3597_v42, 7  ;;  %v12098_v5 = vrot.slane %v3932_v63, 9  ;;  %v3764_v14 = vld [vmem:[#allocation2 + $0x40] sm:$0xe] }
  0xe0   : > { %v3765_v15 = vld [vmem:[#allocation2 + $0x44] sm:$0x1]  ;;  %v3430_v42 = vld [vmem:[#allocation2 + $0x58] sm:$0x1]  ;;  %v3766_v63 = vld [vmem:[#allocation2 + $0x4c] sm:$0xe] }
  0xe1   : > { %3281 = vmatmul.mubr.bf16.gmra.mrb[76].mxu0 %v11918_v45  ;;  %v3997_v26 = vsel %vm15668_vm8, %v12096_v17, %v3996_v19  ;;  %v12087_v45 = vcombine.low %v3825_v35, %v3829_v40  ;;  %v4005_v13 = vsel %vm15668_vm8, %v12098_v5, %v4004_v6  ;;  %v12052_v35 = vrot.slane %v3600_v29, 11  ;;  %v3769_v5 = vld [vmem:[#allocation2 + $0x5c] sm:$0x1]  ;;  %v3432_v29 = vld [vmem:[#allocation2 + $0x64] sm:$0x1] }
  0xe2   : > { %13459 = vmatpush3.bf16.msra.mxu1 %v14800_v20  ;;  %5616 = vmatprep.mubr.bf16.mxu0 %v12063_v10  ;;  %v12039_v20 = vcombine.low %v3489_v11, %v3493_v16  ;;  %v12111_v31 = vcombine.low %v3993_v21, %v3997_v26  ;;  %v3762_v10 = vld [vmem:[#allocation2 + $0x34] sm:$0xe]  ;;  %v3763_v11 = vld [vmem:[#allocation2 + $0x38] sm:$0x1]  ;;  %v12112_v19 = vcombine.low %v4001_v8, %v4005_v13  ;;  %v3836_v21 = vrot.slane %v3765_v15, 5 }
  0xe3   : > { %13460 = vmatprep.subr.bf16.mxu1 %v14805_v48  ;;  %v3423_v48 = vld [vmem:[#allocation2 + $0x30] sm:$0xe]  ;;  %v12073_v16 = vrot.slane %v3762_v10, 9  ;;  %v3832_v17 = vrot.slane %v3763_v11, 5  ;;  %v3599_v26 = vld [vmem:[#allocation2 + $0x4c] sm:$0x7] }
  0xe4   : > { %v12025_v53 = vrot.slane %v3423_v48, 9  ;;  %v3672_v32 = vrot.slane %v3599_v26, 7  ;;  %v3934_v48 = vld [vmem:[#allocation2 + $0x78] sm:$0xe]  ;;  %v12075_v6 = vrot.slane %v3766_v63, 9  ;;  %v3844_v10 = vrot.slane %v3769_v5, 5 }
  0xe5   : > { %14441 = vmatmul.mubr.bf16.gmra.mrb[76].mxu1 %v14803_v46  ;;  %v12050_v46 = vrot.slane %v3596_v41, 11  ;;  %v3833_v22 = vsel %vm15668_vm8, %v12073_v16, %v3832_v17  ;;  %v3429_v41 = vld [vmem:[#allocation2 + $0x54] sm:$0xe]  ;;  %v3603_v15 = vld [vmem:[#allocation2 + $0x64] sm:$0x7]  ;;  %v14816_v5 = vld [vmem:[%s15323_s23 + $0x358] sm:$0xff]  }
  0xe6   : > { %13461 = vmatpush3.bf16.msra.mxu1 %v14806_v49  ;;  %5713 = vmatprep.mubr.bf16.mxu1 %v12111_v31  ;;  %v3424_v49 = vld [vmem:[#allocation2 + $0x34] sm:$0x1]  ;;  %v12051_v31 = vrot.slane %v3598_v24, 11 }
  0xe7   : > { %13462 = vmatprep.subr.bf16.mxu1 %v14807_v50  ;;  %v3665_v50 = vsel %vm15341_vm2, %v12049_v43, %v3664_v44  ;;  %v3496_v54 = vrot.slane %v3424_v49, 5  ;;  %v3669_v55 = vsel %vm15341_vm2, %v12050_v46, %v3668_v47  ;;  %v12027_v43 = vrot.slane %v3427_v37, 9  ;;  %v3935_v49 = vld [vmem:[#allocation2 + $0x7c] sm:$0x1]  ;;  %v14814_v13 = vld [vmem:[%s15323_s23 + $0x350] sm:$0xff]  }
  0xe8   : > { %v12064_v60 = vcombine.low %v3665_v50, %v3669_v55  ;;  %v3673_v40 = vsel %vm15341_vm2, %v12051_v31, %v3672_v32  ;;  %v3504_v44 = vrot.slane %v3428_v38, 5  ;;  %v12028_v46 = vrot.slane %v3429_v41, 9  ;;  %v3433_v31 = vld [vmem:[#allocation2 + $0x6c] sm:$0xe]  ;;  %v3434_v32 = vld [vmem:[#allocation2 + $0x70] sm:$0x1] }
  0xe9   : > { %5617 = vmatmul.mubr.bf16.vlgmr.msra.gmra.mrb[80].mxu0 %v12039_v20  ;;  %v3497_v61 = vsel %vm15668_vm8, %v12025_v53, %v3496_v54  ;;  %v12074_v20 = vrot.slane %v3764_v14, 9  ;;  %v3508_v47 = vrot.slane %v3430_v42, 5  ;;  %v3937_v53 = vld [vmem:[#allocation2 + $0x88] sm:$0x1]  ;;  %v12099_v54 = vrot.slane %v3934_v48, 9 }
  0xea   : > { %13463 = vmatpush3.bf16.msra.mxu1 %v14808_v51  ;;  %13513 = vmatpush3.bf16.msra.mxu0 %v14810_v36  ;;  %v3425_v51 = vld [vmem:[#allocation2 + $0x3c] sm:$0xe]  ;;  %v3676_v36 = vrot.slane %v3601_v30, 7  ;;  %v4008_v55 = vrot.slane %v3935_v49, 5  ;;  %v4012_v58 = vrot.slane %v3937_v53, 5  ;;  %v12030_v37 = vrot.slane %v3433_v31, 9 }
  0xeb   : > { %v12026_v56 = vrot.slane %v3425_v51, 9  ;;  %5624 = vmatprep.mubr.bf16.mxu0 %v12064_v60  ;;  %13514 = vmatprep.subr.bf16.mxu0 %v14811_v9  ;;  %v3837_v28 = vsel %vm15668_vm8, %v12074_v20, %v3836_v21  ;;  %v3505_v51 = vsel %vm15668_vm8, %v12027_v43, %v3504_v44  ;;  %v3602_v14 = vld [vmem:[#allocation2 + $0x60] sm:$0x8]  ;;  %v3605_v20 = vld [vmem:[#allocation2 + $0x70] sm:$0x7]  ;;  %v3516_v38 = vrot.slane %v3434_v32, 5 }
  0xec   : > { %v12088_v33 = vcombine.low %v3833_v22, %v3837_v28  ;;  %v4009_v60 = vsel %vm15668_vm8, %v12099_v54, %v4008_v55  ;;  %v12053_v21 = vrot.slane %v3602_v14, 11  ;;  %v3680_v22 = vrot.slane %v3603_v15, 7  ;;  %v3431_v28 = vld [vmem:[#allocation2 + $0x60] sm:$0xe]  ;;  %v3939_v41 = vld [vmem:[#allocation2 + $0x94] sm:$0x1] }
  0xed   : > { %5714 = vmatmul.mubr.bf16.vlgmr.msra.gmra.mrb[80].mxu1 %v12087_v45  ;;  %v3501_v4 = vsel %vm15668_vm8, %v12026_v56, %v3500_v57  ;;  %v3677_v45 = vsel %vm15341_vm2, %v12052_v35, %v3676_v36  ;;  %v3509_v56 = vsel %vm15668_vm8, %v12028_v46, %v3508_v47  ;;  %v12100_v57 = vrot.slane %v3936_v52, 9  ;;  %v3940_v44 = vld [vmem:[#allocation2 + $0x9c] sm:$0xe]  ;;  %v3770_v54 = vld [vmem:[#allocation2 + $0x64] sm:$0xe] }
  0xee   : > { %v12040_v7 = vcombine.low %v3497_v61, %v3501_v4  ;;  %5721 = vmatprep.mubr.bf16.mxu1 %v12112_v19  ;;  %13515 = vmatpush3.bf16.msra.mxu0 %v14812_v23  ;;  %v12065_v50 = vcombine.low %v3673_v40, %v3677_v45  ;;  %v12041_v59 = vcombine.low %v3505_v51, %v3509_v56  ;;  %v14813_v61 = vld [vmem:[%s15323_s23 + $0x390] sm:$0xff]   ;;  %v3768_v4 = vld [vmem:[#allocation2 + $0x58] sm:$0xe]  ;;  %v3604_v19 = vld [vmem:[#allocation2 + $0x6c] sm:$0x8]  ;;  %v3684_v26 = vrot.slane %v3605_v20, 7 }
  0xef   : > { %v4013_v3 = vsel %vm15668_vm8, %v12100_v57, %v4012_v58  ;;  %13516 = vmatprep.subr.bf16.mxu0 %v14813_v61  ;;  %v12076_v9 = vrot.slane %v3768_v4, 9  ;;  %v12054_v24 = vrot.slane %v3604_v19, 11  ;;  %v3681_v30 = vsel %vm15341_vm2, %v12053_v21, %v3680_v22  ;;  %v3938_v40 = vld [vmem:[#allocation2 + $0x90] sm:$0xe]  ;;  %v3941_v45 = vld [vmem:[#allocation2 + $0xa0] sm:$0x1] }
  0xf0   : > { %v12113_v8 = vcombine.low %v4009_v60, %v4013_v3  ;;  %v3512_v35 = vrot.slane %v3432_v29, 5  ;;  %v12101_v46 = vrot.slane %v3938_v40, 9  ;;  %v4016_v47 = vrot.slane %v3939_v41, 5  ;;  %v14815_v53 = vld [vmem:[%s15323_s23 + $0x398] sm:$0xff]   ;;  %v3771_v55 = vld [vmem:[#allocation2 + $0x68] sm:$0x1] }
  0xf1   : > { %5625 = vmatmul.mubr.bf16.gmra.mrb[84].mxu0 %v12040_v7  ;;  %v3840_v7 = vrot.slane %v3767_v1, 5  ;;  %v3845_v17 = vsel %vm15668_vm8, %v12076_v9, %v3844_v10  ;;  %v3685_v36 = vsel %vm15341_vm2, %v12054_v24, %v3684_v26  ;;  %v3517_v48 = vsel %vm15668_vm8, %v12030_v37, %v3516_v38  ;;  %v3772_v58 = vld [vmem:[#allocation2 + $0x70] sm:$0xe]  ;;  %v3607_v14 = vld [vmem:[#allocation2 + $0x10c] sm:$0x7] }
  0xf2   : > { %5632 = vmatprep.mubr.bf16.mxu0 %v12065_v50  ;;  %13517 = vmatpush3.bf16.msra.mxu0 %v14814_v13  ;;  %v12066_v42 = vcombine.low %v3681_v30, %v3685_v36  ;;  %v12102_v49 = vrot.slane %v3940_v44, 9  ;;  %v4020_v50 = vrot.slane %v3941_v45, 5  ;;  %v4017_v52 = vsel %vm15668_vm8, %v12101_v46, %v4016_v47  ;;  %v3606_v13 = vld [vmem:[#allocation2 + $0x108] sm:$0x8]  ;;  %v3608_v19 = vld [vmem:[#allocation2 + $0x114] sm:$0x8] }
  0xf3   : > { %v3841_v11 = vsel %vm15668_vm8, %v12075_v6, %v3840_v7  ;;  %v12077_v60 = vrot.slane %v3770_v54, 9  ;;  %v3848_v61 = vrot.slane %v3771_v55, 5  ;;  %13518 = vmatprep.subr.bf16.mxu0 %v14815_v53  ;;  %v12078_v1 = vrot.slane %v3772_v58, 9  ;;  %v3609_v20 = vld [vmem:[#allocation2 + $0x118] sm:$0x7] }
  0xf4   : > { %v12089_v23 = vcombine.low %v3841_v11, %v3845_v17  ;;  %v4021_v57 = vsel %vm15668_vm8, %v12102_v49, %v4020_v50  ;;  %v14818_v11 = vld [vmem:[%s15323_s23 + $0x3c0] sm:$0xff]   ;;  %v12055_v21 = vrot.slane %v3606_v13, 11  ;;  %v3688_v22 = vrot.slane %v3607_v14, 7  ;;  %v3435_v26 = vld [vmem:[#allocation2 + $0x108] sm:$0xe] }
  0xf5   : > { %5722 = vmatmul.mubr.bf16.gmra.mrb[84].mxu1 %v12088_v33  ;;  %v12029_v33 = vrot.slane %v3431_v28, 9  ;;  %v12114_v63 = vcombine.low %v4017_v52, %v4021_v57  ;;  %v3849_v4 = vsel %vm15668_vm8, %v12077_v60, %v3848_v61  ;;  %v3692_v24 = vrot.slane %v3609_v20, 7  ;;  %v3436_v28 = vld [vmem:[#allocation2 + $0x10c] sm:$0x1]  ;;  %v3437_v30 = vld [vmem:[#allocation2 + $0x114] sm:$0xe] }
  0xf6   : > { %5729 = vmatprep.mubr.bf16.mxu1 %v12113_v8  ;;  %v14817_v8 = vld [vmem:[%s15323_s23 + $0x400] sm:$0xff]   ;;  %13519 = vmatpush3.bf16.msra.mxu0 %v14816_v5  ;;  %v3689_v29 = vsel %vm15341_vm2, %v12055_v21, %v3688_v22  ;;  %v3520_v31 = vrot.slane %v3436_v28, 5  ;;  %v3942_v36 = vld [vmem:[#allocation2 + $0x138] sm:$0xe]  ;;  %v3943_v37 = vld [vmem:[#allocation2 + $0x13c] sm:$0x1] }
  0xf7   : > { %v3513_v43 = vsel %vm15668_vm8, %v12029_v33, %v3512_v35  ;;  %13576 = vmatprep.subr.bf16.mxu1 %v14817_v8  ;;  %v12032_v33 = vrot.slane %v3437_v30, 9  ;;  %v3944_v41 = vld [vmem:[#allocation2 + $0x144] sm:$0xe]  ;;  %v4024_v44 = vrot.slane %v3943_v37, 5  ;;  %v3775_v52 = vld [vmem:[#allocation2 + $0x110] sm:$0x1] }
  0xf8   : > { %v12042_v51 = vcombine.low %v3513_v43, %v3517_v48  ;;  %13577 = vmatpush3.bf16.msra.mxu1 %v14818_v11  ;;  %v12103_v43 = vrot.slane %v3942_v36, 9  ;;  %v12104_v46 = vrot.slane %v3944_v41, 9  ;;  %v14819_v50 = vld [vmem:[%s15323_s23 + $0x3a0] sm:$0xff]   ;;  %v3776_v55 = vld [vmem:[#allocation2 + $0x118] sm:$0xe]  ;;  %v3856_v58 = vrot.slane %v3775_v52, 5 }
  0xf9   : > { %5633 = vmatmul.mubr.bf16.gmra.mrb[88].mxu0 %v12041_v59  ;;  %v3773_v59 = vld [vmem:[#allocation2 + $0x74] sm:$0x1]  ;;  %13520 = vmatprep.subr.bf16.mxu0 %v14819_v50  ;;  %v12080_v60 = vrot.slane %v3776_v55, 9  ;;  %v14821_v5 = vld [vmem:[%s15323_s23 + $0x408] sm:$0xff]   ;;  %v3611_v11 = vld [vmem:[#allocation2 + $0x124] sm:$0x7] }
  0xfa   : > { %5640 = vmatprep.mubr.bf16.mxu0 %v12066_v42  ;;  %v3852_v3 = vrot.slane %v3773_v59, 5  ;;  %v3945_v42 = vld [vmem:[#allocation2 + $0x148] sm:$0x1]  ;;  %v4025_v49 = vsel %vm15668_vm8, %v12103_v43, %v4024_v44  ;;  %13578 = vmatprep.subr.bf16.mxu1 %v14821_v5  ;;  %v3612_v14 = vld [vmem:[#allocation2 + $0x12c] sm:$0x8]  ;;  %v3696_v21 = vrot.slane %v3611_v11, 7 }
  0xfb   : > { %v4028_v47 = vrot.slane %v3945_v42, 5  ;;  %v14822_v8 = vld [vmem:[%s15323_s23 + $0x3c8] sm:$0xff]   ;;  %v12058_v22 = vrot.slane %v3612_v14, 11  ;;  %v3442_v30 = vld [vmem:[#allocation2 + $0x130] sm:$0x1] }
  0xfc   : > { %v3853_v7 = vsel %vm15668_vm8, %v12078_v1, %v3852_v3  ;;  %v14820_v1 = vld [vmem:[%s15323_s23 + $0x360] sm:$0xff]   ;;  %13579 = vmatpush3.bf16.msra.mxu1 %v14822_v8  ;;  %v3947_v36 = vld [vmem:[#allocation2 + $0x154] sm:$0x1]  ;;  %v3780_v55 = vld [vmem:[#allocation2 + $0x130] sm:$0xe] }
  0xfd   : > { %5730 = vmatmul.mubr.bf16.gmra.mrb[88].mxu1 %v12089_v23  ;;  %v12090_v10 = vcombine.low %v3849_v4, %v3853_v7  ;;  %v12056_v23 = vrot.slane %v3608_v19, 11  ;;  %v4029_v54 = vsel %vm15668_vm8, %v12104_v46, %v4028_v47  ;;  %13521 = vmatpush3.bf16.msra.mxu0 %v14820_v1  ;;  %v3613_v19 = vld [vmem:[#allocation2 + $0x130] sm:$0x7]  ;;  %v3949_v41 = vld [vmem:[#allocation2 + $0x160] sm:$0x1]  ;;  %v4032_v43 = vrot.slane %v3947_v36, 5 }
  0xfe   : > { %5737 = vmatprep.mubr.bf16.mxu1 %v12114_v63  ;;  %v12115_v59 = vcombine.low %v4025_v49, %v4029_v54  ;;  %v4036_v46 = vrot.slane %v3949_v41, 5  ;;  %v14823_v49 = vld [vmem:[%s15323_s23 + $0x3a8] sm:$0xff]   ;;  %v3778_v50 = vld [vmem:[#allocation2 + $0x124] sm:$0xe]  ;;  %v14826_v11 = vld [vmem:[%s15323_s23 + $0x3d0] sm:$0xff]  }
  0xff   : > { %v3693_v32 = vsel %vm15341_vm2, %v12056_v23, %v3692_v24  ;;  %v3700_v23 = vrot.slane %v3613_v19, 7  ;;  %v3439_v24 = vld [vmem:[#allocation2 + $0x120] sm:$0xe]  ;;  %13522 = vmatprep.subr.bf16.mxu0 %v14823_v49  ;;  %v14824_v1 = vld [vmem:[%s15323_s23 + $0x368] sm:$0xff]   ;;  %v14827_v19 = vld [vmem:[%s15323_s23 + $0x418] sm:$0xff]  }
 0x100   : > { %v12067_v38 = vcombine.low %v3689_v29, %v3693_v32  ;;  %v3441_v29 = vld [vmem:[#allocation2 + $0x12c] sm:$0xe]  ;;  %v3951_v41 = vld [vmem:[#allocation2 + $0x16c] sm:$0x1] }
 0x101   : > { %5641 = vmatmul.mubr.bf16.gmra.mrb[92].mxu0 %v12042_v51  ;;  %v3774_v51 = vld [vmem:[#allocation2 + $0x10c] sm:$0xe]  ;;  %v12034_v32 = vrot.slane %v3441_v29, 9  ;;  %v3617_v29 = vld [vmem:[#allocation2 + $0x148] sm:$0x7] }
 0x102   : > { %5648 = vmatprep.mubr.bf16.mxu0 %v12067_v38  ;;  %v12079_v57 = vrot.slane %v3774_v51, 9  ;;  %v3779_v51 = vld [vmem:[#allocation2 + $0x128] sm:$0x1]  ;;  %13523 = vmatpush3.bf16.msra.mxu0 %v14824_v1 }
 0x104   : > { %v15683_v25 = vpop.f32.mrb[0].mxu0  ;;  %v3857_v63 = vsel %vm15668_vm8, %v12079_v57, %v3856_v58  ;;  %v12081_v57 = vrot.slane %v3778_v50, 9  ;;  %v3864_v58 = vrot.slane %v3779_v51, 5 }
 0x105   : > { %v991_v39 = vmax.f32 %v15683_v25, 0.0  ;;  %v15704_v12 = vpop.f32.mrb[1].mxu0  ;;  %5738 = vmatmul.mubr.bf16.gmra.mrb[92].mxu1 %v12090_v10  ;;  %v3610_v10 = vld [vmem:[#allocation2 + $0x120] sm:$0x8]  ;;  %v3444_v25 = vld [vmem:[#allocation2 + $0x13c] sm:$0x1] }
 0x106   : > { %v989_v27 = vmax.f32 %v15704_v12, 0.0  ;;  %v15725_v2 = vpop.f32.mrb[2].mxu0  ;;  %v3438_v12 = vld [vmem:[#allocation2 + $0x118] sm:$0x1]  ;;  %5745 = vmatprep.mubr.bf16.mxu1 %v12115_v59  ;;  %v12057_v20 = vrot.slane %v3610_v10, 11 }
 0x107   : > { %v992_v16 = vmax.f32 %v15725_v2, 0.0  ;;  %v929_v56 = vpop.f32.mrb[3].mxu0  ;;  %v3524_v35 = vrot.slane %v3438_v12, 5  ;;  %v12033_v12 = vrot.slane %v3439_v24, 9  ;;  %v3615_v24 = vld [vmem:[#allocation2 + $0x13c] sm:$0x7] }
 0x108   : > { %v990_v6 = vmax.f32 %v929_v56, 0.0  ;;  %v3777_v56 = vld [vmem:[#allocation2 + $0x11c] sm:$0x1]  ;;  %v3697_v28 = vsel %vm15341_vm2, %v12057_v20, %v3696_v21  ;;  %v3445_v2 = vld [vmem:[#allocation2 + $0x144] sm:$0xe] }
 0x109   : > { %v3525_v45 = vsel %vm15668_vm8, %v12032_v33, %v3524_v35  ;;  %v3860_v61 = vrot.slane %v3777_v56, 5  ;;  %v3532_v33 = vrot.slane %v3442_v30, 5  ;;  %v3946_v35 = vld [vmem:[#allocation2 + $0x150] sm:$0xe]  ;;  %v3781_v56 = vld [vmem:[#allocation2 + $0x134] sm:$0x1]  ;;  %v15821_v21 = vpack.c.bf16 %v992_v16, %v991_v39 }
 0x10a   : > { %v15759_v15 = vpack.c.bf16 %v990_v6, %v989_v27  ;;  %v12031_v27 = vrot.slane %v3435_v26, 9  ;;  %v3440_v26 = vld [vmem:[#allocation2 + $0x124] sm:$0x1]  ;;  %v12105_v42 = vrot.slane %v3946_v35, 9  ;;  %v3446_v16 = vld [vmem:[#allocation2 + $0x148] sm:$0x1] }
 0x10b   : > { %v3861_v4 = vsel %vm15668_vm8, %v12080_v60, %v3860_v61  ;;  %v3533_v44 = vsel %vm15668_vm8, %v12034_v32, %v3532_v33  ;;  %v12082_v60 = vrot.slane %v3780_v55, 9  ;;  %v3868_v61 = vrot.slane %v3781_v56, 5  ;;  %v3443_v32 = vld [vmem:[#allocation2 + $0x138] sm:$0xe]  ;;  %v3782_v55 = vld [vmem:[#allocation2 + $0x13c] sm:$0xe] }
 0x10c   : > { %v15754_v9 = vpop.f32.mrb[4].mxu0  ;;  %v3521_v40 = vsel %vm15668_vm8, %v12031_v27, %v3520_v31  ;;  %v12091_v7 = vcombine.low %v3857_v63, %v3861_v4  ;;  %v3528_v27 = vrot.slane %v3440_v26, 5  ;;  %v3701_v31 = vsel %vm15341_vm2, %v12058_v22, %v3700_v23  ;;  %v14828_v22 = vld [vmem:[%s15323_s23 + $0x3d8] sm:$0xff]   ;;  %v3783_v56 = vld [vmem:[#allocation2 + $0x140] sm:$0x1] }
 0x10d   : > { %v995_v17 = vmax.f32 %v15754_v9, 0.0  ;;  %v12043_v48 = vcombine.low %v3521_v40, %v3525_v45  ;;  %v15773_v53 = vpop.f32.mrb[5].mxu0  ;;  %v12068_v37 = vcombine.low %v3697_v28, %v3701_v31  ;;  %v3948_v40 = vld [vmem:[#allocation2 + $0x15c] sm:$0xe]  ;;  %v3865_v63 = vsel %vm15668_vm8, %v12081_v57, %v3864_v58  ;;  %v3614_v23 = vld [vmem:[#allocation2 + $0x138] sm:$0x8] }
 0x10e   : > { %v993_v3 = vmax.f32 %v15773_v53, 0.0  ;;  %v15784_v6 = vpop.f32.mrb[6].mxu0  ;;  %5746 = vmatmul.mubr.bf16.gmra.mrb[96].mxu1 %v12091_v7  ;;  %v3529_v38 = vsel %vm15668_vm8, %v12033_v12, %v3528_v27  ;;  %v12106_v45 = vrot.slane %v3948_v40, 9  ;;  %v3869_v5 = vsel %vm15668_vm8, %v12082_v60, %v3868_v61  ;;  %v14825_v7 = vld [vmem:[%s15323_s23 + $0x410] sm:$0xff]   ;;  %v3616_v28 = vld [vmem:[#allocation2 + $0x144] sm:$0x8] }
 0x10f   : > { %5649 = vmatmul.mubr.bf16.gmra.mrb[96].mxu0 %v12043_v48  ;;  %v996_v13 = vmax.f32 %v15784_v6, 0.0  ;;  %v12044_v47 = vcombine.low %v3529_v38, %v3533_v44  ;;  %v4033_v48 = vsel %vm15668_vm8, %v12105_v42, %v4032_v43  ;;  %v15799_v52 = vpop.f32.mrb[7].mxu0  ;;  %v12092_v10 = vcombine.low %v3865_v63, %v3869_v5  ;;  %13580 = vmatprep.subr.bf16.mxu1 %v14825_v7  ;;  %v3950_v40 = vld [vmem:[#allocation2 + $0x168] sm:$0xe]  ;;  %v3952_v44 = vld [vmem:[#allocation2 + $0x174] sm:$0xe] }
 0x110   : > { %5656 = vmatprep.mubr.bf16.mxu0 %v12068_v37  ;;  %v4037_v54 = vsel %vm15668_vm8, %v12106_v45, %v4036_v46  ;;  %v994_v4 = vmax.f32 %v15799_v52, 0.0  ;;  %13581 = vmatpush3.bf16.msra.mxu1 %v14826_v11  ;;  %v12059_v30 = vrot.slane %v3614_v23, 11  ;;  %v3704_v12 = vrot.slane %v3615_v24, 7  ;;  %v3953_v45 = vld [vmem:[#allocation2 + $0x178] sm:$0x1]  ;;  %v14831_v53 = vld [vmem:[%s15323_s23 + $0x420] sm:$0xff]  }
 0x111   : > { %v12116_v59 = vcombine.low %v4033_v48, %v4037_v54  ;;  %13582 = vmatprep.subr.bf16.mxu1 %v14827_v19  ;;  %v12060_v27 = vrot.slane %v3616_v28, 11  ;;  %v3708_v31 = vrot.slane %v3617_v29, 7  ;;  %v12035_v33 = vrot.slane %v3443_v32, 9  ;;  %v14829_v54 = vld [vmem:[%s15323_s23 + $0x3b0] sm:$0xff]   ;;  %v3784_v60 = vld [vmem:[#allocation2 + $0x148] sm:$0xe] }
 0x112   : > { %v3705_v39 = vsel %vm15341_vm2, %v12059_v30, %v3704_v12  ;;  %v3536_v35 = vrot.slane %v3444_v25, 5  ;;  %v12036_v37 = vrot.slane %v3445_v2, 9  ;;  %v3540_v38 = vrot.slane %v3446_v16, 5  ;;  %v3785_v61 = vld [vmem:[#allocation2 + $0x14c] sm:$0x1]  ;;  %13524 = vmatprep.subr.bf16.mxu0 %v14829_v54 }
 0x113   : > { %5753 = vmatprep.mubr.bf16.mxu1 %v12116_v59  ;;  %v3709_v36 = vsel %vm15341_vm2, %v12060_v27, %v3708_v31  ;;  %v12107_v46 = vrot.slane %v3950_v40, 9  ;;  %v12108_v49 = vrot.slane %v3952_v44, 9  ;;  %v4044_v50 = vrot.slane %v3953_v45, 5  ;;  %v14833_v23 = vld [vmem:[%s15323_s23 + $0x428] sm:$0xff]   ;;  %v3618_v29 = vld [vmem:[#allocation2 + $0x150] sm:$0x8] }
 0x114   : > { %v15810_v8 = vpop.f32.mrb[8].mxu0  ;;  %13583 = vmatpush3.bf16.msra.mxu1 %v14828_v22  ;;  %v12069_v42 = vcombine.low %v3705_v39, %v3709_v36  ;;  %v3537_v43 = vsel %vm15668_vm8, %v12035_v33, %v3536_v35  ;;  %v3541_v48 = vsel %vm15668_vm8, %v12036_v37, %v3540_v38  ;;  %v15840_v58 = vpack.c.bf16 %v996_v13, %v995_v17  ;;  %v14830_v13 = vld [vmem:[%s15323_s23 + $0x370] sm:$0xff]   ;;  %v14834_v28 = vld [vmem:[%s15323_s23 + $0x3e8] sm:$0xff]   ;;  %v3620_v27 = vld [vmem:[#allocation2 + $0x15c] sm:$0x8] }
 0x115   : > { %v999_v14 = vmax.f32 %v15810_v8, 0.0  ;;  %v15815_v20 = vpop.f32.mrb[9].mxu0  ;;  %v12045_v51 = vcombine.low %v3537_v43, %v3541_v48  ;;  %v4045_v59 = vsel %vm15668_vm8, %v12108_v49, %v4044_v50  ;;  %v12083_v63 = vrot.slane %v3782_v55, 9  ;;  %13525 = vmatpush3.bf16.msra.mxu0 %v14830_v13  ;;  %13584 = vmatprep.subr.bf16.mxu1 %v14831_v53  ;;  %v3619_v30 = vld [vmem:[#allocation2 + $0x154] sm:$0x7] }
 0x116   : > { %5754 = vmatmul.mubr.bf16.gmra.mrb[100].mxu1 %v12092_v10  ;;  %v997_v26 = vmax.f32 %v15815_v20, 0.0  ;;  %v14407_v57 = vpop.f32.mrb[10].mxu0  ;;  %v3872_v1 = vrot.slane %v3783_v56, 5  ;;  %v15846_v5 = vpack.c.bf16 %v994_v4, %v993_v3  ;;  %v12084_v9 = vrot.slane %v3784_v60, 9  ;;  %v14832_v4 = vld [vmem:[%s15323_s23 + $0x3e0] sm:$0xff]   ;;  %v14835_v56 = vld [vmem:[%s15323_s23 + $0x3b8] sm:$0xff]  }
 0x117   : > { %5657 = vmatmul.mubr.bf16.gmra.mrb[100].mxu0 %v12044_v47  ;;  %v4040_v47 = vrot.slane %v3951_v41, 5  ;;  %v3876_v17 = vrot.slane %v3785_v61, 5  ;;  %v1000_v10 = vmax.f32 %v14407_v57, 0.0  ;;  %v961_v19 = vpop.f32.mrb[11].mxu0  ;;  %v3621_v31 = vld [vmem:[#allocation2 + $0x160] sm:$0x7]  ;;  %13526 = vmatprep.subr.bf16.mxu0 %v14835_v56 }
 0x118   : > { %5664 = vmatprep.mubr.bf16.mxu0 %v12069_v42  ;;  %v3873_v6 = vsel %vm15668_vm8, %v12083_v63, %v3872_v1  ;;  %v998_v22 = vmax.f32 %v961_v19, 0.0  ;;  %13585 = vmatpush3.bf16.msra.mxu1 %v14832_v4  ;;  %v12061_v32 = vrot.slane %v3618_v29, 11  ;;  %v3712_v25 = vrot.slane %v3619_v30, 7  ;;  %v3447_v33 = vld [vmem:[#allocation2 + $0x150] sm:$0xe]  ;;  %v14839_v29 = vld [vmem:[%s15323_s23 + $0x438] sm:$0xff]  }
 0x119   : > { %v4041_v52 = vsel %vm15668_vm8, %v12107_v46, %v4040_v47  ;;  %v3877_v11 = vsel %vm15668_vm8, %v12084_v9, %v3876_v17  ;;  %v15862_v39 = vpack.c.bf16 %v1000_v10, %v999_v14  ;;  %13586 = vmatprep.subr.bf16.mxu1 %v14833_v23  ;;  %v12062_v2 = vrot.slane %v3620_v27, 11  ;;  %v3448_v35 = vld [vmem:[#allocation2 + $0x154] sm:$0x1]  ;;  %v3449_v38 = vld [vmem:[#allocation2 + $0x15c] sm:$0xe] }
 0x11a   : > { %v12117_v7 = vcombine.low %v4041_v52, %v4045_v59  ;;  %v12093_v3 = vcombine.low %v3873_v6, %v3877_v11  ;;  %v3716_v16 = vrot.slane %v3621_v31, 7  ;;  %v15866_v36 = vpack.c.bf16 %v998_v22, %v997_v26  ;;  %v3450_v40 = vld [vmem:[#allocation2 + $0x160] sm:$0x1]  ;;  %v3954_v44 = vld [vmem:[#allocation2 + $0x180] sm:$0xe]  ;;  %v13128_v60 = vpop.f32.mrb[0].mxu1 }
 0x11b   : > { %v3713_v37 = vsel %vm15341_vm2, %v12061_v32, %v3712_v25  ;;  %v12037_v41 = vrot.slane %v3447_v33, 9  ;;  %v3544_v42 = vrot.slane %v3448_v35, 5  ;;  %v12038_v14 = vrot.slane %v3449_v38, 9  ;;  %v3955_v45 = vld [vmem:[#allocation2 + $0x184] sm:$0x1]  ;;  %v14836_v11 = vld [vmem:[%s15323_s23 + $0x378] sm:$0xff]  }
 0x11c   : > { %5761 = vmatprep.mubr.bf16.mxu1 %v12117_v7  ;;  %v15856_v24 = vpop.f32.mrb[12].mxu0  ;;  %v3717_v8 = vsel %vm15341_vm2, %v12062_v2, %v3716_v16  ;;  %v3548_v43 = vrot.slane %v3450_v40, 5  ;;  %13587 = vmatpush3.bf16.msra.mxu1 %v14834_v28  ;;  %v3956_v26 = vld [vmem:[#allocation2 + $0x18c] sm:$0xe]  ;;  %v3957_v47 = vld [vmem:[#allocation2 + $0x190] sm:$0x1] }
 0x11d   : > { %v1003_v12 = vmax.f32 %v15856_v24, 0.0  ;;  %v12070_v46 = vcombine.low %v3713_v37, %v3717_v8  ;;  %v3545_v20 = vsel %vm15668_vm8, %v12037_v41, %v3544_v42  ;;  %v12109_v48 = vrot.slane %v3954_v44, 9  ;;  %v3786_v57 = vld [vmem:[#allocation2 + $0x154] sm:$0xe]  ;;  %v3787_v59 = vld [vmem:[#allocation2 + $0x158] sm:$0x1]  ;;  %13527 = vmatpush3.bf16.msra.mxu0 %v14836_v11 }
 0x11e   : > { %5762 = vmatmul.mubr.bf16.gmra.mrb[104].mxu1 %v12093_v3  ;;  %v4048_v49 = vrot.slane %v3955_v45, 5  ;;  %v3549_v50 = vsel %vm15668_vm8, %v12038_v14, %v3548_v43  ;;  %v4052_v52 = vrot.slane %v3957_v47, 5  ;;  %v3788_v63 = vld [vmem:[#allocation2 + $0x160] sm:$0xe]  ;;  %v3789_v1 = vld [vmem:[#allocation2 + $0x164] sm:$0x1] }
 0x11f   : > { %5665 = vmatmul.mubr.bf16.gmra.mrb[104].mxu0 %v12045_v51  ;;  %v12110_v51 = vrot.slane %v3956_v26, 9  ;;  %v12046_v54 = vcombine.low %v3545_v20, %v3549_v50  ;;  %v12085_v7 = vrot.slane %v3786_v57, 9  ;;  %v3880_v9 = vrot.slane %v3787_v59, 5  ;;  %v15884_v53 = vpop.f32.mrb[13].mxu0  ;;  %v14837_v3 = vld [vmem:[%s15323_s23 + $0x430] sm:$0xff]   ;;  %v13129_v28 = vpop.f32.mrb[1].mxu1 }
 0x120   : > { %5672 = vmatprep.mubr.bf16.mxu0 %v12070_v46  ;;  %v4049_v55 = vsel %vm15668_vm8, %v12109_v48, %v4048_v49  ;;  %v12086_v6 = vrot.slane %v3788_v63, 9  ;;  %v3884_v13 = vrot.slane %v3789_v1, 5  ;;  %v1001_v4 = vmax.f32 %v15884_v53, 0.0  ;;  %v14838_v23 = vld [vmem:[%s15323_s23 + $0x3f0] sm:$0xff]   ;;  %13588 = vmatprep.subr.bf16.mxu1 %v14837_v3  ;;  %v14411_v27 = vpop.f32.mrb[14].mxu0  ;;  %v14840_v31 = vld [vmem:[%s15323_s23 + $0x3f8] sm:$0xff]  }
 0x121   : > { %v4053_v61 = vsel %vm15668_vm8, %v12110_v51, %v4052_v52  ;;  %v3881_v10 = vsel %vm15668_vm8, %v12085_v7, %v3880_v9  ;;  %v15892_v30 = vadd.f32 %v13129_v28, %v13128_v60  ;;  %v4262_v32 = vld [vmem:[#allocation2 + $0x4c] sm:$0xe]  ;;  %v4263_v25 = vld [vmem:[#allocation2 + $0x50] sm:$0x1]  ;;  %v1004_v2 = vmax.f32 %v14411_v27, 0.0  ;;  %13589 = vmatpush3.bf16.msra.mxu1 %v14838_v23  ;;  %v15910_v7 = vpop.f32.mrb[2].mxu1 }
 0x122   : > { %v12118_v17 = vcombine.low %v4049_v55, %v4053_v61  ;;  %v3885_v19 = vsel %vm15668_vm8, %v12086_v6, %v3884_v13  ;;  %v4264_v16 = vld [vmem:[#allocation2 + $0x58] sm:$0xe]  ;;  %v4265_v33 = vld [vmem:[#allocation2 + $0x5c] sm:$0x1]  ;;  %v12143_v35 = vrot.slane %v4262_v32, 9  ;;  %v4328_v37 = vrot.slane %v4263_v25, 5  ;;  %13590 = vmatprep.subr.bf16.mxu1 %v14839_v29 }
 0x123   : > { %v12094_v22 = vcombine.low %v3881_v10, %v3885_v19  ;;  %v12144_v38 = vrot.slane %v4264_v16, 9  ;;  %v4332_v40 = vrot.slane %v4265_v33, 5  ;;  %v4094_v41 = vld [vmem:[#allocation2 + $0x48] sm:$0x8]  ;;  %v4095_v42 = vld [vmem:[#allocation2 + $0x4c] sm:$0x7]  ;;  %v15897_v8 = vpack.c.bf16 %v1004_v2, %v1003_v12 }
 0x124   : > { %5769 = vmatprep.mubr.bf16.mxu1 %v12118_v17  ;;  %v4329_v14 = vsel %vm15668_vm8, %v12143_v35, %v4328_v37  ;;  %v4096_v43 = vld [vmem:[#allocation2 + $0x54] sm:$0x8]  ;;  %v4097_v44 = vld [vmem:[#allocation2 + $0x58] sm:$0x7]  ;;  %v12119_v45 = vrot.slane %v4094_v41, 11  ;;  %v4160_v46 = vrot.slane %v4095_v42, 7 }
 0x125   : > { %v4333_v20 = vsel %vm15668_vm8, %v12144_v38, %v4332_v40  ;;  %v12120_v26 = vrot.slane %v4096_v43, 11  ;;  %v4164_v47 = vrot.slane %v4097_v44, 7  ;;  %v4599_v48 = vld [vmem:[#allocation2 + $0x78] sm:$0x8]  ;;  %v4600_v49 = vld [vmem:[#allocation2 + $0x7c] sm:$0x7]  ;;  %13591 = vmatpush3.bf16.msra.mxu1 %v14840_v31 }
 0x126   : > { %5770 = vmatmul.mubr.bf16.gmra.mrb[108].mxu1 %v12094_v22  ;;  %v12159_v50 = vcombine.low %v4329_v14, %v4333_v20  ;;  %v4161_v24 = vsel %vm15341_vm2, %v12119_v45, %v4160_v46  ;;  %v4601_v12 = vld [vmem:[#allocation2 + $0x84] sm:$0x8]  ;;  %v4602_v51 = vld [vmem:[#allocation2 + $0x88] sm:$0x7]  ;;  %v12191_v52 = vrot.slane %v4599_v48, 11 }
 0x127   : > { %5673 = vmatmul.mubr.bf16.gmra.mrb[108].mxu0 %v12046_v54  ;;  %v4665_v54 = vrot.slane %v4600_v49, 7  ;;  %v4165_v55 = vsel %vm15341_vm2, %v12120_v26, %v4164_v47  ;;  %v12192_v56 = vrot.slane %v4601_v12, 11  ;;  %v4669_v57 = vrot.slane %v4602_v51, 7  ;;  %v14841_v61 = vld [vmem:[%s15323_s23 + $0x440] sm:$0xff]   ;;  %v4431_v63 = vld [vmem:[#allocation2 + $0x78] sm:$0xe] }
 0x128   : > { %5810 = vmatprep.mubr.bf16.mxu0 %v12159_v50  ;;  %v12135_v59 = vcombine.low %v4161_v24, %v4165_v55  ;;  %v4432_v1 = vld [vmem:[#allocation2 + $0x7c] sm:$0x1]  ;;  %v4433_v17 = vld [vmem:[#allocation2 + $0x84] sm:$0xe]  ;;  %v4434_v6 = vld [vmem:[#allocation2 + $0x88] sm:$0x1]  ;;  %14444 = vmatprep.subr.bf16.mxu0 %v14841_v61 }
 0x129   : > { %v4666_v60 = vsel %vm15341_vm2, %v12191_v52, %v4665_v54  ;;  %v4670_v9 = vsel %vm15341_vm2, %v12192_v56, %v4669_v57  ;;  %v12167_v13 = vrot.slane %v4431_v63, 9  ;;  %v4497_v10 = vrot.slane %v4432_v1, 5  ;;  %v4266_v22 = vld [vmem:[#allocation2 + $0x64] sm:$0xe]  ;;  %v4267_v23 = vld [vmem:[#allocation2 + $0x68] sm:$0x1] }
 0x12a   : > { %v12207_v11 = vcombine.low %v4666_v60, %v4670_v9  ;;  %v12168_v19 = vrot.slane %v4433_v17, 9  ;;  %v4501_v3 = vrot.slane %v4434_v6, 5  ;;  %v4268_v29 = vld [vmem:[#allocation2 + $0x70] sm:$0xe]  ;;  %v4269_v27 = vld [vmem:[#allocation2 + $0x74] sm:$0x1] }
 0x12b   : > { %v4498_v28 = vsel %vm15668_vm8, %v12167_v13, %v4497_v10  ;;  %v12145_v31 = vrot.slane %v4266_v22, 9  ;;  %v4336_v32 = vrot.slane %v4267_v23, 5  ;;  %v12146_v2 = vrot.slane %v4268_v29, 9  ;;  %v4098_v33 = vld [vmem:[#allocation2 + $0x60] sm:$0x8]  ;;  %v14842_v56 = vld [vmem:[%s15323_s23 + $0x448] sm:$0xff]  }
 0x12c   : > { %5907 = vmatprep.mubr.bf16.mxu1 %v12207_v11  ;;  %v4502_v25 = vsel %vm15668_vm8, %v12168_v19, %v4501_v3  ;;  %v4340_v16 = vrot.slane %v4269_v27, 5  ;;  %v4099_v35 = vld [vmem:[#allocation2 + $0x64] sm:$0x7]  ;;  %v4100_v40 = vld [vmem:[#allocation2 + $0x6c] sm:$0x8]  ;;  %v12121_v42 = vrot.slane %v4098_v33, 11 }
 0x12d   : > { %v12183_v37 = vcombine.low %v4498_v28, %v4502_v25  ;;  %v4337_v38 = vsel %vm15668_vm8, %v12145_v31, %v4336_v32  ;;  %v4101_v41 = vld [vmem:[#allocation2 + $0x70] sm:$0x7]  ;;  %v4168_v14 = vrot.slane %v4099_v35, 7  ;;  %v12122_v44 = vrot.slane %v4100_v40, 11  ;;  %v4603_v46 = vld [vmem:[#allocation2 + $0x90] sm:$0x8] }
 0x12e   : > { %v4341_v43 = vsel %vm15668_vm8, %v12146_v2, %v4340_v16  ;;  %v4172_v45 = vrot.slane %v4101_v41, 7  ;;  %v4604_v20 = vld [vmem:[#allocation2 + $0x94] sm:$0x7]  ;;  %v4605_v48 = vld [vmem:[#allocation2 + $0x9c] sm:$0x8]  ;;  %v12193_v50 = vrot.slane %v4603_v46, 11 }
 0x12f   : > { %5811 = vmatmul.mubr.bf16.vlgmr.msra.gmra.mrb[112].mxu0 %v12135_v59  ;;  %5908 = vmatmul.mubr.bf16.vlgmr.msra.gmra.mrb[112].mxu1 %v12183_v37  ;;  %v12160_v26 = vcombine.low %v4337_v38, %v4341_v43  ;;  %v4169_v47 = vsel %vm15341_vm2, %v12121_v42, %v4168_v14  ;;  %v4606_v49 = vld [vmem:[#allocation2 + $0xa0] sm:$0x7]  ;;  %v4673_v24 = vrot.slane %v4604_v20, 7  ;;  %v12194_v51 = vrot.slane %v4605_v48, 11  ;;  %v4435_v57 = vld [vmem:[#allocation2 + $0x90] sm:$0xe] }
 0x130   : > { %14445 = vmatpush3.bf16.msra.mxu0 %v14841_v61  ;;  %v4173_v12 = vsel %vm15341_vm2, %v12122_v44, %v4172_v45  ;;  %v4677_v52 = vrot.slane %v4606_v49, 7  ;;  %v4436_v59 = vld [vmem:[#allocation2 + $0x94] sm:$0x1]  ;;  %v977_v60 = vpop.f32.mrb[15].mxu0  ;;  %v4437_v63 = vld [vmem:[#allocation2 + $0x9c] sm:$0xe] }
 0x131   : > { %5818 = vmatprep.mubr.bf16.mxu0 %v12160_v26  ;;  %v12136_v54 = vcombine.low %v4169_v47, %v4173_v12  ;;  %v4674_v55 = vsel %vm15341_vm2, %v12193_v50, %v4673_v24  ;;  %v4438_v1 = vld [vmem:[#allocation2 + $0xa0] sm:$0x1]  ;;  %v12169_v9 = vrot.slane %v4435_v57, 9  ;;  %v4505_v17 = vrot.slane %v4436_v59, 5  ;;  %14446 = vmatprep.subr.bf16.mxu0 %v14842_v56  ;;  %v13132_v19 = vpop.f32.mrb[3].mxu1  ;;  %v14843_v33 = vld [vmem:[%s15323_s23 + $0x450] sm:$0xff]  }
 0x132   : > { %v4678_v61 = vsel %vm15341_vm2, %v12194_v51, %v4677_v52  ;;  %v12170_v13 = vrot.slane %v4437_v63, 9  ;;  %v4509_v10 = vrot.slane %v4438_v1, 5  ;;  %v1002_v11 = vmax.f32 %v977_v60, 0.0  ;;  %v4270_v3 = vld [vmem:[#allocation2 + $0x7c] sm:$0xe] }
 0x133   : > { %v12208_v6 = vcombine.low %v4674_v55, %v4678_v61  ;;  %v4506_v22 = vsel %vm15668_vm8, %v12169_v9, %v4505_v17  ;;  %v15934_v23 = vadd.f32 %v13132_v19, %v15910_v7  ;;  %v4271_v28 = vld [vmem:[#allocation2 + $0x80] sm:$0x1]  ;;  %v4272_v29 = vld [vmem:[#allocation2 + $0x88] sm:$0xe]  ;;  %v4273_v27 = vld [vmem:[#allocation2 + $0x8c] sm:$0x1] }
 0x134   : > { %14447 = vmatpush3.bf16.msra.mxu0 %v14842_v56  ;;  %v4510_v31 = vsel %vm15668_vm8, %v12170_v13, %v4509_v10  ;;  %v12147_v32 = vrot.slane %v4270_v3, 9  ;;  %v4344_v25 = vrot.slane %v4271_v28, 5  ;;  %v12148_v2 = vrot.slane %v4272_v29, 9  ;;  %v4102_v16 = vld [vmem:[#allocation2 + $0x78] sm:$0x8]  ;;  %v13192_v17 = vpop.f32.mrb[16].mxu0 }
 0x135   : > { %5915 = vmatprep.mubr.bf16.mxu1 %v12208_v6  ;;  %v12184_v35 = vcombine.low %v4506_v22, %v4510_v31  ;;  %v4348_v37 = vrot.slane %v4273_v27, 5  ;;  %v4103_v38 = vld [vmem:[#allocation2 + $0x7c] sm:$0x7]  ;;  %v4104_v40 = vld [vmem:[#allocation2 + $0x84] sm:$0x8]  ;;  %v12123_v41 = vrot.slane %v4102_v16, 11  ;;  %v15941_v7 = vpack.c.bf16 %v1002_v11, %v1001_v4  ;;  %14448 = vmatprep.subr.bf16.mxu0 %v14843_v33 }
 0x136   : > { %v4345_v42 = vsel %vm15668_vm8, %v12147_v32, %v4344_v25  ;;  %v4105_v14 = vld [vmem:[#allocation2 + $0x88] sm:$0x7]  ;;  %v4176_v43 = vrot.slane %v4103_v38, 7  ;;  %v12124_v44 = vrot.slane %v4104_v40, 11  ;;  %v4607_v45 = vld [vmem:[#allocation2 + $0xa8] sm:$0x8] }
 0x137   : > { %5819 = vmatmul.mubr.bf16.gmra.mrb[116].mxu0 %v12136_v54  ;;  %5916 = vmatmul.mubr.bf16.gmra.mrb[116].mxu1 %v12184_v35  ;;  %v4349_v46 = vsel %vm15668_vm8, %v12148_v2, %v4348_v37  ;;  %v4180_v20 = vrot.slane %v4105_v14, 7  ;;  %v4608_v26 = vld [vmem:[#allocation2 + $0xac] sm:$0x7]  ;;  %v4609_v47 = vld [vmem:[#allocation2 + $0xb4] sm:$0x8]  ;;  %v12195_v48 = vrot.slane %v4607_v45, 11 }
 0x138   : > { %14449 = vmatpush3.bf16.msra.mxu0 %v14843_v33  ;;  %v12161_v53 = vcombine.low %v4345_v42, %v4349_v46  ;;  %v4177_v4 = vsel %vm15341_vm2, %v12123_v41, %v4176_v43  ;;  %v4610_v49 = vld [vmem:[#allocation2 + $0xb8] sm:$0x7]  ;;  %v4681_v50 = vrot.slane %v4608_v26, 7  ;;  %v12196_v24 = vrot.slane %v4609_v47, 11  ;;  %v4439_v52 = vld [vmem:[#allocation2 + $0xa8] sm:$0xe] }
 0x139   : > { %v4181_v12 = vsel %vm15341_vm2, %v12124_v44, %v4180_v20  ;;  %v4685_v51 = vrot.slane %v4610_v49, 7  ;;  %v13134_v54 = vpop.f32.mrb[4].mxu1  ;;  %v4440_v57 = vld [vmem:[#allocation2 + $0xac] sm:$0x1]  ;;  %v4441_v59 = vld [vmem:[#allocation2 + $0xb4] sm:$0xe] }
 0x13a   : > { %5826 = vmatprep.mubr.bf16.mxu0 %v12161_v53  ;;  %v12137_v55 = vcombine.low %v4177_v4, %v4181_v12  ;;  %v4682_v56 = vsel %vm15341_vm2, %v12195_v48, %v4681_v50  ;;  %v4442_v60 = vld [vmem:[#allocation2 + $0xb8] sm:$0x1]  ;;  %v12171_v63 = vrot.slane %v4439_v52, 9  ;;  %v4513_v1 = vrot.slane %v4440_v57, 5  ;;  %v13135_v6 = vpop.f32.mrb[5].mxu1  ;;  %v13193_v3 = vpop.f32.mrb[17].mxu0 }
 0x13b   : > { %v4686_v61 = vsel %vm15341_vm2, %v12196_v24, %v4685_v51  ;;  %v12172_v9 = vrot.slane %v4441_v59, 9  ;;  %v14844_v13 = vld [vmem:[%s15323_s23 + $0x458] sm:$0xff]   ;;  %v4517_v11 = vrot.slane %v4442_v60, 5  ;;  %v15956_v19 = vadd.f32 %v13135_v6, %v13134_v54  ;;  %v13137_v22 = vpop.f32.mrb[6].mxu1  ;;  %v4274_v28 = vld [vmem:[#allocation2 + $0x94] sm:$0xe] }
 0x13c   : > { %v12209_v10 = vcombine.low %v4682_v56, %v4686_v61  ;;  %v14845_v29 = vld [vmem:[%s15323_s23 + $0x4c0] sm:$0xff]   ;;  %v4514_v27 = vsel %vm15668_vm8, %v12171_v63, %v4513_v1  ;;  %v13194_v31 = vadd.f32 %v13193_v3, %v13192_v17  ;;  %v13195_v32 = vpop.f32.mrb[18].mxu0  ;;  %v13138_v25 = vpop.f32.mrb[7].mxu1  ;;  %v4275_v2 = vld [vmem:[#allocation2 + $0x98] sm:$0x1]  ;;  %14450 = vmatprep.subr.bf16.mxu0 %v14844_v13  ;;  %v12149_v40 = vrot.slane %v4274_v28, 9 }
 0x13d   : > { %v4276_v16 = vld [vmem:[#allocation2 + $0xa0] sm:$0xe]  ;;  %v4518_v33 = vsel %vm15668_vm8, %v12172_v9, %v4517_v11  ;;  %v15963_v35 = vadd.f32 %v13138_v25, %v13137_v22  ;;  %v13196_v37 = vpop.f32.mrb[19].mxu0  ;;  %v4277_v38 = vld [vmem:[#allocation2 + $0xa4] sm:$0x1]  ;;  %v4352_v41 = vrot.slane %v4275_v2, 5  ;;  %14451 = vmatpush3.bf16.msra.mxu0 %v14844_v13  ;;  %13656 = vmatprep.subr.bf16.mxu1 %v14845_v29 }
 0x13e   : > { %5923 = vmatprep.mubr.bf16.mxu1 %v12209_v10  ;;  %v13140_v42 = vpop.f32.mrb[8].mxu1  ;;  %v12185_v14 = vcombine.low %v4514_v27, %v4518_v33  ;;  %v15966_v43 = vadd.f32 %v13194_v31, %v15892_v30  ;;  %v13197_v44 = vadd.f32 %v13196_v37, %v13195_v32  ;;  %v12150_v45 = vrot.slane %v4276_v16, 9  ;;  %v4106_v46 = vld [vmem:[#allocation2 + $0x90] sm:$0x8]  ;;  %v4107_v20 = vld [vmem:[#allocation2 + $0x94] sm:$0x7] }
 0x13f   : > { %5827 = vmatmul.mubr.bf16.gmra.mrb[120].mxu0 %v12137_v55  ;;  %v13198_v26 = vpop.f32.mrb[20].mxu0  ;;  %v4353_v47 = vsel %vm15668_vm8, %v12149_v40, %v4352_v41  ;;  %v4356_v48 = vrot.slane %v4277_v38, 5  ;;  %v4108_v53 = vld [vmem:[#allocation2 + $0x9c] sm:$0x8]  ;;  %v4109_v4 = vld [vmem:[#allocation2 + $0xa0] sm:$0x7] }
 0x140   : > { %v12125_v49 = vrot.slane %v4106_v46, 11  ;;  %5924 = vmatmul.mubr.bf16.gmra.mrb[120].mxu1 %v12185_v14  ;;  %v15971_v50 = vadd.f32 %v13197_v44, %v15934_v23  ;;  %v4184_v30 = vrot.slane %v4107_v20, 7  ;;  %v12126_v24 = vrot.slane %v4108_v53, 11  ;;  %v4611_v51 = vld [vmem:[#allocation2 + $0xc0] sm:$0x8]  ;;  %v13141_v63 = vpop.f32.mrb[9].mxu1 }
 0x141   : > { %v4188_v12 = vrot.slane %v4109_v4, 7  ;;  %v14846_v52 = vld [vmem:[%s15323_s23 + $0x480] sm:$0xff]   ;;  %v4357_v54 = vsel %vm15668_vm8, %v12150_v45, %v4356_v48  ;;  %v4613_v56 = vld [vmem:[#allocation2 + $0xcc] sm:$0x8]  ;;  %v4614_v57 = vld [vmem:[#allocation2 + $0xd0] sm:$0x7]  ;;  %v15980_v28 = vadd.f32 %v13141_v63, %v13140_v42 }
 0x142   : > { %v4612_v55 = vld [vmem:[#allocation2 + $0xc4] sm:$0x7]  ;;  %v12162_v59 = vcombine.low %v4353_v47, %v4357_v54  ;;  %v4185_v60 = vsel %vm15341_vm2, %v12125_v49, %v4184_v30  ;;  %v12197_v23 = vrot.slane %v4611_v51, 11  ;;  %13657 = vmatpush3.bf16.msra.mxu1 %v14846_v52  ;;  %v12198_v17 = vrot.slane %v4613_v56, 11  ;;  %v4443_v13 = vld [vmem:[#allocation2 + $0xc0] sm:$0xe] }
 0x143   : > { %v4189_v61 = vsel %vm15341_vm2, %v12126_v24, %v4188_v12  ;;  %v4689_v9 = vrot.slane %v4612_v55, 7  ;;  %v4693_v6 = vrot.slane %v4614_v57, 7  ;;  %v13199_v10 = vpop.f32.mrb[21].mxu0  ;;  %v4444_v11 = vld [vmem:[#allocation2 + $0xc4] sm:$0x1]  ;;  %v12173_v32 = vrot.slane %v4443_v13, 9 }
 0x144   : > { %v12138_v1 = vcombine.low %v4185_v60, %v4189_v61  ;;  %5834 = vmatprep.mubr.bf16.mxu0 %v12162_v59  ;;  %v4445_v3 = vld [vmem:[#allocation2 + $0xcc] sm:$0xe]  ;;  %v4446_v22 = vld [vmem:[#allocation2 + $0xd0] sm:$0x1]  ;;  %v13200_v29 = vadd.f32 %v13199_v10, %v13198_v26  ;;  %v4521_v25 = vrot.slane %v4444_v11, 5  ;;  %v13143_v40 = vpop.f32.mrb[10].mxu1 }
 0x145   : > { %v4690_v27 = vsel %vm15341_vm2, %v12197_v23, %v4689_v9  ;;  %v4694_v31 = vsel %vm15341_vm2, %v12198_v17, %v4693_v6  ;;  %v12174_v16 = vrot.slane %v4445_v3, 9  ;;  %v4525_v33 = vrot.slane %v4446_v22, 5  ;;  %v13201_v41 = vpop.f32.mrb[22].mxu0  ;;  %v4278_v42 = vld [vmem:[#allocation2 + $0x13c] sm:$0xe]  ;;  %v13144_v45 = vpop.f32.mrb[11].mxu1 }
 0x146   : > { %v12210_v2 = vcombine.low %v4690_v27, %v4694_v31  ;;  %v15987_v37 = vadd.f32 %v13200_v29, %v15956_v19  ;;  %v4522_v38 = vsel %vm15668_vm8, %v12173_v32, %v4521_v25  ;;  %v4279_v14 = vld [vmem:[#allocation2 + $0x140] sm:$0x1]  ;;  %v13202_v46 = vpop.f32.mrb[23].mxu0  ;;  %v4280_v20 = vld [vmem:[#allocation2 + $0x148] sm:$0xe]  ;;  %v15993_v48 = vadd.f32 %v13144_v45, %v13143_v40  ;;  %v13146_v4 = vpop.f32.mrb[12].mxu1 }
 0x147   : > { %5835 = vmatmul.mubr.bf16.gmra.mrb[124].mxu0 %v12138_v1  ;;  %v4526_v44 = vsel %vm15668_vm8, %v12174_v16, %v4525_v33  ;;  %v4281_v26 = vld [vmem:[#allocation2 + $0x14c] sm:$0x1]  ;;  %v13203_v19 = vadd.f32 %v13202_v46, %v13201_v41  ;;  %v12151_v53 = vrot.slane %v4278_v42, 9  ;;  %v4110_v49 = vld [vmem:[#allocation2 + $0x138] sm:$0x8]  ;;  %v4360_v24 = vrot.slane %v4279_v14, 5 }
 0x148   : > { %5931 = vmatprep.mubr.bf16.mxu1 %v12210_v2  ;;  %v12186_v47 = vcombine.low %v4522_v38, %v4526_v44  ;;  %v4111_v30 = vld [vmem:[#allocation2 + $0x13c] sm:$0x7]  ;;  %v12152_v12 = vrot.slane %v4280_v20, 9  ;;  %v4364_v51 = vrot.slane %v4281_v26, 5  ;;  %v4112_v52 = vld [vmem:[#allocation2 + $0x144] sm:$0x8] }
 0x149   : > { %v12127_v54 = vrot.slane %v4110_v49, 11  ;;  %v15996_v55 = vadd.f32 %v13203_v19, %v15963_v35  ;;  %v4113_v56 = vld [vmem:[#allocation2 + $0x148] sm:$0x7]  ;;  %v4192_v57 = vrot.slane %v4111_v30, 7  ;;  %v12128_v59 = vrot.slane %v4112_v52, 11  ;;  %v14847_v29 = vld [vmem:[%s15323_s23 + $0x460] sm:$0xff]  }
 0x14a   : > { %5932 = vmatmul.mubr.bf16.gmra.mrb[124].mxu1 %v12186_v47  ;;  %v4615_v60 = vld [vmem:[#allocation2 + $0x168] sm:$0x8]  ;;  %v4361_v61 = vsel %vm15668_vm8, %v12151_v53, %v4360_v24  ;;  %v4365_v23 = vsel %vm15668_vm8, %v12152_v12, %v4364_v51  ;;  %v4196_v63 = vrot.slane %v4113_v56, 7  ;;  %v4616_v1 = vld [vmem:[#allocation2 + $0x16c] sm:$0x7]  ;;  %v13147_v27 = vpop.f32.mrb[13].mxu1  ;;  %14452 = vmatprep.subr.bf16.mxu0 %v14847_v29 }
 0x14b   : > { %v4617_v9 = vld [vmem:[#allocation2 + $0x174] sm:$0x8]  ;;  %v12199_v17 = vrot.slane %v4615_v60, 11  ;;  %v12163_v6 = vcombine.low %v4361_v61, %v4365_v23  ;;  %v4193_v35 = vsel %vm15341_vm2, %v12127_v54, %v4192_v57  ;;  %v4618_v13 = vld [vmem:[#allocation2 + $0x178] sm:$0x7]  ;;  %v4697_v10 = vrot.slane %v4616_v1, 7  ;;  %14453 = vmatpush3.bf16.msra.mxu0 %v14847_v29 }
 0x14c   : > { %v12200_v11 = vrot.slane %v4617_v9, 11  ;;  %v4197_v3 = vsel %vm15341_vm2, %v12128_v59, %v4196_v63  ;;  %v4701_v22 = vrot.slane %v4618_v13, 7  ;;  %v14848_v31 = vld [vmem:[%s15323_s23 + $0x4c8] sm:$0xff]   ;;  %v16010_v2 = vadd.f32 %v13147_v27, %v13146_v4  ;;  %v4449_v38 = vld [vmem:[#allocation2 + $0x174] sm:$0xe]  ;;  %v13149_v45 = vpop.f32.mrb[14].mxu1 }
 0x14d   : > { %5842 = vmatprep.mubr.bf16.mxu0 %v12163_v6  ;;  %v12139_v32 = vcombine.low %v4193_v35, %v4197_v3  ;;  %v4698_v25 = vsel %vm15341_vm2, %v12199_v17, %v4697_v10  ;;  %v4447_v16 = vld [vmem:[#allocation2 + $0x168] sm:$0xe]  ;;  %v4448_v33 = vld [vmem:[#allocation2 + $0x16c] sm:$0x1]  ;;  %v4450_v41 = vld [vmem:[#allocation2 + $0x178] sm:$0x1]  ;;  %13658 = vmatprep.subr.bf16.mxu1 %v14848_v31 }
 0x14e   : > { %v4702_v40 = vsel %vm15341_vm2, %v12200_v11, %v4701_v22  ;;  %v12175_v42 = vrot.slane %v4447_v16, 9  ;;  %v4529_v14 = vrot.slane %v4448_v33, 5  ;;  %v12176_v44 = vrot.slane %v4449_v38, 9  ;;  %v13150_v26 = vpop.f32.mrb[15].mxu1  ;;  %v13204_v53 = vpop.f32.mrb[24].mxu0  ;;  %v14849_v4 = vld [vmem:[%s15323_s23 + $0x488] sm:$0xff]  }
 0x14f   : > { %5843 = vmatmul.mubr.bf16.gmra.mrb[128].mxu0 %v12139_v32  ;;  %v12211_v46 = vcombine.low %v4698_v25, %v4702_v40  ;;  %v4533_v20 = vrot.slane %v4450_v41, 5  ;;  %v16016_v19 = vadd.f32 %v13150_v26, %v13149_v45  ;;  %v13152_v30 = vpop.f32.mrb[16].mxu1  ;;  %v13205_v24 = vpop.f32.mrb[25].mxu0  ;;  %v4282_v12 = vld [vmem:[#allocation2 + $0x154] sm:$0xe]  ;;  %13659 = vmatpush3.bf16.msra.mxu1 %v14849_v4  ;;  %v14850_v6 = vld [vmem:[%s15323_s23 + $0x468] sm:$0xff]  }
 0x150   : > { %v4530_v47 = vsel %vm15668_vm8, %v12175_v42, %v4529_v14  ;;  %v4283_v51 = vld [vmem:[#allocation2 + $0x158] sm:$0x1]  ;;  %v13206_v54 = vadd.f32 %v13205_v24, %v13204_v53  ;;  %v13153_v56 = vpop.f32.mrb[17].mxu1  ;;  %v13207_v57 = vpop.f32.mrb[26].mxu0  ;;  %v4284_v59 = vld [vmem:[#allocation2 + $0x160] sm:$0xe]  ;;  %14454 = vmatprep.subr.bf16.mxu0 %v14850_v6 }
 0x151   : > { %5939 = vmatprep.mubr.bf16.mxu1 %v12211_v46  ;;  %v4534_v49 = vsel %vm15668_vm8, %v12176_v44, %v4533_v20  ;;  %v4285_v60 = vld [vmem:[#allocation2 + $0x164] sm:$0x1]  ;;  %v16021_v61 = vadd.f32 %v13153_v56, %v13152_v30  ;;  %v13155_v23 = vpop.f32.mrb[18].mxu1  ;;  %v13208_v63 = vpop.f32.mrb[27].mxu0  ;;  %v12153_v1 = vrot.slane %v4282_v12, 9  ;;  %v4368_v9 = vrot.slane %v4283_v51, 5  ;;  %14455 = vmatpush3.bf16.msra.mxu0 %v14850_v6 }
 0x152   : > { %v12187_v52 = vcombine.low %v4530_v47, %v4534_v49  ;;  %v12154_v17 = vrot.slane %v4284_v59, 9  ;;  %v16025_v35 = vadd.f32 %v13206_v54, %v15980_v28  ;;  %v13209_v13 = vadd.f32 %v13208_v63, %v13207_v57  ;;  %v13156_v10 = vpop.f32.mrb[19].mxu1  ;;  %v4114_v3 = vld [vmem:[#allocation2 + $0x150] sm:$0x8]  ;;  %v4115_v22 = vld [vmem:[#allocation2 + $0x154] sm:$0x7] }
 0x153   : > { %v4372_v11 = vrot.slane %v4285_v60, 5  ;;  %v16027_v29 = vadd.f32 %v13156_v10, %v13155_v23  ;;  %v4369_v27 = vsel %vm15668_vm8, %v12153_v1, %v4368_v9  ;;  %v13158_v31 = vpop.f32.mrb[20].mxu1  ;;  %v4116_v32 = vld [vmem:[#allocation2 + $0x15c] sm:$0x8]  ;;  %v4117_v25 = vld [vmem:[#allocation2 + $0x160] sm:$0x7] }
 0x154   : > { %5940 = vmatmul.mubr.bf16.gmra.mrb[128].mxu1 %v12187_v52  ;;  %v12129_v16 = vrot.slane %v4114_v3, 11  ;;  %v16032_v33 = vadd.f32 %v13209_v13, %v15993_v48  ;;  %v4200_v38 = vrot.slane %v4115_v22, 7  ;;  %v12130_v40 = vrot.slane %v4116_v32, 11  ;;  %v4619_v41 = vld [vmem:[#allocation2 + $0x180] sm:$0x8]  ;;  %v13159_v4 = vpop.f32.mrb[21].mxu1 }
 0x155   : > { %v4373_v28 = vsel %vm15668_vm8, %v12154_v17, %v4372_v11  ;;  %v4620_v42 = vld [vmem:[#allocation2 + $0x184] sm:$0x7]  ;;  %v4204_v44 = vrot.slane %v4117_v25, 7  ;;  %v4621_v45 = vld [vmem:[#allocation2 + $0x18c] sm:$0x8]  ;;  %v12201_v20 = vrot.slane %v4619_v41, 11  ;;  %v16040_v30 = vadd.f32 %v13159_v4, %v13158_v31 }
 0x156   : > { %v12164_v14 = vcombine.low %v4369_v27, %v4373_v28  ;;  %v4622_v46 = vld [vmem:[#allocation2 + $0x190] sm:$0x7]  ;;  %v4201_v26 = vsel %vm15341_vm2, %v12129_v16, %v4200_v38  ;;  %v4705_v47 = vrot.slane %v4620_v42, 7  ;;  %v12202_v48 = vrot.slane %v4621_v45, 11  ;;  %v4451_v24 = vld [vmem:[#allocation2 + $0x180] sm:$0xe] }
 0x157   : > { %v4709_v53 = vrot.slane %v4622_v46, 7  ;;  %v4205_v49 = vsel %vm15341_vm2, %v12130_v40, %v4204_v44  ;;  %v4452_v12 = vld [vmem:[#allocation2 + $0x184] sm:$0x1]  ;;  %v4453_v56 = vld [vmem:[#allocation2 + $0x18c] sm:$0xe]  ;;  %v12177_v59 = vrot.slane %v4451_v24, 9 }
 0x158   : > { %5850 = vmatprep.mubr.bf16.mxu0 %v12164_v14  ;;  %v12140_v51 = vcombine.low %v4201_v26, %v4205_v49  ;;  %v4706_v52 = vsel %vm15341_vm2, %v12201_v20, %v4705_v47  ;;  %v4454_v57 = vld [vmem:[#allocation2 + $0x190] sm:$0x1]  ;;  %v4537_v63 = vrot.slane %v4452_v12, 5  ;;  %v12178_v1 = vrot.slane %v4453_v56, 9  ;;  %v13161_v17 = vpop.f32.mrb[22].mxu1  ;;  %v13210_v3 = vpop.f32.mrb[28].mxu0 }
 0x159   : > { %v4710_v54 = vsel %vm15341_vm2, %v12202_v48, %v4709_v53  ;;  %v14851_v60 = vld [vmem:[%s15323_s23 + $0x4d0] sm:$0xff]   ;;  %v4541_v9 = vrot.slane %v4454_v57, 5  ;;  %v13162_v11 = vpop.f32.mrb[23].mxu1  ;;  %v14853_v22 = vld [vmem:[%s15323_s23 + $0x4d8] sm:$0xff]   ;;  %v13211_v25 = vpop.f32.mrb[29].mxu0 }
 0x15a   : > { %v12212_v23 = vcombine.low %v4706_v52, %v4710_v54  ;;  %5851 = vmatmul.mubr.bf16.gmra.mrb[132].mxu0 %v12140_v51  ;;  %13660 = vmatprep.subr.bf16.mxu1 %v14851_v60  ;;  %v4538_v6 = vsel %vm15668_vm8, %v12177_v59, %v4537_v63  ;;  %v14852_v10 = vld [vmem:[%s15323_s23 + $0x490] sm:$0xff]   ;;  %v16053_v31 = vadd.f32 %v13162_v11, %v13161_v17  ;;  %v13164_v32 = vpop.f32.mrb[24].mxu1  ;;  %v13213_v38 = vpop.f32.mrb[30].mxu0  ;;  %v14854_v40 = vld [vmem:[%s15323_s23 + $0x498] sm:$0xff]   ;;  %v4286_v45 = vld [vmem:[#allocation2 + $0x16c] sm:$0xe] }
 0x15b   : > { %v4542_v13 = vsel %vm15668_vm8, %v12178_v1, %v4541_v9  ;;  %13661 = vmatpush3.bf16.msra.mxu1 %v14852_v10  ;;  %v13212_v16 = vadd.f32 %v13211_v25, %v13210_v3  ;;  %v13165_v28 = vpop.f32.mrb[25].mxu1  ;;  %v14855_v41 = vld [vmem:[%s15323_s23 + $0x470] sm:$0xff]   ;;  %v13214_v44 = vpop.f32.mrb[31].mxu0  ;;  %v4288_v48 = vld [vmem:[#allocation2 + $0x178] sm:$0xe]  ;;  %v12155_v4 = vrot.slane %v4286_v45, 9 }
 0x15c   : > { %5947 = vmatprep.mubr.bf16.mxu1 %v12212_v23  ;;  %v12188_v27 = vcombine.low %v4538_v6, %v4542_v13  ;;  %v16057_v42 = vadd.f32 %v13165_v28, %v13164_v32  ;;  %13662 = vmatprep.subr.bf16.mxu1 %v14853_v22  ;;  %v13167_v14 = vpop.f32.mrb[26].mxu1  ;;  %v4287_v46 = vld [vmem:[#allocation2 + $0x170] sm:$0x1]  ;;  %v13215_v26 = vadd.f32 %v13214_v44, %v13213_v38  ;;  %v4289_v53 = vld [vmem:[#allocation2 + $0x17c] sm:$0x1]  ;;  %v12156_v12 = vrot.slane %v4288_v48, 9 }
 0x15d   : > { %v16060_v20 = vadd.f32 %v13212_v16, %v16010_v2  ;;  %v13168_v47 = vpop.f32.mrb[27].mxu1  ;;  %14456 = vmatprep.subr.bf16.mxu0 %v14855_v41  ;;  %v4376_v24 = vrot.slane %v4287_v46, 5  ;;  %v4380_v51 = vrot.slane %v4289_v53, 5  ;;  %v4118_v54 = vld [vmem:[#allocation2 + $0x168] sm:$0x8] }
 0x15e   : > { %5948 = vmatmul.mubr.bf16.gmra.mrb[132].mxu1 %v12188_v27  ;;  %v16062_v49 = vadd.f32 %v13168_v47, %v13167_v14  ;;  %v13170_v52 = vpop.f32.mrb[28].mxu1  ;;  %14457 = vmatpush3.bf16.msra.mxu0 %v14855_v41  ;;  %v16065_v56 = vadd.f32 %v13215_v26, %v16016_v19  ;;  %v4119_v2 = vld [vmem:[#allocation2 + $0x16c] sm:$0x7]  ;;  %v4120_v57 = vld [vmem:[#allocation2 + $0x174] sm:$0x8]  ;;  %v12131_v63 = vrot.slane %v4118_v54, 11 }
 0x15f   : > { %13663 = vmatpush3.bf16.msra.mxu1 %v14854_v40  ;;  %v4121_v59 = vld [vmem:[#allocation2 + $0x178] sm:$0x7]  ;;  %v4377_v60 = vsel %vm15668_vm8, %v12155_v4, %v4376_v24  ;;  %v4381_v23 = vsel %vm15668_vm8, %v12156_v12, %v4380_v51  ;;  %v4208_v1 = vrot.slane %v4119_v2, 7  ;;  %v4623_v9 = vld [vmem:[#allocation2 + $0x198] sm:$0x8]  ;;  %v12132_v13 = vrot.slane %v4120_v57, 11 }
 0x160   : > { %v4624_v17 = vld [vmem:[#allocation2 + $0x19c] sm:$0x7]  ;;  %v12165_v6 = vcombine.low %v4377_v60, %v4381_v23  ;;  %v4212_v10 = vrot.slane %v4121_v59, 7  ;;  %v4625_v19 = vld [vmem:[#allocation2 + $0x1a4] sm:$0x8]  ;;  %v12203_v22 = vrot.slane %v4623_v9, 11 }
 0x161   : > { %v4626_v11 = vld [vmem:[#allocation2 + $0x1a8] sm:$0x7]  ;;  %v4209_v3 = vsel %vm15341_vm2, %v12131_v63, %v4208_v1  ;;  %v4713_v27 = vrot.slane %v4624_v17, 7  ;;  %v12204_v32 = vrot.slane %v4625_v19, 11  ;;  %v13171_v25 = vpop.f32.mrb[29].mxu1  ;;  %v14856_v41 = vld [vmem:[%s15323_s23 + $0x4e0] sm:$0xff]  }
 0x162   : > { %5858 = vmatprep.mubr.bf16.mxu0 %v12165_v6  ;;  %v4213_v16 = vsel %vm15341_vm2, %v12132_v13, %v4212_v10  ;;  %v4717_v28 = vrot.slane %v4626_v11, 7  ;;  %v16075_v38 = vadd.f32 %v13171_v25, %v13170_v52  ;;  %v4455_v40 = vld [vmem:[#allocation2 + $0x198] sm:$0xe]  ;;  %v4456_v45 = vld [vmem:[#allocation2 + $0x19c] sm:$0x1]  ;;  %13664 = vmatprep.subr.bf16.mxu1 %v14856_v41  ;;  %v13173_v24 = vpop.f32.mrb[30].mxu1 }
 0x163   : > { %v12141_v14 = vcombine.low %v4209_v3, %v4213_v16  ;;  %v4714_v44 = vsel %vm15341_vm2, %v12203_v22, %v4713_v27  ;;  %v4457_v46 = vld [vmem:[#allocation2 + $0x1a4] sm:$0xe]  ;;  %v4458_v26 = vld [vmem:[#allocation2 + $0x1a8] sm:$0x1]  ;;  %v12179_v48 = vrot.slane %v4455_v40, 9  ;;  %v4545_v53 = vrot.slane %v4456_v45, 5 }
 0x164   : > { %v4718_v47 = vsel %vm15341_vm2, %v12204_v32, %v4717_v28  ;;  %v12180_v4 = vrot.slane %v4457_v46, 9  ;;  %v4549_v51 = vrot.slane %v4458_v26, 5  ;;  %v14857_v52 = vld [vmem:[%s15323_s23 + $0x4a0] sm:$0xff]   ;;  %v13174_v2 = vpop.f32.mrb[31].mxu1  ;;  %v13216_v57 = vpop.f32.mrb[32].mxu0  ;;  %v14858_v1 = vld [vmem:[%s15323_s23 + $0x4e8] sm:$0xff]  }
 0x165   : > { %5859 = vmatmul.mubr.bf16.gmra.mrb[136].mxu0 %v12141_v14  ;;  %v12213_v12 = vcombine.low %v4714_v44, %v4718_v47  ;;  %v4546_v54 = vsel %vm15668_vm8, %v12179_v48, %v4545_v53  ;;  %13665 = vmatpush3.bf16.msra.mxu1 %v14857_v52  ;;  %v16087_v60 = vadd.f32 %v13174_v2, %v13173_v24  ;;  %v13217_v23 = vpop.f32.mrb[33].mxu0  ;;  %v13256_v63 = vpop.f32.mrb[32].mxu1  ;;  %v14859_v9 = vld [vmem:[%s15323_s23 + $0x4a8] sm:$0xff]   ;;  %v4290_v22 = vld [vmem:[#allocation2 + $0x184] sm:$0xe] }
 0x166   : > { %v4550_v59 = vsel %vm15668_vm8, %v12180_v4, %v4549_v51  ;;  %v13218_v6 = vadd.f32 %v13217_v23, %v13216_v57  ;;  %v13219_v13 = vpop.f32.mrb[34].mxu0  ;;  %v13257_v10 = vpop.f32.mrb[33].mxu1  ;;  %13666 = vmatprep.subr.bf16.mxu1 %v14858_v1  ;;  %v4291_v27 = vld [vmem:[#allocation2 + $0x188] sm:$0x1]  ;;  %v4292_v28 = vld [vmem:[#allocation2 + $0x190] sm:$0xe] }
 0x167   : > { %5955 = vmatprep.mubr.bf16.mxu1 %v12213_v12  ;;  %v12189_v17 = vcombine.low %v4546_v54, %v4550_v59  ;;  %v13258_v19 = vadd.f32 %v13257_v10, %v13256_v63  ;;  %v13220_v11 = vpop.f32.mrb[35].mxu0  ;;  %v13259_v3 = vpop.f32.mrb[34].mxu1  ;;  %v4293_v40 = vld [vmem:[#allocation2 + $0x194] sm:$0x1]  ;;  %v12157_v41 = vrot.slane %v4290_v22, 9  ;;  %v4384_v45 = vrot.slane %v4291_v27, 5 }
 0x168   : > { %v16092_v32 = vadd.f32 %v13218_v6, %v16021_v61  ;;  %v13221_v25 = vadd.f32 %v13220_v11, %v13219_v13  ;;  %v13260_v16 = vpop.f32.mrb[35].mxu1  ;;  %v12158_v46 = vrot.slane %v4292_v28, 9  ;;  %v4122_v26 = vld [vmem:[#allocation2 + $0x180] sm:$0x8]  ;;  %v4123_v47 = vld [vmem:[#allocation2 + $0x184] sm:$0x7] }
 0x169   : > { %5956 = vmatmul.mubr.bf16.gmra.mrb[136].mxu1 %v12189_v17  ;;  %v16095_v14 = vadd.f32 %v13258_v19, %v15966_v43  ;;  %v13261_v44 = vadd.f32 %v13260_v16, %v13259_v3  ;;  %v4388_v53 = vrot.slane %v4293_v40, 5  ;;  %v4124_v61 = vld [vmem:[#allocation2 + $0x18c] sm:$0x8]  ;;  %v4125_v4 = vld [vmem:[#allocation2 + $0x190] sm:$0x7]  ;;  %v12133_v24 = vrot.slane %v4122_v26, 11 }
 0x16a   : > { %13667 = vmatpush3.bf16.msra.mxu1 %v14859_v9  ;;  %v16098_v48 = vadd.f32 %v13221_v25, %v16027_v29  ;;  %v4385_v43 = vsel %vm15668_vm8, %v12157_v41, %v4384_v45  ;;  %v4216_v51 = vrot.slane %v4123_v47, 7  ;;  %v12134_v52 = vrot.slane %v4124_v61, 11  ;;  %v4627_v54 = vld [vmem:[#allocation2 + $0x1b0] sm:$0x8]  ;;  %v4628_v2 = vld [vmem:[#allocation2 + $0x1b4] sm:$0x7] }
 0x16b   : > { %v16101_v12 = vadd.f32 %v13261_v44, %v15971_v50  ;;  %v4389_v57 = vsel %vm15668_vm8, %v12158_v46, %v4388_v53  ;;  %v4220_v29 = vrot.slane %v4125_v4, 7  ;;  %v4629_v59 = vld [vmem:[#allocation2 + $0x1bc] sm:$0x8]  ;;  %v4630_v23 = vld [vmem:[#allocation2 + $0x1c0] sm:$0x7]  ;;  %v12205_v63 = vrot.slane %v4627_v54, 11 }
 0x16c   : > { %v12166_v1 = vcombine.low %v4385_v43, %v4389_v57  ;;  %v4217_v50 = vsel %vm15341_vm2, %v12133_v24, %v4216_v51  ;;  %v4721_v9 = vrot.slane %v4628_v2, 7  ;;  %v12206_v17 = vrot.slane %v4629_v59, 11  ;;  %v14860_v10 = vld [vmem:[%s15323_s23 + $0x478] sm:$0xff]   ;;  %v4459_v19 = vld [vmem:[#allocation2 + $0x1b0] sm:$0xe]  ;;  %v13222_v47 = vpop.f32.mrb[36].mxu0 }
 0x16d   : > { %v4221_v6 = vsel %vm15341_vm2, %v12134_v52, %v4220_v29  ;;  %v4725_v13 = vrot.slane %v4630_v23, 7  ;;  %v4460_v11 = vld [vmem:[#allocation2 + $0x1b4] sm:$0x1]  ;;  %v4461_v27 = vld [vmem:[#allocation2 + $0x1bc] sm:$0xe]  ;;  %v12181_v16 = vrot.slane %v4459_v19, 9  ;;  %14458 = vmatprep.subr.bf16.mxu0 %v14860_v10 }
 0x16e   : > { %5866 = vmatprep.mubr.bf16.mxu0 %v12166_v1  ;;  %v12142_v3 = vcombine.low %v4217_v50, %v4221_v6  ;;  %v4722_v22 = vsel %vm15341_vm2, %v12205_v63, %v4721_v9  ;;  %v4462_v25 = vld [vmem:[#allocation2 + $0x1c0] sm:$0x1]  ;;  %v4553_v28 = vrot.slane %v4460_v11, 5  ;;  %v12182_v41 = vrot.slane %v4461_v27, 9  ;;  %v14861_v26 = vld [vmem:[%s15323_s23 + $0x4f0] sm:$0xff]   ;;  %14459 = vmatpush3.bf16.msra.mxu0 %v14860_v10  ;;  %v13223_v4 = vpop.f32.mrb[37].mxu0 }
 0x16f   : > { %v4726_v40 = vsel %vm15341_vm2, %v12206_v17, %v4725_v13  ;;  %v4557_v44 = vrot.slane %v4462_v25, 5  ;;  %v14862_v61 = vld [vmem:[%s15323_s23 + $0x4b0] sm:$0xff]   ;;  %v13262_v24 = vpop.f32.mrb[36].mxu1  ;;  %v14863_v43 = vld [vmem:[%s15323_s23 + $0x4f8] sm:$0xff]   ;;  %13668 = vmatprep.subr.bf16.mxu1 %v14861_v26  ;;  %v13224_v52 = vadd.f32 %v13223_v4, %v13222_v47  ;;  %v13225_v54 = vpop.f32.mrb[38].mxu0  ;;  %v14865_v63 = vld [vmem:[%s15323_s23 + $0x540] sm:$0xff]  }
 0x170   : > { %5867 = vmatmul.mubr.bf16.gmra.mrb[140].mxu0 %v12142_v3  ;;  %v12214_v45 = vcombine.low %v4722_v22, %v4726_v40  ;;  %v4554_v46 = vsel %vm15668_vm8, %v12181_v16, %v4553_v28  ;;  %v13263_v2 = vpop.f32.mrb[37].mxu1  ;;  %13669 = vmatpush3.bf16.msra.mxu1 %v14862_v61  ;;  %v13226_v29 = vpop.f32.mrb[39].mxu0  ;;  %v14864_v23 = vld [vmem:[%s15323_s23 + $0x4b8] sm:$0xff]   ;;  %v4768_v6 = vld [vmem:[#allocation2 + $0x80] sm:$0x1] }
 0x171   : > { %v4558_v53 = vsel %vm15668_vm8, %v12182_v41, %v4557_v44  ;;  %v13264_v57 = vadd.f32 %v13263_v2, %v13262_v24  ;;  %v13265_v59 = vpop.f32.mrb[38].mxu1  ;;  %v16126_v1 = vadd.f32 %v13224_v52, %v16040_v30  ;;  %13670 = vmatprep.subr.bf16.mxu1 %v14863_v43  ;;  %v13227_v50 = vadd.f32 %v13226_v29, %v13225_v54  ;;  %v4767_v17 = vld [vmem:[#allocation2 + $0x7c] sm:$0xe]  ;;  %v4769_v19 = vld [vmem:[#allocation2 + $0x88] sm:$0xe]  ;;  %v14867_v4 = vld [vmem:[%s15323_s23 + $0x500] sm:$0xff]  }
 0x172   : > { %5963 = vmatprep.mubr.bf16.mxu1 %v12214_v45  ;;  %v12190_v51 = vcombine.low %v4554_v46, %v4558_v53  ;;  %v13266_v9 = vpop.f32.mrb[39].mxu1  ;;  %v4770_v11 = vld [vmem:[#allocation2 + $0x8c] sm:$0x1]  ;;  %v12215_v3 = vrot.slane %v4767_v17, 9  ;;  %v4833_v22 = vrot.slane %v4768_v6, 5  ;;  %13720 = vmatprep.subr.bf16.mxu0 %v14865_v63  ;;  %v12216_v25 = vrot.slane %v4769_v19, 9 }
 0x173   : > { %v16129_v13 = vadd.f32 %v13264_v57, %v15987_v37  ;;  %v13267_v10 = vadd.f32 %v13266_v9, %v13265_v59  ;;  %v16132_v27 = vadd.f32 %v13227_v50, %v16053_v31  ;;  %v4837_v30 = vrot.slane %v4770_v11, 5  ;;  %v4771_v16 = vld [vmem:[#allocation2 + $0x94] sm:$0xe]  ;;  %v4772_v28 = vld [vmem:[#allocation2 + $0x98] sm:$0x1]  ;;  %v13228_v9 = vpop.f32.mrb[40].mxu0 }
 0x174   : > { %5964 = vmatmul.mubr.bf16.gmra.mrb[140].mxu1 %v12190_v51  ;;  %v4834_v37 = vsel %vm15668_vm8, %v12215_v3, %v4833_v22  ;;  %v4773_v41 = vld [vmem:[#allocation2 + $0xa0] sm:$0xe]  ;;  %v4774_v44 = vld [vmem:[#allocation2 + $0xa4] sm:$0x1]  ;;  %v12217_v45 = vrot.slane %v4771_v16, 9  ;;  %v4841_v46 = vrot.slane %v4772_v28, 5 }
 0x175   : > { %13671 = vmatpush3.bf16.msra.mxu1 %v14864_v23  ;;  %v16135_v40 = vadd.f32 %v13267_v10, %v15996_v55  ;;  %v4838_v31 = vsel %vm15668_vm8, %v12216_v25, %v4837_v30  ;;  %v12218_v26 = vrot.slane %v4773_v41, 9  ;;  %v4845_v47 = vrot.slane %v4774_v44, 5  ;;  %v6173_v53 = vld [vmem:[#allocation2] sm:$0x8]  ;;  %v6174_v61 = vld [vmem:[#allocation2 + $0x4] sm:$0x7] }
 0x176   : > { %v12231_v24 = vcombine.low %v4834_v37, %v4838_v31  ;;  %v4842_v55 = vsel %vm15668_vm8, %v12217_v45, %v4841_v46  ;;  %v6175_v43 = vld [vmem:[#allocation2 + $0xc] sm:$0x8]  ;;  %v6176_v51 = vld [vmem:[#allocation2 + $0x10] sm:$0x7]  ;;  %v12463_v52 = vrot.slane %v6173_v53, 11  ;;  %v6239_v54 = vrot.slane %v6174_v61, 7 }
 0x177   : > { %v4846_v2 = vsel %vm15668_vm8, %v12218_v26, %v4845_v47  ;;  %v12464_v57 = vrot.slane %v6175_v43, 11  ;;  %v6243_v29 = vrot.slane %v6176_v51, 7  ;;  %v14866_v63 = vld [vmem:[#allocation2] ss:$12 sps:$4 sm:$0xff]   ;;  %v13268_v17 = vpop.f32.mrb[40].mxu1  ;;  %v13229_v10 = vpop.f32.mrb[41].mxu0 }
 0x178   : > { %14460 = vmatprep.mubr.bf16.mxu0 %v12231_v24  ;;  %v12232_v59 = vcombine.low %v4842_v55, %v4846_v2  ;;  %v6240_v23 = vsel %vm15341_vm2, %v12463_v52, %v6239_v54  ;;  %v14868_v19 = vld [vmem:[%s15323_s23 + $0x548] sm:$0xff]   ;;  %v13230_v11 = vadd.f32 %v13229_v10, %v13228_v9  ;;  %v13231_v3 = vpop.f32.mrb[42].mxu0  ;;  %v13269_v22 = vpop.f32.mrb[41].mxu1  ;;  %v14870_v41 = vld [vmem:[%s15323_s23 + $0x550] sm:$0xff]   ;;  %v4777_v26 = vld [vmem:[#allocation2 + $0xb8] sm:$0xe] }
 0x179   : > { %v6244_v50 = vsel %vm15341_vm2, %v12464_v57, %v6243_v29  ;;  %v13270_v25 = vadd.f32 %v13269_v22, %v13268_v17  ;;  %v14869_v30 = vld [vmem:[%s15323_s23 + $0x508] sm:$0xff]   ;;  %v13232_v16 = vpop.f32.mrb[43].mxu0  ;;  %v13271_v28 = vpop.f32.mrb[42].mxu1  ;;  %v4776_v31 = vld [vmem:[#allocation2 + $0xb0] sm:$0x1]  ;;  %v12220_v55 = vrot.slane %v4777_v26, 9 }
 0x17a   : > { %14461 = vmatmul.mubr.bf16.vlgmr.msra.gmra.mrb[144].mxu0 %v12232_v59  ;;  %v12479_v6 = vcombine.low %v6240_v23, %v6244_v50  ;;  %v4775_v37 = vld [vmem:[#allocation2 + $0xac] sm:$0xe]  ;;  %v16154_v44 = vadd.f32 %v13230_v11, %v16057_v42  ;;  %v13233_v45 = vadd.f32 %v13232_v16, %v13231_v3  ;;  %v13272_v46 = vpop.f32.mrb[43].mxu1  ;;  %v4849_v24 = vrot.slane %v4776_v31, 5  ;;  %v4779_v43 = vld [vmem:[#allocation2 + $0xc4] sm:$0xe] }
 0x17b   : > { %13721 = vmatpush3.bf16.msra.mxu0 %v14867_v4  ;;  %v12219_v47 = vrot.slane %v4775_v37, 9  ;;  %v16157_v53 = vadd.f32 %v13270_v25, %v16025_v35  ;;  %v13273_v61 = vadd.f32 %v13272_v46, %v13271_v28  ;;  %v4778_v4 = vld [vmem:[#allocation2 + $0xbc] sm:$0x1]  ;;  %v4780_v42 = vld [vmem:[#allocation2 + $0xc8] sm:$0x1]  ;;  %v12221_v2 = vrot.slane %v4779_v43, 9 }
 0x17c   : > { %8007 = vmatprep.mubr.bf16.mxu1 %v12479_v6  ;;  %13722 = vmatprep.subr.bf16.mxu0 %v14868_v19  ;;  %v16160_v51 = vadd.f32 %v13233_v45, %v16062_v49  ;;  %v4853_v52 = vrot.slane %v4778_v4, 5  ;;  %v4781_v54 = vld [vmem:[#allocation2 + $0xd0] sm:$0xe]  ;;  %v4782_v29 = vld [vmem:[#allocation2 + $0xd4] sm:$0x1]  ;;  %v4857_v59 = vrot.slane %v4780_v42, 5 }
 0x17d   : > { %8008 = vmatmul.mubr.bf16.vlgmr.msra.gmra.mrb[144].mxu1 %v14866_v63  ;;  %v16163_v57 = vadd.f32 %v13273_v61, %v16032_v33  ;;  %v4850_v35 = vsel %vm15668_vm8, %v12219_v47, %v4849_v24  ;;  %v12222_v23 = vrot.slane %v4781_v54, 9  ;;  %v6177_v63 = vld [vmem:[#allocation2 + $0x18] sm:$0x8]  ;;  %v4861_v50 = vrot.slane %v4782_v29, 5  ;;  %v6178_v9 = vld [vmem:[#allocation2 + $0x1c] sm:$0x7] }
 0x17e   : > { %v4854_v49 = vsel %vm15668_vm8, %v12220_v55, %v4853_v52  ;;  %v6179_v17 = vld [vmem:[#allocation2 + $0x24] sm:$0x8]  ;;  %v12465_v6 = vrot.slane %v6177_v63, 11  ;;  %v4858_v33 = vsel %vm15668_vm8, %v12221_v2, %v4857_v59  ;;  %v6180_v19 = vld [vmem:[#allocation2 + $0x28] sm:$0x7]  ;;  %v6247_v11 = vrot.slane %v6178_v9, 7 }
 0x17f   : > { %13723 = vmatpush3.bf16.msra.mxu0 %v14869_v30  ;;  %v12233_v10 = vcombine.low %v4850_v35, %v4854_v49  ;;  %v12466_v3 = vrot.slane %v6179_v17, 11  ;;  %v4862_v22 = vsel %vm15668_vm8, %v12222_v23, %v4861_v50  ;;  %v6251_v25 = vrot.slane %v6180_v19, 7  ;;  %v14872_v30 = vld [vmem:[%s15323_s23 + $0x510] sm:$0xff]   ;;  %v14871_v37 = vld [vmem:[#allocation2 + $0x18] ss:$12 sps:$4 sm:$0xff]   ;;  %v13234_v45 = vpop.f32.mrb[44].mxu0 }
 0x180   : > { %13724 = vmatprep.subr.bf16.mxu0 %v14870_v41  ;;  %v12234_v16 = vcombine.low %v4858_v33, %v4862_v22  ;;  %v6248_v28 = vsel %vm15341_vm2, %v12465_v6, %v6247_v11  ;;  %v13274_v46 = vpop.f32.mrb[44].mxu1  ;;  %v13235_v26 = vpop.f32.mrb[45].mxu0  ;;  %v14873_v47 = vld [vmem:[%s15323_s23 + $0x558] sm:$0xff]   ;;  %v4783_v2 = vld [vmem:[#allocation2 + $0x16c] sm:$0xe]  ;;  %v14875_v9 = vld [vmem:[%s15323_s23 + $0x560] sm:$0xff]  }
 0x181   : > { %14464 = vmatprep.mubr.bf16.mxu0 %v12233_v10  ;;  %v6252_v41 = vsel %vm15341_vm2, %v12466_v3, %v6251_v25  ;;  %v13275_v61 = vpop.f32.mrb[45].mxu1  ;;  %v14874_v4 = vld [vmem:[%s15323_s23 + $0x518] sm:$0xff]   ;;  %v13236_v24 = vadd.f32 %v13235_v26, %v13234_v45  ;;  %v13237_v55 = vpop.f32.mrb[46].mxu0  ;;  %v4784_v35 = vld [vmem:[#allocation2 + $0x170] sm:$0x1]  ;;  %v12223_v50 = vrot.slane %v4783_v2, 9 }
 0x182   : > { %14465 = vmatmul.mubr.bf16.gmra.mrb[148].mxu0 %v12234_v16  ;;  %v12480_v31 = vcombine.low %v6248_v28, %v6252_v41  ;;  %v13276_v43 = vadd.f32 %v13275_v61, %v13274_v46  ;;  %v13277_v52 = vpop.f32.mrb[46].mxu1  ;;  %v13238_v42 = vpop.f32.mrb[47].mxu0  ;;  %v4785_v63 = vld [vmem:[#allocation2 + $0x178] sm:$0xe]  ;;  %v4786_v49 = vld [vmem:[#allocation2 + $0x17c] sm:$0x1] }
 0x183   : > { %13725 = vmatpush3.bf16.msra.mxu0 %v14872_v30  ;;  %v13278_v54 = vpop.f32.mrb[47].mxu1  ;;  %v16181_v29 = vadd.f32 %v13236_v24, %v16075_v38  ;;  %v13239_v23 = vadd.f32 %v13238_v42, %v13237_v55  ;;  %v4865_v6 = vrot.slane %v4784_v35, 5  ;;  %v12224_v10 = vrot.slane %v4785_v63, 9  ;;  %v4787_v19 = vld [vmem:[#allocation2 + $0x184] sm:$0xe]  ;;  %v13320_v45 = vpop.f32.mrb[48].mxu0 }
 0x184   : > { %8015 = vmatprep.mubr.bf16.mxu1 %v12480_v31  ;;  %13726 = vmatprep.subr.bf16.mxu0 %v14873_v47  ;;  %v16184_v59 = vadd.f32 %v13276_v43, %v16060_v20  ;;  %v13279_v17 = vadd.f32 %v13278_v54, %v13277_v52  ;;  %v4869_v33 = vrot.slane %v4786_v49, 5  ;;  %v14877_v11 = vld [vmem:[%s15323_s23 + $0x520] sm:$0xff]   ;;  %v4788_v38 = vld [vmem:[#allocation2 + $0x188] sm:$0x1]  ;;  %v4789_v22 = vld [vmem:[#allocation2 + $0x190] sm:$0xe] }
 0x185   : > { %8016 = vmatmul.mubr.bf16.gmra.mrb[148].mxu1 %v14871_v37  ;;  %v16189_v3 = vadd.f32 %v13239_v23, %v16087_v60  ;;  %v4790_v25 = vld [vmem:[#allocation2 + $0x194] sm:$0x1]  ;;  %v4866_v30 = vsel %vm15668_vm8, %v12223_v50, %v4865_v6  ;;  %v12225_v28 = vrot.slane %v4787_v19, 9  ;;  %v6181_v37 = vld [vmem:[#allocation2 + $0x30] sm:$0x8]  ;;  %v4873_v60 = vrot.slane %v4788_v38, 5 }
 0x186   : > { %v16192_v20 = vadd.f32 %v13279_v17, %v16065_v56  ;;  %v4870_v16 = vsel %vm15668_vm8, %v12224_v10, %v4869_v33  ;;  %v6182_v41 = vld [vmem:[#allocation2 + $0x34] sm:$0x7]  ;;  %v12226_v31 = vrot.slane %v4789_v22, 9  ;;  %v4877_v26 = vrot.slane %v4790_v25, 5  ;;  %v6183_v47 = vld [vmem:[#allocation2 + $0x3c] sm:$0x8] }
 0x187   : > { %13727 = vmatpush3.bf16.msra.mxu0 %v14874_v4  ;;  %v12235_v46 = vcombine.low %v4866_v30, %v4870_v16  ;;  %v13280_v61 = vpop.f32.mrb[48].mxu1  ;;  %v6184_v56 = vld [vmem:[#allocation2 + $0x40] sm:$0x7]  ;;  %v12467_v4 = vrot.slane %v6181_v37, 11  ;;  %v6255_v24 = vrot.slane %v6182_v41, 7  ;;  %v12468_v55 = vrot.slane %v6183_v47, 11 }
 0x188   : > { %13728 = vmatprep.subr.bf16.mxu0 %v14875_v9  ;;  %v13321_v43 = vpop.f32.mrb[49].mxu0  ;;  %v4874_v52 = vsel %vm15668_vm8, %v12225_v28, %v4873_v60  ;;  %v4878_v42 = vsel %vm15668_vm8, %v12226_v31, %v4877_v26  ;;  %v6259_v54 = vrot.slane %v6184_v56, 7  ;;  %v14878_v35 = vld [vmem:[%s15323_s23 + $0x568] sm:$0xff]   ;;  %v14876_v49 = vld [vmem:[#allocation2 + $0x30] ss:$12 sps:$4 sm:$0xff]   ;;  %v13281_v6 = vpop.f32.mrb[49].mxu1 }
 0x189   : > { %14468 = vmatprep.mubr.bf16.mxu0 %v12235_v46  ;;  %v13322_v2 = vadd.f32 %v13321_v43, %v13320_v45  ;;  %v12236_v23 = vcombine.low %v4874_v52, %v4878_v42  ;;  %v6256_v63 = vsel %vm15341_vm2, %v12467_v4, %v6255_v24  ;;  %v13323_v10 = vpop.f32.mrb[50].mxu0  ;;  %v13282_v33 = vadd.f32 %v13281_v6, %v13280_v61  ;;  %v14879_v19 = vld [vmem:[%s15323_s23 + $0x528] sm:$0xff]   ;;  %v14880_v22 = vld [vmem:[%s15323_s23 + $0x570] sm:$0xff]   ;;  %v4791_v16 = vld [vmem:[#allocation2 + $0x19c] sm:$0xe] }
 0x18a   : > { %v6260_v50 = vsel %vm15341_vm2, %v12468_v55, %v6259_v54  ;;  %v13324_v38 = vpop.f32.mrb[51].mxu0  ;;  %v4792_v28 = vld [vmem:[#allocation2 + $0x1a0] sm:$0x1]  ;;  %v14882_v37 = vld [vmem:[%s15323_s23 + $0x530] sm:$0xff]   ;;  %v4793_v45 = vld [vmem:[#allocation2 + $0x1a8] sm:$0xe] }
 0x18b   : > { %13729 = vmatpush3.bf16.msra.mxu0 %v14877_v11  ;;  %v16208_v9 = vadd.f32 %v13322_v2, %v16095_v14  ;;  %v12481_v17 = vcombine.low %v6256_v63, %v6260_v50  ;;  %v13283_v11 = vpop.f32.mrb[50].mxu1  ;;  %v13325_v25 = vadd.f32 %v13324_v38, %v13323_v10  ;;  %v16214_v41 = vadd.f32 %v13282_v33, %v16092_v32  ;;  %v4794_v46 = vld [vmem:[#allocation2 + $0x1ac] sm:$0x1]  ;;  %v4795_v61 = vld [vmem:[#allocation2 + $0x1b4] sm:$0xe] }
 0x18c   : > { %13730 = vmatprep.subr.bf16.mxu0 %v14878_v35  ;;  %14469 = vmatmul.mubr.bf16.gmra.mrb[152].mxu0 %v12236_v23  ;;  %v13284_v30 = vpop.f32.mrb[51].mxu1  ;;  %v12227_v60 = vrot.slane %v4791_v16, 9  ;;  %v4881_v31 = vrot.slane %v4792_v28, 5  ;;  %v12228_v26 = vrot.slane %v4793_v45, 9  ;;  %v4885_v47 = vrot.slane %v4794_v46, 5  ;;  %v14883_v16 = vld [vmem:[%s15323_s23 + $0x5c0] sm:$0xff]  }
 0x18d   : > { %8023 = vmatprep.mubr.bf16.mxu1 %v12481_v17  ;;  %v13285_v14 = vadd.f32 %v13284_v30, %v13283_v11  ;;  %v4796_v56 = vld [vmem:[#allocation2 + $0x1b8] sm:$0x1]  ;;  %v16217_v4 = vadd.f32 %v13325_v25, %v16101_v12  ;;  %v4797_v55 = vld [vmem:[#allocation2 + $0x1c0] sm:$0xe]  ;;  %v4798_v43 = vld [vmem:[#allocation2 + $0x1c4] sm:$0x1]  ;;  %13784 = vmatprep.subr.bf16.mxu1 %v14883_v16 }
 0x18e   : > { %8024 = vmatmul.mubr.bf16.gmra.mrb[152].mxu1 %v14876_v49  ;;  %v4882_v32 = vsel %vm15668_vm8, %v12227_v60, %v4881_v31  ;;  %v12229_v52 = vrot.slane %v4795_v61, 9  ;;  %v4889_v42 = vrot.slane %v4796_v56, 5  ;;  %v4886_v54 = vsel %vm15668_vm8, %v12228_v26, %v4885_v47  ;;  %v6185_v23 = vld [vmem:[#allocation2 + $0x48] sm:$0x8]  ;;  %v6186_v63 = vld [vmem:[#allocation2 + $0x4c] sm:$0x7] }
 0x18f   : > { %13731 = vmatpush3.bf16.msra.mxu0 %v14879_v19  ;;  %v16220_v24 = vadd.f32 %v13285_v14, %v16098_v48  ;;  %v12230_v2 = vrot.slane %v4797_v55, 9  ;;  %v4893_v35 = vrot.slane %v4798_v43, 5  ;;  %v12237_v49 = vcombine.low %v4882_v32, %v4886_v54  ;;  %v6187_v48 = vld [vmem:[#allocation2 + $0x54] sm:$0x8]  ;;  %v6188_v50 = vld [vmem:[#allocation2 + $0x58] sm:$0x7] }
 0x190   : > { %13732 = vmatprep.subr.bf16.mxu0 %v14880_v22  ;;  %v4890_v12 = vsel %vm15668_vm8, %v12229_v52, %v4889_v42  ;;  %v12469_v17 = vrot.slane %v6185_v23, 11  ;;  %v6263_v6 = vrot.slane %v6186_v63, 7  ;;  %v12470_v33 = vrot.slane %v6187_v48, 11  ;;  %v14881_v22 = vld [vmem:[#allocation2 + $0x48] ss:$12 sps:$4 sm:$0xff]   ;;  %v13326_v28 = vpop.f32.mrb[52].mxu0 }
 0x191   : > { %v4894_v10 = vsel %vm15668_vm8, %v12230_v2, %v4893_v35  ;;  %v6267_v19 = vrot.slane %v6188_v50, 7  ;;  %14472 = vmatprep.mubr.bf16.mxu0 %v12237_v49  ;;  %v13286_v62 = vpop.f32.mrb[52].mxu1  ;;  %v13327_v14 = vpop.f32.mrb[53].mxu0  ;;  %v14885_v45 = vld [vmem:[%s15323_s23 + $0x578] sm:$0xff]   ;;  %v14887_v54 = vld [vmem:[#allocation2 + $0x48] ss:$12 sps:$4 sm:$0xff]  }
 0x192   : > { %v12238_v11 = vcombine.low %v4890_v12, %v4894_v10  ;;  %v6264_v38 = vsel %vm15341_vm2, %v12469_v17, %v6263_v6  ;;  %v13328_v46 = vadd.f32 %v13327_v14, %v13326_v28  ;;  %v13287_v60 = vpop.f32.mrb[53].mxu1  ;;  %v13329_v31 = vpop.f32.mrb[54].mxu0  ;;  %v14886_v47 = vld [vmem:[%s15323_s23 + $0x538] sm:$0xff]   ;;  %v6189_v2 = vld [vmem:[#allocation2 + $0xf0] sm:$0x8]  ;;  %v14888_v16 = vld [vmem:[%s15323_s23 + $0x640] sm:$0xff]  }
 0x193   : > { %13733 = vmatpush3.bf16.msra.mxu0 %v14882_v37  ;;  %v6268_v25 = vsel %vm15341_vm2, %v12470_v33, %v6267_v19  ;;  %v14884_v37 = vld [vmem:[%s15323_s23 + $0x580] sm:$0xff]   ;;  %v13288_v26 = vadd.f32 %v13287_v60, %v13286_v62  ;;  %v13289_v61 = vpop.f32.mrb[54].mxu1  ;;  %v13330_v56 = vpop.f32.mrb[55].mxu0  ;;  %v6190_v35 = vld [vmem:[#allocation2 + $0xf4] sm:$0x7]  ;;  %v12471_v49 = vrot.slane %v6189_v2, 11 }
 0x194   : > { %14473 = vmatmul.mubr.bf16.gmra.mrb[156].mxu0 %v12238_v11  ;;  %v12482_v30 = vcombine.low %v6264_v38, %v6268_v25  ;;  %13734 = vmatprep.subr.bf16.mxu0 %v14885_v45  ;;  %v13290_v32 = vpop.f32.mrb[55].mxu1  ;;  %v16239_v55 = vadd.f32 %v13328_v46, %v16129_v13  ;;  %v13331_v52 = vadd.f32 %v13330_v56, %v13329_v31  ;;  %v6191_v23 = vld [vmem:[#allocation2 + $0xfc] sm:$0x8]  ;;  %v6192_v63 = vld [vmem:[#allocation2 + $0x100] sm:$0x7]  ;;  %v6271_v12 = vrot.slane %v6190_v35, 7 }
 0x195   : > { %13785 = vmatpush3.bf16.msra.mxu1 %v14884_v37  ;;  %v16242_v43 = vadd.f32 %v13288_v26, %v16126_v1  ;;  %v13291_v42 = vadd.f32 %v13290_v32, %v13289_v61  ;;  %8104 = vmatprep.mubr.bf16.mxu0 %v14887_v54  ;;  %v12472_v13 = vrot.slane %v6191_v23, 11  ;;  %v6275_v50 = vrot.slane %v6192_v63, 7  ;;  %v6341_v17 = vld [vmem:[#allocation2 + $0x4] sm:$0xc]  ;;  %v6342_v1 = vld [vmem:[#allocation2 + $0x8] sm:$0x3] }
 0x196   : > { %8031 = vmatprep.mubr.bf16.mxu1 %v12482_v30  ;;  %v16248_v6 = vadd.f32 %v13331_v52, %v16135_v40  ;;  %v6272_v10 = vsel %vm15341_vm2, %v12471_v49, %v6271_v12  ;;  %v6343_v33 = vld [vmem:[#allocation2 + $0x10] sm:$0xc]  ;;  %v6344_v19 = vld [vmem:[#allocation2 + $0x14] sm:$0x3]  ;;  %v12487_v11 = vrot.slane %v6341_v17, 10  ;;  %v6407_v38 = vrot.slane %v6342_v1, 6 }
 0x197   : > { %8032 = vmatmul.mubr.bf16.gmra.mrb[156].mxu1 %v14881_v22  ;;  %13735 = vmatpush3.bf16.msra.mxu0 %v14886_v47  ;;  %v16245_v48 = vadd.f32 %v13291_v42, %v16132_v27  ;;  %v6276_v27 = vsel %vm15341_vm2, %v12472_v13, %v6275_v50  ;;  %v12488_v22 = vrot.slane %v6343_v33, 10  ;;  %v6411_v25 = vrot.slane %v6344_v19, 6  ;;  %v13332_v28 = vpop.f32.mrb[56].mxu0  ;;  %v14889_v62 = vld [vmem:[#allocation2 + $0xf0] ss:$12 sps:$4 sm:$0xff]   ;;  %v14890_v45 = vld [vmem:[%s15323_s23 + $0x600] sm:$0xff]  }
 0x198   : > { %v12483_v30 = vcombine.low %v6272_v10, %v6276_v27  ;;  %v6408_v40 = vsel %vm15360_vm5, %v12487_v11, %v6407_v38  ;;  %13848 = vmatprep.subr.bf16.mxu0 %v14888_v16  ;;  %v13292_v46 = vpop.f32.mrb[56].mxu1  ;;  %v14891_v60 = vld [vmem:[%s15323_s23 + $0x5c8] sm:$0xff]   ;;  %v13333_v31 = vpop.f32.mrb[57].mxu0  ;;  %v14896_v12 = vld [vmem:[%s15323_s23 + $0x5d0] sm:$0xff]   ;;  %v6196_v10 = vld [vmem:[#allocation2 + $0x118] sm:$0x7] }
 0x199   : > { %v6412_v37 = vsel %vm15360_vm5, %v12488_v22, %v6411_v25  ;;  %v14892_v26 = vld [vmem:[%s15323_s23 + $0x588] sm:$0xff]   ;;  %v13334_v47 = vadd.f32 %v13333_v31, %v13332_v28  ;;  %v13293_v61 = vpop.f32.mrb[57].mxu1  ;;  %v13335_v56 = vpop.f32.mrb[58].mxu0  ;;  %13786 = vmatprep.subr.bf16.mxu1 %v14891_v60  ;;  %v6195_v1 = vld [vmem:[#allocation2 + $0x114] sm:$0x8]  ;;  %v6283_v38 = vrot.slane %v6196_v10, 7 }
 0x19a   : > { %8039 = vmatprep.mubr.bf16.mxu1 %v12483_v30  ;;  %v12503_v14 = vcombine.low %v6408_v40, %v6412_v37  ;;  %v14894_v32 = vld [vmem:[%s15323_s23 + $0x648] sm:$0xff]   ;;  %v13294_v52 = vadd.f32 %v13293_v61, %v13292_v46  ;;  %v13295_v42 = vpop.f32.mrb[58].mxu1  ;;  %v13336_v54 = vpop.f32.mrb[59].mxu0  ;;  %13787 = vmatpush3.bf16.msra.mxu1 %v14892_v26  ;;  %v12474_v11 = vrot.slane %v6195_v1, 11  ;;  %v6345_v27 = vld [vmem:[#allocation2 + $0x1c] sm:$0xc] }
 0x19b   : > { %v14893_v2 = vld [vmem:[#allocation2 + $0x60] ss:$12 sps:$4 sm:$0xff]   ;;  %v13337_v35 = vadd.f32 %v13336_v54, %v13335_v56  ;;  %v13296_v23 = vpop.f32.mrb[59].mxu1  ;;  %v6193_v63 = vld [vmem:[#allocation2 + $0x108] sm:$0x8]  ;;  %v16265_v13 = vadd.f32 %v13334_v47, %v16157_v53  ;;  %13788 = vmatprep.subr.bf16.mxu1 %v14896_v12  ;;  %v12489_v16 = vrot.slane %v6345_v27, 10 }
 0x19c   : > { %8105 = vmatmul.mubr.bf16.vlgmr.msra.gmra.mrb[160].mxu0 %v12503_v14  ;;  %v6194_v49 = vld [vmem:[#allocation2 + $0x10c] sm:$0x7]  ;;  %v16268_v50 = vadd.f32 %v13294_v52, %v16154_v44  ;;  %v13297_v17 = vadd.f32 %v13296_v23, %v13295_v42  ;;  %v12473_v33 = vrot.slane %v6193_v63, 11  ;;  %v6346_v22 = vld [vmem:[#allocation2 + $0x20] sm:$0x3]  ;;  %v6284_v37 = vsel %vm15341_vm2, %v12474_v11, %v6283_v38  ;;  %v13338_v26 = vpop.f32.mrb[60].mxu0 }
 0x19d   : > { %13849 = vmatpush3.bf16.msra.mxu0 %v14890_v45  ;;  %8112 = vmatprep.mubr.bf16.mxu0 %v14893_v2  ;;  %v6279_v19 = vrot.slane %v6194_v49, 7  ;;  %v16271_v25 = vadd.f32 %v13337_v35, %v16163_v57  ;;  %v6347_v30 = vld [vmem:[#allocation2 + $0x28] sm:$0xc]  ;;  %v6348_v40 = vld [vmem:[#allocation2 + $0x2c] sm:$0x3]  ;;  %v6415_v28 = vrot.slane %v6346_v22, 6 }
 0x19e   : > { %13850 = vmatprep.subr.bf16.mxu0 %v14894_v32  ;;  %v16274_v53 = vadd.f32 %v13297_v17, %v16160_v51  ;;  %v6419_v14 = vrot.slane %v6348_v40, 6  ;;  %v14895_v51 = vld [vmem:[#allocation2 + $0x108] ss:$12 sps:$4 sm:$0xff]   ;;  %v13298_v61 = vpop.f32.mrb[60].mxu1  ;;  %v13339_v56 = vpop.f32.mrb[61].mxu0  ;;  %v14899_v32 = vld [vmem:[%s15323_s23 + $0x5d8] sm:$0xff]  }
 0x19f   : > { %8040 = vmatmul.mubr.bf16.gmra.mrb[160].mxu1 %v14889_v62  ;;  %v6280_v44 = vsel %vm15341_vm2, %v12473_v33, %v6279_v19  ;;  %v12490_v62 = vrot.slane %v6347_v30, 10  ;;  %v6416_v45 = vsel %vm15360_vm5, %v12489_v16, %v6415_v28  ;;  %v14897_v31 = vld [vmem:[%s15323_s23 + $0x608] sm:$0xff]   ;;  %v14898_v47 = vld [vmem:[%s15323_s23 + $0x590] sm:$0xff]   ;;  %v13340_v52 = vadd.f32 %v13339_v56, %v13338_v26  ;;  %v13299_v42 = vpop.f32.mrb[61].mxu1  ;;  %v13341_v54 = vpop.f32.mrb[62].mxu0  ;;  %v14900_v49 = vld [vmem:[%s15323_s23 + $0x598] sm:$0xff]  }
 0x1a0   : > { %v12484_v57 = vcombine.low %v6280_v44, %v6284_v37  ;;  %13789 = vmatpush3.bf16.msra.mxu1 %v14898_v47  ;;  %v13300_v2 = vadd.f32 %v13299_v42, %v13298_v61  ;;  %v13301_v35 = vpop.f32.mrb[62].mxu1  ;;  %v13342_v23 = vpop.f32.mrb[63].mxu0  ;;  %v14901_v33 = vld [vmem:[#allocation2 + $0x78] ss:$12 sps:$4 sm:$0xff]   ;;  %v6197_v19 = vld [vmem:[#allocation2 + $0x120] sm:$0x8] }
 0x1a1   : > { %v6420_v46 = vsel %vm15360_vm5, %v12490_v62, %v6419_v14  ;;  %13851 = vmatpush3.bf16.msra.mxu0 %v14897_v31  ;;  %13790 = vmatprep.subr.bf16.mxu1 %v14899_v32  ;;  %v13343_v63 = vadd.f32 %v13342_v23, %v13341_v54  ;;  %v13302_v12 = vpop.f32.mrb[63].mxu1  ;;  %v16289_v17 = vadd.f32 %v13340_v52, %v16184_v59  ;;  %v6198_v11 = vld [vmem:[#allocation2 + $0x124] sm:$0x7]  ;;  %v6199_v38 = vld [vmem:[#allocation2 + $0x12c] sm:$0x8]  ;;  %v12475_v22 = vrot.slane %v6197_v19, 11 }
 0x1a2   : > { %8047 = vmatprep.mubr.bf16.mxu1 %v12484_v57  ;;  %v12504_v60 = vcombine.low %v6416_v45, %v6420_v46  ;;  %v16292_v1 = vadd.f32 %v13300_v2, %v16181_v29  ;;  %v13303_v10 = vadd.f32 %v13302_v12, %v13301_v35  ;;  %v6200_v27 = vld [vmem:[#allocation2 + $0x130] sm:$0x7]  ;;  %v6287_v44 = vrot.slane %v6198_v11, 7  ;;  %v6349_v16 = vld [vmem:[#allocation2 + $0x34] sm:$0xc]  ;;  %v13344_v26 = vpop.f32.mrb[64].mxu0 }
 0x1a3   : > { %v16295_v30 = vadd.f32 %v13343_v63, %v16192_v20  ;;  %v12476_v59 = vrot.slane %v6199_v38, 11  ;;  %v6291_v29 = vrot.slane %v6200_v27, 7  ;;  %v6350_v28 = vld [vmem:[#allocation2 + $0x38] sm:$0x3]  ;;  %v6351_v62 = vld [vmem:[#allocation2 + $0x40] sm:$0xc] }
 0x1a4   : > { %8113 = vmatmul.mubr.bf16.gmra.mrb[164].mxu0 %v12504_v60  ;;  %13791 = vmatpush3.bf16.msra.mxu1 %v14900_v49  ;;  %v16298_v40 = vadd.f32 %v13303_v10, %v16189_v3  ;;  %v6288_v37 = vsel %vm15341_vm2, %v12475_v22, %v6287_v44  ;;  %v6352_v14 = vld [vmem:[#allocation2 + $0x44] sm:$0x3]  ;;  %v12491_v57 = vrot.slane %v6349_v16, 10  ;;  %v6423_v45 = vrot.slane %v6350_v28, 6  ;;  %v14902_v31 = vld [vmem:[%s15323_s23 + $0x650] sm:$0xff]   ;;  %v13345_v52 = vpop.f32.mrb[65].mxu0 }
 0x1a5   : > { %8120 = vmatprep.mubr.bf16.mxu0 %v14901_v33  ;;  %v6292_v20 = vsel %vm15341_vm2, %v12476_v59, %v6291_v29  ;;  %v12492_v3 = vrot.slane %v6351_v62, 10  ;;  %v14903_v61 = vld [vmem:[#allocation2 + $0x120] ss:$12 sps:$4 sm:$0xff]   ;;  %13852 = vmatprep.subr.bf16.mxu0 %v14902_v31  ;;  %v14905_v42 = vld [vmem:[%s15323_s23 + $0x610] sm:$0xff]   ;;  %v13346_v54 = vadd.f32 %v13345_v52, %v13344_v26  ;;  %v14430_v2 = vpop.f32.mrb[64].mxu1  ;;  %v13347_v63 = vpop.f32.mrb[66].mxu0 }
 0x1a6   : > { %v12485_v46 = vcombine.low %v6288_v37, %v6292_v20  ;;  %v6424_v60 = vsel %vm15360_vm5, %v12491_v57, %v6423_v45  ;;  %v14904_v32 = vld [vmem:[%s15323_s23 + $0x5e0] sm:$0xff]   ;;  %v3332_v23 = vadd.f32 %v14430_v2, %v16239_v55  ;;  %v3323_v49 = vpop.f32.mrb[65].mxu1  ;;  %v14907_v12 = vld [vmem:[%s15323_s23 + $0x5e8] sm:$0xff]   ;;  %13853 = vmatpush3.bf16.msra.mxu0 %v14905_v42  ;;  %v13348_v33 = vpop.f32.mrb[67].mxu0  ;;  %v14910_v59 = vld [vmem:[%s15323_s23 + $0x658] sm:$0xff]  }
 0x1a7   : > { %8048 = vmatmul.mubr.bf16.gmra.mrb[164].mxu1 %v14895_v51  ;;  %v6427_v51 = vrot.slane %v6352_v14, 6  ;;  %13792 = vmatprep.subr.bf16.mxu1 %v14904_v32  ;;  %v14906_v35 = vld [vmem:[%s15323_s23 + $0x5a0] sm:$0xff]   ;;  %v3324_v10 = vadd.f32 %v3323_v49, %v16208_v9  ;;  %v14431_v19 = vpop.f32.mrb[66].mxu1  ;;  %v16316_v11 = vadd.f32 %v13346_v54, %v16214_v41  ;;  %v13349_v27 = vadd.f32 %v13348_v33, %v13347_v63  ;;  %v14908_v44 = vld [vmem:[%s15323_s23 + $0x5a8] sm:$0xff]   ;;  %v14912_v28 = vld [vmem:[%s15323_s23 + $0x5f0] sm:$0xff]   ;;  %v13350_v33 = vpop.f32.mrb[68].mxu0 }
 0x1a8   : > { %8055 = vmatprep.mubr.bf16.mxu1 %v12485_v46  ;;  %13793 = vmatpush3.bf16.msra.mxu1 %v14906_v35  ;;  %v3388_v38 = vmax.f32 %v3332_v23, 0.0  ;;  %v3335_v22 = vadd.f32 %v14431_v19, %v16248_v6  ;;  %v3326_v55 = vpop.f32.mrb[67].mxu1  ;;  %v14909_v37 = vld [vmem:[#allocation2 + $0x90] ss:$12 sps:$4 sm:$0xff]   ;;  %v6201_v62 = vld [vmem:[#allocation2 + $0x138] sm:$0x8] }
 0x1a9   : > { %v6428_v47 = vsel %vm15360_vm5, %v12492_v3, %v6427_v51  ;;  %v3386_v29 = vmax.f32 %v3324_v10, 0.0  ;;  %13794 = vmatprep.subr.bf16.mxu1 %v14907_v12  ;;  %v3327_v16 = vadd.f32 %v3326_v55, %v16217_v4  ;;  %13854 = vmatprep.subr.bf16.mxu0 %v14910_v59  ;;  %v14913_v41 = vld [vmem:[%s15323_s23 + $0x618] sm:$0xff]   ;;  %v16325_v14 = vadd.f32 %v13349_v27, %v16220_v24  ;;  %v6203_v20 = vld [vmem:[#allocation2 + $0x144] sm:$0x8]  ;;  %v6204_v3 = vld [vmem:[#allocation2 + $0x148] sm:$0x7] }
 0x1aa   : > { %v12505_v56 = vcombine.low %v6424_v60, %v6428_v47  ;;  %v3389_v9 = vmax.f32 %v3335_v22, 0.0  ;;  %v6202_v45 = vld [vmem:[#allocation2 + $0x13c] sm:$0x7]  ;;  %v12477_v6 = vrot.slane %v6201_v62, 11  ;;  %v12478_v46 = vrot.slane %v6203_v20, 11  ;;  %13855 = vmatpush3.bf16.msra.mxu0 %v14913_v41  ;;  %v14914_v35 = vld [vmem:[%s15323_s23 + $0x5b0] sm:$0xff]  }
 0x1ab   : > { %v3387_v57 = vmax.f32 %v3327_v16, 0.0  ;;  %v6295_v51 = vrot.slane %v6202_v45, 7  ;;  %v6353_v4 = vld [vmem:[#allocation2 + $0x4c] sm:$0xc]  ;;  %v6299_v31 = vrot.slane %v6204_v3, 7  ;;  %v14434_v19 = vpop.f32.mrb[68].mxu1 }
 0x1ac   : > { %8121 = vmatmul.mubr.bf16.gmra.mrb[168].mxu0 %v12505_v56  ;;  %13795 = vmatpush3.bf16.msra.mxu1 %v14908_v44  ;;  %v16327_v60 = vpack.c.bf16 %v3389_v9, %v3388_v38  ;;  %v6354_v26 = vld [vmem:[#allocation2 + $0x50] sm:$0x3]  ;;  %v6355_v47 = vld [vmem:[#allocation2 + $0x58] sm:$0xc]  ;;  %v6356_v32 = vld [vmem:[#allocation2 + $0x5c] sm:$0x3]  ;;  %v3348_v27 = vadd.f32 %v14434_v19, %v16289_v17 }
 0x1ad   : > { %8128 = vmatprep.mubr.bf16.mxu0 %v14909_v37  ;;  %13796 = vmatprep.subr.bf16.mxu1 %v14912_v28  ;;  %v16329_v24 = vpack.c.bf16 %v3387_v57, %v3386_v29  ;;  %v6296_v56 = vsel %vm15341_vm2, %v12477_v6, %v6295_v51  ;;  %v6431_v52 = vrot.slane %v6354_v26, 6  ;;  %v12494_v42 = vrot.slane %v6355_v47, 10  ;;  %v14911_v49 = vld [vmem:[#allocation2 + $0x138] ss:$12 sps:$4 sm:$0xff]   ;;  %v13351_v38 = vpop.f32.mrb[69].mxu0  ;;  %v3339_v22 = vpop.f32.mrb[69].mxu1 }
 0x1ae   : > { %v6300_v54 = vsel %vm15341_vm2, %v12478_v46, %v6299_v31  ;;  %v6435_v2 = vrot.slane %v6356_v32, 6  ;;  %v13352_v44 = vadd.f32 %v13351_v38, %v13350_v33  ;;  %v13353_v55 = vpop.f32.mrb[70].mxu0  ;;  %v3340_v59 = vadd.f32 %v3339_v22, %v16265_v13  ;;  %v14915_v29 = vld [vmem:[%s15323_s23 + $0x5f8] sm:$0xff]   ;;  %v14435_v16 = vpop.f32.mrb[70].mxu1  ;;  %v14918_v57 = vld [vmem:[%s15323_s23 + $0x660] sm:$0xff]  }
 0x1af   : > { %8056 = vmatmul.mubr.bf16.gmra.mrb[168].mxu1 %v14903_v61  ;;  %v12493_v61 = vrot.slane %v6353_v4, 10  ;;  %v12486_v23 = vcombine.low %v6296_v56, %v6300_v54  ;;  %v14916_v28 = vld [vmem:[%s15323_s23 + $0x5b8] sm:$0xff]   ;;  %v3392_v9 = vmax.f32 %v3348_v27, 0.0  ;;  %v13354_v37 = vpop.f32.mrb[71].mxu0  ;;  %v3351_v62 = vadd.f32 %v14435_v16, %v16295_v30  ;;  %v3342_v41 = vpop.f32.mrb[71].mxu1  ;;  %v14919_v6 = vld [vmem:[%s15323_s23 + $0x620] sm:$0xff]   ;;  %13856 = vmatprep.subr.bf16.mxu0 %v14918_v57 }
 0x1b0   : > { %v6436_v12 = vsel %vm15360_vm5, %v12494_v42, %v6435_v2  ;;  %13797 = vmatpush3.bf16.msra.mxu1 %v14914_v35  ;;  %v3390_v45 = vmax.f32 %v3340_v59, 0.0  ;;  %v13355_v20 = vadd.f32 %v13354_v37, %v13353_v55  ;;  %v3343_v17 = vadd.f32 %v3342_v41, %v16271_v25  ;;  %v14917_v13 = vld [vmem:[#allocation2 + $0x138] ss:$12 sps:$4 sm:$0xff]   ;;  %v6357_v46 = vld [vmem:[#allocation2 + $0xf4] sm:$0xc]  ;;  %v13356_v4 = vpop.f32.mrb[72].mxu0  ;;  %13857 = vmatpush3.bf16.msra.mxu0 %v14919_v6 }
 0x1b1   : > { %v6432_v63 = vsel %vm15360_vm5, %v12493_v61, %v6431_v52  ;;  %8063 = vmatprep.mubr.bf16.mxu1 %v12486_v23  ;;  %13798 = vmatprep.subr.bf16.mxu1 %v14915_v29  ;;  %v3267_v3 = vadd.f32 %v13352_v44, %v16242_v43  ;;  %v3393_v51 = vmax.f32 %v3351_v62, 0.0  ;;  %v6358_v26 = vld [vmem:[#allocation2 + $0xf8] sm:$0x3]  ;;  %v6359_v47 = vld [vmem:[#allocation2 + $0x100] sm:$0xc]  ;;  %v12495_v30 = vrot.slane %v6357_v46, 10 }
 0x1b2   : > { %v12506_v10 = vcombine.low %v6432_v63, %v6436_v12  ;;  %v3391_v31 = vmax.f32 %v3343_v17, 0.0  ;;  %v3270_v61 = vadd.f32 %v13355_v20, %v16245_v48  ;;  %v6360_v56 = vld [vmem:[#allocation2 + $0x104] sm:$0x3]  ;;  %v6439_v32 = vrot.slane %v6358_v26, 6  ;;  %v6749_v52 = vld [vmem:[#allocation2 + $0x4c] sm:$0xc] }
 0x1b3   : > { %v12496_v25 = vrot.slane %v6359_v47, 10  ;;  %v16350_v42 = vpack.c.bf16 %v3393_v51, %v3392_v9  ;;  %v6443_v43 = vrot.slane %v6360_v56, 6  ;;  %v6750_v54 = vld [vmem:[#allocation2 + $0x50] sm:$0x3]  ;;  %v6751_v2 = vld [vmem:[#allocation2 + $0x58] sm:$0xc] }
 0x1b4   : > { %8129 = vmatmul.mubr.bf16.gmra.mrb[172].mxu0 %v12506_v10  ;;  %13799 = vmatpush3.bf16.msra.mxu1 %v14916_v28  ;;  %v12543_v35 = vrot.slane %v6749_v52, 10  ;;  %v16352_v23 = vpack.c.bf16 %v3391_v31, %v3390_v45  ;;  %v6440_v63 = vsel %vm15360_vm5, %v12495_v30, %v6439_v32  ;;  %v6815_v12 = vrot.slane %v6750_v54, 6  ;;  %v6581_v19 = vld [vmem:[#allocation2 + $0x48] sm:$0x8]  ;;  %v13357_v38 = vpop.f32.mrb[73].mxu0  ;;  %v14438_v62 = vpop.f32.mrb[72].mxu1 }
 0x1b5   : > { %8136 = vmatprep.mubr.bf16.mxu0 %v14917_v13  ;;  %v12544_v10 = vrot.slane %v6751_v2, 10  ;;  %v6444_v48 = vsel %vm15360_vm5, %v12496_v25, %v6443_v43  ;;  %v6582_v44 = vld [vmem:[#allocation2 + $0x4c] sm:$0x7]  ;;  %v6583_v55 = vld [vmem:[#allocation2 + $0x54] sm:$0x8]  ;;  %v13358_v29 = vadd.f32 %v13357_v38, %v13356_v4  ;;  %v12519_v28 = vrot.slane %v6581_v19, 11 }
 0x1b6   : > { %v12507_v27 = vcombine.low %v6440_v63, %v6444_v48  ;;  %v6816_v22 = vsel %vm15360_vm5, %v12543_v35, %v6815_v12  ;;  %v6584_v59 = vld [vmem:[#allocation2 + $0x58] sm:$0x7]  ;;  %v6647_v9 = vrot.slane %v6582_v44, 7  ;;  %v12520_v37 = vrot.slane %v6583_v55, 11  ;;  %v13359_v20 = vpop.f32.mrb[74].mxu0  ;;  %v3355_v17 = vpop.f32.mrb[73].mxu1 }
 0x1b7   : > { %8064 = vmatmul.mubr.bf16.gmra.mrb[172].mxu1 %v14911_v49  ;;  %v6752_v49 = vld [vmem:[#allocation2 + $0x5c] sm:$0x3]  ;;  %v6651_v57 = vrot.slane %v6584_v59, 7  ;;  %v3364_v45 = vadd.f32 %v14438_v62, %v3267_v3  ;;  %v14921_v6 = vld [vmem:[%s15323_s23 + $0x668] sm:$0xff]   ;;  %v16364_v51 = vadd.f32 %v13358_v29, %v16268_v50  ;;  %v3356_v46 = vadd.f32 %v3355_v17, %v16316_v11  ;;  %v13360_v4 = vpop.f32.mrb[75].mxu0  ;;  %v14439_v31 = vpop.f32.mrb[74].mxu1 }
 0x1b8   : > { %v6819_v33 = vrot.slane %v6752_v49, 6  ;;  %v6648_v13 = vsel %vm15341_vm2, %v12519_v28, %v6647_v9  ;;  %v13361_v30 = vadd.f32 %v13360_v4, %v13359_v20  ;;  %v3367_v3 = vadd.f32 %v14439_v31, %v3270_v61  ;;  %v3358_v56 = vpop.f32.mrb[75].mxu1  ;;  %v14920_v32 = vld [vmem:[#allocation2 + $0x150] ss:$12 sps:$4 sm:$0xff]   ;;  %v6361_v25 = vld [vmem:[#allocation2 + $0x10c] sm:$0xc]  ;;  %13858 = vmatprep.subr.bf16.mxu0 %v14921_v6 }
 0x1b9   : > { %v6652_v26 = vsel %vm15341_vm2, %v12520_v37, %v6651_v57  ;;  %v3396_v47 = vmax.f32 %v3364_v45, 0.0  ;;  %v3394_v52 = vmax.f32 %v3356_v46, 0.0  ;;  %v3359_v43 = vadd.f32 %v3358_v56, %v16325_v14  ;;  %v6362_v54 = vld [vmem:[#allocation2 + $0x110] sm:$0x3]  ;;  %v6363_v11 = vld [vmem:[#allocation2 + $0x118] sm:$0xc] }
 0x1ba   : > { %v6820_v16 = vsel %vm15360_vm5, %v12544_v10, %v6819_v33  ;;  %v12535_v50 = vcombine.low %v6648_v13, %v6652_v26  ;;  %v12497_v2 = vrot.slane %v6361_v25, 10  ;;  %v3397_v35 = vmax.f32 %v3367_v3, 0.0  ;;  %v6364_v63 = vld [vmem:[#allocation2 + $0x11c] sm:$0x3]  ;;  %v14922_v10 = vld [vmem:[%s15323_s23 + $0x628] sm:$0xff]   ;;  %v13362_v46 = vpop.f32.mrb[76].mxu0 }
 0x1bb   : > { %v12559_v41 = vcombine.low %v6816_v22, %v6820_v16  ;;  %v6447_v49 = vrot.slane %v6362_v54, 6  ;;  %v12498_v12 = vrot.slane %v6363_v11, 10  ;;  %v3278_v61 = vadd.f32 %v13361_v30, %v16274_v53  ;;  %v6753_v19 = vld [vmem:[#allocation2 + $0x64] sm:$0xc]  ;;  %v6754_v38 = vld [vmem:[#allocation2 + $0x68] sm:$0x3]  ;;  %13859 = vmatpush3.bf16.msra.mxu0 %v14922_v10 }
 0x1bc   : > { %8137 = vmatmul.mubr.bf16.gmra.mrb[176].mxu0 %v12507_v27  ;;  %v3395_v48 = vmax.f32 %v3359_v43, 0.0  ;;  %v6451_v33 = vrot.slane %v6364_v63, 6  ;;  %v6755_v14 = vld [vmem:[#allocation2 + $0x70] sm:$0xc]  ;;  %v6756_v22 = vld [vmem:[#allocation2 + $0x74] sm:$0x3]  ;;  %v16376_v59 = vpack.c.bf16 %v3397_v35, %v3396_v47 }
 0x1bd   : > { %8201 = vmatprep.mubr.bf16.mxu1 %v12559_v41  ;;  %8144 = vmatprep.mubr.bf16.mxu0 %v14920_v32  ;;  %v6448_v27 = vsel %vm15360_vm5, %v12497_v2, %v6447_v49  ;;  %v12545_v44 = vrot.slane %v6753_v19, 10  ;;  %v6823_v55 = vrot.slane %v6754_v38, 6  ;;  %v12546_v16 = vrot.slane %v6755_v14, 10  ;;  %v6585_v62 = vld [vmem:[#allocation2 + $0x60] sm:$0x8]  ;;  %v13363_v26 = vpop.f32.mrb[77].mxu0 }
 0x1be   : > { %v6452_v29 = vsel %vm15360_vm5, %v12498_v12, %v6451_v33  ;;  %v6827_v53 = vrot.slane %v6756_v22, 6  ;;  %v16380_v28 = vpack.c.bf16 %v3395_v48, %v3394_v52  ;;  %v6586_v41 = vld [vmem:[#allocation2 + $0x64] sm:$0x7]  ;;  %v6587_v57 = vld [vmem:[#allocation2 + $0x6c] sm:$0x8]  ;;  %v12521_v17 = vrot.slane %v6585_v62, 11 }
 0x1bf   : > { %8202 = vmatmul.mubr.bf16.vlgmr.msra.gmra.mrb[176].mxu1 %v12535_v50  ;;  %v12508_v9 = vcombine.low %v6448_v27, %v6452_v29  ;;  %v6824_v37 = vsel %vm15360_vm5, %v12545_v44, %v6823_v55  ;;  %v6588_v20 = vld [vmem:[#allocation2 + $0x70] sm:$0x7]  ;;  %v6655_v6 = vrot.slane %v6586_v41, 7  ;;  %v12522_v13 = vrot.slane %v6587_v57, 11  ;;  %v14442_v3 = vpop.f32.mrb[76].mxu1  ;;  %v13365_v56 = vpop.f32.mrb[78].mxu0 }
 0x1c0   : > { %v6828_v45 = vsel %vm15360_vm5, %v12546_v16, %v6827_v53  ;;  %v6659_v31 = vrot.slane %v6588_v20, 7  ;;  %v13364_v30 = vadd.f32 %v13363_v26, %v13362_v46  ;;  %v3371_v25 = vpop.f32.mrb[77].mxu1  ;;  %v13366_v50 = vpop.f32.mrb[79].mxu0  ;;  %v14923_v52 = vld [vmem:[#allocation2 + $0x168] ss:$12 sps:$4 sm:$0xff]  }
 0x1c1   : > { %v12560_v4 = vcombine.low %v6824_v37, %v6828_v45  ;;  %v6656_v47 = vsel %vm15341_vm2, %v12521_v17, %v6655_v6  ;;  %v6365_v43 = vld [vmem:[#allocation2 + $0x124] sm:$0xc]  ;;  %v3372_v2 = vadd.f32 %v3371_v25, %v16364_v51  ;;  %v13367_v35 = vadd.f32 %v13366_v50, %v13365_v56  ;;  %v14443_v63 = vpop.f32.mrb[78].mxu1  ;;  %v6366_v49 = vld [vmem:[#allocation2 + $0x128] sm:$0x3]  ;;  %v14924_v10 = vld [vmem:[%s15323_s23 + $0x670] sm:$0xff]  }
 0x1c2   : > { %v6660_v32 = vsel %vm15341_vm2, %v12522_v13, %v6659_v31  ;;  %v3283_v11 = vadd.f32 %v13364_v30, %v16292_v1  ;;  %v6367_v12 = vld [vmem:[#allocation2 + $0x130] sm:$0xc]  ;;  %v3374_v48 = vpop.f32.mrb[79].mxu1  ;;  %v6368_v33 = vld [vmem:[#allocation2 + $0x134] sm:$0x3]  ;;  %v12499_v19 = vrot.slane %v6365_v43, 10  ;;  %13860 = vmatprep.subr.bf16.mxu0 %v14924_v10 }
 0x1c3   : > { %8209 = vmatprep.mubr.bf16.mxu1 %v12560_v4  ;;  %v12536_v54 = vcombine.low %v6656_v47, %v6660_v32  ;;  %v6455_v38 = vrot.slane %v6366_v49, 6  ;;  %v12500_v27 = vrot.slane %v6367_v12, 10  ;;  %v3398_v22 = vmax.f32 %v3372_v2, 0.0  ;;  %v6757_v55 = vld [vmem:[#allocation2 + $0x7c] sm:$0xc]  ;;  %v14925_v29 = vld [vmem:[%s15323_s23 + $0x630] sm:$0xff]  }
 0x1c4   : > { %8145 = vmatmul.mubr.bf16.gmra.mrb[180].mxu0 %v12508_v9  ;;  %v3380_v14 = vadd.f32 %v14442_v3, %v3283_v11  ;;  %v3286_v44 = vadd.f32 %v13367_v35, %v16298_v40  ;;  %v3375_v1 = vadd.f32 %v3374_v48, %v3278_v61  ;;  %v6758_v51 = vld [vmem:[#allocation2 + $0x80] sm:$0x3]  ;;  %v6459_v53 = vrot.slane %v6368_v33, 6  ;;  %v6759_v9 = vld [vmem:[#allocation2 + $0x88] sm:$0xc]  ;;  %v13400_v17 = vpop.f32.mrb[80].mxu0 }
 0x1c5   : > { %8152 = vmatprep.mubr.bf16.mxu0 %v14923_v52  ;;  %v6456_v16 = vsel %vm15360_vm5, %v12499_v19, %v6455_v38  ;;  %v6760_v37 = vld [vmem:[#allocation2 + $0x8c] sm:$0x3]  ;;  %v12547_v62 = vrot.slane %v6757_v55, 10  ;;  %v6831_v20 = vrot.slane %v6758_v51, 6  ;;  %13861 = vmatpush3.bf16.msra.mxu0 %v14925_v29  ;;  %v12548_v61 = vrot.slane %v6759_v9, 10  ;;  %v13464_v11 = vpop.f32.mrb[80].mxu1 }
 0x1c6   : > { %v3400_v41 = vmax.f32 %v3380_v14, 0.0  ;;  %v3383_v57 = vadd.f32 %v14443_v63, %v3286_v44  ;;  %v3399_v45 = vmax.f32 %v3375_v1, 0.0  ;;  %v6460_v40 = vsel %vm15360_vm5, %v12500_v27, %v6459_v53  ;;  %v6589_v13 = vld [vmem:[#allocation2 + $0x78] sm:$0x8]  ;;  %v6590_v26 = vld [vmem:[#allocation2 + $0x7c] sm:$0x7] }
 0x1c7   : > { %8210 = vmatmul.mubr.bf16.gmra.mrb[180].mxu1 %v12536_v54  ;;  %v6835_v6 = vrot.slane %v6760_v37, 6  ;;  %v12509_v4 = vcombine.low %v6456_v16, %v6460_v40  ;;  %v6832_v31 = vsel %vm15360_vm5, %v12547_v62, %v6831_v20  ;;  %v6591_v47 = vld [vmem:[#allocation2 + $0x84] sm:$0x8]  ;;  %v12523_v30 = vrot.slane %v6589_v13, 11  ;;  %v6592_v56 = vld [vmem:[#allocation2 + $0x88] sm:$0x7] }
 0x1c8   : > { %v3401_v46 = vmax.f32 %v3383_v57, 0.0  ;;  %v6663_v32 = vrot.slane %v6590_v26, 7  ;;  %v12524_v25 = vrot.slane %v6591_v47, 11  ;;  %v16403_v50 = vpack.c.bf16 %v3399_v45, %v3398_v22  ;;  %v13401_v54 = vpop.f32.mrb[81].mxu0  ;;  %v14927_v2 = vld [vmem:[%s15323_s23 + $0x678] sm:$0xff]   ;;  %v13465_v10 = vpop.f32.mrb[81].mxu1 }
 0x1c9   : > { %v6836_v3 = vsel %vm15360_vm5, %v12548_v61, %v6835_v6  ;;  %v6667_v43 = vrot.slane %v6592_v56, 7  ;;  %v13402_v49 = vadd.f32 %v13401_v54, %v13400_v17  ;;  %v13403_v12 = vpop.f32.mrb[82].mxu0  ;;  %v13466_v33 = vadd.f32 %v13465_v10, %v13464_v11  ;;  %v13467_v38 = vpop.f32.mrb[82].mxu1  ;;  %v14926_v27 = vld [vmem:[#allocation2 + $0x180] ss:$12 sps:$4 sm:$0xff]   ;;  %13862 = vmatprep.subr.bf16.mxu0 %v14927_v2  ;;  %v14928_v47 = vld [vmem:[%s15323_s23 + $0x638] sm:$0xff]  }
 0x1ca   : > { %v12561_v52 = vcombine.low %v6832_v31, %v6836_v3  ;;  %v16406_v35 = vpack.c.bf16 %v3401_v46, %v3400_v41  ;;  %v6664_v63 = vsel %vm15341_vm2, %v12523_v30, %v6663_v32  ;;  %v13404_v19 = vpop.f32.mrb[83].mxu0  ;;  %v6369_v14 = vld [vmem:[#allocation2 + $0x13c] sm:$0xc]  ;;  %v13468_v1 = vpop.f32.mrb[83].mxu1  ;;  %v6370_v55 = vld [vmem:[#allocation2 + $0x140] sm:$0x3]  ;;  %13863 = vmatpush3.bf16.msra.mxu0 %v14928_v47 }
 0x1cb   : > { %v6668_v48 = vsel %vm15341_vm2, %v12524_v25, %v6667_v43  ;;  %v13405_v44 = vadd.f32 %v13404_v19, %v13403_v12  ;;  %v6371_v51 = vld [vmem:[#allocation2 + $0x148] sm:$0xc]  ;;  %v12501_v29 = vrot.slane %v6369_v14, 10  ;;  %v16412_v16 = vadd.f32 %v13466_v33, %v13402_v49  ;;  %v6372_v9 = vld [vmem:[#allocation2 + $0x14c] sm:$0x3]  ;;  %v14929_v2 = vld [vmem:[%s15323_s23 + $0x680] sm:$0xff]  }
 0x1cc   : > { %8153 = vmatmul.mubr.bf16.gmra.mrb[184].mxu0 %v12509_v4  ;;  %8217 = vmatprep.mubr.bf16.mxu1 %v12561_v52  ;;  %v12537_v22 = vcombine.low %v6664_v63, %v6668_v48  ;;  %v13469_v53 = vadd.f32 %v13468_v1, %v13467_v38  ;;  %v6463_v37 = vrot.slane %v6370_v55, 6  ;;  %v12502_v62 = vrot.slane %v6371_v51, 10  ;;  %v6761_v41 = vld [vmem:[#allocation2 + $0x94] sm:$0xc]  ;;  %v6762_v45 = vld [vmem:[#allocation2 + $0x98] sm:$0x3] }
 0x1cd   : > { %8160 = vmatprep.mubr.bf16.mxu0 %v14926_v27  ;;  %v6467_v57 = vrot.slane %v6372_v9, 6  ;;  %v6763_v20 = vld [vmem:[#allocation2 + $0xa0] sm:$0xc]  ;;  %v12549_v17 = vrot.slane %v6761_v41, 10  ;;  %v6764_v6 = vld [vmem:[#allocation2 + $0xa4] sm:$0x3]  ;;  %14476 = vmatprep.subr.bf16.mxu1 %v14929_v2 }
 0x1ce   : > { %v16414_v40 = vadd.f32 %v13469_v53, %v13405_v44  ;;  %v6464_v61 = vsel %vm15360_vm5, %v12501_v29, %v6463_v37  ;;  %v6839_v13 = vrot.slane %v6762_v45, 6  ;;  %v12550_v46 = vrot.slane %v6763_v20, 10  ;;  %v6593_v26 = vld [vmem:[#allocation2 + $0x90] sm:$0x8]  ;;  %v6594_v56 = vld [vmem:[#allocation2 + $0x94] sm:$0x7]  ;;  %14477 = vmatpush3.bf16.msra.mxu1 %v14929_v2 }
 0x1cf   : > { %8218 = vmatmul.mubr.bf16.gmra.mrb[184].mxu1 %v12537_v22  ;;  %v6468_v4 = vsel %vm15360_vm5, %v12502_v62, %v6467_v57  ;;  %v6843_v31 = vrot.slane %v6764_v6, 6  ;;  %v6595_v32 = vld [vmem:[#allocation2 + $0x9c] sm:$0x8]  ;;  %v6596_v25 = vld [vmem:[#allocation2 + $0xa0] sm:$0x7]  ;;  %v12525_v43 = vrot.slane %v6593_v26, 11 }
 0x1d0   : > { %v12510_v30 = vcombine.low %v6464_v61, %v6468_v4  ;;  %v6840_v3 = vsel %vm15360_vm5, %v12549_v17, %v6839_v13  ;;  %v6671_v54 = vrot.slane %v6594_v56, 7  ;;  %v12526_v11 = vrot.slane %v6595_v32, 11  ;;  %v13406_v12 = vpop.f32.mrb[84].mxu0  ;;  %v13470_v33 = vpop.f32.mrb[84].mxu1  ;;  %v6990_v19 = vld [vmem:[#allocation2 + $0x90] sm:$0x8] }
 0x1d1   : > { %v6844_v52 = vsel %vm15360_vm5, %v12550_v46, %v6843_v31  ;;  %v6675_v49 = vrot.slane %v6596_v25, 7  ;;  %v13407_v48 = vpop.f32.mrb[85].mxu0  ;;  %v13471_v22 = vpop.f32.mrb[85].mxu1  ;;  %v6991_v44 = vld [vmem:[#allocation2 + $0x94] sm:$0x7]  ;;  %v12575_v37 = vrot.slane %v6990_v19, 11 }
 0x1d2   : > { %v12562_v63 = vcombine.low %v6840_v3, %v6844_v52  ;;  %v6672_v10 = vsel %vm15341_vm2, %v12525_v43, %v6671_v54  ;;  %v13408_v27 = vadd.f32 %v13407_v48, %v13406_v12  ;;  %v13409_v14 = vpop.f32.mrb[86].mxu0  ;;  %v6992_v1 = vld [vmem:[#allocation2 + $0x9c] sm:$0x8]  ;;  %v13472_v51 = vadd.f32 %v13471_v22, %v13470_v33  ;;  %v13473_v53 = vpop.f32.mrb[86].mxu1  ;;  %v6993_v9 = vld [vmem:[#allocation2 + $0xa0] sm:$0x7] }
 0x1d3   : > { %v6676_v38 = vsel %vm15341_vm2, %v12526_v11, %v6675_v49  ;;  %v13410_v29 = vpop.f32.mrb[87].mxu0  ;;  %v7056_v62 = vrot.slane %v6991_v44, 7  ;;  %v13474_v57 = vpop.f32.mrb[87].mxu1  ;;  %v12576_v45 = vrot.slane %v6992_v1, 11  ;;  %v7060_v20 = vrot.slane %v6993_v9, 7  ;;  %v14931_v56 = vld [vmem:[%s16438_s30 + $0x40] sm:$0xff]  }
 0x1d4   : > { %8161 = vmatmul.mubr.bf16.gmra.mrb[188].mxu0 %v12510_v30  ;;  %8225 = vmatprep.mubr.bf16.mxu1 %v12562_v63  ;;  %v12538_v55 = vcombine.low %v6672_v10, %v6676_v38  ;;  %v13411_v41 = vadd.f32 %v13410_v29, %v13409_v14  ;;  %v6765_v17 = vld [vmem:[#allocation2 + $0x13c] sm:$0xc]  ;;  %v16431_v61 = vadd.f32 %v13472_v51, %v13408_v27  ;;  %v6766_v46 = vld [vmem:[#allocation2 + $0x140] sm:$0x3]  ;;  %v6767_v4 = vld [vmem:[#allocation2 + $0x148] sm:$0xc] }
 0x1d5   : > { %v13475_v6 = vadd.f32 %v13474_v57, %v13473_v53  ;;  %v7057_v13 = vsel %vm15341_vm2, %v12575_v37, %v7056_v62  ;;  %v6768_v31 = vld [vmem:[#allocation2 + $0x14c] sm:$0x3]  ;;  %v7061_v26 = vsel %vm15341_vm2, %v12576_v45, %v7060_v20  ;;  %v12551_v47 = vrot.slane %v6765_v17, 10  ;;  %v14930_v43 = vld [vmem:[#allocation2 + $0x90] ss:$12 sps:$4 sm:$0xff]   ;;  %v14932_v54 = vld [vmem:[%s16438_s30] sm:$0xff]   ;;  %13928 = vmatprep.subr.bf16.mxu0 %v14931_v56 }
 0x1d6   : > { %v6847_v30 = vrot.slane %v6766_v46, 6  ;;  %v12552_v3 = vrot.slane %v6767_v4, 10  ;;  %v12591_v25 = vcombine.low %v7057_v13, %v7061_v26  ;;  %v6851_v52 = vrot.slane %v6768_v31, 6  ;;  %v6597_v2 = vld [vmem:[#allocation2 + $0x138] sm:$0x8]  ;;  %v14933_v27 = vld [vmem:[%s15323_s23 + $0x688] sm:$0xff]  }
 0x1d7   : > { %8226 = vmatmul.mubr.bf16.gmra.mrb[188].mxu1 %v12538_v55  ;;  %v16443_v32 = vadd.f32 %v13475_v6, %v13411_v41  ;;  %v6598_v49 = vld [vmem:[#allocation2 + $0x13c] sm:$0x7]  ;;  %v6599_v12 = vld [vmem:[#allocation2 + $0x144] sm:$0x8]  ;;  %v6600_v10 = vld [vmem:[#allocation2 + $0x148] sm:$0x7]  ;;  %14478 = vmatprep.subr.bf16.mxu1 %v14933_v27 }
 0x1d8   : > { %v6848_v11 = vsel %vm15360_vm5, %v12551_v47, %v6847_v30  ;;  %8298 = vmatprep.mubr.bf16.mxu0 %v12591_v25  ;;  %v6852_v63 = vsel %vm15360_vm5, %v12552_v3, %v6851_v52  ;;  %v12527_v33 = vrot.slane %v6597_v2, 11  ;;  %v6679_v19 = vrot.slane %v6598_v49, 7  ;;  %v13412_v22 = vpop.f32.mrb[88].mxu0  ;;  %v13476_v55 = vpop.f32.mrb[88].mxu1  ;;  %v6994_v51 = vld [vmem:[#allocation2 + $0xa8] sm:$0x8]  ;;  %14479 = vmatpush3.bf16.msra.mxu1 %v14933_v27 }
 0x1d9   : > { %v12563_v48 = vcombine.low %v6848_v11, %v6852_v63  ;;  %v12528_v38 = vrot.slane %v6599_v12, 11  ;;  %v6683_v14 = vrot.slane %v6600_v10, 7  ;;  %v13413_v1 = vpop.f32.mrb[89].mxu0  ;;  %v13477_v37 = vpop.f32.mrb[89].mxu1  ;;  %v6995_v62 = vld [vmem:[#allocation2 + $0xac] sm:$0x7] }
 0x1da   : > { %v6680_v44 = vsel %vm15341_vm2, %v12527_v33, %v6679_v19  ;;  %v13414_v53 = vadd.f32 %v13413_v1, %v13412_v22  ;;  %v13415_v9 = vpop.f32.mrb[90].mxu0  ;;  %v6996_v41 = vld [vmem:[#allocation2 + $0xb4] sm:$0x8]  ;;  %v13478_v45 = vadd.f32 %v13477_v37, %v13476_v55  ;;  %v13479_v17 = vpop.f32.mrb[90].mxu1  ;;  %v6997_v6 = vld [vmem:[#allocation2 + $0xb8] sm:$0x7] }
 0x1db   : > { %8233 = vmatprep.mubr.bf16.mxu1 %v12563_v48  ;;  %v6684_v29 = vsel %vm15341_vm2, %v12528_v38, %v6683_v14  ;;  %v13416_v20 = vpop.f32.mrb[91].mxu0  ;;  %v12577_v13 = vrot.slane %v6994_v51, 11  ;;  %v7064_v46 = vrot.slane %v6995_v62, 7  ;;  %v13480_v31 = vpop.f32.mrb[91].mxu1  ;;  %v12578_v26 = vrot.slane %v6996_v41, 11  ;;  %v14935_v3 = vld [vmem:[%s16438_s30 + $0x48] sm:$0xff]  }
 0x1dc   : > { %8299 = vmatmul.mubr.bf16.vlgmr.msra.gmra.mrb[192].mxu0 %v14930_v43  ;;  %v12539_v57 = vcombine.low %v6680_v44, %v6684_v29  ;;  %v13417_v4 = vadd.f32 %v13416_v20, %v13415_v9  ;;  %v7068_v47 = vrot.slane %v6997_v6, 7  ;;  %v6769_v30 = vld [vmem:[#allocation2 + $0x154] sm:$0xc]  ;;  %v13481_v56 = vadd.f32 %v13480_v31, %v13479_v17  ;;  %v6770_v52 = vld [vmem:[#allocation2 + $0x158] sm:$0x3]  ;;  %v14937_v38 = vld [vmem:[%s16438_s30 + $0x8] sm:$0xff]  }
 0x1dd   : > { %13929 = vmatpush3.bf16.msra.mxu0 %v14932_v54  ;;  %v7065_v25 = vsel %vm15341_vm2, %v12577_v13, %v7064_v46  ;;  %v6771_v43 = vld [vmem:[#allocation2 + $0x160] sm:$0xc]  ;;  %v6772_v54 = vld [vmem:[#allocation2 + $0x164] sm:$0x3]  ;;  %v16458_v11 = vadd.f32 %v13478_v45, %v13414_v53  ;;  %v12553_v63 = vrot.slane %v6769_v30, 10  ;;  %v6855_v49 = vrot.slane %v6770_v52, 6 }
 0x1de   : > { %v7069_v2 = vsel %vm15341_vm2, %v12578_v26, %v7068_v47  ;;  %v12554_v12 = vrot.slane %v6771_v43, 10  ;;  %13930 = vmatprep.subr.bf16.mxu0 %v14935_v3  ;;  %v14936_v10 = vld [vmem:[%s15323_s23 + $0x690] sm:$0xff]   ;;  %v6859_v33 = vrot.slane %v6772_v54, 6  ;;  %v16464_v27 = vadd.f32 %v13481_v56, %v13417_v4  ;;  %v6603_v55 = vld [vmem:[#allocation2 + $0x15c] sm:$0x8]  ;;  %v13418_v62 = vpop.f32.mrb[92].mxu0 }
 0x1df   : > { %8234 = vmatmul.mubr.bf16.gmra.mrb[192].mxu1 %v12539_v57  ;;  %v12592_v48 = vcombine.low %v7065_v25, %v7069_v2  ;;  %v14934_v19 = vld [vmem:[#allocation2 + $0xa8] ss:$12 sps:$4 sm:$0xff]   ;;  %v6856_v14 = vsel %vm15360_vm5, %v12553_v63, %v6855_v49  ;;  %v6601_v22 = vld [vmem:[#allocation2 + $0x150] sm:$0x8]  ;;  %14480 = vmatprep.subr.bf16.mxu1 %v14936_v10  ;;  %v6604_v51 = vld [vmem:[#allocation2 + $0x160] sm:$0x7] }
 0x1e0   : > { %v6860_v44 = vsel %vm15360_vm5, %v12554_v12, %v6859_v33  ;;  %v6602_v1 = vld [vmem:[#allocation2 + $0x154] sm:$0x7]  ;;  %v12529_v53 = vrot.slane %v6601_v22, 11  ;;  %v12530_v37 = vrot.slane %v6603_v55, 11  ;;  %14481 = vmatpush3.bf16.msra.mxu1 %v14936_v10  ;;  %v6691_v41 = vrot.slane %v6604_v51, 7  ;;  %v13419_v57 = vpop.f32.mrb[93].mxu0 }
 0x1e1   : > { %8306 = vmatprep.mubr.bf16.mxu0 %v12592_v48  ;;  %13931 = vmatpush3.bf16.msra.mxu0 %v14937_v38  ;;  %v12564_v29 = vcombine.low %v6856_v14, %v6860_v44  ;;  %v6687_v9 = vrot.slane %v6602_v1, 7  ;;  %v13420_v20 = vadd.f32 %v13419_v57, %v13418_v62  ;;  %v13482_v17 = vpop.f32.mrb[92].mxu1  ;;  %v13421_v6 = vpop.f32.mrb[94].mxu0  ;;  %v14938_v4 = vld [vmem:[%s15323_s23 + $0x698] sm:$0xff]   ;;  %v14940_v26 = vld [vmem:[%s16438_s30 + $0x50] sm:$0xff]   ;;  %v14941_v43 = vld [vmem:[%s15323_s23 + $0x6a0] sm:$0xff]  }
 0x1e2   : > { %v6692_v13 = vsel %vm15341_vm2, %v12530_v37, %v6691_v41  ;;  %v13483_v46 = vpop.f32.mrb[93].mxu1  ;;  %v13422_v31 = vpop.f32.mrb[95].mxu0  ;;  %v6998_v25 = vld [vmem:[#allocation2 + $0xc0] sm:$0x8]  ;;  %v6999_v52 = vld [vmem:[#allocation2 + $0xc4] sm:$0x7]  ;;  %14482 = vmatprep.subr.bf16.mxu1 %v14938_v4  ;;  %13932 = vmatprep.subr.bf16.mxu0 %v14940_v26 }
 0x1e3   : > { %8241 = vmatprep.mubr.bf16.mxu1 %v12564_v29  ;;  %v6688_v45 = vsel %vm15341_vm2, %v12529_v53, %v6687_v9  ;;  %v13484_v30 = vadd.f32 %v13483_v46, %v13482_v17  ;;  %v13423_v3 = vadd.f32 %v13422_v31, %v13421_v6  ;;  %v13485_v56 = vpop.f32.mrb[94].mxu1  ;;  %v7000_v2 = vld [vmem:[#allocation2 + $0xcc] sm:$0x8]  ;;  %v7001_v63 = vld [vmem:[#allocation2 + $0xd0] sm:$0x7]  ;;  %v12579_v49 = vrot.slane %v6998_v25, 11 }
 0x1e4   : > { %8307 = vmatmul.mubr.bf16.gmra.mrb[196].mxu0 %v14934_v19  ;;  %v12540_v47 = vcombine.low %v6688_v45, %v6692_v13  ;;  %v13486_v54 = vpop.f32.mrb[95].mxu1  ;;  %v7072_v10 = vrot.slane %v6999_v52, 7  ;;  %v12580_v48 = vrot.slane %v7000_v2, 11  ;;  %v7076_v33 = vrot.slane %v7001_v63, 7  ;;  %v6773_v19 = vld [vmem:[#allocation2 + $0x16c] sm:$0xc]  ;;  %14483 = vmatpush3.bf16.msra.mxu1 %v14938_v4 }
 0x1e5   : > { %v13487_v12 = vadd.f32 %v13486_v54, %v13485_v56  ;;  %v14942_v38 = vld [vmem:[%s16438_s30 + $0x10] sm:$0xff]   ;;  %v6775_v22 = vld [vmem:[#allocation2 + $0x178] sm:$0xc]  ;;  %v6776_v44 = vld [vmem:[#allocation2 + $0x17c] sm:$0x3]  ;;  %v16478_v1 = vadd.f32 %v13484_v30, %v13420_v20  ;;  %v12555_v29 = vrot.slane %v6773_v19, 10  ;;  %14484 = vmatprep.subr.bf16.mxu1 %v14941_v43 }
 0x1e6   : > { %v6774_v14 = vld [vmem:[#allocation2 + $0x170] sm:$0x3]  ;;  %v7073_v55 = vsel %vm15341_vm2, %v12579_v49, %v7072_v10  ;;  %v7077_v51 = vsel %vm15341_vm2, %v12580_v48, %v7076_v33  ;;  %13933 = vmatpush3.bf16.msra.mxu0 %v14942_v38  ;;  %v12556_v37 = vrot.slane %v6775_v22, 10  ;;  %v6867_v62 = vrot.slane %v6776_v44, 6  ;;  %v14939_v41 = vld [vmem:[#allocation2 + $0xc0] ss:$12 sps:$4 sm:$0xff]  }
 0x1e7   : > { %8242 = vmatmul.mubr.bf16.gmra.mrb[196].mxu1 %v12540_v47  ;;  %v6863_v53 = vrot.slane %v6774_v14, 6  ;;  %v12593_v9 = vcombine.low %v7073_v55, %v7077_v51  ;;  %v16484_v57 = vadd.f32 %v13487_v12, %v13423_v3  ;;  %v6605_v20 = vld [vmem:[#allocation2 + $0x168] sm:$0x8]  ;;  %v6606_v17 = vld [vmem:[#allocation2 + $0x16c] sm:$0x7]  ;;  %v13424_v56 = vpop.f32.mrb[96].mxu0 }
 0x1e8   : > { %v6868_v6 = vsel %vm15360_vm5, %v12556_v37, %v6867_v62  ;;  %v6607_v13 = vld [vmem:[#allocation2 + $0x174] sm:$0x8]  ;;  %v6608_v46 = vld [vmem:[#allocation2 + $0x178] sm:$0x7]  ;;  %v12531_v4 = vrot.slane %v6605_v20, 11  ;;  %v6695_v31 = vrot.slane %v6606_v17, 7  ;;  %14485 = vmatpush3.bf16.msra.mxu1 %v14941_v43 }
 0x1e9   : > { %v6864_v45 = vsel %vm15360_vm5, %v12555_v29, %v6863_v53  ;;  %8314 = vmatprep.mubr.bf16.mxu0 %v12593_v9  ;;  %v12532_v47 = vrot.slane %v6607_v13, 11  ;;  %v6699_v30 = vrot.slane %v6608_v46, 7  ;;  %v13488_v25 = vpop.f32.mrb[96].mxu1  ;;  %v13425_v54 = vpop.f32.mrb[97].mxu0  ;;  %v14943_v10 = vld [vmem:[%s15323_s23 + $0x6a8] sm:$0xff]   ;;  %v14945_v19 = vld [vmem:[%s16438_s30 + $0x58] sm:$0xff]  }
 0x1ea   : > { %v12565_v26 = vcombine.low %v6864_v45, %v6868_v6  ;;  %v6696_v3 = vsel %vm15341_vm2, %v12531_v4, %v6695_v31  ;;  %v13489_v2 = vpop.f32.mrb[97].mxu1  ;;  %v13426_v49 = vadd.f32 %v13425_v54, %v13424_v56  ;;  %v13427_v43 = vpop.f32.mrb[98].mxu0  ;;  %v7002_v33 = vld [vmem:[#allocation2 + $0xd8] sm:$0x8]  ;;  %v7003_v22 = vld [vmem:[#allocation2 + $0xdc] sm:$0x7]  ;;  %14486 = vmatprep.subr.bf16.mxu1 %v14943_v10  ;;  %13934 = vmatprep.subr.bf16.mxu0 %v14945_v19 }
 0x1eb   : > { %v6700_v52 = vsel %vm15341_vm2, %v12532_v47, %v6699_v30  ;;  %v13490_v12 = vadd.f32 %v13489_v2, %v13488_v25  ;;  %v13491_v48 = vpop.f32.mrb[98].mxu1  ;;  %v13428_v38 = vpop.f32.mrb[99].mxu0  ;;  %v7004_v44 = vld [vmem:[#allocation2 + $0xe4] sm:$0x8]  ;;  %v7005_v29 = vld [vmem:[#allocation2 + $0xe8] sm:$0x7] }
 0x1ec   : > { %8315 = vmatmul.mubr.bf16.gmra.mrb[200].mxu0 %v14939_v41  ;;  %8249 = vmatprep.mubr.bf16.mxu1 %v12565_v26  ;;  %v12541_v63 = vcombine.low %v6696_v3, %v6700_v52  ;;  %v13492_v14 = vpop.f32.mrb[99].mxu1  ;;  %v13429_v55 = vadd.f32 %v13428_v38, %v13427_v43  ;;  %v12581_v53 = vrot.slane %v7002_v33, 11  ;;  %v7080_v9 = vrot.slane %v7003_v22, 7  ;;  %v6777_v37 = vld [vmem:[#allocation2 + $0x184] sm:$0xc]  ;;  %v14946_v26 = vld [vmem:[%s15323_s23 + $0x6b0] sm:$0xff]  }
 0x1ed   : > { %v13493_v51 = vadd.f32 %v13492_v14, %v13491_v48  ;;  %14487 = vmatpush3.bf16.msra.mxu1 %v14943_v10  ;;  %v12582_v62 = vrot.slane %v7004_v44, 11  ;;  %v7084_v41 = vrot.slane %v7005_v29, 7  ;;  %v6778_v45 = vld [vmem:[#allocation2 + $0x188] sm:$0x3]  ;;  %v6779_v20 = vld [vmem:[#allocation2 + $0x190] sm:$0xc]  ;;  %v16496_v17 = vadd.f32 %v13490_v12, %v13426_v49 }
 0x1ee   : > { %v7081_v6 = vsel %vm15341_vm2, %v12581_v53, %v7080_v9  ;;  %v6780_v13 = vld [vmem:[#allocation2 + $0x194] sm:$0x3]  ;;  %v12557_v46 = vrot.slane %v6777_v37, 10  ;;  %v6871_v4 = vrot.slane %v6778_v45, 6  ;;  %v12558_v31 = vrot.slane %v6779_v20, 10  ;;  %v14947_v3 = vld [vmem:[%s16438_s30 + $0x18] sm:$0xff]   ;;  %14488 = vmatprep.subr.bf16.mxu1 %v14946_v26 }
 0x1ef   : > { %8250 = vmatmul.mubr.bf16.gmra.mrb[200].mxu1 %v12541_v63  ;;  %v7085_v47 = vsel %vm15341_vm2, %v12582_v62, %v7084_v41  ;;  %v6875_v30 = vrot.slane %v6780_v13, 6  ;;  %v16504_v56 = vadd.f32 %v13493_v51, %v13429_v55  ;;  %v14944_v54 = vld [vmem:[#allocation2 + $0xd8] ss:$12 sps:$4 sm:$0xff]   ;;  %v6609_v63 = vld [vmem:[#allocation2 + $0x180] sm:$0x8]  ;;  %13935 = vmatpush3.bf16.msra.mxu0 %v14947_v3  ;;  %v13430_v38 = vpop.f32.mrb[100].mxu0 }
 0x1f0   : > { %v12594_v25 = vcombine.low %v7081_v6, %v7085_v47  ;;  %v6872_v52 = vsel %vm15360_vm5, %v12557_v46, %v6871_v4  ;;  %v6610_v49 = vld [vmem:[#allocation2 + $0x184] sm:$0x7]  ;;  %v6611_v43 = vld [vmem:[#allocation2 + $0x18c] sm:$0x8]  ;;  %v6612_v10 = vld [vmem:[#allocation2 + $0x190] sm:$0x7] }
 0x1f1   : > { %v6876_v2 = vsel %vm15360_vm5, %v12558_v31, %v6875_v30  ;;  %14489 = vmatpush3.bf16.msra.mxu1 %v14946_v26  ;;  %v12533_v48 = vrot.slane %v6609_v63, 11  ;;  %v6703_v33 = vrot.slane %v6610_v49, 7  ;;  %v12534_v19 = vrot.slane %v6611_v43, 11  ;;  %v13431_v22 = vpop.f32.mrb[101].mxu0  ;;  %v13494_v51 = vpop.f32.mrb[100].mxu1  ;;  %v14948_v37 = vld [vmem:[%s15323_s23 + $0x6b8] sm:$0xff]   ;;  %s17023_s23 = scalar_lea.vmem %s17639_s6, %s14653_s20 }
 0x1f2   : > { %8322 = vmatprep.mubr.bf16.mxu0 %v12594_v25  ;;  %v12566_v12 = vcombine.low %v6872_v52, %v6876_v2  ;;  %v6707_v14 = vrot.slane %v6612_v10, 7  ;;  %v13432_v55 = vadd.f32 %v13431_v22, %v13430_v38  ;;  %v13433_v29 = vpop.f32.mrb[102].mxu0  ;;  %v13495_v9 = vpop.f32.mrb[101].mxu1  ;;  %v7006_v6 = vld [vmem:[#allocation2 + $0x180] sm:$0x8]  ;;  %14490 = vmatprep.subr.bf16.mxu1 %v14948_v37 }
 0x1f3   : > { %v6704_v44 = vsel %vm15341_vm2, %v12533_v48, %v6703_v33  ;;  %v13496_v41 = vadd.f32 %v13495_v9, %v13494_v51  ;;  %v13434_v45 = vpop.f32.mrb[103].mxu0  ;;  %v13497_v20 = vpop.f32.mrb[102].mxu1  ;;  %v7007_v13 = vld [vmem:[#allocation2 + $0x184] sm:$0x7]  ;;  %v7008_v31 = vld [vmem:[#allocation2 + $0x18c] sm:$0x8] }
 0x1f4   : > { %8323 = vmatmul.mubr.bf16.gmra.mrb[204].mxu0 %v14944_v54  ;;  %8257 = vmatprep.mubr.bf16.mxu1 %v12566_v12  ;;  %v6708_v53 = vsel %vm15341_vm2, %v12534_v19, %v6707_v14  ;;  %v13435_v46 = vadd.f32 %v13434_v45, %v13433_v29  ;;  %v13498_v4 = vpop.f32.mrb[103].mxu1  ;;  %v7009_v26 = vld [vmem:[#allocation2 + $0x190] sm:$0x7]  ;;  %v12583_v47 = vrot.slane %v7006_v6, 11  ;;  %v7088_v3 = vrot.slane %v7007_v13, 7  ;;  %v14950_v54 = vld [vmem:[%s16438_s30 + $0x60] sm:$0xff]  }
 0x1f5   : > { %v12542_v62 = vcombine.low %v6704_v44, %v6708_v53  ;;  %v13499_v30 = vadd.f32 %v13498_v4, %v13497_v20  ;;  %v12584_v25 = vrot.slane %v7008_v31, 11  ;;  %v7092_v52 = vrot.slane %v7009_v26, 7  ;;  %14491 = vmatpush3.bf16.msra.mxu1 %v14948_v37  ;;  %v14949_v2 = vld [vmem:[#allocation2 + $0x180] ss:$12 sps:$4 sm:$0xff]   ;;  %v7158_v63 = vld [vmem:[#allocation2 + $0x94] sm:$0xc]  ;;  %13936 = vmatprep.subr.bf16.mxu0 %v14950_v54 }
 0x1f6   : > { %v16516_v49 = vadd.f32 %v13496_v41, %v13432_v55  ;;  %v7089_v43 = vsel %vm15341_vm2, %v12583_v47, %v7088_v3  ;;  %v7159_v10 = vld [vmem:[#allocation2 + $0x98] sm:$0x3]  ;;  %v7160_v48 = vld [vmem:[#allocation2 + $0xa0] sm:$0xc]  ;;  %v7161_v33 = vld [vmem:[#allocation2 + $0xa4] sm:$0x3] }
 0x1f7   : > { %8258 = vmatmul.mubr.bf16.gmra.mrb[204].mxu1 %v12542_v62  ;;  %v7093_v12 = vsel %vm15341_vm2, %v12584_v25, %v7092_v52  ;;  %v16522_v19 = vadd.f32 %v13499_v30, %v13435_v46  ;;  %v12599_v14 = vrot.slane %v7158_v63, 10  ;;  %v7224_v22 = vrot.slane %v7159_v10, 6  ;;  %v14951_v51 = vld [vmem:[%s16438_s30 + $0x20] sm:$0xff]   ;;  %v7162_v55 = vld [vmem:[#allocation2 + $0xac] sm:$0xc]  ;;  %v13436_v53 = vpop.f32.mrb[104].mxu0 }
 0x1f8   : > { %v12595_v38 = vcombine.low %v7089_v43, %v7093_v12  ;;  %v12600_v44 = vrot.slane %v7160_v48, 10  ;;  %v7228_v29 = vrot.slane %v7161_v33, 6  ;;  %v7163_v37 = vld [vmem:[#allocation2 + $0xb0] sm:$0x3]  ;;  %v7164_v62 = vld [vmem:[#allocation2 + $0xb8] sm:$0xc]  ;;  %13937 = vmatpush3.bf16.msra.mxu0 %v14951_v51 }
 0x1f9   : > { %v7225_v9 = vsel %vm15360_vm5, %v12599_v14, %v7224_v22  ;;  %v7165_v41 = vld [vmem:[#allocation2 + $0xbc] sm:$0x3]  ;;  %v12601_v20 = vrot.slane %v7162_v55, 10  ;;  %v7232_v6 = vrot.slane %v7163_v37, 6  ;;  %v12602_v13 = vrot.slane %v7164_v62, 10  ;;  %v13437_v46 = vpop.f32.mrb[105].mxu0 }
 0x1fa   : > { %8330 = vmatprep.mubr.bf16.mxu0 %v12595_v38  ;;  %v7229_v45 = vsel %vm15360_vm5, %v12600_v44, %v7228_v29  ;;  %v7236_v31 = vrot.slane %v7165_v41, 6  ;;  %v13438_v26 = vadd.f32 %v13437_v46, %v13436_v53  ;;  %v13500_v47 = vpop.f32.mrb[104].mxu1  ;;  %v13439_v30 = vpop.f32.mrb[106].mxu0  ;;  %v14953_v3 = vld [vmem:[%s16438_s30 + $0x68] sm:$0xff]   ;;  %v7010_v63 = vld [vmem:[#allocation2 + $0x198] sm:$0x8] }
 0x1fb   : > { %v12615_v4 = vcombine.low %v7225_v9, %v7229_v45  ;;  %v7233_v25 = vsel %vm15360_vm5, %v12601_v20, %v7232_v6  ;;  %v13501_v52 = vpop.f32.mrb[105].mxu1  ;;  %v13440_v54 = vpop.f32.mrb[107].mxu0  ;;  %v7012_v33 = vld [vmem:[#allocation2 + $0x1a4] sm:$0x8]  ;;  %v7013_v38 = vld [vmem:[#allocation2 + $0x1a8] sm:$0x7]  ;;  %13938 = vmatprep.subr.bf16.mxu0 %v14953_v3 }
 0x1fc   : > { %8331 = vmatmul.mubr.bf16.gmra.mrb[208].mxu0 %v14949_v2  ;;  %v7011_v2 = vld [vmem:[#allocation2 + $0x19c] sm:$0x7]  ;;  %v7237_v43 = vsel %vm15360_vm5, %v12602_v13, %v7236_v31  ;;  %v13502_v12 = vadd.f32 %v13501_v52, %v13500_v47  ;;  %v13441_v10 = vadd.f32 %v13440_v54, %v13439_v30  ;;  %v13503_v48 = vpop.f32.mrb[106].mxu1  ;;  %v12585_v14 = vrot.slane %v7010_v63, 11  ;;  %v14952_v9 = vld [vmem:[#allocation2 + $0x198] ss:$12 sps:$4 sm:$0xff]  }
 0x1fd   : > { %14492 = vmatprep.mubr.bf16.mxu1 %v12615_v4  ;;  %v12616_v22 = vcombine.low %v7233_v25, %v7237_v43  ;;  %v13504_v44 = vpop.f32.mrb[107].mxu1  ;;  %v7096_v51 = vrot.slane %v7011_v2, 7  ;;  %v12586_v29 = vrot.slane %v7012_v33, 11  ;;  %v7100_v55 = vrot.slane %v7013_v38, 7  ;;  %v7166_v37 = vld [vmem:[#allocation2 + $0xc4] sm:$0xc] }
 0x1fe   : > { %v13505_v53 = vadd.f32 %v13504_v44, %v13503_v48  ;;  %v16534_v62 = vadd.f32 %v13502_v12, %v13438_v26  ;;  %v7167_v20 = vld [vmem:[#allocation2 + $0xc8] sm:$0x3]  ;;  %v7168_v6 = vld [vmem:[#allocation2 + $0xd0] sm:$0xc]  ;;  %v7169_v13 = vld [vmem:[#allocation2 + $0xd4] sm:$0x3] }
 0x1ff   : > { %14493 = vmatmul.mubr.bf16.vlgmr.msra.gmra.mrb[208].mxu1 %v12616_v22  ;;  %v7097_v41 = vsel %vm15341_vm2, %v12585_v14, %v7096_v51  ;;  %v7101_v45 = vsel %vm15341_vm2, %v12586_v29, %v7100_v55  ;;  %v12603_v4 = vrot.slane %v7166_v37, 10  ;;  %v7240_v31 = vrot.slane %v7167_v20, 6  ;;  %v14954_v30 = vld [vmem:[%s16438_s30 + $0x28] sm:$0xff]   ;;  %v7170_v25 = vld [vmem:[#allocation2 + $0xdc] sm:$0xc]  ;;  %v13442_v52 = vpop.f32.mrb[108].mxu0 }
 0x200   : > { %v12596_v46 = vcombine.low %v7097_v41, %v7101_v45  ;;  %v12604_v47 = vrot.slane %v7168_v6, 10  ;;  %v7244_v3 = vrot.slane %v7169_v13, 6  ;;  %v16541_v26 = vadd.f32 %v13505_v53, %v13441_v10  ;;  %v7171_v63 = vld [vmem:[#allocation2 + $0xe0] sm:$0x3]  ;;  %v7172_v2 = vld [vmem:[#allocation2 + $0xe8] sm:$0xc]  ;;  %13939 = vmatpush3.bf16.msra.mxu0 %v14954_v30 }
 0x201   : > { %v7241_v54 = vsel %vm15360_vm5, %v12603_v4, %v7240_v31  ;;  %v7173_v43 = vld [vmem:[#allocation2 + $0xec] sm:$0x3]  ;;  %v12605_v48 = vrot.slane %v7170_v25, 10  ;;  %v7248_v33 = vrot.slane %v7171_v63, 6  ;;  %v12606_v38 = vrot.slane %v7172_v2, 10  ;;  %v13443_v14 = vpop.f32.mrb[109].mxu0 }
 0x202   : > { %8338 = vmatprep.mubr.bf16.mxu0 %v12596_v46  ;;  %v7245_v12 = vsel %vm15360_vm5, %v12604_v47, %v7244_v3  ;;  %v7252_v10 = vrot.slane %v7173_v43, 6  ;;  %v13444_v44 = vadd.f32 %v13443_v14, %v13442_v52  ;;  %v13506_v51 = vpop.f32.mrb[108].mxu1  ;;  %v13445_v29 = vpop.f32.mrb[110].mxu0  ;;  %v14956_v55 = vld [vmem:[%s16438_s30 + $0x70] sm:$0xff]   ;;  %v7016_v4 = vld [vmem:[#allocation2 + $0x1bc] sm:$0x8] }
 0x203   : > { %v12617_v22 = vcombine.low %v7241_v54, %v7245_v12  ;;  %v7249_v53 = vsel %vm15360_vm5, %v12605_v48, %v7248_v33  ;;  %v13507_v37 = vpop.f32.mrb[109].mxu1  ;;  %v13446_v41 = vpop.f32.mrb[111].mxu0  ;;  %v7014_v45 = vld [vmem:[#allocation2 + $0x1b0] sm:$0x8]  ;;  %v7017_v31 = vld [vmem:[#allocation2 + $0x1c0] sm:$0x7]  ;;  %13940 = vmatprep.subr.bf16.mxu0 %v14956_v55 }
 0x204   : > { %8339 = vmatmul.mubr.bf16.gmra.mrb[212].mxu0 %v14952_v9  ;;  %v7015_v9 = vld [vmem:[#allocation2 + $0x1b4] sm:$0x7]  ;;  %v7253_v20 = vsel %vm15360_vm5, %v12606_v38, %v7252_v10  ;;  %v13508_v6 = vadd.f32 %v13507_v37, %v13506_v51  ;;  %v13447_v13 = vadd.f32 %v13446_v41, %v13445_v29  ;;  %v13509_v46 = vpop.f32.mrb[110].mxu1  ;;  %v12587_v47 = vrot.slane %v7014_v45, 11  ;;  %v14955_v2 = vld [vmem:[#allocation2 + $0x1b0] ss:$12 sps:$4 sm:$0xff]  }
 0x205   : > { %14496 = vmatprep.mubr.bf16.mxu1 %v12617_v22  ;;  %v12618_v30 = vcombine.low %v7249_v53, %v7253_v20  ;;  %v13510_v3 = vpop.f32.mrb[111].mxu1  ;;  %v7104_v25 = vrot.slane %v7015_v9, 7  ;;  %v12588_v52 = vrot.slane %v7016_v4, 11  ;;  %v7108_v54 = vrot.slane %v7017_v31, 7  ;;  %v7174_v43 = vld [vmem:[#allocation2 + $0x184] sm:$0xc] }
 0x206   : > { %v13511_v63 = vadd.f32 %v13510_v3, %v13509_v46  ;;  %v16552_v12 = vadd.f32 %v13508_v6, %v13444_v44  ;;  %v7175_v38 = vld [vmem:[#allocation2 + $0x188] sm:$0x3]  ;;  %v7176_v14 = vld [vmem:[#allocation2 + $0x190] sm:$0xc]  ;;  %v7177_v22 = vld [vmem:[#allocation2 + $0x194] sm:$0x3] }
 0x207   : > { %14497 = vmatmul.mubr.bf16.gmra.mrb[212].mxu1 %v12618_v30  ;;  %v7105_v48 = vsel %vm15341_vm2, %v12587_v47, %v7104_v25  ;;  %v7109_v33 = vsel %vm15341_vm2, %v12588_v52, %v7108_v54  ;;  %v12607_v51 = vrot.slane %v7174_v43, 10  ;;  %v7256_v29 = vrot.slane %v7175_v38, 6  ;;  %v14957_v53 = vld [vmem:[%s16438_s30 + $0x30] sm:$0xff]   ;;  %v7178_v41 = vld [vmem:[#allocation2 + $0x19c] sm:$0xc]  ;;  %v13528_v45 = vpop.f32.mrb[112].mxu0 }
 0x208   : > { %v12597_v10 = vcombine.low %v7105_v48, %v7109_v33  ;;  %v12608_v55 = vrot.slane %v7176_v14, 10  ;;  %v7260_v37 = vrot.slane %v7177_v22, 6  ;;  %v16559_v44 = vadd.f32 %v13511_v63, %v13447_v13  ;;  %v7179_v20 = vld [vmem:[#allocation2 + $0x1a0] sm:$0x3]  ;;  %v7180_v6 = vld [vmem:[#allocation2 + $0x1a8] sm:$0xc]  ;;  %13941 = vmatpush3.bf16.msra.mxu0 %v14957_v53 }
 0x209   : > { %v7257_v9 = vsel %vm15360_vm5, %v12607_v51, %v7256_v29  ;;  %v7181_v46 = vld [vmem:[#allocation2 + $0x1ac] sm:$0x3]  ;;  %v12609_v31 = vrot.slane %v7178_v41, 10  ;;  %v7264_v47 = vrot.slane %v7179_v20, 6  ;;  %v12610_v30 = vrot.slane %v7180_v6, 10  ;;  %v13529_v3 = vpop.f32.mrb[113].mxu0 }
 0x20a   : > { %8346 = vmatprep.mubr.bf16.mxu0 %v12597_v10  ;;  %v7261_v4 = vsel %vm15360_vm5, %v12608_v55, %v7260_v37  ;;  %v7268_v13 = vrot.slane %v7181_v46, 6  ;;  %v13530_v52 = vadd.f32 %v13529_v3, %v13528_v45  ;;  %v13531_v54 = vpop.f32.mrb[114].mxu0  ;;  %v13592_v63 = vpop.f32.mrb[112].mxu1  ;;  %v14959_v43 = vld [vmem:[%s16438_s30 + $0x78] sm:$0xff]   ;;  %v7018_v14 = vld [vmem:[#allocation2 + $0x1c8] sm:$0x8] }
 0x20b   : > { %v12619_v25 = vcombine.low %v7257_v9, %v7261_v4  ;;  %v7265_v48 = vsel %vm15360_vm5, %v12609_v31, %v7264_v47  ;;  %v13532_v33 = vpop.f32.mrb[115].mxu0  ;;  %v13593_v38 = vpop.f32.mrb[113].mxu1  ;;  %v7020_v55 = vld [vmem:[#allocation2 + $0x1d4] sm:$0x8]  ;;  %v7021_v53 = vld [vmem:[#allocation2 + $0x1d8] sm:$0x7]  ;;  %13942 = vmatprep.subr.bf16.mxu0 %v14959_v43 }
 0x20c   : > { %8347 = vmatmul.mubr.bf16.gmra.mrb[216].mxu0 %v14955_v2  ;;  %v7019_v2 = vld [vmem:[#allocation2 + $0x1cc] sm:$0x7]  ;;  %v7269_v22 = vsel %vm15360_vm5, %v12610_v30, %v7268_v13  ;;  %v13533_v10 = vadd.f32 %v13532_v33, %v13531_v54  ;;  %v13594_v51 = vadd.f32 %v13593_v38, %v13592_v63  ;;  %v13595_v29 = vpop.f32.mrb[114].mxu1  ;;  %v12589_v37 = vrot.slane %v7018_v14, 11  ;;  %v14958_v4 = vld [vmem:[#allocation2 + $0x1c8] ss:$12 sps:$4 sm:$0xff]  }
 0x20d   : > { %14500 = vmatprep.mubr.bf16.mxu1 %v12619_v25  ;;  %v12620_v41 = vcombine.low %v7265_v48, %v7269_v22  ;;  %v7112_v45 = vrot.slane %v7019_v2, 7  ;;  %v12590_v9 = vrot.slane %v7020_v55, 11  ;;  %v7116_v20 = vrot.slane %v7021_v53, 7  ;;  %v13596_v6 = vpop.f32.mrb[115].mxu1  ;;  %v7182_v31 = vld [vmem:[#allocation2 + $0x1b4] sm:$0xc] }
 0x20e   : > { %v13597_v46 = vadd.f32 %v13596_v6, %v13595_v29  ;;  %v5813_v47 = vadd.f32 %v13530_v52, %v16412_v16  ;;  %v5816_v30 = vadd.f32 %v13533_v10, %v16414_v40  ;;  %v7183_v13 = vld [vmem:[#allocation2 + $0x1b8] sm:$0x3]  ;;  %v7184_v54 = vld [vmem:[#allocation2 + $0x1c0] sm:$0xc]  ;;  %v7185_v63 = vld [vmem:[#allocation2 + $0x1c4] sm:$0x3] }
 0x20f   : > { %14501 = vmatmul.mubr.bf16.gmra.mrb[216].mxu1 %v12620_v41  ;;  %v7113_v3 = vsel %vm15341_vm2, %v12589_v37, %v7112_v45  ;;  %v7117_v25 = vsel %vm15341_vm2, %v12590_v9, %v7116_v20  ;;  %v12611_v48 = vrot.slane %v7182_v31, 10  ;;  %v7272_v33 = vrot.slane %v7183_v13, 6  ;;  %v14960_v14 = vld [vmem:[%s16438_s30 + $0x38] sm:$0xff]   ;;  %v7186_v22 = vld [vmem:[#allocation2 + $0x1cc] sm:$0xc]  ;;  %v13534_v16 = vpop.f32.mrb[116].mxu0 }
 0x210   : > { %v12598_v43 = vcombine.low %v7113_v3, %v7117_v25  ;;  %v12612_v38 = vrot.slane %v7184_v54, 10  ;;  %v7276_v2 = vrot.slane %v7185_v63, 6  ;;  %v16577_v40 = vadd.f32 %v13594_v51, %v5813_v47  ;;  %v7187_v10 = vld [vmem:[#allocation2 + $0x1d0] sm:$0x3]  ;;  %v16585_v29 = vld [vmem:[#allocation2 + $0x1d8] sm:$0xc]  ;;  %13943 = vmatpush3.bf16.msra.mxu0 %v14960_v14 }
 0x211   : > { %v16579_v52 = vadd.f32 %v13597_v46, %v5816_v30  ;;  %v16583_v18 = vsel %vm15360_vm5, %v12611_v48, %v7272_v33  ;;  %v16587_v55 = vld [vmem:[#allocation2 + $0x1dc] sm:$0x3]  ;;  %v12613_v37 = vrot.slane %v7186_v22, 10  ;;  %v7280_v51 = vrot.slane %v7187_v10, 6  ;;  %v13535_v45 = vpop.f32.mrb[117].mxu0 }
 0x212   : > { %8354 = vmatprep.mubr.bf16.mxu0 %v12598_v43  ;;  %v7277_v53 = vsel %vm15360_vm5, %v12612_v38, %v7276_v2  ;;  %v12614_v41 = vrot.slane %v16585_v29, 10  ;;  %v7284_v20 = vrot.slane %v16587_v55, 6  ;;  %v13536_v6 = vadd.f32 %v13535_v45, %v13534_v16  ;;  %v13537_v46 = vpop.f32.mrb[118].mxu0  ;;  %v14961_v2 = vld [vmem:[%s16596_s15] sm:$0xff]  }
 0x213   : > { %v12621_v9 = vcombine.low %v16583_v18, %v7277_v53  ;;  %v7281_v31 = vsel %vm15360_vm5, %v12613_v37, %v7280_v51  ;;  %v13538_v47 = vpop.f32.mrb[119].mxu0  ;;  %v15112_v3 = vmov 0.0  }
 0x214   : > { %8355 = vmatmul.mubr.bf16.gmra.mrb[220].mxu0 %v14958_v4  ;;  %v13598_v4 = vpop.f32.mrb[116].mxu1  ;;  %14508 = vmatprep.subr.bf16.mxu0 %v15112_v3  ;;  %8974 = vst [vmem:[#allocation3] sm:$0xff] %v15112_v3  ;;  %8975 = vst [vmem:[#allocation3 + $0x8] sm:$0x3] %v15112_v3  ;;  %v13539_v25 = vadd.f32 %v13538_v47, %v13537_v46  ;;  %v13540_v63 = vpop.f32.mrb[120].mxu0  ;;  %v5821_v43 = vadd.f32 %v13536_v6, %v16431_v61 }
 0x215   : > { %8812 = vmatprep.mubr.bf16.mxu0 %v16329_v24  ;;  %v13599_v30 = vpop.f32.mrb[117].mxu1  ;;  %8976 = vst [vmem:[#allocation3 + $0x10] sm:$0xff] %v15112_v3  ;;  %8977 = vst [vmem:[#allocation3 + $0x18] sm:$0x3] %v15112_v3  ;;  %14504 = vmatprep.mubr.bf16.mxu1 %v12621_v9  ;;  %v7285_v24 = vsel %vm15360_vm5, %v12614_v41, %v7284_v20  ;;  %v13541_v38 = vpop.f32.mrb[121].mxu0  ;;  %v14962_v20 = vld [vmem:[%s16596_s15 + $0x8] sm:$0xff]  }
 0x216   : > { %8978 = vst [vmem:[#allocation3 + $0x20] sm:$0xff] %v15112_v3  ;;  %8979 = vst [vmem:[#allocation3 + $0x28] sm:$0x3] %v15112_v3  ;;  %v13600_v13 = vadd.f32 %v13599_v30, %v13598_v4  ;;  %v13601_v54 = vpop.f32.mrb[118].mxu1  ;;  %v12622_v48 = vcombine.low %v7281_v31, %v7285_v24  ;;  %v13542_v22 = vadd.f32 %v13541_v38, %v13540_v63  ;;  %v13543_v16 = vpop.f32.mrb[122].mxu0 }
 0x217   : > { %8980 = vst [vmem:[#allocation3 + $0x30] sm:$0xff] %v15112_v3  ;;  %8981 = vst [vmem:[#allocation3 + $0x38] sm:$0x3] %v15112_v3  ;;  %v13602_v33 = vpop.f32.mrb[119].mxu1  ;;  %v5824_v34 = vadd.f32 %v13539_v25, %v16443_v32  ;;  %v13544_v29 = vpop.f32.mrb[123].mxu0 }
 0x218   : > { %8982 = vst [vmem:[#allocation3 + $0x40] sm:$0xff] %v15112_v3  ;;  %8983 = vst [vmem:[#allocation3 + $0x48] sm:$0x3] %v15112_v3  ;;  %v13603_v14 = vadd.f32 %v13602_v33, %v13601_v54  ;;  %v13604_v18 = vpop.f32.mrb[120].mxu1  ;;  %v16648_v10 = vadd.f32 %v13600_v13, %v5821_v43  ;;  %14505 = vmatmul.mubr.bf16.gmra.mrb[220].mxu1 %v12622_v48  ;;  %v5829_v53 = vadd.f32 %v13542_v22, %v16458_v11  ;;  %v13058_v48 = vld [vmem:[%s15352_s26] sm:$0xff]  }
 0x219   : > { %8984 = vst [vmem:[#allocation3 + $0x50] sm:$0xff] %v15112_v3  ;;  %8985 = vst [vmem:[#allocation3 + $0x58] sm:$0x3] %v15112_v3  ;;  %v13605_v55 = vpop.f32.mrb[121].mxu1  ;;  %v13545_v37 = vadd.f32 %v13544_v29, %v13543_v16 }
 0x21a   : > { %8986 = vst [vmem:[#allocation3 + $0x60] sm:$0xff] %v15112_v3  ;;  %8987 = vst [vmem:[#allocation3 + $0x68] sm:$0x3] %v15112_v3  ;;  %v13606_v61 = vadd.f32 %v13605_v55, %v13604_v18  ;;  %v13607_v51 = vpop.f32.mrb[122].mxu1  ;;  %v13546_v41 = vpop.f32.mrb[124].mxu0  ;;  %v16652_v45 = vadd.f32 %v13603_v14, %v5824_v34  ;;  %v14963_v14 = vld [vmem:[%s16596_s15 + $0x10] sm:$0xff]   ;;  %v13059_v55 = vunpack.c.l.bf16 %v13058_v48 }
 0x21b   : > { %8988 = vst [vmem:[#allocation3 + $0x70] sm:$0xff] %v15112_v3  ;;  %8989 = vst [vmem:[#allocation3 + $0x78] sm:$0x3] %v15112_v3  ;;  %v13608_v9 = vpop.f32.mrb[123].mxu1  ;;  %v13547_v6 = vpop.f32.mrb[125].mxu0  ;;  %v5832_v32 = vadd.f32 %v13545_v37, %v16464_v27  ;;  %v13089_v18 = vld [vmem:[%s15352_s26 + $0x8] sm:$0xff]  }
 0x21c   : > { %8990 = vst [vmem:[#allocation3 + $0x80] sm:$0xff] %v15112_v3  ;;  %8991 = vst [vmem:[#allocation3 + $0x88] sm:$0x3] %v15112_v3  ;;  %8813 = vmatmul.mubr.bf16.vlgmr.msra.gmra.mrb[224].mxu0 %v15759_v15  ;;  %v13609_v46 = vadd.f32 %v13608_v9, %v13607_v51  ;;  %v13548_v4 = vadd.f32 %v13547_v6, %v13546_v41  ;;  %v13549_v11 = vpop.f32.mrb[126].mxu0  ;;  %v16659_v24 = vadd.f32 %v13606_v61, %v5829_v53  ;;  %v14964_v41 = vld [vmem:[%s16596_s15 + $0x18] sm:$0xff]   ;;  %v16676_v6 = vld [vmem:[%s15352_s26 + $0x10] sm:$0xff]  }
 0x21d   : > { %8992 = vst [vmem:[#allocation3 + $0x90] sm:$0xff] %v15112_v3  ;;  %8993 = vst [vmem:[#allocation3 + $0x98] sm:$0x3] %v15112_v3  ;;  %8820 = vmatprep.mubr.bf16.mxu0 %v16327_v60  ;;  %14509 = vmatpush3.bf16.msra.mxu0 %v14961_v2  ;;  %v13610_v31 = vpop.f32.mrb[124].mxu1  ;;  %v13550_v47 = vpop.f32.mrb[127].mxu0  ;;  %v13060_v53 = vunpack.c.h.bf16 %v13058_v48 }
 0x21e   : > { %8994 = vst [vmem:[#allocation3 + $0xa0] sm:$0xff] %v15112_v3  ;;  %8995 = vst [vmem:[#allocation3 + $0xa8] sm:$0x3] %v15112_v3  ;;  %14510 = vmatprep.subr.bf16.mxu0 %v15112_v3  ;;  %v13611_v30 = vpop.f32.mrb[125].mxu1  ;;  %v5837_v15 = vadd.f32 %v13548_v4, %v16478_v1  ;;  %v13551_v25 = vadd.f32 %v13550_v47, %v13549_v11  ;;  %v16662_v27 = vadd.f32 %v13609_v46, %v5832_v32 }
 0x21f   : > { %8996 = vst [vmem:[#allocation3 + $0xb0] sm:$0xff] %v15112_v3  ;;  %8997 = vst [vmem:[#allocation3 + $0xb8] sm:$0x3] %v15112_v3  ;;  %v13612_v60 = vadd.f32 %v13611_v30, %v13610_v31  ;;  %v13613_v13 = vpop.f32.mrb[126].mxu1  ;;  %v13063_v4 = vunpack.c.l.bf16 %v13089_v18 }
 0x220   : > { %8998 = vst [vmem:[#allocation3 + $0xc0] sm:$0xff] %v15112_v3  ;;  %8999 = vst [vmem:[#allocation3 + $0xc8] sm:$0x3] %v15112_v3  ;;  %v13614_v63 = vpop.f32.mrb[127].mxu1  ;;  %v5840_v33 = vadd.f32 %v13551_v25, %v16484_v57 }
 0x221   : > { %9000 = vst [vmem:[#allocation3 + $0xd0] sm:$0xff] %v15112_v3  ;;  %9001 = vst [vmem:[#allocation3 + $0xd8] sm:$0x3] %v15112_v3  ;;  %14511 = vmatpush3.bf16.msra.mxu0 %v14962_v20  ;;  %v13615_v38 = vadd.f32 %v13614_v63, %v13613_v13  ;;  %v16667_v16 = vadd.f32 %v13612_v60, %v5837_v15  ;;  %v13064_v60 = vunpack.c.h.bf16 %v13089_v18 }
 0x222   : > { %9002 = vst [vmem:[#allocation3 + $0xe0] sm:$0xff] %v15112_v3  ;;  %9003 = vst [vmem:[#allocation3 + $0xe8] sm:$0x3] %v15112_v3  ;;  %v13552_v54 = vpop.f32.mrb[128].mxu0  ;;  %14512 = vmatprep.subr.bf16.mxu0 %v15112_v3  ;;  %v9030_v13 = vadd.f32 %v13060_v53, %v13059_v55 }
 0x223   : > { %9004 = vst [vmem:[#allocation3 + $0xf0] sm:$0xff] %v15112_v3  ;;  %9005 = vst [vmem:[#allocation3 + $0xf8] sm:$0x3] %v15112_v3  ;;  %v13553_v43 = vpop.f32.mrb[129].mxu0  ;;  %v16673_v20 = vadd.f32 %v13615_v38, %v5840_v33  ;;  %v14965_v38 = vld [vmem:[%s16596_s15 + $0x20] sm:$0xff]  }
 0x224   : > { %9006 = vst [vmem:[#allocation3 + $0x100] sm:$0xff] %v15112_v3  ;;  %9007 = vst [vmem:[#allocation3 + $0x108] sm:$0x3] %v15112_v3  ;;  %v13554_v2 = vadd.f32 %v13553_v43, %v13552_v54  ;;  %v13555_v22 = vpop.f32.mrb[130].mxu0  ;;  %8821 = vmatmul.mubr.bf16.gmra.mrb[228].mxu0 %v15821_v21 }
 0x225   : > { %9008 = vst [vmem:[#allocation3 + $0x110] sm:$0xff] %v15112_v3  ;;  %9009 = vst [vmem:[#allocation3 + $0x118] sm:$0x3] %v15112_v3  ;;  %v13556_v34 = vpop.f32.mrb[131].mxu0  ;;  %8828 = vmatprep.mubr.bf16.mxu0 %v16352_v23  ;;  %14513 = vmatpush3.bf16.msra.mxu0 %v14963_v14 }
 0x226   : > { %9010 = vst [vmem:[#allocation3 + $0x120] sm:$0xff] %v15112_v3  ;;  %9011 = vst [vmem:[#allocation3 + $0x128] sm:$0x3] %v15112_v3  ;;  %v5845_v37 = vadd.f32 %v13554_v2, %v16496_v17  ;;  %v13557_v61 = vadd.f32 %v13556_v34, %v13555_v22  ;;  %14514 = vmatprep.subr.bf16.mxu0 %v15112_v3  ;;  %v13067_v2 = vunpack.c.l.bf16 %v16676_v6 }
 0x227   : > { %9012 = vst [vmem:[#allocation3 + $0x130] sm:$0xff] %v15112_v3  ;;  %9013 = vst [vmem:[#allocation3 + $0x138] sm:$0x3] %v15112_v3  ;;  %v13616_v1 = vpop.f32.mrb[128].mxu1  ;;  %v9031_v22 = vadd.f32 %v13063_v4, %v9030_v13 }
 0x228   : > { %v13617_v29 = vpop.f32.mrb[129].mxu1  ;;  %v5848_v11 = vadd.f32 %v13557_v61, %v16504_v56  ;;  %v13068_v61 = vunpack.c.h.bf16 %v16676_v6 }
 0x229   : > { %v13618_v57 = vadd.f32 %v13617_v29, %v13616_v1  ;;  %v13619_v51 = vpop.f32.mrb[130].mxu1  ;;  %14515 = vmatpush3.bf16.msra.mxu0 %v14964_v41 }
 0x22a   : > { %v13620_v32 = vpop.f32.mrb[131].mxu1  ;;  %14516 = vmatprep.subr.bf16.mxu0 %v15112_v3 }
 0x22b   : > { %v13621_v17 = vadd.f32 %v13620_v32, %v13619_v51  ;;  %v16682_v21 = vadd.f32 %v13618_v57, %v5845_v37  ;;  %v9032_v57 = vadd.f32 %v13064_v60, %v9031_v22 }
 0x22c   : > { %8829 = vmatmul.mubr.bf16.gmra.mrb[232].mxu0 %v15846_v5 }
 0x22d   : > { %v13558_v9 = vpop.f32.mrb[132].mxu0  ;;  %v16685_v56 = vadd.f32 %v13621_v17, %v5848_v11  ;;  %v14966_v17 = vld [vmem:[%s16596_s15 + $0x28] sm:$0xff]   ;;  %8836 = vmatprep.mubr.bf16.mxu0 %v16350_v42  ;;  %14517 = vmatpush3.bf16.msra.mxu0 %v14965_v38 }
 0x22e   : > { %v13559_v46 = vpop.f32.mrb[133].mxu0  ;;  %14518 = vmatprep.subr.bf16.mxu0 %v15112_v3 }
 0x22f   : > { %v13560_v31 = vadd.f32 %v13559_v46, %v13558_v9  ;;  %v13561_v47 = vpop.f32.mrb[134].mxu0  ;;  %v16696_v46 = vld [vmem:[%s15352_s26 + $0x18] sm:$0xff]  }
 0x230   : > { %v13562_v15 = vpop.f32.mrb[135].mxu0  ;;  %v13071_v5 = vunpack.c.l.bf16 %v16696_v46 }
 0x231   : > { %v13622_v30 = vpop.f32.mrb[132].mxu1  ;;  %v5853_v54 = vadd.f32 %v13560_v31, %v16516_v49  ;;  %v13563_v63 = vadd.f32 %v13562_v15, %v13561_v47  ;;  %v9033_v47 = vadd.f32 %v13067_v2, %v9032_v57  ;;  %14519 = vmatpush3.bf16.msra.mxu0 %v14966_v17  ;;  %v14977_v57 = vld [vmem:[%s16438_s30 + $0xc0] sm:$0xff]   ;;  %v14979_v17 = vld [vmem:[%s16438_s30 + $0xc8] sm:$0xff]  }
 0x232   : > { %v13623_v25 = vpop.f32.mrb[133].mxu1  ;;  %14520 = vmatprep.subr.bf16.mxu0 %v15112_v3  ;;  %13992 = vmatprep.subr.bf16.mxu1 %v14977_v57 }
 0x233   : > { %v13624_v23 = vadd.f32 %v13623_v25, %v13622_v30  ;;  %v13625_v43 = vpop.f32.mrb[134].mxu1  ;;  %v5856_v1 = vadd.f32 %v13563_v63, %v16522_v19 }
 0x234   : > { %v13626_v33 = vpop.f32.mrb[135].mxu1  ;;  %8837 = vmatmul.mubr.bf16.gmra.mrb[236].mxu0 %v15840_v58 }
 0x235   : > { %v13627_v18 = vadd.f32 %v13626_v33, %v13625_v43  ;;  %v16690_v55 = vadd.f32 %v13624_v23, %v5853_v54  ;;  %v9034_v54 = vadd.f32 %v13068_v61, %v9033_v47  ;;  %v14967_v33 = vld [vmem:[%s16596_s15 + $0x30] sm:$0xff]   ;;  %8844 = vmatprep.mubr.bf16.mxu0 %v16380_v28 }
 0x236   : > { %14521 = vmatpush3.bf16.msra.mxu0 %v14967_v33  ;;  %v14980_v33 = vld [vmem:[%s16438_s30 + $0x88] sm:$0xff]  }
 0x237   : > { %v16698_v4 = vadd.f32 %v13627_v18, %v5856_v1  ;;  %14522 = vmatprep.subr.bf16.mxu0 %v15112_v3 }
 0x238   : > { %v13564_v48 = vpop.f32.mrb[136].mxu0 }
 0x239   : > { %v13565_v14 = vpop.f32.mrb[137].mxu0 }
 0x23a   : > { %v13566_v34 = vadd.f32 %v13565_v14, %v13564_v48  ;;  %v13567_v29 = vpop.f32.mrb[138].mxu0 }
 0x23b   : > { %v13568_v53 = vpop.f32.mrb[139].mxu0 }
 0x23c   : > { %v13628_v49 = vpop.f32.mrb[136].mxu1  ;;  %v5861_v51 = vadd.f32 %v13566_v34, %v16534_v62  ;;  %v13569_v41 = vadd.f32 %v13568_v53, %v13567_v29  ;;  %8845 = vmatmul.mubr.bf16.gmra.mrb[240].mxu0 %v15866_v36 }
 0x23d   : > { %v13629_v37 = vpop.f32.mrb[137].mxu1  ;;  %8852 = vmatprep.mubr.bf16.mxu0 %v16376_v59 }
 0x23e   : > { %v13630_v9 = vadd.f32 %v13629_v37, %v13628_v49  ;;  %v13631_v19 = vpop.f32.mrb[138].mxu1  ;;  %v5864_v62 = vadd.f32 %v13569_v41, %v16541_v26  ;;  %v14968_v41 = vld [vmem:[%s16596_s15 + $0x38] sm:$0xff]  }
 0x23f   : > { %v13632_v11 = vpop.f32.mrb[139].mxu1  ;;  %14523 = vmatpush3.bf16.msra.mxu0 %v14968_v41 }
 0x240   : > { %v13633_v6 = vadd.f32 %v13632_v11, %v13631_v19  ;;  %v16706_v63 = vadd.f32 %v13630_v9, %v5861_v51  ;;  %v14978_v51 = vld [vmem:[%s16438_s30 + $0x80] sm:$0xff]   ;;  %14548 = vmatprep.subr.bf16.mxu0 %v15112_v3 }
 0x241   : > { %13993 = vmatpush3.bf16.msra.mxu1 %v14978_v51 }
 0x242   : > { %v16710_v38 = vadd.f32 %v13633_v6, %v5864_v62  ;;  %13994 = vmatprep.subr.bf16.mxu1 %v14979_v17 }
 0x243   : > { %v13570_v32 = vpop.f32.mrb[140].mxu0 }
 0x244   : > { %v13571_v31 = vpop.f32.mrb[141].mxu0  ;;  %8853 = vmatmul.mubr.bf16.gmra.mrb[244].mxu0 %v15862_v39 }
 0x245   : > { %v13572_v30 = vadd.f32 %v13571_v31, %v13570_v32  ;;  %v13573_v15 = vpop.f32.mrb[142].mxu0  ;;  %13995 = vmatpush3.bf16.msra.mxu1 %v14980_v33  ;;  %8860 = vmatprep.mubr.bf16.mxu0 %v16403_v50 }
 0x246   : > { %v13574_v60 = vpop.f32.mrb[143].mxu0 }
 0x247   : > { %v13634_v25 = vpop.f32.mrb[140].mxu1  ;;  %v5869_v23 = vadd.f32 %v13572_v30, %v16552_v12  ;;  %v13575_v42 = vadd.f32 %v13574_v60, %v13573_v15 }
 0x248   : > { %v13635_v13 = vpop.f32.mrb[141].mxu1 }
 0x249   : > { %v13636_v43 = vadd.f32 %v13635_v13, %v13634_v25  ;;  %v13637_v48 = vpop.f32.mrb[142].mxu1  ;;  %v5872_v1 = vadd.f32 %v13575_v42, %v16559_v44 }
 0x24a   : > { %v13638_v14 = vpop.f32.mrb[143].mxu1 }
 0x24b   : > { %v13639_v18 = vadd.f32 %v13638_v14, %v13637_v48  ;;  %v16715_v29 = vadd.f32 %v13636_v43, %v5869_v23  ;;  %v13092_v48 = vld [vmem:[%s15352_s26 + $0x20] sm:$0xff]  }
 0x24c   : > { %v13076_v57 = vunpack.c.h.bf16 %v13092_v48  ;;  %8861 = vmatmul.mubr.bf16.gmra.mrb[248].mxu0 %v15941_v7 }
 0x24d   : > { %v14462_v26 = vpop.f32.mrb[144].mxu0  ;;  %v16726_v32 = vadd.f32 %v13639_v18, %v5872_v1  ;;  %8868 = vmatprep.mubr.bf16.mxu0 %v16406_v35 }
 0x24e   : > { %v6015_v2 = vadd.f32 %v14462_v26, %v16648_v10  ;;  %v6006_v22 = vpop.f32.mrb[145].mxu0  ;;  %v13072_v10 = vunpack.c.h.bf16 %v16696_v46 }
 0x24f   : > { %v6007_v12 = vadd.f32 %v6006_v22, %v16577_v40  ;;  %v14463_v34 = vpop.f32.mrb[146].mxu0  ;;  %v9035_v40 = vadd.f32 %v13071_v5, %v9034_v54 }
 0x250   : > { %v13672_v49 = vpop.f32.mrb[144].mxu1  ;;  %v6018_v53 = vadd.f32 %v14463_v34, %v16652_v45  ;;  %v6009_v37 = vpop.f32.mrb[147].mxu0  ;;  %v6071_v45 = vmax.f32 %v6015_v2, 0.0 }
 0x251   : > { %v13673_v61 = vpop.f32.mrb[145].mxu1  ;;  %v6010_v44 = vadd.f32 %v6009_v37, %v16579_v52  ;;  %v6069_v52 = vmax.f32 %v6007_v12, 0.0 }
 0x252   : > { %v16724_v19 = vadd.f32 %v13673_v61, %v13672_v49  ;;  %v13675_v11 = vpop.f32.mrb[146].mxu1  ;;  %v6072_v31 = vmax.f32 %v6018_v53, 0.0  ;;  %v13075_v61 = vunpack.c.l.bf16 %v13092_v48 }
 0x253   : > { %v13676_v62 = vpop.f32.mrb[147].mxu1  ;;  %v6070_v6 = vmax.f32 %v6010_v44, 0.0 }
 0x254   : > { %v16733_v25 = vadd.f32 %v13676_v62, %v13675_v11  ;;  %v16735_v60 = vpack.c.bf16 %v6072_v31, %v6071_v45  ;;  %v16760_v11 = vld [vmem:[%s15352_s26 + $0x28] sm:$0xff]   ;;  %8869 = vmatmul.mubr.bf16.gmra.mrb[252].mxu0 %v15897_v8 }
 0x255   : > { %v14466_v9 = vpop.f32.mrb[148].mxu0  ;;  %v16739_v28 = vpack.c.bf16 %v6070_v6, %v6069_v52  ;;  %14524 = vmatprep.mubr.msk.bf16.mxu0 %vm15113_vm9, %v15112_v3 }
 0x256   : > { %v6031_v46 = vadd.f32 %v14466_v9, %v16667_v16  ;;  %v6022_v47 = vpop.f32.mrb[149].mxu0 }
 0x257   : > { %v6023_v30 = vadd.f32 %v6022_v47, %v16659_v24  ;;  %v14467_v15 = vpop.f32.mrb[150].mxu0  ;;  %v9036_v24 = vadd.f32 %v13072_v10, %v9035_v40 }
 0x258   : > { %v13678_v58 = vpop.f32.mrb[148].mxu1  ;;  %v6034_v16 = vadd.f32 %v14467_v15, %v16673_v20  ;;  %v6025_v13 = vpop.f32.mrb[151].mxu0  ;;  %v6075_v26 = vmax.f32 %v6031_v46, 0.0  ;;  %v14981_v15 = vld [vmem:[%s16438_s30 + $0xd0] sm:$0xff]  }
 0x259   : > { %v13679_v5 = vpop.f32.mrb[149].mxu1  ;;  %v6026_v54 = vadd.f32 %v6025_v13, %v16662_v27  ;;  %v6073_v1 = vmax.f32 %v6023_v30, 0.0  ;;  %v9037_v44 = vrot.slane %v9036_v24, 4  ;;  %v13079_v13 = vunpack.c.l.bf16 %v16760_v11  ;;  %13996 = vmatprep.subr.bf16.mxu1 %v14981_v15 }
 0x25a   : > { %v16742_v42 = vadd.f32 %v13679_v5, %v13678_v58  ;;  %v13681_v43 = vpop.f32.mrb[150].mxu1  ;;  %v6076_v14 = vmax.f32 %v6034_v16, 0.0  ;;  %v14982_v58 = vld [vmem:[%s16438_s30 + $0x90] sm:$0xff]  }
 0x25b   : > { %v13682_v22 = vpop.f32.mrb[151].mxu1  ;;  %v6074_v18 = vmax.f32 %v6026_v54, 0.0  ;;  %v14983_v54 = vld [vmem:[%s16438_s30 + $0xd8] sm:$0xff]   ;;  %v9038_v59 = vadd.f32 %v9037_v44, %v9036_v24  ;;  %13997 = vmatpush3.bf16.msra.mxu1 %v14982_v58  ;;  %v13080_v44 = vunpack.c.h.bf16 %v16760_v11 }
 0x25c   : > { %v16748_v34 = vadd.f32 %v13682_v22, %v13681_v43  ;;  %v16750_v53 = vpack.c.bf16 %v6076_v14, %v6075_v26  ;;  %v9302_v43 = vadd.f32 %v13076_v57, %v13075_v61  ;;  %13998 = vmatprep.subr.bf16.mxu1 %v14983_v54 }
 0x25d   : > { %v16754_v51 = vpack.c.bf16 %v6074_v18, %v6073_v1 }
 0x25f   : > { %v14470_v23 = vpop.f32.mrb[152].mxu0 }
 0x260   : > { %v6047_v2 = vadd.f32 %v14470_v23, %v16690_v55  ;;  %v6038_v20 = vpop.f32.mrb[153].mxu0 }
 0x261   : > { %v6039_v12 = vadd.f32 %v6038_v20, %v16682_v21  ;;  %v14471_v27 = vpop.f32.mrb[154].mxu0  ;;  %v13684_v49 = vpop.f32.mrb[152].mxu1 }
 0x262   : > { %v6050_v37 = vadd.f32 %v14471_v27, %v16698_v4  ;;  %v6041_v10 = vpop.f32.mrb[155].mxu0  ;;  %v13685_v55 = vpop.f32.mrb[153].mxu1  ;;  %v6079_v4 = vmax.f32 %v6047_v2, 0.0 }
 0x263   : > { %v6042_v21 = vadd.f32 %v6041_v10, %v16685_v56  ;;  %v16757_v9 = vadd.f32 %v13685_v55, %v13684_v49  ;;  %v13687_v40 = vpop.f32.mrb[154].mxu1  ;;  %v6077_v56 = vmax.f32 %v6039_v12, 0.0  ;;  %v9039_v12 = vrot.slane %v9038_v59, 2  ;;  %v14984_v55 = vld [vmem:[%s16438_s30 + $0x98] sm:$0xff]  }
 0x264   : > { %v6080_v17 = vmax.f32 %v6050_v37, 0.0  ;;  %v13688_v46 = vpop.f32.mrb[155].mxu1  ;;  %13999 = vmatpush3.bf16.msra.mxu1 %v14984_v55 }
 0x265   : > { %v6078_v47 = vmax.f32 %v6042_v21, 0.0  ;;  %v16766_v6 = vadd.f32 %v13688_v46, %v13687_v40  ;;  %v9303_v21 = vadd.f32 %v13079_v13, %v9302_v43 }
 0x266   : > { %v16770_v36 = vpack.c.bf16 %v6080_v17, %v6079_v4  ;;  %v13094_v4 = vld [vmem:[%s15352_s26 + $0x30] sm:$0xff]  }
 0x267   : > { %v14474_v41 = vpop.f32.mrb[156].mxu0  ;;  %v16775_v23 = vpack.c.bf16 %v6078_v47, %v6077_v56  ;;  %v13083_v11 = vunpack.c.l.bf16 %v13094_v4  ;;  %v9304_v56 = vadd.f32 %v13080_v44, %v9303_v21  ;;  %v14985_v47 = vld [vmem:[%s16438_s30 + $0xe0] sm:$0xff]  }
 0x268   : > { %v6063_v45 = vadd.f32 %v14474_v41, %v16715_v29  ;;  %v6054_v31 = vpop.f32.mrb[157].mxu0  ;;  %14000 = vmatprep.subr.bf16.mxu1 %v14985_v47 }
 0x269   : > { %v6055_v62 = vadd.f32 %v6054_v31, %v16706_v63  ;;  %v14475_v52 = vpop.f32.mrb[158].mxu0  ;;  %v9040_v31 = vadd.f32 %v9039_v12, %v9038_v59  ;;  %v9305_v15 = vadd.f32 %v13083_v11, %v9304_v56  ;;  %v14989_v12 = vld [vmem:[%s16438_s30 + $0xf0] sm:$0xff]  }
 0x26a   : > { %v13690_v30 = vpop.f32.mrb[156].mxu1  ;;  %v6066_v16 = vadd.f32 %v14475_v52, %v16726_v32  ;;  %v6057_v29 = vpop.f32.mrb[159].mxu0  ;;  %v6083_v33 = vmax.f32 %v6063_v45, 0.0  ;;  %v14987_v52 = vld [vmem:[%s16438_s30 + $0xe8] sm:$0xff]  }
 0x26b   : > { %v13691_v5 = vpop.f32.mrb[157].mxu1  ;;  %v6058_v63 = vadd.f32 %v6057_v29, %v16710_v38  ;;  %v6081_v26 = vmax.f32 %v6055_v62, 0.0  ;;  %v14986_v62 = vld [vmem:[%s16438_s30 + $0xa0] sm:$0xff]   ;;  %v9041_v50 = vrot.slane %v9040_v31, 1 }
 0x26c   : > { %v13693_v48 = vpop.f32.mrb[158].mxu1  ;;  %v6084_v14 = vmax.f32 %v6066_v16, 0.0  ;;  %v16778_v2 = vadd.f32 %v13691_v5, %v13690_v30  ;;  %v13084_v30 = vunpack.c.h.bf16 %v13094_v4  ;;  %14001 = vmatpush3.bf16.msra.mxu1 %v14986_v62  ;;  %v13095_v16 = vld [vmem:[%s15352_s26 + $0x38] sm:$0xff]   ;;  %v14970_v62 = vld [vmem:[%s16596_s15 + $0x8] sm:$0xff]   ;;  %s17401_s26 = scalar_lea.vmem %s17640_s7, %s15310_s16  ;;  %s508_s16 = scalar_lea.vmem %s17641_s8, %s17655_s14 }
 0x26d   : > { %v13694_v32 = vpop.f32.mrb[159].mxu1  ;;  %v6082_v20 = vmax.f32 %v6058_v63, 0.0  ;;  %14002 = vmatprep.subr.bf16.mxu1 %v14987_v52  ;;  %v9042_v7 = vadd.f32 %v9041_v50, %v9040_v31  ;;  %v14992_v31 = vld [vmem:[%s16438_s30 + $0xb8] sm:$0xff]  }
 0x26e   : > { %v16780_v22 = vadd.f32 %v13694_v32, %v13693_v48  ;;  %v16782_v1 = vpack.c.bf16 %v6084_v14, %v6083_v33  ;;  %v13087_v48 = vunpack.c.l.bf16 %v13095_v16  ;;  %v9306_v33 = vadd.f32 %v13084_v30, %v9305_v15  ;;  %v14988_v32 = vld [vmem:[%s16438_s30 + $0xa8] sm:$0xff]  }
 0x26f   : > { %v13736_v38 = vpop.f32.mrb[160].mxu0  ;;  %v16784_v27 = vpack.c.bf16 %v6082_v20, %v6081_v26 }
 0x270   : > { %v13737_v49 = vpop.f32.mrb[161].mxu0  ;;  %14003 = vmatpush3.bf16.msra.mxu1 %v14988_v32 }
 0x271   : > { %v13738_v61 = vadd.f32 %v13737_v49, %v13736_v38  ;;  %v13739_v57 = vpop.f32.mrb[162].mxu0  ;;  %v13088_v38 = vunpack.c.h.bf16 %v13095_v16  ;;  %v14990_v49 = vld [vmem:[%s16438_s30 + $0xb0] sm:$0xff]   ;;  %14004 = vmatprep.subr.bf16.mxu1 %v14989_v12  ;;  %v14972_v16 = vld [vmem:[%s16596_s15 + $0x18] sm:$0xff]  }
 0x272   : > { %v13696_v24 = vpop.f32.mrb[160].mxu1  ;;  %v13740_v40 = vpop.f32.mrb[163].mxu0 }
 0x273   : > { %v13697_v18 = vpop.f32.mrb[161].mxu1  ;;  %v16802_v45 = vadd.f32 %v13738_v61, %v16724_v19  ;;  %v13741_v39 = vadd.f32 %v13740_v40, %v13739_v57 }
 0x274   : > { %v16786_v37 = vadd.f32 %v13697_v18, %v13696_v24  ;;  %v13699_v10 = vpop.f32.mrb[162].mxu1  ;;  %v9044_v24 = vmul.f32 0.015625, %v9042_v7  ;;  %v9307_v18 = vadd.f32 %v13087_v48, %v9306_v33  ;;  %14005 = vmatpush3.bf16.msra.mxu1 %v14990_v49  ;;  %v16854_v33 = vld [vmem:[#allocation3] sm:$0xff] }
 0x275   : > { %v13700_v41 = vpop.f32.mrb[163].mxu1  ;;  %v16805_v46 = vadd.f32 %v13741_v39, %v16733_v25 }
 0x276   : > { %v16799_v17 = vadd.f32 %v13700_v41, %v13699_v10  ;;  %v9045_v10 = vpack.c.bf16 %v9044_v24, %v9044_v24  ;;  %v9308_v55 = vadd.f32 %v13088_v38, %v9307_v18  ;;  %v14974_v18 = vld [vmem:[%s16596_s15 + $0x28] sm:$0xff]  }
 0x277   : > { %v13742_v19 = vpop.f32.mrb[164].mxu0 }
 0x278   : > { %v13743_v29 = vpop.f32.mrb[165].mxu0  ;;  %14525 = vmatmul.mubr.bf16.vlgmr.msra.gmra.mrb[0].mxu0 %v9045_v10  ;;  %v9309_v11 = vrot.slane %v9308_v55, 4 }
 0x279   : > { %v13744_v54 = vadd.f32 %v13743_v29, %v13742_v19  ;;  %v13745_v59 = vpop.f32.mrb[166].mxu0  ;;  %14564 = vmatprep.mubr.msk.bf16.mxu0 %vm15113_vm9, %v15112_v3 }
 0x27a   : > { %v13702_v58 = vpop.f32.mrb[164].mxu1  ;;  %v13746_v43 = vpop.f32.mrb[167].mxu0  ;;  %v9310_v15 = vadd.f32 %v9309_v11, %v9308_v55 }
 0x27b   : > { %v13703_v25 = vpop.f32.mrb[165].mxu1  ;;  %v16818_v26 = vadd.f32 %v13744_v54, %v16742_v42  ;;  %v13747_v14 = vadd.f32 %v13746_v43, %v13745_v59  ;;  %v14991_v42 = vld [vmem:[%s16438_s30 + $0xf8] sm:$0xff]   ;;  %s17564_s30 = scalar_lea.vmem %s17643_s10, %s13056_s27 }
 0x27c   : > { %v16813_v13 = vadd.f32 %v13703_v25, %v13702_v58  ;;  %v13705_v5 = vpop.f32.mrb[166].mxu1  ;;  %14006 = vmatprep.subr.bf16.mxu1 %v14991_v42  ;;  %v14971_v58 = vld [vmem:[%s16596_s15 + $0x10] sm:$0xff]   ;;  %v9311_v19 = vrot.slane %v9310_v15, 2 }
 0x27d   : > { %v13706_v63 = vpop.f32.mrb[167].mxu1  ;;  %v16822_v20 = vadd.f32 %v13747_v14, %v16748_v34  ;;  %v14969_v34 = vld [vmem:[%s16596_s15] sm:$0xff]   ;;  %14007 = vmatpush3.bf16.msra.mxu1 %v14992_v31  ;;  %v14975_v42 = vld [vmem:[%s16596_s15 + $0x30] sm:$0xff]  }
 0x27e   : > { %v16815_v35 = vadd.f32 %v13706_v63, %v13705_v5  ;;  %14549 = vmatpush3.bf16.msra.mxu0 %v14969_v34  ;;  %14528 = vmatprep.subr.bf16.mxu1 %v15112_v3  ;;  %v9312_v5 = vadd.f32 %v9311_v19, %v9310_v15  ;;  %v14973_v63 = vld [vmem:[%s16596_s15 + $0x20] sm:$0xff]  }
 0x27f   : > { %v13748_v57 = vpop.f32.mrb[168].mxu0  ;;  %14550 = vmatprep.subr.bf16.mxu0 %v15112_v3 }
 0x280   : > { %v13749_v44 = vpop.f32.mrb[169].mxu0  ;;  %v9313_v38 = vrot.slane %v9312_v5, 1 }
 0x281   : > { %v13750_v40 = vadd.f32 %v13749_v44, %v13748_v57  ;;  %v13751_v4 = vpop.f32.mrb[170].mxu0  ;;  %v14976_v57 = vld [vmem:[%s16596_s15 + $0x38] sm:$0xff]  }
 0x282   : > { %v13708_v61 = vpop.f32.mrb[168].mxu1  ;;  %v13752_v56 = vpop.f32.mrb[171].mxu0  ;;  %14551 = vmatpush3.bf16.msra.mxu0 %v14970_v62  ;;  %v9314_v49 = vadd.f32 %v9313_v38, %v9312_v5 }
 0x283   : > { %v13709_v8 = vpop.f32.mrb[169].mxu1  ;;  %v16840_v52 = vadd.f32 %v13750_v40, %v16757_v9  ;;  %v13753_v50 = vadd.f32 %v13752_v56, %v13751_v4  ;;  %14552 = vmatprep.subr.bf16.mxu0 %v15112_v3 }
 0x284   : > { %v16831_v21 = vadd.f32 %v13709_v8, %v13708_v61  ;;  %v13711_v41 = vpop.f32.mrb[170].mxu1  ;;  %v9315_v61 = vmul.f32 0.015625, %v9314_v49 }
 0x285   : > { %v13712_v39 = vpop.f32.mrb[171].mxu1  ;;  %v16844_v30 = vadd.f32 %v13753_v50, %v16766_v6 }
 0x286   : > { %v16834_v47 = vadd.f32 %v13712_v39, %v13711_v41  ;;  %14553 = vmatpush3.bf16.msra.mxu0 %v14971_v58  ;;  %v9316_v40 = vpack.c.bf16 %v9315_v61, %v9315_v61 }
 0x287   : > { %14554 = vmatprep.subr.bf16.mxu0 %v15112_v3  ;;  %v13754_v25 = vpop.f32.mrb[172].mxu0 }
 0x288   : > { %v13755_v54 = vpop.f32.mrb[173].mxu0 }
 0x289   : > { %v13756_v7 = vadd.f32 %v13755_v54, %v13754_v25  ;;  %v13757_v43 = vpop.f32.mrb[174].mxu0 }
 0x28a   : > { %v13714_v9 = vpop.f32.mrb[172].mxu1  ;;  %14555 = vmatpush3.bf16.msra.mxu0 %v14972_v16  ;;  %v13758_v3 = vpop.f32.mrb[175].mxu0 }
 0x28b   : > { %v13715_v29 = vpop.f32.mrb[173].mxu1  ;;  %14556 = vmatprep.subr.bf16.mxu0 %v16854_v33  ;;  %v16860_v32 = vadd.f32 %v13756_v7, %v16778_v2  ;;  %v13759_v24 = vadd.f32 %v13758_v3, %v13757_v43 }
 0x28c   : > { %v16851_v6 = vadd.f32 %v13715_v29, %v13714_v9  ;;  %v13717_v59 = vpop.f32.mrb[174].mxu1 }
 0x28d   : > { %v13718_v48 = vpop.f32.mrb[175].mxu1  ;;  %v16864_v12 = vadd.f32 %v13759_v24, %v16780_v22 }
 0x28e   : > { %v16857_v14 = vadd.f32 %v13718_v48, %v13717_v59  ;;  %14557 = vmatpush3.bf16.msra.mxu0 %v14973_v63 }
 0x28f   : > { %14558 = vmatprep.subr.bf16.mxu0 %v16854_v33  ;;  %v13760_v10 = vpop.f32.mrb[176].mxu0 }
 0x290   : > { %v13761_v55 = vpop.f32.mrb[177].mxu0 }
 0x291   : > { %v13762_v2 = vadd.f32 %v13761_v55, %v13760_v10  ;;  %v13763_v34 = vpop.f32.mrb[178].mxu0 }
 0x292   : > { %14559 = vmatpush3.bf16.msra.mxu0 %v14974_v18  ;;  %v13764_v8 = vpop.f32.mrb[179].mxu0  ;;  %v13800_v41 = vpop.f32.mrb[176].mxu1 }
 0x293   : > { %14560 = vmatprep.subr.bf16.mxu0 %v16854_v33  ;;  %v16872_v22 = vadd.f32 %v13762_v2, %v16786_v37  ;;  %v13765_v44 = vadd.f32 %v13764_v8, %v13763_v34  ;;  %v13801_v4 = vpop.f32.mrb[177].mxu1 }
 0x294   : > { %v13802_v31 = vadd.f32 %v13801_v4, %v13800_v41  ;;  %v13803_v11 = vpop.f32.mrb[178].mxu1 }
 0x295   : > { %v16875_v39 = vadd.f32 %v13765_v44, %v16799_v17  ;;  %v13804_v56 = vpop.f32.mrb[179].mxu1 }
 0x296   : > { %14561 = vmatpush3.bf16.msra.mxu0 %v14975_v42  ;;  %v8204_v62 = vadd.f32 %v13802_v31, %v16802_v45  ;;  %v13805_v50 = vadd.f32 %v13804_v56, %v13803_v11 }
 0x297   : > { %14562 = vmatprep.subr.bf16.mxu0 %v16854_v33  ;;  %v13766_v15 = vpop.f32.mrb[180].mxu0 }
 0x298   : > { %v8207_v58 = vadd.f32 %v13805_v50, %v16805_v46  ;;  %v13767_v37 = vpop.f32.mrb[181].mxu0 }
 0x299   : > { %v13768_v19 = vadd.f32 %v13767_v37, %v13766_v15  ;;  %v13769_v16 = vpop.f32.mrb[182].mxu0 }
 0x29a   : > { %14563 = vmatpush3.bf16.msra.mxu0 %v14976_v57  ;;  %v13770_v9 = vpop.f32.mrb[183].mxu0  ;;  %v13806_v29 = vpop.f32.mrb[180].mxu1 }
 0x29b   : > { %v16880_v25 = vadd.f32 %v13768_v19, %v16813_v13  ;;  %v13771_v17 = vadd.f32 %v13770_v9, %v13769_v16  ;;  %v13807_v5 = vpop.f32.mrb[181].mxu1 }
 0x29c   : > { %v13808_v59 = vadd.f32 %v13807_v5, %v13806_v29  ;;  %v13809_v45 = vpop.f32.mrb[182].mxu1 }
 0x29d   : > { %14565 = vmatmul.mubr.bf16.vlgmr.msra.gmra.mrb[4].mxu0 %v9316_v40  ;;  %v16883_v54 = vadd.f32 %v13771_v17, %v16815_v35  ;;  %v13810_v63 = vpop.f32.mrb[183].mxu1 }
 0x29e   : > { %v8212_v7 = vadd.f32 %v13808_v59, %v16818_v26  ;;  %v13811_v43 = vadd.f32 %v13810_v63, %v13809_v45 }
 0x29f   : > { %v13772_v48 = vpop.f32.mrb[184].mxu0 }
 0x2a0   : > { %v8215_v46 = vadd.f32 %v13811_v43, %v16822_v20  ;;  %v13773_v3 = vpop.f32.mrb[185].mxu0 }
 0x2a1   : > { %v13774_v24 = vadd.f32 %v13773_v3, %v13772_v48  ;;  %v13775_v38 = vpop.f32.mrb[186].mxu0 }
 0x2a2   : > { %v13776_v13 = vpop.f32.mrb[187].mxu0  ;;  %v13812_v42 = vpop.f32.mrb[184].mxu1 }
 0x2a3   : > { %v16888_v18 = vadd.f32 %v13774_v24, %v16831_v21  ;;  %v13777_v49 = vadd.f32 %v13776_v13, %v13775_v38  ;;  %v13813_v35 = vpop.f32.mrb[185].mxu1 }
 0x2a4   : > { %v13814_v55 = vadd.f32 %v13813_v35, %v13812_v42  ;;  %v13815_v61 = vpop.f32.mrb[186].mxu1 }
 0x2a5   : > { %v16891_v10 = vadd.f32 %v13777_v49, %v16834_v47  ;;  %v13816_v26 = vpop.f32.mrb[187].mxu1 }
 0x2a6   : > { %v8220_v2 = vadd.f32 %v13814_v55, %v16840_v52  ;;  %v13817_v20 = vadd.f32 %v13816_v26, %v13815_v61 }
 0x2a7   : > { %v13778_v34 = vpop.f32.mrb[188].mxu0 }
 0x2a8   : > { %v8223_v57 = vadd.f32 %v13817_v20, %v16844_v30  ;;  %v13779_v8 = vpop.f32.mrb[189].mxu0 }
 0x2a9   : > { %v13780_v44 = vadd.f32 %v13779_v8, %v13778_v34  ;;  %v13781_v41 = vpop.f32.mrb[190].mxu0 }
 0x2aa   : > { %v13782_v21 = vpop.f32.mrb[191].mxu0  ;;  %v13818_v31 = vpop.f32.mrb[188].mxu1 }
 0x2ab   : > { %v16896_v40 = vadd.f32 %v13780_v44, %v16851_v6  ;;  %v13783_v4 = vadd.f32 %v13782_v21, %v13781_v41  ;;  %v13819_v47 = vpop.f32.mrb[189].mxu1 }
 0x2ac   : > { %v13820_v56 = vadd.f32 %v13819_v47, %v13818_v31  ;;  %v13821_v50 = vpop.f32.mrb[190].mxu1 }
 0x2ad   : > { %v16899_v11 = vadd.f32 %v13783_v4, %v16857_v14  ;;  %v13822_v52 = vpop.f32.mrb[191].mxu1 }
 0x2ae   : > { %v8228_v15 = vadd.f32 %v13820_v56, %v16860_v32  ;;  %v13823_v37 = vadd.f32 %v13822_v52, %v13821_v50 }
 0x2af   : > { %v13864_v30 = vpop.f32.mrb[192].mxu0 }
 0x2b0   : > { %v8231_v19 = vadd.f32 %v13823_v37, %v16864_v12  ;;  %v13865_v16 = vpop.f32.mrb[193].mxu0 }
 0x2b1   : > { %v13866_v9 = vadd.f32 %v13865_v16, %v13864_v30  ;;  %v13867_v17 = vpop.f32.mrb[194].mxu0 }
 0x2b2   : > { %v13868_v6 = vpop.f32.mrb[195].mxu0  ;;  %v13824_v59 = vpop.f32.mrb[192].mxu1 }
 0x2b3   : > { %v13869_v29 = vadd.f32 %v13868_v6, %v13867_v17  ;;  %v16903_v5 = vadd.f32 %v13866_v9, %v8204_v62  ;;  %v13825_v14 = vpop.f32.mrb[193].mxu1 }
 0x2b4   : > { %v13826_v63 = vadd.f32 %v13825_v14, %v13824_v59  ;;  %v13827_v43 = vpop.f32.mrb[194].mxu1 }
 0x2b5   : > { %v16905_v45 = vadd.f32 %v13869_v29, %v8207_v58  ;;  %v13828_v48 = vpop.f32.mrb[195].mxu1 }
 0x2b6   : > { %v8236_v32 = vadd.f32 %v13826_v63, %v16872_v22  ;;  %v13829_v3 = vadd.f32 %v13828_v48, %v13827_v43 }
 0x2b7   : > { %v13870_v24 = vpop.f32.mrb[196].mxu0 }
 0x2b8   : > { %v8239_v12 = vadd.f32 %v13829_v3, %v16875_v39  ;;  %v13871_v38 = vpop.f32.mrb[197].mxu0 }
 0x2b9   : > { %v13872_v13 = vadd.f32 %v13871_v38, %v13870_v24  ;;  %v13873_v49 = vpop.f32.mrb[198].mxu0 }
 0x2ba   : > { %v13874_v42 = vpop.f32.mrb[199].mxu0  ;;  %v13830_v55 = vpop.f32.mrb[196].mxu1 }
 0x2bb   : > { %v13875_v35 = vadd.f32 %v13874_v42, %v13873_v49  ;;  %v8309_v62 = vadd.f32 %v13872_v13, %v8212_v7  ;;  %v13831_v58 = vpop.f32.mrb[197].mxu1 }
 0x2bc   : > { %v13832_v26 = vadd.f32 %v13831_v58, %v13830_v55  ;;  %v13833_v20 = vpop.f32.mrb[198].mxu1 }
 0x2bd   : > { %v8312_v61 = vadd.f32 %v13875_v35, %v8215_v46  ;;  %v13834_v34 = vpop.f32.mrb[199].mxu1 }
 0x2be   : > { %v16910_v8 = vadd.f32 %v13832_v26, %v16880_v25  ;;  %v13835_v22 = vadd.f32 %v13834_v34, %v13833_v20 }
 0x2bf   : > { %v13876_v39 = vpop.f32.mrb[200].mxu0 }
 0x2c0   : > { %v16913_v44 = vadd.f32 %v13835_v22, %v16883_v54  ;;  %v13877_v41 = vpop.f32.mrb[201].mxu0 }
 0x2c1   : > { %v13878_v21 = vadd.f32 %v13877_v41, %v13876_v39  ;;  %v13879_v4 = vpop.f32.mrb[202].mxu0 }
 0x2c2   : > { %v13880_v31 = vpop.f32.mrb[203].mxu0  ;;  %v13836_v56 = vpop.f32.mrb[200].mxu1 }
 0x2c3   : > { %v13881_v47 = vadd.f32 %v13880_v31, %v13879_v4  ;;  %v8317_v7 = vadd.f32 %v13878_v21, %v8220_v2  ;;  %v13837_v46 = vpop.f32.mrb[201].mxu1 }
 0x2c4   : > { %v13838_v52 = vadd.f32 %v13837_v46, %v13836_v56  ;;  %v13839_v37 = vpop.f32.mrb[202].mxu1 }
 0x2c5   : > { %v16915_v50 = vadd.f32 %v13881_v47, %v8223_v57  ;;  %v13840_v30 = vpop.f32.mrb[203].mxu1 }
 0x2c6   : > { %v16918_v25 = vadd.f32 %v13838_v52, %v16888_v18  ;;  %v13841_v16 = vadd.f32 %v13840_v30, %v13839_v37 }
 0x2c7   : > { %v13882_v9 = vpop.f32.mrb[204].mxu0 }
 0x2c8   : > { %v16921_v54 = vadd.f32 %v13841_v16, %v16891_v10  ;;  %v13883_v17 = vpop.f32.mrb[205].mxu0 }
 0x2c9   : > { %v13884_v6 = vadd.f32 %v13883_v17, %v13882_v9  ;;  %v13885_v29 = vpop.f32.mrb[206].mxu0 }
 0x2ca   : > { %v13886_v59 = vpop.f32.mrb[207].mxu0  ;;  %v13842_v63 = vpop.f32.mrb[204].mxu1 }
 0x2cb   : > { %v13887_v2 = vadd.f32 %v13886_v59, %v13885_v29  ;;  %v8325_v14 = vadd.f32 %v13884_v6, %v8228_v15  ;;  %v13843_v57 = vpop.f32.mrb[205].mxu1  ;;  %v14994_v59 = vld [vmem:[%s16793_s19 + $0x8] sm:$0xff]  }
 0x2cc   : > { %v13844_v48 = vadd.f32 %v13843_v57, %v13842_v63  ;;  %v13845_v3 = vpop.f32.mrb[206].mxu1 }
 0x2cd   : > { %v8328_v43 = vadd.f32 %v13887_v2, %v8231_v19  ;;  %v13846_v24 = vpop.f32.mrb[207].mxu1 }
 0x2ce   : > { %v16924_v18 = vadd.f32 %v13844_v48, %v16896_v40  ;;  %v13847_v38 = vadd.f32 %v13846_v24, %v13845_v3 }
 0x2cf   : > { %v13888_v13 = vpop.f32.mrb[208].mxu0 }
 0x2d0   : > { %v16927_v10 = vadd.f32 %v13847_v38, %v16899_v11  ;;  %v13889_v49 = vpop.f32.mrb[209].mxu0  ;;  %v14995_v38 = vld [vmem:[%s16793_s19 + $0x10] sm:$0xff]  }
 0x2d1   : > { %v13890_v42 = vadd.f32 %v13889_v49, %v13888_v13  ;;  %v13891_v35 = vpop.f32.mrb[210].mxu0 }
 0x2d2   : > { %v13892_v55 = vpop.f32.mrb[211].mxu0  ;;  %v14494_v26 = vpop.f32.mrb[208].mxu1 }
 0x2d3   : > { %v13893_v58 = vadd.f32 %v13892_v55, %v13891_v35  ;;  %v16929_v15 = vadd.f32 %v13890_v42, %v8236_v32  ;;  %v8406_v20 = vadd.f32 %v14494_v26, %v8309_v62  ;;  %v8397_v34 = vpop.f32.mrb[209].mxu1 }
 0x2d4   : > { %v8398_v40 = vadd.f32 %v8397_v34, %v16903_v5  ;;  %v14495_v22 = vpop.f32.mrb[210].mxu1 }
 0x2d5   : > { %v16931_v19 = vadd.f32 %v13893_v58, %v8239_v12  ;;  %v8409_v39 = vadd.f32 %v14495_v22, %v8312_v61  ;;  %v8400_v11 = vpop.f32.mrb[211].mxu1  ;;  %v8462_v4 = vmax.f32 %v8406_v20, 0.0  ;;  %v14993_v61 = vld [vmem:[%s16793_s19] sm:$0xff]   ;;  %v14996_v58 = vld [vmem:[%s16793_s19 + $0x18] sm:$0xff]  }
 0x2d6   : > { %v8401_v41 = vadd.f32 %v8400_v11, %v16905_v45  ;;  %v8460_v56 = vmax.f32 %v8398_v40, 0.0 }
 0x2d7   : > { %v13894_v21 = vpop.f32.mrb[212].mxu0  ;;  %v8463_v31 = vmax.f32 %v8409_v39, 0.0 }
 0x2d8   : > { %v13895_v47 = vpop.f32.mrb[213].mxu0  ;;  %v8461_v32 = vmax.f32 %v8401_v41, 0.0 }
 0x2d9   : > { %v13896_v46 = vadd.f32 %v13895_v47, %v13894_v21  ;;  %v13897_v52 = vpop.f32.mrb[214].mxu0  ;;  %v8477_v12 = vpack.c.bf16 %v8463_v31, %v8462_v4 }
 0x2da   : > { %v13898_v62 = vpop.f32.mrb[215].mxu0  ;;  %v8476_v37 = vpack.c.bf16 %v8461_v32, %v8460_v56  ;;  %v14498_v16 = vpop.f32.mrb[212].mxu1 }
 0x2db   : > { %v13899_v30 = vadd.f32 %v13898_v62, %v13897_v52  ;;  %v8341_v5 = vadd.f32 %v13896_v46, %v16910_v8  ;;  %v8422_v9 = vadd.f32 %v14498_v16, %v8325_v14  ;;  %v8413_v17 = vpop.f32.mrb[213].mxu1 }
 0x2dc   : > { %8909 = vmatprep.mubr.bf16.mxu1 %v8476_v37  ;;  %v8414_v6 = vadd.f32 %v8413_v17, %v8317_v7  ;;  %v14499_v29 = vpop.f32.mrb[214].mxu1 }
 0x2dd   : > { %v8344_v45 = vadd.f32 %v13899_v30, %v16913_v44  ;;  %8910 = vmatmul.mubr.bf16.vlgmr.msra.gmra.mrb[224].mxu1 %v16739_v28  ;;  %v8425_v2 = vadd.f32 %v14499_v29, %v8328_v43  ;;  %v8416_v63 = vpop.f32.mrb[215].mxu1  ;;  %v8466_v48 = vmax.f32 %v8422_v9, 0.0 }
 0x2de   : > { %8917 = vmatprep.mubr.bf16.mxu1 %v8477_v12  ;;  %14529 = vmatpush3.bf16.msra.mxu1 %v14993_v61  ;;  %v8417_v8 = vadd.f32 %v8416_v63, %v16915_v50  ;;  %v8464_v14 = vmax.f32 %v8414_v6, 0.0  ;;  %v14998_v12 = vld [vmem:[%s16793_s19 + $0x28] sm:$0xff]  }
 0x2df   : > { %14530 = vmatprep.subr.bf16.mxu1 %v16854_v33  ;;  %v13900_v57 = vpop.f32.mrb[216].mxu0  ;;  %v8467_v3 = vmax.f32 %v8425_v2, 0.0 }
 0x2e0   : > { %v13901_v44 = vpop.f32.mrb[217].mxu0  ;;  %v8465_v24 = vmax.f32 %v8417_v8, 0.0 }
 0x2e1   : > { %v13902_v28 = vadd.f32 %v13901_v44, %v13900_v57  ;;  %v13903_v7 = vpop.f32.mrb[218].mxu0  ;;  %v8479_v13 = vpack.c.bf16 %v8467_v3, %v8466_v48  ;;  %v15000_v3 = vld [vmem:[%s16793_s19 + $0x38] sm:$0xff]  }
 0x2e2   : > { %14531 = vmatpush3.bf16.msra.mxu1 %v14994_v59  ;;  %v13904_v49 = vpop.f32.mrb[219].mxu0  ;;  %v8478_v43 = vpack.c.bf16 %v8465_v24, %v8464_v14  ;;  %v14502_v50 = vpop.f32.mrb[216].mxu1 }
 0x2e3   : > { %14532 = vmatprep.subr.bf16.mxu1 %v16854_v33  ;;  %v13905_v42 = vadd.f32 %v13904_v49, %v13903_v7  ;;  %v8349_v35 = vadd.f32 %v13902_v28, %v16918_v25  ;;  %v8438_v26 = vadd.f32 %v14502_v50, %v8341_v5  ;;  %v8429_v20 = vpop.f32.mrb[217].mxu1 }
 0x2e4   : > { %v8430_v34 = vadd.f32 %v8429_v20, %v16929_v15  ;;  %v14503_v40 = vpop.f32.mrb[218].mxu1 }
 0x2e5   : > { %8918 = vmatmul.mubr.bf16.gmra.mrb[228].mxu1 %v16735_v60  ;;  %v8352_v55 = vadd.f32 %v13905_v42, %v16921_v54  ;;  %v8441_v22 = vadd.f32 %v14503_v40, %v8344_v45  ;;  %v8432_v39 = vpop.f32.mrb[219].mxu1  ;;  %v14997_v60 = vld [vmem:[%s16793_s19 + $0x20] sm:$0xff]   ;;  %v8470_v41 = vmax.f32 %v8438_v26, 0.0 }
 0x2e6   : > { %8925 = vmatprep.mubr.bf16.mxu1 %v8478_v43  ;;  %14533 = vmatpush3.bf16.msra.mxu1 %v14995_v38  ;;  %v8433_v25 = vadd.f32 %v8432_v39, %v16931_v19  ;;  %v8468_v4 = vmax.f32 %v8430_v34, 0.0 }
 0x2e7   : > { %14534 = vmatprep.subr.bf16.mxu1 %v16854_v33  ;;  %v13906_v11 = vpop.f32.mrb[220].mxu0  ;;  %v8471_v21 = vmax.f32 %v8441_v22, 0.0 }
 0x2e8   : > { %v13907_v54 = vpop.f32.mrb[221].mxu0  ;;  %v8469_v31 = vmax.f32 %v8433_v25, 0.0 }
 0x2e9   : > { %v13908_v47 = vadd.f32 %v13907_v54, %v13906_v11  ;;  %v13909_v56 = vpop.f32.mrb[222].mxu0  ;;  %v8481_v32 = vpack.c.bf16 %v8471_v21, %v8470_v41 }
 0x2ea   : > { %14535 = vmatpush3.bf16.msra.mxu1 %v14996_v58  ;;  %v13910_v15 = vpop.f32.mrb[223].mxu0  ;;  %v8480_v46 = vpack.c.bf16 %v8469_v31, %v8468_v4 }
 0x2eb   : > { %14536 = vmatprep.subr.bf16.mxu1 %v16854_v33  ;;  %v8357_v19 = vadd.f32 %v13908_v47, %v16924_v18  ;;  %v13911_v52 = vadd.f32 %v13910_v15, %v13909_v56  ;;  %v14506_v62 = vpop.f32.mrb[220].mxu1 }
 0x2ec   : > { %v8445_v5 = vpop.f32.mrb[221].mxu1 }
 0x2ed   : > { %8926 = vmatmul.mubr.bf16.gmra.mrb[232].mxu1 %v16754_v51  ;;  %v8360_v37 = vadd.f32 %v13911_v52, %v16927_v10  ;;  %v8454_v30 = vadd.f32 %v14506_v62, %v8357_v19  ;;  %v8446_v61 = vadd.f32 %v8445_v5, %v8349_v35  ;;  %v14507_v16 = vpop.f32.mrb[222].mxu1  ;;  %v14999_v51 = vld [vmem:[%s16793_s19 + $0x30] sm:$0xff]  }
 0x2ee   : > { %8933 = vmatprep.mubr.bf16.mxu1 %v8479_v13  ;;  %14537 = vmatpush3.bf16.msra.mxu1 %v14997_v60  ;;  %v8448_v17 = vpop.f32.mrb[223].mxu1 }
 0x2ef   : > { %14538 = vmatprep.subr.bf16.mxu1 %v16854_v33  ;;  %v13944_v45 = vpop.f32.mrb[224].mxu0  ;;  %v8457_v9 = vadd.f32 %v14507_v16, %v8360_v37  ;;  %v8449_v6 = vadd.f32 %v8448_v17, %v8352_v55  ;;  %v8474_v2 = vmax.f32 %v8454_v30, 0.0  ;;  %v8472_v8 = vmax.f32 %v8446_v61, 0.0 }
 0x2f0   : > { %v13945_v18 = vpop.f32.mrb[225].mxu0 }
 0x2f1   : > { %v16960_v29 = vadd.f32 %v13945_v18, %v13944_v45  ;;  %v13947_v59 = vpop.f32.mrb[226].mxu0  ;;  %v8475_v63 = vmax.f32 %v8457_v9, 0.0  ;;  %v8473_v57 = vmax.f32 %v8449_v6, 0.0  ;;  %v15002_v18 = vld [vmem:[%s16793_s19 + $0x8] sm:$0xff]   ;;  %v15003_v6 = vld [vmem:[%s16793_s19 + $0x10] sm:$0xff]  }
 0x2f2   : > { %14539 = vmatpush3.bf16.msra.mxu1 %v14998_v12  ;;  %v13948_v10 = vpop.f32.mrb[227].mxu0 }
 0x2f3   : > { %14540 = vmatprep.subr.bf16.mxu1 %v16854_v33  ;;  %v16963_v48 = vadd.f32 %v13948_v10, %v13947_v59  ;;  %v8483_v44 = vpack.c.bf16 %v8475_v63, %v8474_v2  ;;  %v8482_v14 = vpack.c.bf16 %v8473_v57, %v8472_v8  ;;  %v15004_v59 = vld [vmem:[%s16793_s19 + $0x18] sm:$0xff]   ;;  %v15005_v2 = vld [vmem:[%s16793_s19 + $0x20] sm:$0xff]   ;;  %v15006_v63 = vld [vmem:[%s16793_s19 + $0x28] sm:$0xff]  }
 0x2f4   : > { %v15007_v10 = vld [vmem:[%s16793_s19 + $0x30] sm:$0xff]   ;;  %v15008_v8 = vld [vmem:[%s16793_s19 + $0x38] sm:$0xff]  }
 0x2f5   : > { %8934 = vmatmul.mubr.bf16.gmra.mrb[236].mxu1 %v16750_v53 }
 0x2f6   : > { %8941 = vmatprep.mubr.bf16.mxu1 %v8480_v46  ;;  %14541 = vmatpush3.bf16.msra.mxu1 %v14999_v51  ;;  %v15001_v51 = vld [vmem:[%s16793_s19] sm:$0xff]  }
 0x2f7   : > { %14542 = vmatprep.subr.bf16.mxu1 %v16854_v33  ;;  %v13950_v24 = vpop.f32.mrb[228].mxu0 }
 0x2f8   : > { %v13951_v28 = vpop.f32.mrb[229].mxu0 }
 0x2f9   : > { %v16968_v7 = vadd.f32 %v13951_v28, %v13950_v24  ;;  %v13953_v38 = vpop.f32.mrb[230].mxu0 }
 0x2fa   : > { %14543 = vmatpush3.bf16.msra.mxu1 %v15000_v3  ;;  %v13954_v53 = vpop.f32.mrb[231].mxu0 }
 0x2fb   : > { %14568 = vmatprep.subr.bf16.mxu1 %v16854_v33  ;;  %v16971_v13 = vadd.f32 %v13954_v53, %v13953_v38  ;;  %v15010_v38 = vld [vmem:[%s17023_s23 + $0xc0] sm:$0xff]  }
 0x2fc   : > { %v15011_v53 = vld [vmem:[%s17023_s23] sm:$0xff]  }
 0x2fd   : > { %8942 = vmatmul.mubr.bf16.gmra.mrb[240].mxu1 %v16775_v23 }
 0x2fe   : > { %8949 = vmatprep.mubr.bf16.mxu1 %v8481_v32 }
 0x2ff   : > { %v13956_v49 = vpop.f32.mrb[232].mxu0 }
 0x300   : > { %v13957_v43 = vpop.f32.mrb[233].mxu0 }
 0x301   : > { %v16973_v42 = vadd.f32 %v13957_v43, %v13956_v49  ;;  %v13959_v35 = vpop.f32.mrb[234].mxu0  ;;  %v15012_v49 = vld [vmem:[%s17023_s23 + $0x80] sm:$0xff]   ;;  %v15013_v43 = vld [vmem:[%s17023_s23 + $0x48] sm:$0xff]  }
 0x302   : > { %v13960_v50 = vpop.f32.mrb[235].mxu0 }
 0x303   : > { %v16976_v55 = vadd.f32 %v13960_v50, %v13959_v35  ;;  %v15014_v35 = vld [vmem:[%s17023_s23 + $0xc8] sm:$0xff]  }
 0x304   : > { %v15015_v50 = vld [vmem:[%s17023_s23 + $0x8] sm:$0xff]  }
 0x305   : > { %8950 = vmatmul.mubr.bf16.gmra.mrb[244].mxu1 %v16770_v36 }
 0x306   : > { %8957 = vmatprep.mubr.bf16.mxu1 %v8482_v14 }
 0x307   : > { %v13962_v58 = vpop.f32.mrb[236].mxu0 }
 0x308   : > { %v13963_v26 = vpop.f32.mrb[237].mxu0 }
 0x309   : > { %v16978_v20 = vadd.f32 %v13963_v26, %v13962_v58  ;;  %v13965_v34 = vpop.f32.mrb[238].mxu0  ;;  %v15016_v58 = vld [vmem:[%s17023_s23 + $0x88] sm:$0xff]   ;;  %v15017_v26 = vld [vmem:[%s17023_s23 + $0x50] sm:$0xff]  }
 0x30a   : > { %v13966_v23 = vpop.f32.mrb[239].mxu0 }
 0x30b   : > { %v16981_v40 = vadd.f32 %v13966_v23, %v13965_v34  ;;  %v15018_v34 = vld [vmem:[%s17023_s23 + $0xd0] sm:$0xff]  }
 0x30c   : > { %v15019_v23 = vld [vmem:[%s17023_s23 + $0x10] sm:$0xff]  }
 0x30d   : > { %8958 = vmatmul.mubr.bf16.gmra.mrb[248].mxu1 %v16784_v27 }
 0x30e   : > { %8965 = vmatprep.mubr.bf16.mxu1 %v8483_v44 }
 0x30f   : > { %v13968_v22 = vpop.f32.mrb[240].mxu0 }
 0x310   : > { %v13969_v39 = vpop.f32.mrb[241].mxu0 }
 0x311   : > { %v16983_v25 = vadd.f32 %v13969_v39, %v13968_v22  ;;  %v13971_v11 = vpop.f32.mrb[242].mxu0  ;;  %v15020_v22 = vld [vmem:[%s17023_s23 + $0x90] sm:$0xff]   ;;  %v15021_v39 = vld [vmem:[%s17023_s23 + $0x58] sm:$0xff]  }
 0x312   : > { %v13972_v36 = vpop.f32.mrb[243].mxu0 }
 0x313   : > { %v16986_v60 = vadd.f32 %v13972_v36, %v13971_v11  ;;  %v15022_v11 = vld [vmem:[%s17023_s23 + $0xd8] sm:$0xff]  }
 0x314   : > { %v15023_v36 = vld [vmem:[%s17023_s23 + $0x18] sm:$0xff]  }
 0x315   : > { %8966 = vmatmul.mubr.bf16.gmra.mrb[252].mxu1 %v16782_v1 }
 0x316   : > { %14544 = vmatprep.mubr.msk.bf16.mxu1 %vm15113_vm9, %v16854_v33 }
 0x317   : > { %v13974_v41 = vpop.f32.mrb[244].mxu0 }
 0x318   : > { %v13975_v21 = vpop.f32.mrb[245].mxu0 }
 0x319   : > { %v16990_v54 = vadd.f32 %v13975_v21, %v13974_v41  ;;  %v13977_v27 = vpop.f32.mrb[246].mxu0  ;;  %v15024_v41 = vld [vmem:[%s17023_s23 + $0x98] sm:$0xff]   ;;  %v15025_v21 = vld [vmem:[%s17023_s23 + $0x60] sm:$0xff]  }
 0x31a   : > { %v13978_v4 = vpop.f32.mrb[247].mxu0 }
 0x31b   : > { %v16992_v31 = vadd.f32 %v13978_v4, %v13977_v27  ;;  %v15026_v27 = vld [vmem:[%s17023_s23 + $0xe0] sm:$0xff]  }
 0x31c   : > { %v15027_v4 = vld [vmem:[%s17023_s23 + $0x20] sm:$0xff]  }
 0x31f   : > { %v13980_v47 = vpop.f32.mrb[248].mxu0 }
 0x320   : > { %v13981_v56 = vpop.f32.mrb[249].mxu0 }
 0x321   : > { %v16994_v32 = vadd.f32 %v13981_v56, %v13980_v47  ;;  %v13983_v15 = vpop.f32.mrb[250].mxu0  ;;  %v15028_v47 = vld [vmem:[%s17023_s23 + $0xa0] sm:$0xff]   ;;  %v15029_v56 = vld [vmem:[%s17023_s23 + $0x68] sm:$0xff]  }
 0x322   : > { %v13984_v1 = vpop.f32.mrb[251].mxu0 }
 0x323   : > { %v16996_v46 = vadd.f32 %v13984_v1, %v13983_v15  ;;  %v15030_v15 = vld [vmem:[%s17023_s23 + $0xe8] sm:$0xff]  }
 0x324   : > { %v15031_v1 = vld [vmem:[%s17023_s23 + $0x28] sm:$0xff]  }
 0x327   : > { %v13986_v19 = vpop.f32.mrb[252].mxu0 }
 0x328   : > { %v13987_v52 = vpop.f32.mrb[253].mxu0 }
 0x329   : > { %v16998_v12 = vadd.f32 %v13987_v52, %v13986_v19  ;;  %v13989_v62 = vpop.f32.mrb[254].mxu0  ;;  %v15032_v19 = vld [vmem:[%s17023_s23 + $0xa8] sm:$0xff]   ;;  %v15033_v52 = vld [vmem:[%s17023_s23 + $0x70] sm:$0xff]  }
 0x32a   : > { %v13990_v37 = vpop.f32.mrb[255].mxu0 }
 0x32b   : > { %v17000_v30 = vadd.f32 %v13990_v37, %v13989_v62  ;;  %v15034_v62 = vld [vmem:[%s17023_s23 + $0xf0] sm:$0xff]  }
 0x32c   : > { %v15035_v37 = vld [vmem:[%s17023_s23 + $0x30] sm:$0xff]  }
 0x34b   : > { %v9144_v5 = vpop.f32.mrb[0].mxu0 }
 0x34c   : > { %v9150_v61 = vmax.f32 %v9144_v5, 0.0  ;;  %v14526_v16 = vpop.f32.mrb[1].mxu0  ;;  %v15036_v5 = vld [vmem:[%s17023_s23 + $0xb0] sm:$0xff]  }
 0x34d   : > { %v9147_v45 = vpop.f32.mrb[2].mxu0  ;;  %v15038_v16 = vld [vmem:[%s17023_s23 + $0xf8] sm:$0xff]  }
 0x34e   : > { %v9151_v9 = vpack.c.bf16 %v9150_v61, %v9150_v61  ;;  %v14527_v17 = vpop.f32.mrb[3].mxu0  ;;  %v15037_v61 = vld [vmem:[%s17023_s23 + $0x78] sm:$0xff]  }
 0x34f   : > { %v15039_v45 = vld [vmem:[%s17023_s23 + $0x38] sm:$0xff]  }
 0x350   : > { %14545 = vmatmul.mubr.bf16.vlgmr.msra.gmra.mrb[0].mxu1 %v9151_v9  ;;  %v15041_v9 = vld [vmem:[%s17023_s23 + $0x140] sm:$0xff]  }
 0x351   : > { %14569 = vmatpush3.bf16.msra.mxu1 %v15001_v51  ;;  %14584 = vmatprep.mubr.msk.bf16.mxu1 %vm15113_vm9, %v16854_v33  ;;  %v15040_v51 = vld [vmem:[%s17023_s23 + $0xb8] sm:$0xff]  }
 0x352   : > { %14570 = vmatprep.subr.bf16.mxu1 %v16854_v33 }
 0x355   : > { %14571 = vmatpush3.bf16.msra.mxu1 %v15002_v18 }
 0x356   : > { %14572 = vmatprep.subr.bf16.mxu1 %v16854_v33 }
 0x359   : > { %14573 = vmatpush3.bf16.msra.mxu1 %v15003_v6 }
 0x35a   : > { %14574 = vmatprep.subr.bf16.mxu1 %v16854_v33 }
 0x35d   : > { %14575 = vmatpush3.bf16.msra.mxu1 %v15004_v59 }
 0x35e   : > { %14576 = vmatprep.subr.bf16.mxu1 %v16854_v33 }
 0x361   : > { %14577 = vmatpush3.bf16.msra.mxu1 %v15005_v2 }
 0x362   : > { %14578 = vmatprep.subr.bf16.mxu1 %v16854_v33 }
 0x365   : > { %14579 = vmatpush3.bf16.msra.mxu1 %v15006_v63 }
 0x366   : > { %14580 = vmatprep.subr.bf16.mxu1 %v16854_v33 }
 0x369   : > { %14581 = vmatpush3.bf16.msra.mxu1 %v15007_v10 }
 0x36a   : > { %14582 = vmatprep.subr.bf16.mxu1 %v16854_v33  ;;  %v15009_v33 = vld [vmem:[%s17023_s23 + $0x40] sm:$0xff]  }
 0x36b   : > { %14092 = vmatprep.subr.bf16.mxu0 %v15009_v33 }
 0x36c   : > { %14093 = vmatpush3.bf16.msra.mxu0 %v15011_v53 }
 0x36d   : > { %14583 = vmatpush3.bf16.msra.mxu1 %v15008_v8  ;;  %14094 = vmatprep.subr.bf16.mxu0 %v15013_v43  ;;  %v15049_v8 = vld [vmem:[%s17023_s23 + $0x1c0] sm:$0xff]  }
 0x36e   : > { %14156 = vmatprep.subr.bf16.mxu1 %v15010_v38 }
 0x370   : > { %v9415_v57 = vpop.f32.mrb[4].mxu0  ;;  %14095 = vmatpush3.bf16.msra.mxu0 %v15015_v50 }
 0x371   : > { %v9421_v3 = vmax.f32 %v9415_v57, 0.0  ;;  %v14566_v44 = vpop.f32.mrb[5].mxu0  ;;  %14096 = vmatprep.subr.bf16.mxu0 %v15017_v26 }
 0x372   : > { %v9418_v14 = vpop.f32.mrb[6].mxu0 }
 0x373   : > { %v9422_v24 = vpack.c.bf16 %v9421_v3, %v9421_v3  ;;  %v14567_v28 = vpop.f32.mrb[7].mxu0 }
 0x374   : > { %14097 = vmatpush3.bf16.msra.mxu0 %v15019_v23 }
 0x375   : > { %14585 = vmatmul.mubr.bf16.vlgmr.msra.gmra.mrb[4].mxu1 %v9422_v24  ;;  %14098 = vmatprep.subr.bf16.mxu0 %v15021_v39 }
 0x376   : > { %14157 = vmatpush3.bf16.msra.mxu1 %v15012_v49 }
 0x377   : > { %14158 = vmatprep.subr.bf16.mxu1 %v15014_v35 }
 0x378   : > { %14099 = vmatpush3.bf16.msra.mxu0 %v15023_v36 }
 0x379   : > { %14100 = vmatprep.subr.bf16.mxu0 %v15025_v21 }
 0x37a   : > { %14159 = vmatpush3.bf16.msra.mxu1 %v15016_v58 }
 0x37b   : > { %14160 = vmatprep.subr.bf16.mxu1 %v15018_v34 }
 0x37c   : > { %14101 = vmatpush3.bf16.msra.mxu0 %v15027_v4 }
 0x37d   : > { %14102 = vmatprep.subr.bf16.mxu0 %v15029_v56 }
 0x37e   : > { %14161 = vmatpush3.bf16.msra.mxu1 %v15020_v22 }
 0x37f   : > { %14162 = vmatprep.subr.bf16.mxu1 %v15022_v11 }
 0x380   : > { %14103 = vmatpush3.bf16.msra.mxu0 %v15031_v1 }
 0x381   : > { %14104 = vmatprep.subr.bf16.mxu0 %v15033_v52 }
 0x382   : > { %14163 = vmatpush3.bf16.msra.mxu1 %v15024_v41 }
 0x383   : > { %14164 = vmatprep.subr.bf16.mxu1 %v15026_v27 }
 0x384   : > { %14105 = vmatpush3.bf16.msra.mxu0 %v15035_v37 }
 0x385   : > { %14106 = vmatprep.subr.bf16.mxu0 %v15037_v61 }
 0x386   : > { %14165 = vmatpush3.bf16.msra.mxu1 %v15028_v47 }
 0x387   : > { %14166 = vmatprep.subr.bf16.mxu1 %v15030_v15 }
 0x388   : > { %14107 = vmatpush3.bf16.msra.mxu0 %v15039_v45 }
 0x389   : > { %14220 = vmatprep.subr.bf16.mxu0 %v15041_v9 }
 0x38a   : > { %14167 = vmatpush3.bf16.msra.mxu1 %v15032_v19 }
 0x38b   : > { %14168 = vmatprep.subr.bf16.mxu1 %v15034_v62 }
 0x38e   : > { %14169 = vmatpush3.bf16.msra.mxu1 %v15036_v5 }
 0x38f   : > { %14170 = vmatprep.subr.bf16.mxu1 %v15038_v16 }
 0x392   : > { %14171 = vmatpush3.bf16.msra.mxu1 %v15040_v51 }
 0x393   : > { %14284 = vmatprep.subr.bf16.mxu1 %v15049_v8  ;;  %v9256_v8 = vlaneseq }
 0x3b0   : > { %v14008_v17 = vpop.f32.mrb[224].mxu1 }
 0x3b1   : > { %v14009_v18 = vpop.f32.mrb[225].mxu1 }
 0x3b2   : > { %v14010_v6 = vadd.f32 %v14009_v18, %v14008_v17  ;;  %v14011_v59 = vpop.f32.mrb[226].mxu1 }
 0x3b3   : > { %v14012_v2 = vpop.f32.mrb[227].mxu1 }
 0x3b4   : > { %v17059_v63 = vadd.f32 %v14010_v6, %v16960_v29  ;;  %v14013_v10 = vadd.f32 %v14012_v2, %v14011_v59 }
 0x3b6   : > { %v17063_v57 = vadd.f32 %v14013_v10, %v16963_v48 }
 0x3b8   : > { %v14014_v3 = vpop.f32.mrb[228].mxu1 }
 0x3b9   : > { %v14015_v44 = vpop.f32.mrb[229].mxu1 }
 0x3ba   : > { %v14016_v14 = vadd.f32 %v14015_v44, %v14014_v3  ;;  %v14017_v24 = vpop.f32.mrb[230].mxu1  ;;  %v17095_v3 = vshrl.u32 %v9256_v8, 7 }
 0x3bb   : > { %v14018_v28 = vpop.f32.mrb[231].mxu1 }
 0x3bc   : > { %v8920_v33 = vadd.f32 %v14016_v14, %v16968_v7  ;;  %v14019_v38 = vadd.f32 %v14018_v28, %v14017_v24 }
 0x3be   : > { %v8923_v53 = vadd.f32 %v14019_v38, %v16971_v13 }
 0x3c0   : > { %v14020_v49 = vpop.f32.mrb[232].mxu1 }
 0x3c1   : > { %v14021_v43 = vpop.f32.mrb[233].mxu1 }
 0x3c2   : > { %v14022_v29 = vadd.f32 %v14021_v43, %v14020_v49  ;;  %v14023_v35 = vpop.f32.mrb[234].mxu1 }
 0x3c3   : > { %v14024_v50 = vpop.f32.mrb[235].mxu1 }
 0x3c4   : > { %v8928_v58 = vadd.f32 %v14022_v29, %v16973_v42  ;;  %v14025_v48 = vadd.f32 %v14024_v50, %v14023_v35 }
 0x3c6   : > { %v8931_v26 = vadd.f32 %v14025_v48, %v16976_v55  ;;  %v9588_v48 = vld [vmem:[#allocation3 + $0x1] sm:$0xff] }
 0x3c8   : > { %v14026_v34 = vpop.f32.mrb[236].mxu1 }
 0x3c9   : > { %v14027_v23 = vpop.f32.mrb[237].mxu1 }
 0x3ca   : > { %v14028_v22 = vadd.f32 %v14027_v23, %v14026_v34  ;;  %v14029_v39 = vpop.f32.mrb[238].mxu1 }
 0x3cb   : > { %v14030_v11 = vpop.f32.mrb[239].mxu1 }
 0x3cc   : > { %v8936_v7 = vadd.f32 %v14028_v22, %v16978_v20  ;;  %v14031_v36 = vadd.f32 %v14030_v11, %v14029_v39 }
 0x3ce   : > { %v8939_v13 = vadd.f32 %v14031_v36, %v16981_v40 }
 0x3d0   : > { %v14032_v41 = vpop.f32.mrb[240].mxu1 }
 0x3d1   : > { %v14033_v21 = vpop.f32.mrb[241].mxu1 }
 0x3d2   : > { %v14034_v27 = vadd.f32 %v14033_v21, %v14032_v41  ;;  %v14035_v4 = vpop.f32.mrb[242].mxu1 }
 0x3d3   : > { %v14036_v47 = vpop.f32.mrb[243].mxu1 }
 0x3d4   : > { %v17072_v42 = vadd.f32 %v14034_v27, %v16983_v25  ;;  %v14037_v56 = vadd.f32 %v14036_v47, %v14035_v4  ;;  %v9620_v27 = vld [vmem:[#allocation3 + $0x2] sm:$0xff] }
 0x3d6   : > { %v17075_v55 = vadd.f32 %v14037_v56, %v16986_v60 }
 0x3d8   : > { %v14038_v15 = vpop.f32.mrb[244].mxu1 }
 0x3d9   : > { %v14039_v1 = vpop.f32.mrb[245].mxu1 }
 0x3da   : > { %v14040_v19 = vadd.f32 %v14039_v1, %v14038_v15  ;;  %v14041_v52 = vpop.f32.mrb[246].mxu1  ;;  %v17149_v1 = vld [vmem:[#allocation3] sm:$0xff] }
 0x3db   : > { %v14042_v20 = vpop.f32.mrb[247].mxu1 }
 0x3dc   : > { %v17078_v62 = vadd.f32 %v14040_v19, %v16990_v54  ;;  %v14043_v40 = vadd.f32 %v14042_v20, %v14041_v52 }
 0x3de   : > { %v17081_v37 = vadd.f32 %v14043_v40, %v16992_v31 }
 0x3e0   : > { %v14044_v5 = vpop.f32.mrb[248].mxu1 }
 0x3e1   : > { %v14045_v61 = vpop.f32.mrb[249].mxu1 }
 0x3e2   : > { %v14046_v25 = vadd.f32 %v14045_v61, %v14044_v5  ;;  %v14047_v16 = vpop.f32.mrb[250].mxu1  ;;  %v15042_v5 = vld [vmem:[%s17023_s23 + $0x100] sm:$0xff]   ;;  %v15043_v61 = vld [vmem:[%s17023_s23 + $0x148] sm:$0xff]  }
 0x3e3   : > { %v14048_v45 = vpop.f32.mrb[251].mxu1 }
 0x3e4   : > { %v17084_v60 = vadd.f32 %v14046_v25, %v16994_v32  ;;  %v14049_v51 = vadd.f32 %v14048_v45, %v14047_v16  ;;  %v9258_v32 = vsub.s32 0, %v17095_v3  ;;  %v15050_v25 = vld [vmem:[%s17023_s23 + $0x180] sm:$0xff]   ;;  %v15053_v45 = vld [vmem:[%s17023_s23 + $0x1c8] sm:$0xff]  }
 0x3e6   : > { %v17087_v9 = vadd.f32 %v14049_v51, %v16996_v46  ;;  %v15044_v51 = vld [vmem:[%s17023_s23 + $0x108] sm:$0xff]  }
 0x3e8   : > { %v14050_v17 = vpop.f32.mrb[252].mxu1 }
 0x3e9   : > { %v14051_v18 = vpop.f32.mrb[253].mxu1 }
 0x3ea   : > { %v14052_v54 = vadd.f32 %v14051_v18, %v14050_v17  ;;  %v14053_v6 = vpop.f32.mrb[254].mxu1  ;;  %v15045_v17 = vld [vmem:[%s17023_s23 + $0x150] sm:$0xff]   ;;  %v15054_v18 = vld [vmem:[%s17023_s23 + $0x188] sm:$0xff]  }
 0x3eb   : > { %v14054_v59 = vpop.f32.mrb[255].mxu1 }
 0x3ec   : > { %v17090_v31 = vadd.f32 %v14052_v54, %v16998_v12  ;;  %v14055_v2 = vadd.f32 %v14054_v59, %v14053_v6  ;;  %v15056_v59 = vld [vmem:[%s17023_s23 + $0x1d0] sm:$0xff]  }
 0x3ee   : > { %v17093_v10 = vadd.f32 %v14055_v2, %v17000_v30 }
 0x423   : > { %v9250_v44 = vpop.f32.mrb[0].mxu1 }
 0x424   : > { %v9259_v46 = vrot.slane %v9250_v44, %v9258_v32  ;;  %v14546_v14 = vpop.f32.mrb[1].mxu1 }
 0x425   : > { %v9253_v24 = vpop.f32.mrb[2].mxu1 }
 0x426   : > { %v9260_v28 = vadd.f32 %v9259_v46, %v17059_v63  ;;  %v9261_v12 = vadd.f32 %v9259_v46, %v17063_v57  ;;  %v9262_v38 = vadd.f32 %v9259_v46, %v8920_v33  ;;  %v9263_v49 = vadd.f32 %v9259_v46, %v8923_v53  ;;  %v14547_v43 = vpop.f32.mrb[3].mxu1  ;;  %v15047_v24 = vld [vmem:[%s17023_s23 + $0x158] sm:$0xff]  }
 0x427   : > { %v9264_v30 = vadd.f32 %v9259_v46, %v8928_v58  ;;  %v9265_v29 = vadd.f32 %v9259_v46, %v8931_v26  ;;  %v9266_v35 = vadd.f32 %v9259_v46, %v8936_v7  ;;  %v9267_v50 = vadd.f32 %v9259_v46, %v8939_v13  ;;  %v15046_v46 = vld [vmem:[%s17023_s23 + $0x110] sm:$0xff]   ;;  %v15051_v43 = vld [vmem:[%s17023_s23 + $0x160] sm:$0xff]  }
 0x428   : > { %v17102_v34 = vmax.f32 %v9260_v28, 0.0  ;;  %v17104_v23 = vmax.f32 %v9261_v12, 0.0  ;;  %v17106_v22 = vmax.f32 %v9262_v38, 0.0  ;;  %v17108_v39 = vmax.f32 %v9263_v49, 0.0  ;;  %v15058_v28 = vld [vmem:[%s17023_s23 + $0x190] sm:$0xff]   ;;  %v15059_v38 = vld [vmem:[%s17023_s23 + $0x1d8] sm:$0xff]  }
 0x429   : > { %v17110_v11 = vmax.f32 %v9264_v30, 0.0  ;;  %v17112_v63 = vmax.f32 %v9265_v29, 0.0  ;;  %v17114_v57 = vmax.f32 %v9266_v35, 0.0  ;;  %v17116_v33 = vmax.f32 %v9267_v50, 0.0  ;;  %v15048_v49 = vld [vmem:[%s17023_s23 + $0x118] sm:$0xff]   ;;  %v15062_v50 = vld [vmem:[%s17023_s23 + $0x1e0] sm:$0xff]  }
 0x42a   : > { %9277 = vst [vmem:[#allocation3 + $0x11] sm:$0xff] %v17102_v34  ;;  %9278 = vst [vmem:[#allocation3 + $0x21] sm:$0xff] %v17104_v23  ;;  %v9604_v53 = vpack.c.bf16 %v17102_v34, %v9588_v48  ;;  %v17125_v58 = vpack.c.bf16 %v17106_v22, %v17104_v23  ;;  %v9700_v26 = vpack.c.bf16 %v17104_v23, %v17102_v34  ;;  %v15060_v30 = vld [vmem:[%s17023_s23 + $0x198] sm:$0xff]   ;;  %v15077_v34 = vld [vmem:[%s17023_s23 + $0x220] sm:$0xff]  }
 0x42b   : > { %9279 = vst [vmem:[#allocation3 + $0x31] sm:$0xff] %v17106_v22  ;;  %9280 = vst [vmem:[#allocation3 + $0x41] sm:$0xff] %v17108_v39  ;;  %v9701_v7 = vpack.c.bf16 %v17108_v39, %v17106_v22  ;;  %v17137_v36 = vpack.c.bf16 %v17110_v11, %v17108_v39  ;;  %v17141_v13 = vpack.c.bf16 %v17114_v57, %v17112_v63  ;;  %v15079_v39 = vld [vmem:[%s17023_s23 + $0x230] sm:$0xff]  }
 0x42c   : > { %9281 = vst [vmem:[#allocation3 + $0x51] sm:$0xff] %v17110_v11  ;;  %9282 = vst [vmem:[#allocation3 + $0x61] sm:$0xff] %v17112_v63  ;;  %v9702_v41 = vpack.c.bf16 %v17112_v63, %v17110_v11  ;;  %10525 = vmatprep.mubr.bf16.mxu0 %v9604_v53  ;;  %v9703_v21 = vpack.c.bf16 %v17116_v33, %v17114_v57 }
 0x42d   : > { %9283 = vst [vmem:[#allocation3 + $0x71] sm:$0xff] %v17114_v57  ;;  %9284 = vst [vmem:[#allocation3 + $0x81] sm:$0xff] %v17116_v33 }
 0x431   : > { %v9652_v4 = vld [vmem:[#allocation3 + $0x10] sm:$0xff]  ;;  %v9653_v47 = vld [vmem:[#allocation3 + $0x20] sm:$0xff] }
 0x432   : > { %v17147_v56 = vld [vmem:[#allocation3 + $0x12] sm:$0xff]  ;;  %v9668_v15 = vpack.c.bf16 %v9653_v47, %v9652_v4  ;;  %v9572_v19 = vpack.c.bf16 %v9652_v4, %v17149_v1  ;;  %v9655_v40 = vld [vmem:[#allocation3 + $0x40] sm:$0xff] }
 0x433   : > { %v9636_v52 = vpack.c.bf16 %v17147_v56, %v9620_v27  ;;  %v9654_v20 = vld [vmem:[#allocation3 + $0x30] sm:$0xff]  ;;  %v17161_v54 = vld [vmem:[#allocation3 + $0x22] sm:$0xff] }
 0x434   : > { %10622 = vmatprep.mubr.bf16.mxu1 %v9668_v15  ;;  %10526 = vmatmul.mubr.bf16.vlgmr.msra.gmra.mrb[8].mxu0 %v9572_v19  ;;  %v9669_v16 = vpack.c.bf16 %v9655_v40, %v9654_v20  ;;  %v17163_v6 = vld [vmem:[#allocation3 + $0x32] sm:$0xff]  ;;  %v9657_v8 = vld [vmem:[#allocation3 + $0x60] sm:$0xff]  ;;  %v17166_v44 = vpack.c.bf16 %v9654_v20, %v9653_v47  ;;  %v9732_v0 = vpack.c.bf16 %v17161_v54, %v17147_v56 }
 0x435   : > { %10623 = vmatmul.mubr.bf16.vlgmr.msra.gmra.mrb[8].mxu1 %v9636_v52  ;;  %10533 = vmatprep.mubr.bf16.mxu0 %v17125_v58  ;;  %v9656_v2 = vld [vmem:[#allocation3 + $0x50] sm:$0xff]  ;;  %v17171_v14 = vpack.c.bf16 %v17163_v6, %v17161_v54  ;;  %v17182_v29 = vld [vmem:[#allocation3 + $0x42] sm:$0xff] }
 0x436   : > { %10630 = vmatprep.mubr.bf16.mxu1 %v9669_v16  ;;  %14221 = vmatpush3.bf16.msra.mxu0 %v15042_v5  ;;  %v9670_v12 = vpack.c.bf16 %v9657_v8, %v9656_v2  ;;  %v17184_v35 = vld [vmem:[#allocation3 + $0x52] sm:$0xff]  ;;  %v17187_v53 = vld [vmem:[#allocation3 + $0x80] sm:$0xff]  ;;  %v17189_v27 = vpack.c.bf16 %v9656_v2, %v9655_v40  ;;  %v15055_v40 = vld [vmem:[%s17023_s23 + $0x168] sm:$0xff]  }
 0x437   : > { %14222 = vmatprep.subr.bf16.mxu0 %v15043_v61  ;;  %14285 = vmatpush3.bf16.msra.mxu1 %v15050_v25  ;;  %v9658_v48 = vld [vmem:[#allocation3 + $0x70] sm:$0xff]  ;;  %v17193_v47 = vpack.c.bf16 %v17184_v35, %v17182_v29  ;;  %v15052_v15 = vld [vmem:[%s17023_s23 + $0x120] sm:$0xff]   ;;  %v15065_v16 = vld [vmem:[%s17023_s23 + $0x1e8] sm:$0xff]  }
 0x438   : > { %14286 = vmatprep.subr.bf16.mxu1 %v15053_v45  ;;  %v9671_v20 = vpack.c.bf16 %v17187_v53, %v9658_v48  ;;  %v15064_v5 = vld [vmem:[%s17023_s23 + $0x1a0] sm:$0xff]   ;;  %v17204_v25 = vpack.c.bf16 %v9658_v48, %v9657_v8  ;;  %v15075_v56 = vld [vmem:[%s17023_s23 + $0x210] sm:$0xff]   ;;  %v15078_v54 = vld [vmem:[%s17023_s23 + $0x228] sm:$0xff]  }
 0x439   : > { %v9723_v23 = vld [vmem:[#allocation3 + $0x82] sm:$0xff] }
 0x43a   : > { %14223 = vmatpush3.bf16.msra.mxu0 %v15044_v51 }
 0x43b   : > { %14224 = vmatprep.subr.bf16.mxu0 %v15045_v17  ;;  %14287 = vmatpush3.bf16.msra.mxu1 %v15054_v18 }
 0x43c   : > { %10534 = vmatmul.mubr.bf16.gmra.mrb[12].mxu0 %v17166_v44  ;;  %14288 = vmatprep.subr.bf16.mxu1 %v15056_v59 }
 0x43d   : > { %10631 = vmatmul.mubr.bf16.gmra.mrb[12].mxu1 %v17171_v14  ;;  %10541 = vmatprep.mubr.bf16.mxu0 %v17137_v36 }
 0x43e   : > { %10638 = vmatprep.mubr.bf16.mxu1 %v9670_v12  ;;  %14225 = vmatpush3.bf16.msra.mxu0 %v15046_v46  ;;  %v17215_v46 = vld [vmem:[#allocation3 + $0x62] sm:$0xff] }
 0x43f   : > { %14226 = vmatprep.subr.bf16.mxu0 %v15047_v24  ;;  %14289 = vmatpush3.bf16.msra.mxu1 %v15058_v28 }
 0x440   : > { %14290 = vmatprep.subr.bf16.mxu1 %v15059_v38 }
 0x442   : > { %14227 = vmatpush3.bf16.msra.mxu0 %v15048_v49 }
 0x443   : > { %14228 = vmatprep.subr.bf16.mxu0 %v15051_v43  ;;  %14291 = vmatpush3.bf16.msra.mxu1 %v15060_v30  ;;  %v15066_v30 = vld [vmem:[%s17023_s23 + $0x1a8] sm:$0xff]  }
 0x444   : > { %10542 = vmatmul.mubr.bf16.gmra.mrb[16].mxu0 %v17189_v27  ;;  %14292 = vmatprep.subr.bf16.mxu1 %v15062_v50 }
 0x445   : > { %10639 = vmatmul.mubr.bf16.gmra.mrb[16].mxu1 %v17193_v47  ;;  %10549 = vmatprep.mubr.bf16.mxu0 %v17141_v13 }
 0x446   : > { %10646 = vmatprep.mubr.bf16.mxu1 %v9671_v20  ;;  %14229 = vmatpush3.bf16.msra.mxu0 %v15052_v15  ;;  %v15068_v20 = vld [vmem:[%s17023_s23 + $0x1f0] sm:$0xff]  }
 0x447   : > { %14230 = vmatprep.subr.bf16.mxu0 %v15055_v40  ;;  %14293 = vmatpush3.bf16.msra.mxu1 %v15064_v5  ;;  %v15067_v5 = vld [vmem:[%s17023_s23 + $0x178] sm:$0xff]  }
 0x448   : > { %v9521_v4 = vpop.f32.mrb[4].mxu1  ;;  %14294 = vmatprep.subr.bf16.mxu1 %v15065_v16  ;;  %v15070_v16 = vld [vmem:[%s17023_s23 + $0x1b0] sm:$0xff]  }
 0x449   : > { %v9530_v19 = vrot.slane %v9521_v4, %v9258_v32  ;;  %v14586_v52 = vpop.f32.mrb[5].mxu1 }
 0x44a   : > { %v9524_v61 = vpop.f32.mrb[6].mxu1  ;;  %v15063_v52 = vld [vmem:[%s17023_s23 + $0x130] sm:$0xff]  }
 0x44b   : > { %v9531_v3 = vadd.f32 %v9530_v19, %v17072_v42  ;;  %v9532_v32 = vadd.f32 %v9530_v19, %v17075_v55  ;;  %v9533_v45 = vadd.f32 %v9530_v19, %v17078_v62  ;;  %v9534_v51 = vadd.f32 %v9530_v19, %v17081_v37  ;;  %v14587_v17 = vpop.f32.mrb[7].mxu1  ;;  %v17217_v42 = vld [vmem:[#allocation3 + $0x72] sm:$0xff]  ;;  %v15057_v55 = vld [vmem:[%s17023_s23 + $0x128] sm:$0xff]   ;;  %14295 = vmatpush3.bf16.msra.mxu1 %v15066_v30  ;;  %v15073_v30 = vld [vmem:[%s17023_s23 + $0x200] sm:$0xff]  }
 0x44c   : > { %v9535_v18 = vadd.f32 %v9530_v19, %v17084_v60  ;;  %v9536_v59 = vadd.f32 %v9530_v19, %v17087_v9  ;;  %v9537_v2 = vadd.f32 %v9530_v19, %v17090_v31  ;;  %v9538_v8 = vadd.f32 %v9530_v19, %v17093_v10  ;;  %v9596_v60 = vld [vmem:[#allocation3 + $0xa1] sm:$0xff]  ;;  %v15061_v9 = vld [vmem:[%s17023_s23 + $0x170] sm:$0xff]   ;;  %14231 = vmatpush3.bf16.msra.mxu0 %v15057_v55 }
 0x44d   : > { %v17220_v62 = vmax.f32 %v9531_v3, 0.0  ;;  %v17222_v37 = vmax.f32 %v9532_v32, 0.0  ;;  %v17224_v24 = vmax.f32 %v9533_v45, 0.0  ;;  %v17226_v28 = vmax.f32 %v9534_v51, 0.0  ;;  %10550 = vmatmul.mubr.bf16.gmra.mrb[20].mxu0 %v17204_v25  ;;  %14232 = vmatprep.subr.bf16.mxu0 %v15061_v9  ;;  %v15069_v3 = vld [vmem:[%s17023_s23 + $0x138] sm:$0xff]   ;;  %v9628_v45 = vld [vmem:[#allocation3 + $0xa2] sm:$0xff] }
 0x44e   : > { %v17229_v31 = vmax.f32 %v9535_v18, 0.0  ;;  %v17231_v10 = vmax.f32 %v9536_v59, 0.0  ;;  %v17233_v12 = vmax.f32 %v9537_v2, 0.0  ;;  %v17235_v38 = vmax.f32 %v9538_v8, 0.0  ;;  %14296 = vmatprep.subr.bf16.mxu1 %v15068_v20  ;;  %v15071_v32 = vld [vmem:[%s17023_s23 + $0x1f8] sm:$0xff]  }
 0x44f   : > { %9548 = vst [vmem:[#allocation3 + $0xb1] sm:$0xff] %v17220_v62  ;;  %9549 = vst [vmem:[#allocation3 + $0xc1] sm:$0xff] %v17222_v37  ;;  %v17243_v49 = vpack.c.bf16 %v17217_v42, %v17215_v46  ;;  %v17247_v43 = vpack.c.bf16 %v17224_v24, %v17222_v37  ;;  %v9704_v50 = vpack.c.bf16 %v17222_v37, %v17220_v62  ;;  %14297 = vmatpush3.bf16.msra.mxu1 %v15070_v16  ;;  %v15087_v37 = vld [vmem:[%s17401_s26 + $0x30] sm:$0xff]  }
 0x450   : > { %9550 = vst [vmem:[#allocation3 + $0xd1] sm:$0xff] %v17224_v24  ;;  %9551 = vst [vmem:[#allocation3 + $0xe1] sm:$0xff] %v17226_v28  ;;  %v9705_v48 = vpack.c.bf16 %v17226_v28, %v17224_v24  ;;  %v9608_v4 = vpack.c.bf16 %v17220_v62, %v9596_v60  ;;  %v17261_v15 = vpack.c.bf16 %v17229_v31, %v17226_v28  ;;  %14233 = vmatpush3.bf16.msra.mxu0 %v15063_v52  ;;  %v15072_v60 = vld [vmem:[%s17023_s23 + $0x1b8] sm:$0xff]   ;;  %v15086_v62 = vld [vmem:[%s17401_s26 + $0x28] sm:$0xff]  }
 0x451   : > { %9552 = vst [vmem:[#allocation3 + $0xf1] sm:$0xff] %v17229_v31  ;;  %9553 = vst [vmem:[#allocation3 + $0x101] sm:$0xff] %v17231_v10  ;;  %v17265_v19 = vpack.c.bf16 %v17233_v12, %v17231_v10  ;;  %v9706_v40 = vpack.c.bf16 %v17231_v10, %v17229_v31  ;;  %v9707_v61 = vpack.c.bf16 %v17235_v38, %v17233_v12  ;;  %10647 = vmatmul.mubr.bf16.gmra.mrb[20].mxu1 %v17243_v49 }
 0x452   : > { %9554 = vst [vmem:[#allocation3 + $0x111] sm:$0xff] %v17233_v12  ;;  %9555 = vst [vmem:[#allocation3 + $0x121] sm:$0xff] %v17235_v38  ;;  %10557 = vmatprep.mubr.bf16.mxu0 %v9608_v4  ;;  %14234 = vmatprep.subr.bf16.mxu0 %v15067_v5 }
 0x453   : > { %14298 = vmatprep.subr.bf16.mxu1 %v15071_v32 }
 0x454   : > { %14235 = vmatpush3.bf16.msra.mxu0 %v15069_v3  ;;  %14299 = vmatpush3.bf16.msra.mxu1 %v15072_v60 }
 0x455   : > { %14588 = vmatprep.subr.bf16.mxu0 %v15073_v30 }
 0x456   : > { %v9660_v51 = vld [vmem:[#allocation3 + $0xb0] sm:$0xff]  ;;  %v9661_v17 = vld [vmem:[#allocation3 + $0xc0] sm:$0xff] }
 0x457   : > { %v17279_v18 = vld [vmem:[#allocation3 + $0xb2] sm:$0xff]  ;;  %v9672_v59 = vpack.c.bf16 %v9661_v17, %v9660_v51  ;;  %v9576_v2 = vpack.c.bf16 %v9660_v51, %v17149_v1  ;;  %v9663_v55 = vld [vmem:[#allocation3 + $0xe0] sm:$0xff] }
 0x458   : > { %v9662_v8 = vld [vmem:[#allocation3 + $0xd0] sm:$0xff]  ;;  %v9640_v9 = vpack.c.bf16 %v17279_v18, %v9628_v45  ;;  %v17286_v52 = vld [vmem:[#allocation3 + $0xc2] sm:$0xff] }
 0x459   : > { %10654 = vmatprep.mubr.bf16.mxu1 %v9672_v59  ;;  %10558 = vmatmul.mubr.bf16.gmra.mrb[24].mxu0 %v9576_v2  ;;  %v9673_v4 = vpack.c.bf16 %v9663_v55, %v9662_v8  ;;  %v17288_v20 = vld [vmem:[#allocation3 + $0xd2] sm:$0xff]  ;;  %v9665_v16 = vld [vmem:[#allocation3 + $0x100] sm:$0xff]  ;;  %v17290_v51 = vpack.c.bf16 %v9662_v8, %v9661_v17 }
 0x45a   : > { %10655 = vmatmul.mubr.bf16.gmra.mrb[24].mxu1 %v9640_v9  ;;  %10565 = vmatprep.mubr.bf16.mxu0 %v17247_v43  ;;  %v9664_v5 = vld [vmem:[#allocation3 + $0xf0] sm:$0xff]  ;;  %v17294_v3 = vpack.c.bf16 %v17288_v20, %v17286_v52  ;;  %v17299_v45 = vld [vmem:[#allocation3 + $0xe2] sm:$0xff] }
 0x45b   : > { %10662 = vmatprep.mubr.bf16.mxu1 %v9673_v4  ;;  %v9674_v32 = vpack.c.bf16 %v9665_v16, %v9664_v5  ;;  %v17301_v59 = vld [vmem:[#allocation3 + $0xf2] sm:$0xff]  ;;  %v17303_v60 = vld [vmem:[#allocation3 + $0x120] sm:$0xff]  ;;  %v17305_v17 = vpack.c.bf16 %v9664_v5, %v9663_v55  ;;  %v9737_v11 = vpack.c.bf16 %v17299_v45, %v17288_v20 }
 0x45c   : > { %v9666_v2 = vld [vmem:[#allocation3 + $0x110] sm:$0xff]  ;;  %v17309_v8 = vpack.c.bf16 %v17301_v59, %v17299_v45  ;;  %v17315_v4 = vld [vmem:[#allocation3 + $0x102] sm:$0xff] }
 0x45d   : > { %v9675_v9 = vpack.c.bf16 %v17303_v60, %v9666_v2  ;;  %v17319_v55 = vpack.c.bf16 %v9666_v2, %v9665_v16  ;;  %v15074_v16 = vld [vmem:[%s17023_s23 + $0x208] sm:$0xff]   ;;  %v9738_v63 = vpack.c.bf16 %v17315_v4, %v17301_v59 }
 0x45e   : > { %v9731_v57 = vld [vmem:[#allocation3 + $0x122] sm:$0xff] }
 0x461   : > { %10566 = vmatmul.mubr.bf16.gmra.mrb[28].mxu0 %v17290_v51 }
 0x462   : > { %10663 = vmatmul.mubr.bf16.gmra.mrb[28].mxu1 %v17294_v3  ;;  %10573 = vmatprep.mubr.bf16.mxu0 %v17261_v15 }
 0x463   : > { %10670 = vmatprep.mubr.bf16.mxu1 %v9674_v32  ;;  %v17317_v32 = vld [vmem:[#allocation3 + $0x112] sm:$0xff] }
 0x464   : > { %v17323_v5 = vpack.c.bf16 %v17317_v32, %v17315_v4 }
 0x469   : > { %10574 = vmatmul.mubr.bf16.gmra.mrb[32].mxu0 %v17305_v17 }
 0x46a   : > { %10671 = vmatmul.mubr.bf16.gmra.mrb[32].mxu1 %v17309_v8  ;;  %10581 = vmatprep.mubr.bf16.mxu0 %v17265_v19 }
 0x46b   : > { %10678 = vmatprep.mubr.bf16.mxu1 %v9675_v9  ;;  %v9733_v9 = vpack.c.bf16 %v17182_v29, %v17163_v6  ;;  %v15080_v6 = vld [vmem:[%s17023_s23 + $0x238] sm:$0xff]  }
 0x46c   : > { %v9820_v29 = vld [vmem:[#allocation3 + $0x92] sm:$0xff] }
 0x471   : > { %10582 = vmatmul.mubr.bf16.gmra.mrb[36].mxu0 %v17319_v55 }
 0x472   : > { %10679 = vmatmul.mubr.bf16.gmra.mrb[36].mxu1 %v17323_v5  ;;  %10719 = vmatprep.mubr.bf16.mxu0 %v9732_v0  ;;  %v9734_v0 = vpack.c.bf16 %v17215_v46, %v17184_v35  ;;  %v9832_v35 = vpack.c.bf16 %v9820_v29, %v9723_v23  ;;  %v15084_v46 = vld [vmem:[%s17401_s26 + $0x18] sm:$0xff]  }
 0x473   : > { %10816 = vmatprep.mubr.bf16.mxu1 %v17125_v58  ;;  %v15076_v58 = vld [vmem:[%s17023_s23 + $0x218] sm:$0xff]  }
 0x479   : > { %10720 = vmatmul.mubr.bf16.vlgmr.msra.gmra.mrb[40].mxu0 %v9700_v26  ;;  %v9788_v26 = vld [vmem:[#allocation3 + $0x91] sm:$0xff] }
 0x47a   : > { %10817 = vmatmul.mubr.bf16.vlgmr.msra.gmra.mrb[40].mxu1 %v17166_v44  ;;  %10727 = vmatprep.mubr.bf16.mxu0 %v9733_v9  ;;  %v9800_v22 = vpack.c.bf16 %v9788_v26, %v17116_v33  ;;  %v9796_v33 = vld [vmem:[#allocation3 + $0x131] sm:$0xff]  ;;  %v9772_v44 = vpack.c.bf16 %v17149_v1, %v17303_v60 }
 0x47b   : > { %10824 = vmatprep.mubr.bf16.mxu1 %v17137_v36  ;;  %14589 = vmatpush3.bf16.msra.mxu0 %v15073_v30  ;;  %v9735_v36 = vpack.c.bf16 %v9723_v23, %v17217_v42  ;;  %v15085_v42 = vld [vmem:[%s17401_s26 + $0x20] sm:$0xff]   ;;  %v15088_v30 = vld [vmem:[%s17401_s26 + $0x38] sm:$0xff]  }
 0x47c   : > { %14590 = vmatprep.subr.bf16.mxu0 %v15074_v16 }
 0x47f   : > { %14591 = vmatpush3.bf16.msra.mxu0 %v15074_v16 }
 0x480   : > { %14592 = vmatprep.subr.bf16.mxu0 %v15075_v56 }
 0x481   : > { %10728 = vmatmul.mubr.bf16.gmra.mrb[44].mxu0 %v9701_v7  ;;  %v9768_v7 = vpack.c.bf16 %v17149_v1, %v17187_v53  ;;  %v9828_v1 = vld [vmem:[#allocation3 + $0x132] sm:$0xff] }
 0x482   : > { %10825 = vmatmul.mubr.bf16.gmra.mrb[44].mxu1 %v17189_v27  ;;  %10735 = vmatprep.mubr.bf16.mxu0 %v9734_v0  ;;  %v9836_v53 = vpack.c.bf16 %v9828_v1, %v9731_v57  ;;  %v17653_v27 = vmov 0  }
 0x483   : > { %10832 = vmatprep.mubr.bf16.mxu1 %v17141_v13  ;;  %14593 = vmatpush3.bf16.msra.mxu0 %v15075_v56  ;;  %v9736_v13 = vpack.c.bf16 %v17286_v52, %v17279_v18 }
 0x484   : > { %14594 = vmatprep.subr.bf16.mxu0 %v15076_v58 }
 0x487   : > { %14595 = vmatpush3.bf16.msra.mxu0 %v15076_v58 }
 0x488   : > { %14596 = vmatprep.subr.bf16.mxu0 %v15077_v34 }
 0x489   : > { %10736 = vmatmul.mubr.bf16.gmra.mrb[48].mxu0 %v9702_v41  ;;  %v9739_v41 = vpack.c.bf16 %v9731_v57, %v17317_v32 }
 0x48a   : > { %10833 = vmatmul.mubr.bf16.gmra.mrb[48].mxu1 %v17204_v25  ;;  %10743 = vmatprep.mubr.bf16.mxu0 %v9735_v36  ;;  %v15083_v25 = vld [vmem:[%s17401_s26 + $0x10] sm:$0xff]  }
 0x48b   : > { %10840 = vmatprep.mubr.bf16.mxu1 %v9800_v22  ;;  %14597 = vmatpush3.bf16.msra.mxu0 %v15077_v34 }
 0x48c   : > { %14598 = vmatprep.subr.bf16.mxu0 %v15078_v54 }
 0x48f   : > { %14599 = vmatpush3.bf16.msra.mxu0 %v15078_v54 }
 0x490   : > { %14600 = vmatprep.subr.bf16.mxu0 %v15079_v39 }
 0x491   : > { %10744 = vmatmul.mubr.bf16.gmra.mrb[52].mxu0 %v9703_v21  ;;  %v9804_v21 = vpack.c.bf16 %v9796_v33, %v17235_v38 }
 0x492   : > { %10841 = vmatmul.mubr.bf16.gmra.mrb[52].mxu1 %v9768_v7  ;;  %10751 = vmatprep.mubr.bf16.mxu0 %v9736_v13 }
 0x493   : > { %10848 = vmatprep.mubr.bf16.mxu1 %v17247_v43  ;;  %14601 = vmatpush3.bf16.msra.mxu0 %v15079_v39 }
 0x494   : > { %14602 = vmatprep.subr.bf16.mxu0 %v15080_v6 }
 0x497   : > { %14603 = vmatpush3.bf16.msra.mxu0 %v15080_v6 }
 0x499   : > { %10752 = vmatmul.mubr.bf16.gmra.mrb[56].mxu0 %v9704_v50 }
 0x49a   : > { %10849 = vmatmul.mubr.bf16.gmra.mrb[56].mxu1 %v17290_v51  ;;  %10759 = vmatprep.mubr.bf16.mxu0 %v9737_v11 }
 0x49b   : > { %10856 = vmatprep.mubr.bf16.mxu1 %v17261_v15 }
 0x4a1   : > { %10760 = vmatmul.mubr.bf16.gmra.mrb[60].mxu0 %v9705_v48 }
 0x4a2   : > { %10857 = vmatmul.mubr.bf16.gmra.mrb[60].mxu1 %v17305_v17  ;;  %10767 = vmatprep.mubr.bf16.mxu0 %v9738_v63 }
 0x4a3   : > { %10864 = vmatprep.mubr.bf16.mxu1 %v17265_v19 }
 0x4a9   : > { %10768 = vmatmul.mubr.bf16.gmra.mrb[64].mxu0 %v9706_v40 }
 0x4aa   : > { %10865 = vmatmul.mubr.bf16.gmra.mrb[64].mxu1 %v17319_v55  ;;  %10775 = vmatprep.mubr.bf16.mxu0 %v9739_v41 }
 0x4ab   : > { %10872 = vmatprep.mubr.bf16.mxu1 %v9804_v21 }
 0x4b1   : > { %10776 = vmatmul.mubr.bf16.gmra.mrb[68].mxu0 %v9707_v61 }
 0x4b2   : > { %10873 = vmatmul.mubr.bf16.gmra.mrb[68].mxu1 %v9772_v44  ;;  %14604 = vmatprep.mubr.bf16.mxu0 %v17171_v14  ;;  %v15081_v14 = vld [vmem:[%s17401_s26] sm:$0xff]  }
 0x4b3   : > { %14620 = vmatprep.subr.bf16.mxu1 %v15081_v14 }
 0x4b4   : > { %14621 = vmatpush3.bf16.msra.mxu1 %v15081_v14 }
 0x4b9   : > { %14605 = vmatmul.mubr.bf16.vlgmr.msra.gmra.mrb[72].mxu0 %v17193_v47  ;;  %v15082_v47 = vld [vmem:[%s17401_s26 + $0x8] sm:$0xff]  }
 0x4ba   : > { %14608 = vmatprep.mubr.bf16.mxu0 %v17243_v49  ;;  %14622 = vmatprep.subr.bf16.mxu1 %v15082_v47 }
 0x4bb   : > { %14623 = vmatpush3.bf16.msra.mxu1 %v15082_v47 }
 0x4bc   : > { %14624 = vmatprep.subr.bf16.mxu1 %v15083_v25 }
 0x4bf   : > { %14625 = vmatpush3.bf16.msra.mxu1 %v15083_v25 }
 0x4c0   : > { %14626 = vmatprep.subr.bf16.mxu1 %v15084_v46 }
 0x4c1   : > { %14609 = vmatmul.mubr.bf16.gmra.mrb[76].mxu0 %v9832_v35 }
 0x4c2   : > { %14612 = vmatprep.mubr.bf16.mxu0 %v17294_v3 }
 0x4c3   : > { %14627 = vmatpush3.bf16.msra.mxu1 %v15084_v46 }
 0x4c4   : > { %14628 = vmatprep.subr.bf16.mxu1 %v15085_v42 }
 0x4c7   : > { %14629 = vmatpush3.bf16.msra.mxu1 %v15085_v42 }
 0x4c8   : > { %14630 = vmatprep.subr.bf16.mxu1 %v15086_v62 }
 0x4c9   : > { %14613 = vmatmul.mubr.bf16.gmra.mrb[80].mxu0 %v17309_v8 }
 0x4ca   : > { %14616 = vmatprep.mubr.bf16.mxu0 %v17323_v5 }
 0x4cb   : > { %14631 = vmatpush3.bf16.msra.mxu1 %v15086_v62 }
 0x4cc   : > { %14632 = vmatprep.subr.bf16.mxu1 %v15087_v37 }
 0x4cf   : > { %14633 = vmatpush3.bf16.msra.mxu1 %v15087_v37 }
 0x4d0   : > { %14634 = vmatprep.subr.bf16.mxu1 %v15088_v30 }
 0x4d1   : > { %14617 = vmatmul.mubr.bf16.gmra.mrb[84].mxu0 %v9836_v53 }
 0x4d2   : > { %11295 = vmatprep.mubr.bf16.mxu0 %v17653_v27 }
 0x4d3   : > { %14635 = vmatpush3.bf16.msra.mxu1 %v15088_v30 }
 0x507   : > { %v14108_v24 = vpop.f32.mrb[8].mxu0 }
 0x508   : > { %v14172_v28 = vpop.f32.mrb[8].mxu1  ;;  %v14109_v31 = vpop.f32.mrb[9].mxu0 }
 0x509   : > { %v14110_v10 = vadd.f32 %v14109_v31, %v14108_v24  ;;  %v14173_v12 = vpop.f32.mrb[9].mxu1  ;;  %v14111_v38 = vpop.f32.mrb[10].mxu0 }
 0x50a   : > { %v14174_v49 = vadd.f32 %v14173_v12, %v14172_v28  ;;  %v14175_v43 = vpop.f32.mrb[10].mxu1  ;;  %v14112_v50 = vpop.f32.mrb[11].mxu0 }
 0x50b   : > { %v14113_v48 = vadd.f32 %v14112_v50, %v14111_v38  ;;  %v14176_v15 = vpop.f32.mrb[11].mxu1 }
 0x50c   : > { %v17410_v19 = vadd.f32 %v14174_v49, %v14110_v10  ;;  %v14177_v40 = vadd.f32 %v14176_v15, %v14175_v43 }
 0x50e   : > { %v17412_v61 = vadd.f32 %v14177_v40, %v14113_v48 }
 0x50f   : > { %v14114_v18 = vpop.f32.mrb[12].mxu0 }
 0x510   : > { %v14178_v52 = vpop.f32.mrb[12].mxu1  ;;  %v14115_v20 = vpop.f32.mrb[13].mxu0 }
 0x511   : > { %v14116_v51 = vadd.f32 %v14115_v20, %v14114_v18  ;;  %v14179_v3 = vpop.f32.mrb[13].mxu1  ;;  %v14117_v45 = vpop.f32.mrb[14].mxu0 }
 0x512   : > { %v14180_v59 = vadd.f32 %v14179_v3, %v14178_v52  ;;  %v14181_v2 = vpop.f32.mrb[14].mxu1  ;;  %v14118_v60 = vpop.f32.mrb[15].mxu0 }
 0x513   : > { %v14119_v17 = vadd.f32 %v14118_v60, %v14117_v45  ;;  %v14182_v8 = vpop.f32.mrb[15].mxu1 }
 0x514   : > { %v17415_v4 = vadd.f32 %v14180_v59, %v14116_v51  ;;  %v14183_v32 = vadd.f32 %v14182_v8, %v14181_v2 }
 0x516   : > { %v17417_v55 = vadd.f32 %v14183_v32, %v14119_v17 }
 0x517   : > { %v14120_v5 = vpop.f32.mrb[16].mxu0 }
 0x518   : > { %v14184_v9 = vpop.f32.mrb[16].mxu1  ;;  %v14121_v16 = vpop.f32.mrb[17].mxu0 }
 0x519   : > { %v14122_v56 = vadd.f32 %v14121_v16, %v14120_v5  ;;  %v14185_v0 = vpop.f32.mrb[17].mxu1  ;;  %v14123_v58 = vpop.f32.mrb[18].mxu0 }
 0x51a   : > { %v14186_v34 = vadd.f32 %v14185_v0, %v14184_v9  ;;  %v14187_v23 = vpop.f32.mrb[18].mxu1  ;;  %v14124_v26 = vpop.f32.mrb[19].mxu0 }
 0x51b   : > { %v14125_v36 = vadd.f32 %v14124_v26, %v14123_v58  ;;  %v14188_v54 = vpop.f32.mrb[19].mxu1 }
 0x51c   : > { %v17419_v22 = vadd.f32 %v14186_v34, %v14122_v56  ;;  %v14189_v39 = vadd.f32 %v14188_v54, %v14187_v23 }
 0x51e   : > { %v17421_v7 = vadd.f32 %v14189_v39, %v14125_v36 }
 0x520   : > { %v14126_v13 = vpop.f32.mrb[20].mxu0 }
 0x521   : > { %v14127_v11 = vpop.f32.mrb[21].mxu0 }
 0x522   : > { %v14128_v63 = vadd.f32 %v14127_v11, %v14126_v13  ;;  %v14129_v33 = vpop.f32.mrb[22].mxu0 }
 0x523   : > { %v14130_v44 = vpop.f32.mrb[23].mxu0 }
 0x524   : > { %v14190_v6 = vpop.f32.mrb[20].mxu1  ;;  %v14131_v29 = vadd.f32 %v14130_v44, %v14129_v33 }
 0x525   : > { %v14191_v57 = vpop.f32.mrb[21].mxu1 }
 0x526   : > { %v14192_v41 = vadd.f32 %v14191_v57, %v14190_v6  ;;  %v14193_v21 = vpop.f32.mrb[22].mxu1 }
 0x527   : > { %v14194_v35 = vpop.f32.mrb[23].mxu1 }
 0x528   : > { %v17423_v1 = vadd.f32 %v14192_v41, %v14128_v63  ;;  %v14195_v53 = vadd.f32 %v14194_v35, %v14193_v21 }
 0x52a   : > { %v17425_v14 = vadd.f32 %v14195_v53, %v14131_v29 }
 0x52c   : > { %v14132_v47 = vpop.f32.mrb[24].mxu0 }
 0x52d   : > { %v14196_v25 = vpop.f32.mrb[24].mxu1  ;;  %v14133_v46 = vpop.f32.mrb[25].mxu0 }
 0x52e   : > { %v14134_v42 = vadd.f32 %v14133_v46, %v14132_v47  ;;  %v14197_v62 = vpop.f32.mrb[25].mxu1  ;;  %v14135_v37 = vpop.f32.mrb[26].mxu0 }
 0x52f   : > { %v14198_v24 = vadd.f32 %v14197_v62, %v14196_v25  ;;  %v14199_v28 = vpop.f32.mrb[26].mxu1  ;;  %v14136_v31 = vpop.f32.mrb[27].mxu0 }
 0x530   : > { %v14137_v10 = vadd.f32 %v14136_v31, %v14135_v37  ;;  %v14200_v12 = vpop.f32.mrb[27].mxu1 }
 0x531   : > { %v17427_v38 = vadd.f32 %v14198_v24, %v14134_v42  ;;  %v14201_v49 = vadd.f32 %v14200_v12, %v14199_v28 }
 0x533   : > { %v17429_v43 = vadd.f32 %v14201_v49, %v14137_v10 }
 0x534   : > { %v14138_v50 = vpop.f32.mrb[28].mxu0 }
 0x535   : > { %v14202_v48 = vpop.f32.mrb[28].mxu1  ;;  %v14139_v15 = vpop.f32.mrb[29].mxu0 }
 0x536   : > { %v14140_v40 = vadd.f32 %v14139_v15, %v14138_v50  ;;  %v14203_v18 = vpop.f32.mrb[29].mxu1  ;;  %v14141_v30 = vpop.f32.mrb[30].mxu0 }
 0x537   : > { %v14204_v52 = vadd.f32 %v14203_v18, %v14202_v48  ;;  %v14205_v20 = vpop.f32.mrb[30].mxu1  ;;  %v14142_v51 = vpop.f32.mrb[31].mxu0 }
 0x538   : > { %v14143_v3 = vadd.f32 %v14142_v51, %v14141_v30  ;;  %v14206_v45 = vpop.f32.mrb[31].mxu1 }
 0x539   : > { %v17431_v59 = vadd.f32 %v14204_v52, %v14140_v40  ;;  %v14207_v2 = vadd.f32 %v14206_v45, %v14205_v20 }
 0x53b   : > { %v17433_v60 = vadd.f32 %v14207_v2, %v14143_v3 }
 0x53c   : > { %v14144_v17 = vpop.f32.mrb[32].mxu0 }
 0x53d   : > { %v14208_v8 = vpop.f32.mrb[32].mxu1  ;;  %v14145_v32 = vpop.f32.mrb[33].mxu0 }
 0x53e   : > { %v14146_v5 = vadd.f32 %v14145_v32, %v14144_v17  ;;  %v14209_v9 = vpop.f32.mrb[33].mxu1  ;;  %v14147_v16 = vpop.f32.mrb[34].mxu0 }
 0x53f   : > { %v14210_v56 = vadd.f32 %v14209_v9, %v14208_v8  ;;  %v14211_v0 = vpop.f32.mrb[34].mxu1  ;;  %v14148_v58 = vpop.f32.mrb[35].mxu0 }
 0x540   : > { %v14149_v34 = vadd.f32 %v14148_v58, %v14147_v16  ;;  %v14212_v23 = vpop.f32.mrb[35].mxu1 }
 0x541   : > { %v17435_v26 = vadd.f32 %v14210_v56, %v14146_v5  ;;  %v14213_v36 = vadd.f32 %v14212_v23, %v14211_v0 }
 0x543   : > { %v17437_v54 = vadd.f32 %v14213_v36, %v14149_v34 }
 0x544   : > { %v14150_v39 = vpop.f32.mrb[36].mxu0 }
 0x545   : > { %v14214_v13 = vpop.f32.mrb[36].mxu1  ;;  %v14151_v6 = vpop.f32.mrb[37].mxu0 }
 0x546   : > { %v14152_v11 = vadd.f32 %v14151_v6, %v14150_v39  ;;  %v14215_v63 = vpop.f32.mrb[37].mxu1  ;;  %v14153_v57 = vpop.f32.mrb[38].mxu0 }
 0x547   : > { %v14216_v33 = vadd.f32 %v14215_v63, %v14214_v13  ;;  %v14217_v41 = vpop.f32.mrb[38].mxu1  ;;  %v14154_v21 = vpop.f32.mrb[39].mxu0 }
 0x548   : > { %v14155_v44 = vadd.f32 %v14154_v21, %v14153_v57  ;;  %v14218_v29 = vpop.f32.mrb[39].mxu1 }
 0x549   : > { %v17439_v35 = vadd.f32 %v14216_v33, %v14152_v11  ;;  %v14219_v53 = vadd.f32 %v14218_v29, %v14217_v41 }
 0x54b   : > { %v17441_v47 = vadd.f32 %v14219_v53, %v14155_v44 }
 0x54c   : > { %v14236_v25 = vpop.f32.mrb[40].mxu0 }
 0x54d   : > { %v14300_v46 = vpop.f32.mrb[40].mxu1  ;;  %v14237_v42 = vpop.f32.mrb[41].mxu0 }
 0x54e   : > { %v14238_v62 = vadd.f32 %v14237_v42, %v14236_v25  ;;  %v14301_v37 = vpop.f32.mrb[41].mxu1  ;;  %v14239_v24 = vpop.f32.mrb[42].mxu0 }
 0x54f   : > { %v14302_v28 = vadd.f32 %v14301_v37, %v14300_v46  ;;  %v14303_v31 = vpop.f32.mrb[42].mxu1  ;;  %v14240_v10 = vpop.f32.mrb[43].mxu0 }
 0x550   : > { %v10722_v12 = vadd.f32 %v14238_v62, %v17410_v19  ;;  %v14241_v49 = vadd.f32 %v14240_v10, %v14239_v24  ;;  %v14304_v50 = vpop.f32.mrb[43].mxu1 }
 0x551   : > { %v14305_v48 = vadd.f32 %v14304_v50, %v14303_v31 }
 0x552   : > { %v10725_v15 = vadd.f32 %v14241_v49, %v17412_v61  ;;  %v17445_v40 = vadd.f32 %v14302_v28, %v10722_v12 }
 0x554   : > { %v14242_v18 = vpop.f32.mrb[44].mxu0  ;;  %v17447_v30 = vadd.f32 %v14305_v48, %v10725_v15 }
 0x555   : > { %v14306_v52 = vpop.f32.mrb[44].mxu1  ;;  %v14243_v20 = vpop.f32.mrb[45].mxu0 }
 0x556   : > { %v14244_v51 = vadd.f32 %v14243_v20, %v14242_v18  ;;  %v14307_v3 = vpop.f32.mrb[45].mxu1  ;;  %v14245_v45 = vpop.f32.mrb[46].mxu0 }
 0x557   : > { %v14308_v2 = vadd.f32 %v14307_v3, %v14306_v52  ;;  %v14309_v17 = vpop.f32.mrb[46].mxu1  ;;  %v14246_v8 = vpop.f32.mrb[47].mxu0 }
 0x558   : > { %v10730_v19 = vadd.f32 %v14244_v51, %v17415_v4  ;;  %v14247_v32 = vadd.f32 %v14246_v8, %v14245_v45  ;;  %v14310_v5 = vpop.f32.mrb[47].mxu1 }
 0x559   : > { %v14311_v9 = vadd.f32 %v14310_v5, %v14309_v17 }
 0x55a   : > { %v10733_v61 = vadd.f32 %v14247_v32, %v17417_v55  ;;  %v17451_v16 = vadd.f32 %v14308_v2, %v10730_v19 }
 0x55c   : > { %v14248_v56 = vpop.f32.mrb[48].mxu0  ;;  %v17453_v0 = vadd.f32 %v14311_v9, %v10733_v61 }
 0x55d   : > { %v14312_v58 = vpop.f32.mrb[48].mxu1  ;;  %v14249_v34 = vpop.f32.mrb[49].mxu0 }
 0x55e   : > { %v14250_v23 = vadd.f32 %v14249_v34, %v14248_v56  ;;  %v14313_v36 = vpop.f32.mrb[49].mxu1  ;;  %v14251_v39 = vpop.f32.mrb[50].mxu0 }
 0x55f   : > { %v14314_v13 = vadd.f32 %v14313_v36, %v14312_v58  ;;  %v14315_v6 = vpop.f32.mrb[50].mxu1  ;;  %v14252_v11 = vpop.f32.mrb[51].mxu0 }
 0x560   : > { %v10738_v4 = vadd.f32 %v14250_v23, %v17419_v22  ;;  %v14253_v63 = vadd.f32 %v14252_v11, %v14251_v39  ;;  %v14316_v57 = vpop.f32.mrb[51].mxu1 }
 0x561   : > { %v14317_v33 = vadd.f32 %v14316_v57, %v14315_v6 }
 0x562   : > { %v10741_v55 = vadd.f32 %v14253_v63, %v17421_v7  ;;  %v17457_v41 = vadd.f32 %v14314_v13, %v10738_v4 }
 0x564   : > { %v14254_v21 = vpop.f32.mrb[52].mxu0  ;;  %v17459_v44 = vadd.f32 %v14317_v33, %v10741_v55 }
 0x565   : > { %v14318_v29 = vpop.f32.mrb[52].mxu1  ;;  %v14255_v53 = vpop.f32.mrb[53].mxu0 }
 0x566   : > { %v14256_v25 = vadd.f32 %v14255_v53, %v14254_v21  ;;  %v14319_v46 = vpop.f32.mrb[53].mxu1  ;;  %v14257_v42 = vpop.f32.mrb[54].mxu0 }
 0x567   : > { %v14320_v62 = vadd.f32 %v14319_v46, %v14318_v29  ;;  %v14321_v37 = vpop.f32.mrb[54].mxu1  ;;  %v14258_v24 = vpop.f32.mrb[55].mxu0 }
 0x568   : > { %v10746_v22 = vadd.f32 %v14256_v25, %v17423_v1  ;;  %v14259_v28 = vadd.f32 %v14258_v24, %v14257_v42  ;;  %v14322_v31 = vpop.f32.mrb[55].mxu1 }
 0x569   : > { %v14323_v10 = vadd.f32 %v14322_v31, %v14321_v37 }
 0x56a   : > { %v10749_v7 = vadd.f32 %v14259_v28, %v17425_v14  ;;  %v17463_v12 = vadd.f32 %v14320_v62, %v10746_v22 }
 0x56c   : > { %v14260_v49 = vpop.f32.mrb[56].mxu0  ;;  %v17465_v50 = vadd.f32 %v14323_v10, %v10749_v7 }
 0x56d   : > { %v14324_v48 = vpop.f32.mrb[56].mxu1  ;;  %v14261_v15 = vpop.f32.mrb[57].mxu0 }
 0x56e   : > { %v14262_v18 = vadd.f32 %v14261_v15, %v14260_v49  ;;  %v14325_v52 = vpop.f32.mrb[57].mxu1  ;;  %v14263_v20 = vpop.f32.mrb[58].mxu0 }
 0x56f   : > { %v14326_v51 = vadd.f32 %v14325_v52, %v14324_v48  ;;  %v14327_v3 = vpop.f32.mrb[58].mxu1  ;;  %v14264_v45 = vpop.f32.mrb[59].mxu0 }
 0x570   : > { %v10754_v1 = vadd.f32 %v14262_v18, %v17427_v38  ;;  %v14265_v2 = vadd.f32 %v14264_v45, %v14263_v20  ;;  %v14328_v17 = vpop.f32.mrb[59].mxu1 }
 0x571   : > { %v14329_v8 = vadd.f32 %v14328_v17, %v14327_v3 }
 0x572   : > { %v10757_v14 = vadd.f32 %v14265_v2, %v17429_v43  ;;  %v17469_v19 = vadd.f32 %v14326_v51, %v10754_v1 }
 0x574   : > { %v14266_v32 = vpop.f32.mrb[60].mxu0  ;;  %v17471_v5 = vadd.f32 %v14329_v8, %v10757_v14 }
 0x575   : > { %v14330_v9 = vpop.f32.mrb[60].mxu1  ;;  %v14267_v61 = vpop.f32.mrb[61].mxu0 }
 0x576   : > { %v14268_v56 = vadd.f32 %v14267_v61, %v14266_v32  ;;  %v14331_v58 = vpop.f32.mrb[61].mxu1  ;;  %v14269_v34 = vpop.f32.mrb[62].mxu0 }
 0x577   : > { %v14332_v23 = vadd.f32 %v14331_v58, %v14330_v9  ;;  %v14333_v36 = vpop.f32.mrb[62].mxu1  ;;  %v14270_v39 = vpop.f32.mrb[63].mxu0 }
 0x578   : > { %v10762_v38 = vadd.f32 %v14268_v56, %v17431_v59  ;;  %v14271_v13 = vadd.f32 %v14270_v39, %v14269_v34  ;;  %v14334_v6 = vpop.f32.mrb[63].mxu1 }
 0x579   : > { %v14335_v11 = vadd.f32 %v14334_v6, %v14333_v36 }
 0x57a   : > { %v10765_v43 = vadd.f32 %v14271_v13, %v17433_v60  ;;  %v17475_v4 = vadd.f32 %v14332_v23, %v10762_v38 }
 0x57c   : > { %v14272_v63 = vpop.f32.mrb[64].mxu0  ;;  %v17477_v57 = vadd.f32 %v14335_v11, %v10765_v43 }
 0x57d   : > { %v14336_v33 = vpop.f32.mrb[64].mxu1  ;;  %v14273_v55 = vpop.f32.mrb[65].mxu0 }
 0x57e   : > { %v14274_v21 = vadd.f32 %v14273_v55, %v14272_v63  ;;  %v14337_v29 = vpop.f32.mrb[65].mxu1  ;;  %v14275_v53 = vpop.f32.mrb[66].mxu0 }
 0x57f   : > { %v14338_v25 = vadd.f32 %v14337_v29, %v14336_v33  ;;  %v14339_v46 = vpop.f32.mrb[66].mxu1  ;;  %v14276_v42 = vpop.f32.mrb[67].mxu0 }
 0x580   : > { %v10770_v59 = vadd.f32 %v14274_v21, %v17435_v26  ;;  %v14277_v62 = vadd.f32 %v14276_v42, %v14275_v53  ;;  %v14340_v37 = vpop.f32.mrb[67].mxu1 }
 0x581   : > { %v14341_v24 = vadd.f32 %v14340_v37, %v14339_v46 }
 0x582   : > { %v10773_v60 = vadd.f32 %v14277_v62, %v17437_v54  ;;  %v17481_v22 = vadd.f32 %v14338_v25, %v10770_v59 }
 0x584   : > { %v14278_v28 = vpop.f32.mrb[68].mxu0  ;;  %v17483_v31 = vadd.f32 %v14341_v24, %v10773_v60 }
 0x585   : > { %v14342_v10 = vpop.f32.mrb[68].mxu1  ;;  %v14279_v7 = vpop.f32.mrb[69].mxu0 }
 0x586   : > { %v14280_v49 = vadd.f32 %v14279_v7, %v14278_v28  ;;  %v14343_v48 = vpop.f32.mrb[69].mxu1  ;;  %v14281_v15 = vpop.f32.mrb[70].mxu0 }
 0x587   : > { %v14344_v18 = vadd.f32 %v14343_v48, %v14342_v10  ;;  %v14345_v52 = vpop.f32.mrb[70].mxu1  ;;  %v14282_v20 = vpop.f32.mrb[71].mxu0 }
 0x588   : > { %v10778_v26 = vadd.f32 %v14280_v49, %v17439_v35  ;;  %v14283_v51 = vadd.f32 %v14282_v20, %v14281_v15  ;;  %v14346_v3 = vpop.f32.mrb[71].mxu1 }
 0x589   : > { %v14347_v45 = vadd.f32 %v14346_v3, %v14345_v52  ;;  %v15091_v3 = vld [vmem:[%s17642_s9 + $0x4] ss:$8 sps:$4 sm:$0xff]  }
 0x58a   : > { %v10781_v54 = vadd.f32 %v14283_v51, %v17441_v47  ;;  %v10875_v1 = vadd.f32 %v14344_v18, %v10778_v26  ;;  %11263 = vmatprep.subr.bf16.mxu0 %v15091_v3  ;;  %11452 = vmatprep.subr.bf16.mxu1 %v15091_v3 }
 0x58c   : > { %v14606_v2 = vpop.f32.mrb[72].mxu0  ;;  %v10878_v17 = vadd.f32 %v14347_v45, %v10781_v54  ;;  %v15092_v45 = vld [vmem:[%s17642_s9 + $0x10] ss:$8 sps:$4 sm:$0xff]   ;;  %v15097_v54 = vld [vmem:[%s17642_s9 + $0x24] ss:$8 sps:$4 sm:$0xff]  }
 0x58d   : > { %v10924_v8 = vadd.f32 %v14606_v2, %v17451_v16  ;;  %v10915_v14 = vpop.f32.mrb[73].mxu0  ;;  %v15100_v2 = vld [vmem:[%s17642_s9 + $0x34] ss:$8 sps:$4 sm:$0xff]  }
 0x58e   : > { %v10916_v32 = vadd.f32 %v10915_v14, %v17445_v40  ;;  %v14607_v9 = vpop.f32.mrb[74].mxu0  ;;  %v12983_v14 = vld [vmem:[%s508_s16] ss:$0 sm:$0xff] }
 0x58f   : > { %v10927_v61 = vadd.f32 %v14607_v9, %v17453_v0  ;;  %v10918_v56 = vpop.f32.mrb[75].mxu0  ;;  %v10980_v35 = vmax.f32 %v10924_v8, 0.0 }
 0x590   : > { %v10919_v58 = vadd.f32 %v10918_v56, %v17447_v30  ;;  %v10978_v23 = vmax.f32 %v10916_v32, 0.0 }
 0x591   : > { %v10981_v34 = vmax.f32 %v10927_v61, 0.0 }
 0x592   : > { %v10979_v36 = vmax.f32 %v10919_v58, 0.0 }
 0x593   : > { %v10995_v39 = vpack.c.bf16 %v10981_v34, %v10980_v35 }
 0x594   : > { %v10994_v47 = vpack.c.bf16 %v10979_v36, %v10978_v23  ;;  %v14610_v38 = vpop.f32.mrb[76].mxu0 }
 0x595   : > { %v10940_v13 = vadd.f32 %v14610_v38, %v17463_v12  ;;  %v10931_v6 = vpop.f32.mrb[77].mxu0 }
 0x596   : > { %v10932_v16 = vadd.f32 %v10931_v6, %v17457_v41  ;;  %v14611_v11 = vpop.f32.mrb[78].mxu0  ;;  %14636 = vmatprep.mubr.bf16.mxu1 %v10994_v47 }
 0x597   : > { %v10943_v40 = vadd.f32 %v14611_v11, %v17465_v50  ;;  %v10934_v0 = vpop.f32.mrb[79].mxu0  ;;  %14637 = vmatmul.mubr.bf16.vlgmr.msra.gmra.mrb[72].mxu1 %v10995_v39  ;;  %v10984_v43 = vmax.f32 %v10940_v13, 0.0 }
 0x598   : > { %v10935_v30 = vadd.f32 %v10934_v0, %v17459_v44  ;;  %v10982_v33 = vmax.f32 %v10932_v16, 0.0 }
 0x599   : > { %v10985_v63 = vmax.f32 %v10943_v40, 0.0 }
 0x59a   : > { %v10983_v55 = vmax.f32 %v10935_v30, 0.0 }
 0x59b   : > { %v10997_v21 = vpack.c.bf16 %v10985_v63, %v10984_v43 }
 0x59c   : > { %v10996_v29 = vpack.c.bf16 %v10983_v55, %v10982_v33  ;;  %v14614_v53 = vpop.f32.mrb[80].mxu0 }
 0x59d   : > { %v10956_v12 = vadd.f32 %v14614_v53, %v17475_v4  ;;  %v10947_v25 = vpop.f32.mrb[81].mxu0 }
 0x59e   : > { %v10948_v41 = vadd.f32 %v10947_v25, %v17469_v19  ;;  %v14615_v46 = vpop.f32.mrb[82].mxu0  ;;  %14640 = vmatprep.mubr.bf16.mxu1 %v10996_v29 }
 0x59f   : > { %v10959_v50 = vadd.f32 %v14615_v46, %v17477_v57  ;;  %v10950_v42 = vpop.f32.mrb[83].mxu0  ;;  %14641 = vmatmul.mubr.bf16.gmra.mrb[76].mxu1 %v10997_v21  ;;  %v10988_v59 = vmax.f32 %v10956_v12, 0.0 }
 0x5a0   : > { %v10951_v44 = vadd.f32 %v10950_v42, %v17471_v5  ;;  %v10986_v37 = vmax.f32 %v10948_v41, 0.0 }
 0x5a1   : > { %v10989_v62 = vmax.f32 %v10959_v50, 0.0 }
 0x5a2   : > { %v10987_v24 = vmax.f32 %v10951_v44, 0.0 }
 0x5a3   : > { %v10999_v60 = vpack.c.bf16 %v10989_v62, %v10988_v59 }
 0x5a4   : > { %v10998_v28 = vpack.c.bf16 %v10987_v24, %v10986_v37  ;;  %v14618_v10 = vpop.f32.mrb[84].mxu0 }
 0x5a5   : > { %v10972_v7 = vadd.f32 %v14618_v10, %v10875_v1  ;;  %v10963_v4 = vpop.f32.mrb[85].mxu0  ;;  %v15095_v1 = vld [vmem:[%s17642_s9 + $0x20] ss:$8 sps:$4 sm:$0xff]  }
 0x5a6   : > { %v10964_v49 = vadd.f32 %v10963_v4, %v17481_v22  ;;  %v14619_v19 = vpop.f32.mrb[86].mxu0  ;;  %14644 = vmatprep.mubr.bf16.mxu1 %v10998_v28  ;;  %v15089_v22 = vld [vmem:[%s17642_s9] ss:$8 sps:$4 sm:$0xff]  }
 0x5a7   : > { %v10975_v48 = vadd.f32 %v14619_v19, %v10878_v17  ;;  %v10966_v15 = vpop.f32.mrb[87].mxu0  ;;  %14645 = vmatmul.mubr.bf16.gmra.mrb[80].mxu1 %v10999_v60  ;;  %v10992_v18 = vmax.f32 %v10972_v7, 0.0  ;;  %11264 = vmatpush1.bf16.msra.mxu0 %v15089_v22  ;;  %v15098_v17 = vld [vmem:[%s17642_s9 + $0x30] ss:$8 sps:$4 sm:$0xff]  }
 0x5a8   : > { %v10967_v57 = vadd.f32 %v10966_v15, %v17483_v31  ;;  %v10990_v52 = vmax.f32 %v10964_v49, 0.0  ;;  %v15094_v31 = vld [vmem:[%s17642_s9 + $0x14] ss:$8 sps:$4 sm:$0xff]   ;;  %11453 = vmatpush1.bf16.msra.mxu1 %v15089_v22 }
 0x5a9   : > { %v10993_v5 = vmax.f32 %v10975_v48, 0.0  ;;  %11265 = vmatprep.subr.bf16.mxu0 %v15094_v31  ;;  %11454 = vmatprep.subr.bf16.mxu1 %v15094_v31 }
 0x5aa   : > { %v10991_v20 = vmax.f32 %v10967_v57, 0.0 }
 0x5ab   : > { %v11001_v26 = vpack.c.bf16 %v10993_v5, %v10992_v18  ;;  %11266 = vmatpush1.bf16.msra.mxu0 %v15092_v45 }
 0x5ac   : > { %v11000_v51 = vpack.c.bf16 %v10991_v20, %v10990_v52  ;;  %11455 = vmatpush1.bf16.msra.mxu1 %v15092_v45  ;;  %11267 = vmatprep.subr.bf16.mxu0 %v15097_v54 }
 0x5ad   : > { %11456 = vmatprep.subr.bf16.mxu1 %v15097_v54 }
 0x5ae   : > { %14648 = vmatprep.mubr.bf16.mxu1 %v11000_v51 }
 0x5af   : > { %14649 = vmatmul.mubr.bf16.gmra.mrb[84].mxu1 %v11001_v26  ;;  %11268 = vmatpush1.bf16.msra.mxu0 %v15095_v1 }
 0x5b0   : > { %11484 = vmatprep.mubr.bf16.mxu1 %v17653_v27  ;;  %11457 = vmatpush1.bf16.msra.mxu1 %v15095_v1 }
 0x5b1   : > { %11269 = vmatprep.subr.bf16.mxu0 %v15100_v2  ;;  %11458 = vmatprep.subr.bf16.mxu1 %v15100_v2 }
 0x5b3   : > { %11270 = vmatpush1.bf16.msra.mxu0 %v15098_v17 }
 0x5b4   : > { %11459 = vmatpush1.bf16.msra.mxu1 %v15098_v17 }
 0x66a   : > { %v14638_v8 = vpop.f32.mrb[72].mxu1 }
 0x66b   : > { %v11107_v32 = vpop.f32.mrb[73].mxu1  ;;  %v11116_v61 = vadd.f32 %v14638_v8, %v12983_v14 }
 0x66c   : > { %v14639_v9 = vpop.f32.mrb[74].mxu1  ;;  %v11108_v35 = vadd.f32 %v12983_v14, %v11107_v32 }
 0x66d   : > { %v11119_v56 = vadd.f32 %v14639_v9, %v12983_v14  ;;  %v11110_v58 = vpop.f32.mrb[75].mxu1 }
 0x66e   : > { %v11111_v34 = vadd.f32 %v12983_v14, %v11110_v58 }
 0x66f   : > { %v11179_v23 = vpack.c.bf16 %v11119_v56, %v11116_v61 }
 0x670   : > { %v11178_v36 = vpack.c.bf16 %v11111_v34, %v11108_v35 }
 0x672   : > { %v14642_v39 = vpop.f32.mrb[76].mxu1  ;;  %11182 = vxpose.xlu0.c.b16.start [1/4] (short) %v11178_v36, 128 }
 0x673   : > { %v11123_v47 = vpop.f32.mrb[77].mxu1  ;;  %v11132_v13 = vadd.f32 %v14642_v39, %v12983_v14 }
 0x674   : > { %v14643_v38 = vpop.f32.mrb[78].mxu1  ;;  %v11124_v11 = vadd.f32 %v12983_v14, %v11123_v47 }
 0x675   : > { %v11135_v6 = vadd.f32 %v14643_v38, %v12983_v14  ;;  %v11126_v16 = vpop.f32.mrb[79].mxu1 }
 0x676   : > { %v11127_v40 = vadd.f32 %v12983_v14, %v11126_v16  ;;  %11183 = vxpose.xlu0.c.b16.cont [2/4] (short) %v11179_v23, 128 }
 0x677   : > { %v11181_v0 = vpack.c.bf16 %v11135_v6, %v11132_v13 }
 0x678   : > { %v11180_v30 = vpack.c.bf16 %v11127_v40, %v11124_v11 }
 0x67a   : > { %v14646_v43 = vpop.f32.mrb[80].mxu1  ;;  %11184 = vxpose.xlu0.c.b16.cont [3/4] (short) %v11180_v30, 128 }
 0x67b   : > { %v11139_v63 = vpop.f32.mrb[81].mxu1  ;;  %v11148_v55 = vadd.f32 %v14646_v43, %v12983_v14 }
 0x67c   : > { %v14647_v33 = vpop.f32.mrb[82].mxu1  ;;  %v11140_v53 = vadd.f32 %v12983_v14, %v11139_v63 }
 0x67d   : > { %v11151_v21 = vadd.f32 %v14647_v33, %v12983_v14  ;;  %v11142_v29 = vpop.f32.mrb[83].mxu1 }
 0x67e   : > { %v11143_v12 = vadd.f32 %v12983_v14, %v11142_v29  ;;  %11185 = vxpose.xlu0.c.b16.end [4/4] (short) %v11181_v0, 128 }
 0x67f   : > { %v11409_v25 = vpack.c.bf16 %v11151_v21, %v11148_v55 }
 0x680   : > { %v11408_v41 = vpack.c.bf16 %v11143_v12, %v11140_v53 }
 0x682   : > { %v14650_v46 = vpop.f32.mrb[84].mxu1  ;;  %11412 = vxpose.xlu1.c.b16.start [1/4] (short) %v11408_v41, 128 }
 0x683   : > { %v11155_v50 = vpop.f32.mrb[85].mxu1  ;;  %v11164_v44 = vadd.f32 %v14650_v46, %v12983_v14 }
 0x684   : > { %v14651_v42 = vpop.f32.mrb[86].mxu1  ;;  %v11156_v37 = vadd.f32 %v12983_v14, %v11155_v50 }
 0x685   : > { %v11167_v59 = vadd.f32 %v14651_v42, %v12983_v14  ;;  %v11158_v62 = vpop.f32.mrb[87].mxu1 }
 0x686   : > { %v11159_v24 = vadd.f32 %v12983_v14, %v11158_v62  ;;  %11413 = vxpose.xlu1.c.b16.cont [2/4] (short) %v11409_v25, 128 }
 0x687   : > { %v11411_v60 = vpack.c.bf16 %v11167_v59, %v11164_v44 }
 0x688   : > { %v11410_v28 = vpack.c.bf16 %v11159_v24, %v11156_v37 }
 0x68a   : > { %11414 = vxpose.xlu1.c.b16.cont [3/4] (short) %v11410_v28, 128 }
 0x68e   : > { %11415 = vxpose.xlu1.c.b16.end [4/4] (short) %v11411_v60, 128 }
 0x6d8   : > { %v11190_v10 = vpop.trf.xlu0 }
 0x6d9   : > { %13000 = vmatmul.mubr.msk.bf16.vlgmr.msra.gmra.mrb[88].mxu0 %vm11238_vm10, %v11190_v10 }
 0x6da   : > { %11305 = vmatprep.mubr.bf16.mxu0 %v17653_v27 }
 0x6dc   : > { %v11191_v7 = vpop.trf.xlu0 }
 0x6e0   : > { %v11192_v4 = vpop.trf.xlu0 }
 0x6e1   : > { %13001 = vmatmul.mubr.msk.bf16.gmra.mrb[92].mxu0 %vm11238_vm10, %v11191_v7 }
 0x6e2   : > { %11315 = vmatprep.mubr.bf16.mxu0 %v17653_v27 }
 0x6e4   : > { %v11193_v48 = vpop.trf.xlu0 }
 0x6e8   : > { %v11420_v49 = vpop.trf.xlu1  ;;  %v11194_v57 = vpop.trf.xlu0 }
 0x6e9   : > { %13008 = vmatmul.mubr.msk.bf16.vlgmr.msra.gmra.mrb[88].mxu1 %vm11238_vm10, %v11420_v49  ;;  %13002 = vmatmul.mubr.msk.bf16.gmra.mrb[96].mxu0 %vm11238_vm10, %v11192_v4 }
 0x6ea   : > { %11494 = vmatprep.mubr.bf16.mxu1 %v17653_v27  ;;  %11325 = vmatprep.mubr.bf16.mxu0 %v17653_v27 }
 0x6ec   : > { %v11421_v19 = vpop.trf.xlu1  ;;  %v11195_v5 = vpop.trf.xlu0 }
 0x6f0   : > { %v11422_v15 = vpop.trf.xlu1  ;;  %v11196_v20 = vpop.trf.xlu0 }
 0x6f1   : > { %13009 = vmatmul.mubr.msk.bf16.gmra.mrb[92].mxu1 %vm11238_vm10, %v11421_v19  ;;  %13003 = vmatmul.mubr.msk.bf16.gmra.mrb[100].mxu0 %vm11238_vm10, %v11193_v48 }
 0x6f2   : > { %11504 = vmatprep.mubr.bf16.mxu1 %v17653_v27  ;;  %11335 = vmatprep.mubr.bf16.mxu0 %v17653_v27 }
 0x6f4   : > { %v11423_v18 = vpop.trf.xlu1  ;;  %v11197_v51 = vpop.trf.xlu0 }
 0x6f8   : > { %v11424_v52 = vpop.trf.xlu1 }
 0x6f9   : > { %13010 = vmatmul.mubr.msk.bf16.gmra.mrb[96].mxu1 %vm11238_vm10, %v11422_v15  ;;  %13004 = vmatmul.mubr.msk.bf16.gmra.mrb[104].mxu0 %vm11238_vm10, %v11194_v57 }
 0x6fa   : > { %11514 = vmatprep.mubr.bf16.mxu1 %v17653_v27  ;;  %11345 = vmatprep.mubr.bf16.mxu0 %v17653_v27 }
 0x6fc   : > { %v11425_v26 = vpop.trf.xlu1 }
 0x700   : > { %v11426_v22 = vpop.trf.xlu1 }
 0x701   : > { %13011 = vmatmul.mubr.msk.bf16.gmra.mrb[100].mxu1 %vm11238_vm10, %v11423_v18  ;;  %13005 = vmatmul.mubr.msk.bf16.gmra.mrb[108].mxu0 %vm11238_vm10, %v11195_v5 }
 0x702   : > { %11524 = vmatprep.mubr.bf16.mxu1 %v17653_v27  ;;  %11355 = vmatprep.mubr.bf16.mxu0 %v17653_v27 }
 0x704   : > { %v11427_v3 = vpop.trf.xlu1 }
 0x709   : > { %13012 = vmatmul.mubr.msk.bf16.gmra.mrb[104].mxu1 %vm11238_vm10, %v11424_v52  ;;  %13006 = vmatmul.mubr.msk.bf16.gmra.mrb[112].mxu0 %vm11238_vm10, %v11196_v20 }
 0x70a   : > { %11534 = vmatprep.mubr.bf16.mxu1 %v17653_v27  ;;  %11365 = vmatprep.mubr.bf16.mxu0 %v17653_v27 }
 0x711   : > { %13013 = vmatmul.mubr.msk.bf16.gmra.mrb[108].mxu1 %vm11238_vm10, %v11425_v26  ;;  %13007 = vmatmul.mubr.msk.bf16.gmra.mrb[116].mxu0 %vm11238_vm10, %v11197_v51 }
 0x712   : > { %11544 = vmatprep.mubr.bf16.mxu1 %v17653_v27 }
 0x719   : > { %13014 = vmatmul.mubr.msk.bf16.gmra.mrb[112].mxu1 %vm11238_vm10, %v11426_v22 }
 0x71a   : > { %11554 = vmatprep.mubr.bf16.mxu1 %v17653_v27 }
 0x721   : > { %13015 = vmatmul.mubr.msk.bf16.gmra.mrb[116].mxu1 %vm11238_vm10, %v11427_v3 }
 0x7ac   : > { %v11297_v31 = vpop.f32.mrb[88].mxu0 }
 0x7ad   : > { %11376 = vst [vmem:[%s17564_s30] sm:$0xff] %v11297_v31  ;;  %v11299_v27 = vpop.f32.mrb[89].mxu0 }
 0x7ae   : > { %11377 = vst [vmem:[%s17564_s30 + $0x8] sm:$0xff] %v11299_v27  ;;  %v11301_v45 = vpop.f32.mrb[90].mxu0 }
 0x7af   : > { %11378 = vst [vmem:[%s17564_s30 + $0x10] sm:$0xff] %v11301_v45  ;;  %v11303_v54 = vpop.f32.mrb[91].mxu0 }
 0x7b0   : > { %11379 = vst [vmem:[%s17564_s30 + $0x18] sm:$0xff] %v11303_v54 }
 0x7b4   : > { %v11307_v1 = vpop.f32.mrb[92].mxu0 }
 0x7b5   : > { %11380 = vst [vmem:[%s17564_s30 + $0x20] sm:$0xff] %v11307_v1  ;;  %v11309_v2 = vpop.f32.mrb[93].mxu0 }
 0x7b6   : > { %11381 = vst [vmem:[%s17564_s30 + $0x28] sm:$0xff] %v11309_v2  ;;  %v11311_v17 = vpop.f32.mrb[94].mxu0 }
 0x7b7   : > { %11382 = vst [vmem:[%s17564_s30 + $0x30] sm:$0xff] %v11311_v17  ;;  %v11313_v8 = vpop.f32.mrb[95].mxu0 }
 0x7b8   : > { %11383 = vst [vmem:[%s17564_s30 + $0x38] sm:$0xff] %v11313_v8 }
 0x7bc   : > { %v11486_v14 = vpop.f32.mrb[88].mxu1  ;;  %v11317_v32 = vpop.f32.mrb[96].mxu0 }
 0x7bd   : > { %13016 = vst [vmem:[%s17564_s30 + $0x100] sm:$0xff] %v11486_v14  ;;  %v11488_v9 = vpop.f32.mrb[89].mxu1  ;;  %11384 = vst [vmem:[%s17564_s30 + $0x40] sm:$0xff] %v11317_v32  ;;  %v11319_v61 = vpop.f32.mrb[97].mxu0 }
 0x7be   : > { %13017 = vst [vmem:[%s17564_s30 + $0x108] sm:$0xff] %v11488_v9  ;;  %v11490_v56 = vpop.f32.mrb[90].mxu1  ;;  %11385 = vst [vmem:[%s17564_s30 + $0x48] sm:$0xff] %v11319_v61  ;;  %v11321_v58 = vpop.f32.mrb[98].mxu0 }
 0x7bf   : > { %13018 = vst [vmem:[%s17564_s30 + $0x110] sm:$0xff] %v11490_v56  ;;  %v11492_v35 = vpop.f32.mrb[91].mxu1  ;;  %11386 = vst [vmem:[%s17564_s30 + $0x50] sm:$0xff] %v11321_v58  ;;  %v11323_v34 = vpop.f32.mrb[99].mxu0 }
 0x7c0   : > { %13019 = vst [vmem:[%s17564_s30 + $0x118] sm:$0xff] %v11492_v35  ;;  %11387 = vst [vmem:[%s17564_s30 + $0x58] sm:$0xff] %v11323_v34 }
 0x7c4   : > { %v11496_v23 = vpop.f32.mrb[92].mxu1  ;;  %v11327_v36 = vpop.f32.mrb[100].mxu0 }
 0x7c5   : > { %13020 = vst [vmem:[%s17564_s30 + $0x120] sm:$0xff] %v11496_v23  ;;  %v11498_v39 = vpop.f32.mrb[93].mxu1  ;;  %11388 = vst [vmem:[%s17564_s30 + $0x60] sm:$0xff] %v11327_v36  ;;  %v11329_v47 = vpop.f32.mrb[101].mxu0 }
 0x7c6   : > { %13021 = vst [vmem:[%s17564_s30 + $0x128] sm:$0xff] %v11498_v39  ;;  %v11500_v38 = vpop.f32.mrb[94].mxu1  ;;  %11389 = vst [vmem:[%s17564_s30 + $0x68] sm:$0xff] %v11329_v47  ;;  %v11331_v13 = vpop.f32.mrb[102].mxu0 }
 0x7c7   : > { %13022 = vst [vmem:[%s17564_s30 + $0x130] sm:$0xff] %v11500_v38  ;;  %v11502_v6 = vpop.f32.mrb[95].mxu1  ;;  %11390 = vst [vmem:[%s17564_s30 + $0x70] sm:$0xff] %v11331_v13  ;;  %v11333_v16 = vpop.f32.mrb[103].mxu0 }
 0x7c8   : > { %13023 = vst [vmem:[%s17564_s30 + $0x138] sm:$0xff] %v11502_v6  ;;  %11391 = vst [vmem:[%s17564_s30 + $0x78] sm:$0xff] %v11333_v16 }
 0x7cc   : > { %v11506_v11 = vpop.f32.mrb[96].mxu1  ;;  %v11337_v40 = vpop.f32.mrb[104].mxu0 }
 0x7cd   : > { %13024 = vst [vmem:[%s17564_s30 + $0x140] sm:$0xff] %v11506_v11  ;;  %v11508_v0 = vpop.f32.mrb[97].mxu1  ;;  %11392 = vst [vmem:[%s17564_s30 + $0x80] sm:$0xff] %v11337_v40  ;;  %v11339_v30 = vpop.f32.mrb[105].mxu0 }
 0x7ce   : > { %13025 = vst [vmem:[%s17564_s30 + $0x148] sm:$0xff] %v11508_v0  ;;  %v11510_v43 = vpop.f32.mrb[98].mxu1  ;;  %11393 = vst [vmem:[%s17564_s30 + $0x88] sm:$0xff] %v11339_v30  ;;  %v11341_v63 = vpop.f32.mrb[106].mxu0 }
 0x7cf   : > { %13026 = vst [vmem:[%s17564_s30 + $0x150] sm:$0xff] %v11510_v43  ;;  %v11512_v33 = vpop.f32.mrb[99].mxu1  ;;  %11394 = vst [vmem:[%s17564_s30 + $0x90] sm:$0xff] %v11341_v63  ;;  %v11343_v55 = vpop.f32.mrb[107].mxu0 }
 0x7d0   : > { %13027 = vst [vmem:[%s17564_s30 + $0x158] sm:$0xff] %v11512_v33  ;;  %11395 = vst [vmem:[%s17564_s30 + $0x98] sm:$0xff] %v11343_v55 }
 0x7d4   : > { %v11516_v21 = vpop.f32.mrb[100].mxu1  ;;  %v11347_v29 = vpop.f32.mrb[108].mxu0 }
 0x7d5   : > { %13028 = vst [vmem:[%s17564_s30 + $0x160] sm:$0xff] %v11516_v21  ;;  %v11518_v53 = vpop.f32.mrb[101].mxu1  ;;  %11396 = vst [vmem:[%s17564_s30 + $0xa0] sm:$0xff] %v11347_v29  ;;  %v11349_v12 = vpop.f32.mrb[109].mxu0 }
 0x7d6   : > { %13029 = vst [vmem:[%s17564_s30 + $0x168] sm:$0xff] %v11518_v53  ;;  %v11520_v25 = vpop.f32.mrb[102].mxu1  ;;  %11397 = vst [vmem:[%s17564_s30 + $0xa8] sm:$0xff] %v11349_v12  ;;  %v11351_v41 = vpop.f32.mrb[110].mxu0 }
 0x7d7   : > { %13030 = vst [vmem:[%s17564_s30 + $0x170] sm:$0xff] %v11520_v25  ;;  %v11522_v46 = vpop.f32.mrb[103].mxu1  ;;  %11398 = vst [vmem:[%s17564_s30 + $0xb0] sm:$0xff] %v11351_v41  ;;  %v11353_v50 = vpop.f32.mrb[111].mxu0 }
 0x7d8   : > { %13031 = vst [vmem:[%s17564_s30 + $0x178] sm:$0xff] %v11522_v46  ;;  %11399 = vst [vmem:[%s17564_s30 + $0xb8] sm:$0xff] %v11353_v50 }
 0x7dc   : > { %v11526_v42 = vpop.f32.mrb[104].mxu1  ;;  %v11357_v44 = vpop.f32.mrb[112].mxu0 }
 0x7dd   : > { %13032 = vst [vmem:[%s17564_s30 + $0x180] sm:$0xff] %v11526_v42  ;;  %v11528_v59 = vpop.f32.mrb[105].mxu1  ;;  %11400 = vst [vmem:[%s17564_s30 + $0xc0] sm:$0xff] %v11357_v44  ;;  %v11359_v62 = vpop.f32.mrb[113].mxu0 }
 0x7de   : > { %13033 = vst [vmem:[%s17564_s30 + $0x188] sm:$0xff] %v11528_v59  ;;  %v11530_v37 = vpop.f32.mrb[106].mxu1  ;;  %11401 = vst [vmem:[%s17564_s30 + $0xc8] sm:$0xff] %v11359_v62  ;;  %v11361_v24 = vpop.f32.mrb[114].mxu0 }
 0x7df   : > { %13034 = vst [vmem:[%s17564_s30 + $0x190] sm:$0xff] %v11530_v37  ;;  %v11532_v60 = vpop.f32.mrb[107].mxu1  ;;  %11402 = vst [vmem:[%s17564_s30 + $0xd0] sm:$0xff] %v11361_v24  ;;  %v11363_v28 = vpop.f32.mrb[115].mxu0 }
 0x7e0   : > { %13035 = vst [vmem:[%s17564_s30 + $0x198] sm:$0xff] %v11532_v60  ;;  %11403 = vst [vmem:[%s17564_s30 + $0xd8] sm:$0xff] %v11363_v28 }
 0x7e4   : > { %v11536_v10 = vpop.f32.mrb[108].mxu1  ;;  %v11367_v7 = vpop.f32.mrb[116].mxu0 }
 0x7e5   : > { %13036 = vst [vmem:[%s17564_s30 + $0x1a0] sm:$0xff] %v11536_v10  ;;  %v11538_v4 = vpop.f32.mrb[109].mxu1  ;;  %11404 = vst [vmem:[%s17564_s30 + $0xe0] sm:$0xff] %v11367_v7  ;;  %v11369_v49 = vpop.f32.mrb[117].mxu0 }
 0x7e6   : > { %13037 = vst [vmem:[%s17564_s30 + $0x1a8] sm:$0xff] %v11538_v4  ;;  %v11540_v19 = vpop.f32.mrb[110].mxu1  ;;  %11405 = vst [vmem:[%s17564_s30 + $0xe8] sm:$0xff] %v11369_v49  ;;  %v11371_v48 = vpop.f32.mrb[118].mxu0 }
 0x7e7   : > { %13038 = vst [vmem:[%s17564_s30 + $0x1b0] sm:$0xff] %v11540_v19  ;;  %v11542_v15 = vpop.f32.mrb[111].mxu1  ;;  %11406 = vst [vmem:[%s17564_s30 + $0xf0] sm:$0xff] %v11371_v48  ;;  %v11373_v57 = vpop.f32.mrb[119].mxu0 }
 0x7e8   : > { %13039 = vst [vmem:[%s17564_s30 + $0x1b8] sm:$0xff] %v11542_v15  ;;  %11407 = vst [vmem:[%s17564_s30 + $0xf8] sm:$0xff] %v11373_v57 }
 0x7ec   : > { %v11546_v18 = vpop.f32.mrb[112].mxu1 }
 0x7ed   : > { %13040 = vst [vmem:[%s17564_s30 + $0x1c0] sm:$0xff] %v11546_v18  ;;  %v11548_v5 = vpop.f32.mrb[113].mxu1 }
 0x7ee   : > { %13041 = vst [vmem:[%s17564_s30 + $0x1c8] sm:$0xff] %v11548_v5  ;;  %v11550_v52 = vpop.f32.mrb[114].mxu1 }
 0x7ef   : > { %13042 = vst [vmem:[%s17564_s30 + $0x1d0] sm:$0xff] %v11550_v52  ;;  %v11552_v20 = vpop.f32.mrb[115].mxu1 }
 0x7f0   : > { %13043 = vst [vmem:[%s17564_s30 + $0x1d8] sm:$0xff] %v11552_v20 }
 0x7f4   : > { %v11556_v26 = vpop.f32.mrb[116].mxu1 }
 0x7f5   : > { %13044 = vst [vmem:[%s17564_s30 + $0x1e0] sm:$0xff] %v11556_v26  ;;  %v11558_v51 = vpop.f32.mrb[117].mxu1 }
 0x7f6   : > { %13045 = vst [vmem:[%s17564_s30 + $0x1e8] sm:$0xff] %v11558_v51  ;;  %v11560_v22 = vpop.f32.mrb[118].mxu1 }
 0x7f7   : > { %13046 = vst [vmem:[%s17564_s30 + $0x1f0] sm:$0xff] %v11560_v22  ;;  %v11562_v3 = vpop.f32.mrb[119].mxu1 }
 0x7f8   : > { %13047 = vst [vmem:[%s17564_s30 + $0x1f8] sm:$0xff] %v11562_v3 }
 0x7f9 PF: > { %s20_s13 = sadd.s32 1, %s15109_s13  }
 0x7fa   : > { %p17_p4 = scmp.ge.s32.totalorder %s20_s13, 5  }
 0x7fc   :  { %19 = sbr.rel (!%p17_p4) target bundleno = 1 (0x1), region = 127 }

</bundles_post_ra>
